<compile_context>
chip_gen: v7x
topology: tpu7x:2x2x1
jax: 0.10.0
libtpu: 0.0.40
codegen_flags: <defaults>
</compile_context>

<pallas_src>
import jax
import jax.numpy as jnp
from jax.experimental import pallas as pl
from jax.experimental.pallas import tpu as pltpu


def _prelu(x, alpha):
    # PReLU with a single scalar parameter per activation layer (PyTorch default).
    return jnp.where(x >= 0, x, alpha * x)


_NT = (((1,), (1,)), ((), ()))  # contract the last dim of both operands: A @ B.T


def _has_bf16_vpu():
    """True on TPU generations with a bf16-native VPU (v6e, v7x).  The bf16 epilogue
    still compiles elsewhere; it is just not a win on v5e/older, so we default f32."""
    try:
        kind = jax.devices()[0].device_kind.lower()
    except Exception:
        return False
    return any(tag in kind for tag in ("v6", "v7", "tpu7"))


def _choose_tm(M, F):
    """Row-tile size.

    Live VMEM is dominated by the (F, tm) intermediates (a few f32/bf16 copies), not
    the weights.  Budget ~10 MiB for ~4 f32-equivalent copies so we stay well inside
    the scoped-VMEM default on every generation (v5e: 16 MiB, v6e/v7x: 32 MiB scoped,
    v7x: 64 MiB physical) without raising vmem_limit_bytes.  Aim for ~2 big grid steps
    (each step costs ~0.35 us of pipeline overhead, and >= 2 steps keeps both v7x
    TensorCores busy)."""
    cap = max(256, ((10 << 20) // (4 * F * 4)) // 256 * 256)
    tm = max(256, -(-pl.cdiv(M, 2) // 256) * 256)  # ceil(M/2) rounded up to 256
    return min(tm, cap)


def mlp_kernel(alpha_ref, x_ref, w0t_ref, b0_ref, wh_ref, bh_ref, wot_ref, bo_ref,
               o_ref):
    """One row tile of the fused MLP; activations kept row-major (tm, F).

    alpha_ref : SMEM (L,)        f32   PReLU scalars
    x_ref     : VMEM (tm, dim_x)       input rows
    w0t_ref   : VMEM (dim_x, F)  f32   first Linear, pre-transposed (K = dim_x)
    b0_ref    : VMEM (1, F)      adt
    wh_ref    : VMEM (L-1, F, F) wdt   hidden Linears, PyTorch (out, in) layout
    bh_ref    : VMEM (L-1, 1, F) adt
    wot_ref   : VMEM (F, dim_x)  wdt   output Linear, pre-transposed
    bo_ref    : VMEM (1, dim_x)  f32
    o_ref     : VMEM (tm, dim_x)       output rows
    """
    wdt = wh_ref.dtype   # MXU operand dtype for the F x F chain (bf16 by default)
    adt = b0_ref.dtype   # epilogue / inter-layer activation dtype

    # Layer 0: (tm, dim_x) @ (dim_x, F) -> (tm, F).  K = dim_x (=3), negligible MXU
    # cost; f32 operands so the lane-sparse x tile needs no cast pass.
    h = jnp.dot(x_ref[...], w0t_ref[...], preferred_element_type=jnp.float32)
    h = h.astype(adt) + b0_ref[...]
    h = _prelu(h, alpha_ref[0].astype(adt))

    # Hidden chain: h @ W_l^T (MXU consumes the transposed operand directly, so the
    # PyTorch (out, in) weight layout is kept).  f32 accumulate, then a single
    # downcast + bias + PReLU pass per layer in `adt`.  Statically unrolled.
    for l in range(wh_ref.shape[0]):
        z = jax.lax.dot_general(h.astype(wdt), wh_ref[l], _NT,
                                preferred_element_type=jnp.float32)
        h = z.astype(adt) + bh_ref[l]
        h = _prelu(h, alpha_ref[l + 1].astype(adt))

    # Output layer: (tm, F) @ (F, dim_x) -> (tm, dim_x); final bias add in f32.
    o = jnp.dot(h.astype(wdt), wot_ref[...], preferred_element_type=jnp.float32)
    o_ref[...] = (o + bo_ref[...]).astype(o_ref.dtype)


def convection_backbone(x, params, *, tm=None, matmul_dtype=jnp.bfloat16,
                        act_dtype=None):
    """Fused forward of Convection_backbone.  x: [B, N, dim_x] -> [B, N, dim_x].

    matmul_dtype : MXU operand dtype for the F x F chain (default bf16; expect ~1e-2
                   relative error vs the f32 PyTorch module).  None -> exact f32.
    act_dtype    : dtype activations / bias / PReLU are kept in between layers.
                   Default: bf16 on v6e/v7x (bf16 VPU), f32 otherwise.  Every matmul
                   accumulates in f32 regardless.
    """
    alphas, w0, b0, wh, bh, wo, bo = params
    B, N, dim_x = x.shape
    M = B * N
    F = w0.shape[0]
    n_hidden = wh.shape[0]
    if n_hidden < 1:
        # TODO(synk): layer_size == 1 (no hidden Linear+PReLU blocks) needs a kernel
        # variant without the zero-sized wh/bh operands; not wired up here.
        raise NotImplementedError("convection_backbone kernel needs layer_size >= 2")

    wdt = jnp.dtype(jnp.float32 if matmul_dtype is None else matmul_dtype)
    if act_dtype is None:
        adt = (jnp.dtype(jnp.bfloat16)
               if (wdt == jnp.bfloat16 and _has_bf16_vpu())
               else jnp.dtype(jnp.float32))
    else:
        adt = jnp.dtype(act_dtype)

    if tm is None:
        tm = _choose_tm(M, F)
    n_tiles = pl.cdiv(M, tm)

    # Activation path: pure views, no pad / transpose / slice XLA kernels.
    x2 = x.reshape(M, dim_x)

    # Parameter prep (tiny, O(weights) ops).
    w0t = w0.T                       # (dim_x, F), f32
    b0r = b0[None, :].astype(adt)    # (1, F)
    whc = wh.astype(wdt)             # (n_hidden, F, F), PyTorch (out, in) layout
    bhr = bh[:, None, :].astype(adt)  # (n_hidden, 1, F)
    wot = wo.T.astype(wdt)           # (F, dim_x)
    bor = bo[None, :]                # (1, dim_x), f32

    flops = 2 * M * (dim_x * F + n_hidden * F * F + F * dim_x)
    bytes_accessed = (
        2 * M * dim_x * x.dtype.itemsize
        + sum(int(a.size) * a.dtype.itemsize
              for a in (alphas, w0t, b0r, whc, bhr, wot, bor)))

    out = pl.pallas_call(
        mlp_kernel,
        out_shape=jax.ShapeDtypeStruct((M, dim_x), x.dtype),
        grid_spec=pltpu.PrefetchScalarGridSpec(
            num_scalar_prefetch=0,
            grid=(n_tiles,),
            in_specs=[
                # PReLU scalars -> SMEM (scalar reads inside the kernel).
                pl.BlockSpec(memory_space=pltpu.MemorySpace.SMEM),
                # Row tile of the input; ragged last tile handled by Pallas.
                pl.BlockSpec((tm, dim_x), lambda i: (i, 0)),
                # Weights / biases: constant index_maps -> fetched once, VMEM-resident.
                pl.BlockSpec(w0t.shape, lambda i: (0, 0)),
                pl.BlockSpec(b0r.shape, lambda i: (0, 0)),
                pl.BlockSpec(whc.shape, lambda i: (0, 0, 0)),
                pl.BlockSpec(bhr.shape, lambda i: (0, 0, 0)),
                pl.BlockSpec(wot.shape, lambda i: (0, 0)),
                pl.BlockSpec(bor.shape, lambda i: (0, 0)),
            ],
            out_specs=pl.BlockSpec((tm, dim_x), lambda i: (i, 0)),
        ),
        compiler_params=pltpu.CompilerParams(
            dimension_semantics=("parallel",),   # row tiles across v7x's 2 TCs
        ),
        cost_estimate=pl.CostEstimate(
            flops=flops, transcendentals=0, bytes_accessed=bytes_accessed),
    )(alphas, x2, w0t, b0r, whc, bhr, wot, bor)

    return out.reshape(B, N, dim_x)


def init_params(key, dim_x=3, filter_size=128, layer_size=8):
    """Synthetic params; weights use the PyTorch nn.Linear (out, in) layout.
    PReLU has one scalar per activation layer (PyTorch inits to 0.25; distinct values
    are used here so per-layer alpha indexing is actually exercised)."""
    ks = jax.random.split(key, 6)
    F, s = filter_size, 0.1
    w0 = jax.random.normal(ks[0], (F, dim_x), jnp.float32) * s
    b0 = jax.random.normal(ks[1], (F,), jnp.float32) * s
    wh = jax.random.normal(ks[2], (layer_size - 1, F, F), jnp.float32) * s
    bh = jax.random.normal(ks[3], (layer_size - 1, F), jnp.float32) * s
    wo = jax.random.normal(ks[4], (dim_x, F), jnp.float32) * s
    bo = jax.random.normal(ks[5], (dim_x,), jnp.float32) * s
    alphas = jnp.linspace(0.15, 0.4, layer_size).astype(jnp.float32)
    return alphas, w0, b0, wh, bh, wo, bo


def ref_forward(x, params):
    """Pure-JAX reference matching the PyTorch forward (full-precision matmuls)."""
    alphas, w0, b0, wh, bh, wo, bo = params
    hi = jax.lax.Precision.HIGHEST
    h = jnp.dot(x, w0.T, precision=hi) + b0
    h = jnp.where(h >= 0, h, alphas[0] * h)
    for l in range(wh.shape[0]):
        h = jnp.dot(h, wh[l].T, precision=hi) + bh[l]
        h = jnp.where(h >= 0, h, alphas[l + 1] * h)
    return jnp.dot(h, wo.T, precision=hi) + bo


if __name__ == "__main__":
    key = jax.random.PRNGKey(0)
    k_x, k_xr, k_p = jax.random.split(key, 3)

    dim_x, filter_size, layer_size = 3, 128, 8      # PyTorch module defaults
    B, N = 2, 1024

    x = jax.random.normal(k_x, (B, N, dim_x), jnp.float32)
    params = init_params(k_p, dim_x=dim_x, filter_size=filter_size,
                         layer_size=layer_size)
    y_ref = ref_forward(x, params)

    def rel_err(a, b):
        a = a.astype(jnp.float32)
        b = b.astype(jnp.float32)
        return float(jnp.linalg.norm(a - b) / jnp.linalg.norm(b))

    # 1) exact-f32 path (PyTorch arithmetic; loose bound absorbs MXU f32 pass modes).
    y_f32 = jax.block_until_ready(convection_backbone(x, params, matmul_dtype=None))
    assert y_f32.shape == (B, N, dim_x)
    e_f32 = rel_err(y_f32, y_ref)
    assert e_f32 < 2e-2, f"f32 path relative error too large: {e_f32}"

    # 2) default path: bf16 MXU operands, f32 accumulate, bf16 epilogue on v6e/v7x.
    y = jax.block_until_ready(convection_backbone(x, params))
    assert y.shape == (B, N, dim_x)
    e_bf16 = rel_err(y, y_ref)
    assert e_bf16 < 5e-2, f"bf16 path relative error too large: {e_bf16}"

    # 3) ragged row count (M not a multiple of the tile): exercises the no-pad path.
    x_r = jax.random.normal(k_xr, (1, 777, dim_x), jnp.float32)
    y_r = jax.block_until_ready(convection_backbone(x_r, params, matmul_dtype=None))
    assert y_r.shape == (1, 777, dim_x)
    assert rel_err(y_r, ref_forward(x_r, params)) < 2e-2

    print("KERNEL_OK")
</pallas_src>

<mosaic_0001>
module attributes {stable_mosaic.version = 11 : i64} {
  func.func @mlp_kernel(%arg0: i32, %arg1: memref<8xf32, #tpu.memory_space<smem>>, %arg2: memref<1024x3xf32, #tpu.memory_space<vmem>>, %arg3: memref<3x128xf32, #tpu.memory_space<vmem>>, %arg4: memref<1x128xf32, #tpu.memory_space<vmem>>, %arg5: memref<7x128x128xf32, #tpu.memory_space<vmem>>, %arg6: memref<7x1x128xf32, #tpu.memory_space<vmem>>, %arg7: memref<128x3xf32, #tpu.memory_space<vmem>>, %arg8: memref<1x3xf32, #tpu.memory_space<vmem>>, %arg9: memref<1024x3xf32, #tpu.memory_space<vmem>>) attributes {dimension_semantics = [#tpu.dimension_semantics<parallel>], iteration_bounds = array<i64: 2>, scalar_prefetch = 0 : i64, scratch_operands = 0 : i64, tpu.core_type = #tpu.core_type<tc>, window_params = [{transform_indices = @transform_0, window_bounds = array<i64: 8>}, {transform_indices = @transform_1, window_bounds = array<i64: 1024, 3>}, {pipeline_mode = #tpu.pipeline_mode<synchronous>, transform_indices = @transform_2, window_bounds = array<i64: 3, 128>}, {pipeline_mode = #tpu.pipeline_mode<synchronous>, transform_indices = @transform_3, window_bounds = array<i64: 1, 128>}, {pipeline_mode = #tpu.pipeline_mode<synchronous>, transform_indices = @transform_4, window_bounds = array<i64: 7, 128, 128>}, {pipeline_mode = #tpu.pipeline_mode<synchronous>, transform_indices = @transform_5, window_bounds = array<i64: 7, 1, 128>}, {pipeline_mode = #tpu.pipeline_mode<synchronous>, transform_indices = @transform_6, window_bounds = array<i64: 128, 3>}, {pipeline_mode = #tpu.pipeline_mode<synchronous>, transform_indices = @transform_7, window_bounds = array<i64: 1, 3>}, {transform_indices = @transform_8, window_bounds = array<i64: 1024, 3>}]} {
    %c0 = arith.constant 0 : index
    %c0_0 = arith.constant 0 : index
    %0 = vector.load %arg2[%c0, %c0_0] : memref<1024x3xf32, #tpu.memory_space<vmem>>, vector<1024x3xf32>
    %c0_1 = arith.constant 0 : index
    %c0_2 = arith.constant 0 : index
    %1 = vector.load %arg3[%c0_1, %c0_2] : memref<3x128xf32, #tpu.memory_space<vmem>>, vector<3x128xf32>
    %cst = arith.constant dense<0.000000e+00> : vector<1024x128xf32>
    %2 = tpu.matmul %0, %1, %cst {dimension_numbers = #tpu.dot_dimension_numbers<[1], [0], [0], [1], [0, 0, 1, 1], [], []>} : vector<1024x3xf32>, vector<3x128xf32>, vector<1024x128xf32> -> vector<1024x128xf32>
    %c0_3 = arith.constant 0 : index
    %c0_4 = arith.constant 0 : index
    %3 = vector.load %arg4[%c0_3, %c0_4] : memref<1x128xf32, #tpu.memory_space<vmem>>, vector<1x128xf32>
    %4 = vector.broadcast %3 : vector<1x128xf32> to vector<1024x128xf32>
    %5 = arith.addf %2, %4 : vector<1024x128xf32>
    %c0_5 = arith.constant 0 : index
    %6 = memref.load %arg1[%c0_5] : memref<8xf32, #tpu.memory_space<smem>>
    %cst_6 = arith.constant 0.000000e+00 : f32
    %7 = vector.broadcast %cst_6 : f32 to vector<1024x128xf32>
    %8 = arith.cmpf oge, %5, %7 : vector<1024x128xf32>
    %9 = vector.broadcast %6 : f32 to vector<1024x128xf32>
    %10 = arith.mulf %9, %5 : vector<1024x128xf32>
    %11 = arith.select %8, %5, %10 : vector<1024x128xi1>, vector<1024x128xf32>
    %c0_7 = arith.constant 0 : index
    %c0_8 = arith.constant 0 : index
    %c0_9 = arith.constant 0 : index
    %12 = vector.load %arg5[%c0_7, %c0_8, %c0_9] : memref<7x128x128xf32, #tpu.memory_space<vmem>>, vector<1x128x128xf32>
    %13 = vector.shape_cast %12 : vector<1x128x128xf32> to vector<128x128xf32>
    %cst_10 = arith.constant dense<0.000000e+00> : vector<1024x128xf32>
    %14 = tpu.matmul %11, %13, %cst_10 {dimension_numbers = #tpu.dot_dimension_numbers<[1], [1], [0], [0], [0, 0, 1, 0], [], []>} : vector<1024x128xf32>, vector<128x128xf32>, vector<1024x128xf32> -> vector<1024x128xf32>
    %c0_11 = arith.constant 0 : index
    %c0_12 = arith.constant 0 : index
    %c0_13 = arith.constant 0 : index
    %15 = vector.load %arg6[%c0_11, %c0_12, %c0_13] : memref<7x1x128xf32, #tpu.memory_space<vmem>>, vector<1x1x128xf32>
    %16 = vector.shape_cast %15 : vector<1x1x128xf32> to vector<1x128xf32>
    %17 = vector.broadcast %16 : vector<1x128xf32> to vector<1024x128xf32>
    %18 = arith.addf %14, %17 : vector<1024x128xf32>
    %c1 = arith.constant 1 : index
    %19 = memref.load %arg1[%c1] : memref<8xf32, #tpu.memory_space<smem>>
    %cst_14 = arith.constant 0.000000e+00 : f32
    %20 = vector.broadcast %cst_14 : f32 to vector<1024x128xf32>
    %21 = arith.cmpf oge, %18, %20 : vector<1024x128xf32>
    %22 = vector.broadcast %19 : f32 to vector<1024x128xf32>
    %23 = arith.mulf %22, %18 : vector<1024x128xf32>
    %24 = arith.select %21, %18, %23 : vector<1024x128xi1>, vector<1024x128xf32>
    %c1_15 = arith.constant 1 : index
    %c0_16 = arith.constant 0 : index
    %c0_17 = arith.constant 0 : index
    %25 = vector.load %arg5[%c1_15, %c0_16, %c0_17] : memref<7x128x128xf32, #tpu.memory_space<vmem>>, vector<1x128x128xf32>
    %26 = vector.shape_cast %25 : vector<1x128x128xf32> to vector<128x128xf32>
    %cst_18 = arith.constant dense<0.000000e+00> : vector<1024x128xf32>
    %27 = tpu.matmul %24, %26, %cst_18 {dimension_numbers = #tpu.dot_dimension_numbers<[1], [1], [0], [0], [0, 0, 1, 0], [], []>} : vector<1024x128xf32>, vector<128x128xf32>, vector<1024x128xf32> -> vector<1024x128xf32>
    %c1_19 = arith.constant 1 : index
    %c0_20 = arith.constant 0 : index
    %c0_21 = arith.constant 0 : index
    %28 = vector.load %arg6[%c1_19, %c0_20, %c0_21] : memref<7x1x128xf32, #tpu.memory_space<vmem>>, vector<1x1x128xf32>
    %29 = vector.shape_cast %28 : vector<1x1x128xf32> to vector<1x128xf32>
    %30 = vector.broadcast %29 : vector<1x128xf32> to vector<1024x128xf32>
    %31 = arith.addf %27, %30 : vector<1024x128xf32>
    %c2 = arith.constant 2 : index
    %32 = memref.load %arg1[%c2] : memref<8xf32, #tpu.memory_space<smem>>
    %cst_22 = arith.constant 0.000000e+00 : f32
    %33 = vector.broadcast %cst_22 : f32 to vector<1024x128xf32>
    %34 = arith.cmpf oge, %31, %33 : vector<1024x128xf32>
    %35 = vector.broadcast %32 : f32 to vector<1024x128xf32>
    %36 = arith.mulf %35, %31 : vector<1024x128xf32>
    %37 = arith.select %34, %31, %36 : vector<1024x128xi1>, vector<1024x128xf32>
    %c2_23 = arith.constant 2 : index
    %c0_24 = arith.constant 0 : index
    %c0_25 = arith.constant 0 : index
    %38 = vector.load %arg5[%c2_23, %c0_24, %c0_25] : memref<7x128x128xf32, #tpu.memory_space<vmem>>, vector<1x128x128xf32>
    %39 = vector.shape_cast %38 : vector<1x128x128xf32> to vector<128x128xf32>
    %cst_26 = arith.constant dense<0.000000e+00> : vector<1024x128xf32>
    %40 = tpu.matmul %37, %39, %cst_26 {dimension_numbers = #tpu.dot_dimension_numbers<[1], [1], [0], [0], [0, 0, 1, 0], [], []>} : vector<1024x128xf32>, vector<128x128xf32>, vector<1024x128xf32> -> vector<1024x128xf32>
    %c2_27 = arith.constant 2 : index
    %c0_28 = arith.constant 0 : index
    %c0_29 = arith.constant 0 : index
    %41 = vector.load %arg6[%c2_27, %c0_28, %c0_29] : memref<7x1x128xf32, #tpu.memory_space<vmem>>, vector<1x1x128xf32>
    %42 = vector.shape_cast %41 : vector<1x1x128xf32> to vector<1x128xf32>
    %43 = vector.broadcast %42 : vector<1x128xf32> to vector<1024x128xf32>
    %44 = arith.addf %40, %43 : vector<1024x128xf32>
    %c3 = arith.constant 3 : index
    %45 = memref.load %arg1[%c3] : memref<8xf32, #tpu.memory_space<smem>>
    %cst_30 = arith.constant 0.000000e+00 : f32
    %46 = vector.broadcast %cst_30 : f32 to vector<1024x128xf32>
    %47 = arith.cmpf oge, %44, %46 : vector<1024x128xf32>
    %48 = vector.broadcast %45 : f32 to vector<1024x128xf32>
    %49 = arith.mulf %48, %44 : vector<1024x128xf32>
    %50 = arith.select %47, %44, %49 : vector<1024x128xi1>, vector<1024x128xf32>
    %c3_31 = arith.constant 3 : index
    %c0_32 = arith.constant 0 : index
    %c0_33 = arith.constant 0 : index
    %51 = vector.load %arg5[%c3_31, %c0_32, %c0_33] : memref<7x128x128xf32, #tpu.memory_space<vmem>>, vector<1x128x128xf32>
    %52 = vector.shape_cast %51 : vector<1x128x128xf32> to vector<128x128xf32>
    %cst_34 = arith.constant dense<0.000000e+00> : vector<1024x128xf32>
    %53 = tpu.matmul %50, %52, %cst_34 {dimension_numbers = #tpu.dot_dimension_numbers<[1], [1], [0], [0], [0, 0, 1, 0], [], []>} : vector<1024x128xf32>, vector<128x128xf32>, vector<1024x128xf32> -> vector<1024x128xf32>
    %c3_35 = arith.constant 3 : index
    %c0_36 = arith.constant 0 : index
    %c0_37 = arith.constant 0 : index
    %54 = vector.load %arg6[%c3_35, %c0_36, %c0_37] : memref<7x1x128xf32, #tpu.memory_space<vmem>>, vector<1x1x128xf32>
    %55 = vector.shape_cast %54 : vector<1x1x128xf32> to vector<1x128xf32>
    %56 = vector.broadcast %55 : vector<1x128xf32> to vector<1024x128xf32>
    %57 = arith.addf %53, %56 : vector<1024x128xf32>
    %c4 = arith.constant 4 : index
    %58 = memref.load %arg1[%c4] : memref<8xf32, #tpu.memory_space<smem>>
    %cst_38 = arith.constant 0.000000e+00 : f32
    %59 = vector.broadcast %cst_38 : f32 to vector<1024x128xf32>
    %60 = arith.cmpf oge, %57, %59 : vector<1024x128xf32>
    %61 = vector.broadcast %58 : f32 to vector<1024x128xf32>
    %62 = arith.mulf %61, %57 : vector<1024x128xf32>
    %63 = arith.select %60, %57, %62 : vector<1024x128xi1>, vector<1024x128xf32>
    %c4_39 = arith.constant 4 : index
    %c0_40 = arith.constant 0 : index
    %c0_41 = arith.constant 0 : index
    %64 = vector.load %arg5[%c4_39, %c0_40, %c0_41] : memref<7x128x128xf32, #tpu.memory_space<vmem>>, vector<1x128x128xf32>
    %65 = vector.shape_cast %64 : vector<1x128x128xf32> to vector<128x128xf32>
    %cst_42 = arith.constant dense<0.000000e+00> : vector<1024x128xf32>
    %66 = tpu.matmul %63, %65, %cst_42 {dimension_numbers = #tpu.dot_dimension_numbers<[1], [1], [0], [0], [0, 0, 1, 0], [], []>} : vector<1024x128xf32>, vector<128x128xf32>, vector<1024x128xf32> -> vector<1024x128xf32>
    %c4_43 = arith.constant 4 : index
    %c0_44 = arith.constant 0 : index
    %c0_45 = arith.constant 0 : index
    %67 = vector.load %arg6[%c4_43, %c0_44, %c0_45] : memref<7x1x128xf32, #tpu.memory_space<vmem>>, vector<1x1x128xf32>
    %68 = vector.shape_cast %67 : vector<1x1x128xf32> to vector<1x128xf32>
    %69 = vector.broadcast %68 : vector<1x128xf32> to vector<1024x128xf32>
    %70 = arith.addf %66, %69 : vector<1024x128xf32>
    %c5 = arith.constant 5 : index
    %71 = memref.load %arg1[%c5] : memref<8xf32, #tpu.memory_space<smem>>
    %cst_46 = arith.constant 0.000000e+00 : f32
    %72 = vector.broadcast %cst_46 : f32 to vector<1024x128xf32>
    %73 = arith.cmpf oge, %70, %72 : vector<1024x128xf32>
    %74 = vector.broadcast %71 : f32 to vector<1024x128xf32>
    %75 = arith.mulf %74, %70 : vector<1024x128xf32>
    %76 = arith.select %73, %70, %75 : vector<1024x128xi1>, vector<1024x128xf32>
    %c5_47 = arith.constant 5 : index
    %c0_48 = arith.constant 0 : index
    %c0_49 = arith.constant 0 : index
    %77 = vector.load %arg5[%c5_47, %c0_48, %c0_49] : memref<7x128x128xf32, #tpu.memory_space<vmem>>, vector<1x128x128xf32>
    %78 = vector.shape_cast %77 : vector<1x128x128xf32> to vector<128x128xf32>
    %cst_50 = arith.constant dense<0.000000e+00> : vector<1024x128xf32>
    %79 = tpu.matmul %76, %78, %cst_50 {dimension_numbers = #tpu.dot_dimension_numbers<[1], [1], [0], [0], [0, 0, 1, 0], [], []>} : vector<1024x128xf32>, vector<128x128xf32>, vector<1024x128xf32> -> vector<1024x128xf32>
    %c5_51 = arith.constant 5 : index
    %c0_52 = arith.constant 0 : index
    %c0_53 = arith.constant 0 : index
    %80 = vector.load %arg6[%c5_51, %c0_52, %c0_53] : memref<7x1x128xf32, #tpu.memory_space<vmem>>, vector<1x1x128xf32>
    %81 = vector.shape_cast %80 : vector<1x1x128xf32> to vector<1x128xf32>
    %82 = vector.broadcast %81 : vector<1x128xf32> to vector<1024x128xf32>
    %83 = arith.addf %79, %82 : vector<1024x128xf32>
    %c6 = arith.constant 6 : index
    %84 = memref.load %arg1[%c6] : memref<8xf32, #tpu.memory_space<smem>>
    %cst_54 = arith.constant 0.000000e+00 : f32
    %85 = vector.broadcast %cst_54 : f32 to vector<1024x128xf32>
    %86 = arith.cmpf oge, %83, %85 : vector<1024x128xf32>
    %87 = vector.broadcast %84 : f32 to vector<1024x128xf32>
    %88 = arith.mulf %87, %83 : vector<1024x128xf32>
    %89 = arith.select %86, %83, %88 : vector<1024x128xi1>, vector<1024x128xf32>
    %c6_55 = arith.constant 6 : index
    %c0_56 = arith.constant 0 : index
    %c0_57 = arith.constant 0 : index
    %90 = vector.load %arg5[%c6_55, %c0_56, %c0_57] : memref<7x128x128xf32, #tpu.memory_space<vmem>>, vector<1x128x128xf32>
    %91 = vector.shape_cast %90 : vector<1x128x128xf32> to vector<128x128xf32>
    %cst_58 = arith.constant dense<0.000000e+00> : vector<1024x128xf32>
    %92 = tpu.matmul %89, %91, %cst_58 {dimension_numbers = #tpu.dot_dimension_numbers<[1], [1], [0], [0], [0, 0, 1, 0], [], []>} : vector<1024x128xf32>, vector<128x128xf32>, vector<1024x128xf32> -> vector<1024x128xf32>
    %c6_59 = arith.constant 6 : index
    %c0_60 = arith.constant 0 : index
    %c0_61 = arith.constant 0 : index
    %93 = vector.load %arg6[%c6_59, %c0_60, %c0_61] : memref<7x1x128xf32, #tpu.memory_space<vmem>>, vector<1x1x128xf32>
    %94 = vector.shape_cast %93 : vector<1x1x128xf32> to vector<1x128xf32>
    %95 = vector.broadcast %94 : vector<1x128xf32> to vector<1024x128xf32>
    %96 = arith.addf %92, %95 : vector<1024x128xf32>
    %c7 = arith.constant 7 : index
    %97 = memref.load %arg1[%c7] : memref<8xf32, #tpu.memory_space<smem>>
    %cst_62 = arith.constant 0.000000e+00 : f32
    %98 = vector.broadcast %cst_62 : f32 to vector<1024x128xf32>
    %99 = arith.cmpf oge, %96, %98 : vector<1024x128xf32>
    %100 = vector.broadcast %97 : f32 to vector<1024x128xf32>
    %101 = arith.mulf %100, %96 : vector<1024x128xf32>
    %102 = arith.select %99, %96, %101 : vector<1024x128xi1>, vector<1024x128xf32>
    %c0_63 = arith.constant 0 : index
    %c0_64 = arith.constant 0 : index
    %103 = vector.load %arg7[%c0_63, %c0_64] : memref<128x3xf32, #tpu.memory_space<vmem>>, vector<128x3xf32>
    %cst_65 = arith.constant dense<0.000000e+00> : vector<1024x3xf32>
    %104 = tpu.matmul %102, %103, %cst_65 {dimension_numbers = #tpu.dot_dimension_numbers<[1], [0], [0], [1], [0, 0, 1, 1], [], []>} : vector<1024x128xf32>, vector<128x3xf32>, vector<1024x3xf32> -> vector<1024x3xf32>
    %c0_66 = arith.constant 0 : index
    %c0_67 = arith.constant 0 : index
    %105 = vector.load %arg8[%c0_66, %c0_67] : memref<1x3xf32, #tpu.memory_space<vmem>>, vector<1x3xf32>
    %106 = vector.broadcast %105 : vector<1x3xf32> to vector<1024x3xf32>
    %107 = arith.addf %104, %106 : vector<1024x3xf32>
    %c0_68 = arith.constant 0 : index
    %c0_69 = arith.constant 0 : index
    %108 = vector.load %arg9[%c0_68, %c0_69] : memref<1024x3xf32, #tpu.memory_space<vmem>>, vector<1024x3xf32>
    tpu.vector_store %arg9[%c0_68, %c0_69], %107 {strides = array<i32>} : memref<1024x3xf32, #tpu.memory_space<vmem>>, vector<1024x3xf32>,
    return
  }
  func.func @transform_0(%arg0: i32) -> i32 {
    %c0_i32 = arith.constant 0 : i32
    %c0_i32_0 = arith.constant 0 : i32
    return %c0_i32 : i32
  }
  func.func @transform_1(%arg0: i32) -> (i32, i32) {
    %c0_i32 = arith.constant 0 : i32
    %c0_i32_0 = arith.constant 0 : i32
    return %arg0, %c0_i32 : i32, i32
  }
  func.func @transform_2(%arg0: i32) -> (i32, i32) {
    %c0_i32 = arith.constant 0 : i32
    %c0_i32_0 = arith.constant 0 : i32
    %c0_i32_1 = arith.constant 0 : i32
    return %c0_i32, %c0_i32_0 : i32, i32
  }
  func.func @transform_3(%arg0: i32) -> (i32, i32) {
    %c0_i32 = arith.constant 0 : i32
    %c0_i32_0 = arith.constant 0 : i32
    %c0_i32_1 = arith.constant 0 : i32
    return %c0_i32, %c0_i32_0 : i32, i32
  }
  func.func @transform_4(%arg0: i32) -> (i32, i32, i32) {
    %c0_i32 = arith.constant 0 : i32
    %c0_i32_0 = arith.constant 0 : i32
    %c0_i32_1 = arith.constant 0 : i32
    %c0_i32_2 = arith.constant 0 : i32
    return %c0_i32, %c0_i32_0, %c0_i32_1 : i32, i32, i32
  }
  func.func @transform_5(%arg0: i32) -> (i32, i32, i32) {
    %c0_i32 = arith.constant 0 : i32
    %c0_i32_0 = arith.constant 0 : i32
    %c0_i32_1 = arith.constant 0 : i32
    %c0_i32_2 = arith.constant 0 : i32
    return %c0_i32, %c0_i32_0, %c0_i32_1 : i32, i32, i32
  }
  func.func @transform_6(%arg0: i32) -> (i32, i32) {
    %c0_i32 = arith.constant 0 : i32
    %c0_i32_0 = arith.constant 0 : i32
    %c0_i32_1 = arith.constant 0 : i32
    return %c0_i32, %c0_i32_0 : i32, i32
  }
  func.func @transform_7(%arg0: i32) -> (i32, i32) {
    %c0_i32 = arith.constant 0 : i32
    %c0_i32_0 = arith.constant 0 : i32
    %c0_i32_1 = arith.constant 0 : i32
    return %c0_i32, %c0_i32_0 : i32, i32
  }
  func.func @transform_8(%arg0: i32) -> (i32, i32) {
    %c0_i32 = arith.constant 0 : i32
    %c0_i32_0 = arith.constant 0 : i32
    return %arg0, %c0_i32 : i32, i32
  }
}

</mosaic_0001>

<bundles_post_ra>
// kernel: tpu_custom_call.1
= control target key start
LH: loop header
LB: loop body
LE: loop exit
PB: predicated region body
PF: predicated region fallthrough
CT: control target
= control target key end

     0   :  { %13 = vsyncpa [#allocation3], 0  ;;  %s14558_s27 = smov 0   ;;  %s18006_s0 = inlined_call_operand.vmem [shape: f32[8], index: 0, kind: input, shape index: {}]   ;;  %s18007_s1 = inlined_call_operand.vmem [shape: f32[2048,3], index: 1, kind: input, shape index: {}]   ;;  %s18008_s2 = inlined_call_operand.vmem [shape: f32[3,128], index: 2, kind: input, shape index: {}]   ;;  %s18009_s3 = inlined_call_operand.vmem [shape: f32[1,128], index: 3, kind: input, shape index: {}]   ;;  %s18010_s4 = inlined_call_operand.vmem [shape: f32[7,128,128], index: 4, kind: input, shape index: {}]   ;;  %s18011_s5 = inlined_call_operand.vmem [shape: f32[7,1,128], index: 5, kind: input, shape index: {}]   ;;  %s18012_s6 = inlined_call_operand.vmem [shape: f32[128,3], index: 6, kind: input, shape index: {}]   ;;  %s18013_s7 = inlined_call_operand.vmem [shape: f32[1,3], index: 7, kind: input, shape index: {}]   ;;  %s18014_s8 = inlined_call_operand.vmem [shape: f32[2048,3], index: 8, kind: output, shape index: {}]  }
   0x1 LB: > { %s10673_s28 = sadd.s32 4294967295, %s14510_s27   ;;  %p10675_p0 = scmp.ge.s32.totalorder %s14510_s27, 1  ;;  %s14510_s27 = sphi %s14558_s27, %s19_s27  }
   0x2   : > { %p223_p1 = scmp.lt.s32.totalorder %s14510_s27, 3  ;;  %s236_s9 = sshll.u32 %s18006_s0, 4  ;;  %s237_s9 = int_to_ptr.vmem [resolvable:$true] %s236_s9 }
   0x3   : > { %p14573_p3 = scmp.eq.s32.totalorder %s10673_s28, 0  ;;  %s14485_s12 = scalar_lea.vmem %s237_s9, 16 }
   0x4   : > { %p14569_p2 = pnand %p10675_p0, %p223_p1  ;;  %p14486_p6 = scmp.ne.s32.totalorder %s237_s9, %s14485_s12 }
   0x5   : > { %p14493_p10 = scmp.lt.s32.totalorder %s237_s9, %s237_s9  ;;  %p14494_p11 = scmp.lt.s32.totalorder %s14485_s12, %s14485_s12 }
   0x6   : > { %p14462_p4 = pneg %p14569_p2 }
   0x7   : > { %p14495_p12 = por %p14494_p11, %p14493_p10 }
   0x8   : > { %p14463_p5 = pnand %p14573_p3, %p14462_p4 }
   0xa   : > { %p14487_p7 = pneg %p14463_p5 }
   0xc   : > { %p14488_p8 = pnand %p14487_p7, %p14486_p6 }
   0xe   : > { %p14489_p9 = pneg %p14488_p8 }
  0x10   : > { %p14496_p13 = pnand %p14495_p12, %p14489_p9 }
  0x12   : > { %14499 = shalt.err (!%p14496_p13)
}
  0x13   : > { %s14512_s13 = smov [#allocation2]   ;;  %276 = sbr.rel (%p14569_p2) target bundleno = 2257 (0x8d1), region = 52 }
  0x14   : > { %14465 = dma.vmem_to_smem (!%p14463_p5), %s237_s9, 16, %s14512_s13, [#allocation3]  }
  0x1a   : > { %14505 = dma.done.wait (%p14573_p3), [#allocation3], 16  }
  0x1b   : > { %14507 = vsyncadd (%p14573_p3), [#allocation3], 4294967280 }
  0x1c   : > { %282 = sfence }
  0x1d   : > { %v451_v0 = vld [vmem:[%s18008_s2] sm:$0x7]  ;;  %vm844_vm0 = vcmask 1042432   ;;  %s10680_s16 = sshll.u32 %s10673_s28, 7  ;;  %v1940_v2 = vld [vmem:[%s18010_s4 + $0x8] sm:$0xff]  ;;  %vm459_vm1 = vcmask 23552  }
  0x1e   : > { %v1939_v1 = vld [vmem:[%s18010_s4] sm:$0xff]  ;;  %12214 = vmatprep.subr.msk.mxu0 %vm844_vm0, %v451_v0  ;;  %p312_p0 = scmp.lt.s32.totalorder %s10680_s16, 255  ;;  %14456 = vmatprep.subr.msk.mxu1 %vm844_vm0, %v451_v0  ;;  %v1941_v13 = vld [vmem:[%s18010_s4 + $0x10] sm:$0xff]  ;;  %v1942_v14 = vld [vmem:[%s18010_s4 + $0x18] sm:$0xff]  ;;  %s10815_s14 = sld [smem:[#allocation2 + $0x1]] }
  0x1f   : > { %12215 = vmatpush3.msk.msra.mxu0 %vm844_vm0, %v451_v0  ;;  %14457 = vmatpush3.msk.msra.mxu1 %vm844_vm0, %v451_v0  ;;  %v14200_v3 = vpack.c.bf16 %v1940_v2, %v1939_v1  ;;  %v14204_v20 = vpack.c.bf16 %v1942_v14, %v1941_v13  ;;  %v1943_v25 = vld [vmem:[%s18010_s4 + $0x20] sm:$0xff]  ;;  %v1944_v26 = vld [vmem:[%s18010_s4 + $0x28] sm:$0xff]  ;;  %v1945_v36 = vld [vmem:[%s18010_s4 + $0x30] sm:$0xff]  ;;  %s10834_s13 = sld [smem:[#allocation2 + $0x2]]  ;;  %s10853_s12 = sld [smem:[#allocation2 + $0x3]] }
  0x20   : > { %s18040_s16 = smov (!%p312_p0, %s10680_s16), 255  ;;  %v14208_v31 = vpack.c.bf16 %v1944_v26, %v1943_v25  ;;  %v1946_v37 = vld [vmem:[%s18010_s4 + $0x38] sm:$0xff]  ;;  %v1947_v47 = vld [vmem:[%s18010_s4 + $0x40] sm:$0xff]  ;;  %v1948_v48 = vld [vmem:[%s18010_s4 + $0x48] sm:$0xff]  ;;  %s10872_s11 = sld [smem:[#allocation2 + $0x4]] }
  0x21   : > { %14201 = vmatprep.subr.bf16.mxu1 %v14200_v3  ;;  %s10681_s21 = sshll.u32 %s18040_s16, 3  ;;  %v14212_v42 = vpack.c.bf16 %v1946_v37, %v1945_v36  ;;  %v14216_v53 = vpack.c.bf16 %v1948_v48, %v1947_v47  ;;  %v1949_v58 = vld [vmem:[%s18010_s4 + $0x50] sm:$0xff]  ;;  %v1950_v59 = vld [vmem:[%s18010_s4 + $0x58] sm:$0xff]  ;;  %s10891_s10 = sld [smem:[#allocation2 + $0x5]] }
  0x22   : > { %s14604_s24 = scalar_lea.vmem %s18007_s1, %s10681_s21  ;;  %v14220_v0 = vpack.c.bf16 %v1950_v59, %v1949_v58  ;;  %s10910_s9 = sld [smem:[#allocation2 + $0x6]] }
  0x23   : > { %v323_v4 = vld [vmem:[%s14604_s24] sm:$0xff]  ;;  %v324_v5 = vld [vmem:[%s14604_s24 + $0x8] sm:$0xff]  ;;  %v325_v6 = vld [vmem:[%s14604_s24 + $0x10] sm:$0xff]  ;;  %s10929_s29 = sld [smem:[#allocation2 + $0x7]]  ;;  %s17579_s17 = scalar_lea.vmem %s18014_s8, %s10681_s21 }
  0x24   : > { %12216 = vmatprep.mubr.msk.f32.mxu0 %vm459_vm1, %v323_v4  ;;  %v326_v7 = vld [vmem:[%s14604_s24 + $0x18] sm:$0xff]  ;;  %v327_v8 = vld [vmem:[%s14604_s24 + $0x20] sm:$0xff]  ;;  %v328_v9 = vld [vmem:[%s14604_s24 + $0x28] sm:$0xff] }
  0x25   : > { %12217 = vmatmul.mubr.msk.f32.vlgmr.msra.gmra.mrb[0].mxu0 %vm459_vm1, %v324_v5  ;;  %v329_v10 = vld [vmem:[%s14604_s24 + $0x30] sm:$0xff]  ;;  %v330_v11 = vld [vmem:[%s14604_s24 + $0x38] sm:$0xff]  ;;  %v331_v12 = vld [vmem:[%s14604_s24 + $0x40] sm:$0xff] }
  0x26   : > { %12219 = vmatprep.mubr.msk.f32.mxu0 %vm459_vm1, %v325_v6  ;;  %v332_v15 = vld [vmem:[%s14604_s24 + $0x48] sm:$0xff]  ;;  %v387_v16 = vld [vmem:[%s14604_s24 + $0x200] sm:$0xff]  ;;  %v333_v18 = vld [vmem:[%s14604_s24 + $0x50] sm:$0xff] }
  0x27   : > { %v388_v17 = vld [vmem:[%s14604_s24 + $0x208] sm:$0xff]  ;;  %12312 = vmatprep.mubr.msk.f32.mxu1 %vm459_vm1, %v387_v16  ;;  %v389_v19 = vld [vmem:[%s14604_s24 + $0x210] sm:$0xff]  ;;  %v390_v21 = vld [vmem:[%s14604_s24 + $0x218] sm:$0xff] }
  0x28   : > { %12313 = vmatmul.mubr.msk.f32.vlgmr.msra.gmra.mrb[0].mxu1 %vm459_vm1, %v388_v17  ;;  %v334_v22 = vld [vmem:[%s14604_s24 + $0x58] sm:$0xff]  ;;  %v391_v23 = vld [vmem:[%s14604_s24 + $0x220] sm:$0xff]  ;;  %v392_v27 = vld [vmem:[%s14604_s24 + $0x228] sm:$0xff] }
  0x29   : > { %12220 = vmatmul.mubr.msk.f32.gmra.mrb[2].mxu0 %vm459_vm1, %v326_v7  ;;  %12315 = vmatprep.mubr.msk.f32.mxu1 %vm459_vm1, %v389_v19  ;;  %v335_v24 = vld [vmem:[%s14604_s24 + $0x60] sm:$0xff]  ;;  %v336_v28 = vld [vmem:[%s14604_s24 + $0x68] sm:$0xff]  ;;  %v393_v29 = vld [vmem:[%s14604_s24 + $0x230] sm:$0xff] }
  0x2a   : > { %12222 = vmatprep.mubr.msk.f32.mxu0 %vm459_vm1, %v327_v8  ;;  %14203 = vmatpush3.bf16.xpose.msra.mxu1 %v14200_v3  ;;  %v337_v30 = vld [vmem:[%s14604_s24 + $0x70] sm:$0xff]  ;;  %v394_v32 = vld [vmem:[%s14604_s24 + $0x238] sm:$0xff]  ;;  %v395_v34 = vld [vmem:[%s14604_s24 + $0x240] sm:$0xff] }
  0x2b   : > { %14205 = vmatprep.subr.bf16.mxu1 %v14204_v20  ;;  %v338_v33 = vld [vmem:[%s14604_s24 + $0x78] sm:$0xff]  ;;  %v339_v35 = vld [vmem:[%s14604_s24 + $0x80] sm:$0xff]  ;;  %v396_v38 = vld [vmem:[%s14604_s24 + $0x248] sm:$0xff] }
  0x2c   : > { %12316 = vmatmul.mubr.msk.f32.gmra.mrb[2].mxu1 %vm459_vm1, %v390_v21  ;;  %v340_v39 = vld [vmem:[%s14604_s24 + $0x88] sm:$0xff]  ;;  %v397_v40 = vld [vmem:[%s14604_s24 + $0x250] sm:$0xff]  ;;  %v398_v43 = vld [vmem:[%s14604_s24 + $0x258] sm:$0xff] }
  0x2d   : > { %12223 = vmatmul.mubr.msk.f32.gmra.mrb[4].mxu0 %vm459_vm1, %v328_v9  ;;  %12318 = vmatprep.mubr.msk.f32.mxu1 %vm459_vm1, %v391_v23  ;;  %v341_v41 = vld [vmem:[%s14604_s24 + $0x90] sm:$0xff]  ;;  %v342_v44 = vld [vmem:[%s14604_s24 + $0x98] sm:$0xff]  ;;  %v399_v45 = vld [vmem:[%s14604_s24 + $0x260] sm:$0xff] }
  0x2e   : > { %12225 = vmatprep.mubr.msk.f32.mxu0 %vm459_vm1, %v329_v10  ;;  %v343_v46 = vld [vmem:[%s14604_s24 + $0xa0] sm:$0xff]  ;;  %v400_v49 = vld [vmem:[%s14604_s24 + $0x268] sm:$0xff]  ;;  %v401_v51 = vld [vmem:[%s14604_s24 + $0x270] sm:$0xff] }
  0x2f   : > { %v344_v50 = vld [vmem:[%s14604_s24 + $0xa8] sm:$0xff]  ;;  %v345_v52 = vld [vmem:[%s14604_s24 + $0xb0] sm:$0xff]  ;;  %v402_v54 = vld [vmem:[%s14604_s24 + $0x278] sm:$0xff] }
  0x30   : > { %12319 = vmatmul.mubr.msk.f32.gmra.mrb[4].mxu1 %vm459_vm1, %v392_v27  ;;  %v346_v55 = vld [vmem:[%s14604_s24 + $0xb8] sm:$0xff]  ;;  %v403_v56 = vld [vmem:[%s14604_s24 + $0x280] sm:$0xff]  ;;  %v404_v60 = vld [vmem:[%s14604_s24 + $0x288] sm:$0xff] }
  0x31   : > { %12226 = vmatmul.mubr.msk.f32.gmra.mrb[6].mxu0 %vm459_vm1, %v330_v11  ;;  %12321 = vmatprep.mubr.msk.f32.mxu1 %vm459_vm1, %v393_v29  ;;  %v347_v57 = vld [vmem:[%s14604_s24 + $0xc0] sm:$0xff]  ;;  %v348_v61 = vld [vmem:[%s14604_s24 + $0xc8] sm:$0xff]  ;;  %v405_v62 = vld [vmem:[%s14604_s24 + $0x290] sm:$0xff] }
  0x32   : > { %12228 = vmatprep.mubr.msk.f32.mxu0 %vm459_vm1, %v331_v12  ;;  %14207 = vmatpush3.bf16.xpose.msra.mxu1 %v14204_v20  ;;  %v349_v63 = vld [vmem:[%s14604_s24 + $0xd0] sm:$0xff]  ;;  %v406_v1 = vld [vmem:[%s14604_s24 + $0x298] sm:$0xff]  ;;  %v407_v3 = vld [vmem:[%s14604_s24 + $0x2a0] sm:$0xff] }
  0x33   : > { %14209 = vmatprep.subr.bf16.mxu1 %v14208_v31  ;;  %v350_v2 = vld [vmem:[%s14604_s24 + $0xd8] sm:$0xff]  ;;  %v351_v4 = vld [vmem:[%s14604_s24 + $0xe0] sm:$0xff]  ;;  %v1952_v6 = vld [vmem:[%s18010_s4 + $0x68] sm:$0xff] }
  0x34   : > { %12322 = vmatmul.mubr.msk.f32.gmra.mrb[6].mxu1 %vm459_vm1, %v394_v32  ;;  %v1951_v5 = vld [vmem:[%s18010_s4 + $0x60] sm:$0xff]  ;;  %v408_v7 = vld [vmem:[%s14604_s24 + $0x2a8] sm:$0xff]  ;;  %v409_v9 = vld [vmem:[%s14604_s24 + $0x2b0] sm:$0xff] }
  0x35   : > { %12229 = vmatmul.mubr.msk.f32.gmra.mrb[8].mxu0 %vm459_vm1, %v332_v15  ;;  %12324 = vmatprep.mubr.msk.f32.mxu1 %vm459_vm1, %v395_v34  ;;  %v352_v8 = vld [vmem:[%s14604_s24 + $0xe8] sm:$0xff]  ;;  %v353_v10 = vld [vmem:[%s14604_s24 + $0xf0] sm:$0xff]  ;;  %v14224_v11 = vpack.c.bf16 %v1952_v6, %v1951_v5  ;;  %v410_v12 = vld [vmem:[%s14604_s24 + $0x2b8] sm:$0xff] }
  0x36   : > { %12231 = vmatprep.mubr.msk.f32.mxu0 %vm459_vm1, %v333_v18  ;;  %v354_v13 = vld [vmem:[%s14604_s24 + $0xf8] sm:$0xff]  ;;  %v411_v14 = vld [vmem:[%s14604_s24 + $0x2c0] sm:$0xff]  ;;  %v1953_v16 = vld [vmem:[%s18010_s4 + $0x70] sm:$0xff] }
  0x37   : > { %v355_v15 = vld [vmem:[%s14604_s24 + $0x100] sm:$0xff]  ;;  %v1954_v17 = vld [vmem:[%s18010_s4 + $0x78] sm:$0xff]  ;;  %v412_v18 = vld [vmem:[%s14604_s24 + $0x2c8] sm:$0xff] }
  0x38   : > { %12325 = vmatmul.mubr.msk.f32.gmra.mrb[8].mxu1 %vm459_vm1, %v396_v38  ;;  %v356_v19 = vld [vmem:[%s14604_s24 + $0x108] sm:$0xff]  ;;  %v413_v20 = vld [vmem:[%s14604_s24 + $0x2d0] sm:$0xff]  ;;  %v414_v23 = vld [vmem:[%s14604_s24 + $0x2d8] sm:$0xff] }
  0x39   : > { %12232 = vmatmul.mubr.msk.f32.gmra.mrb[10].mxu0 %vm459_vm1, %v334_v22  ;;  %12327 = vmatprep.mubr.msk.f32.mxu1 %vm459_vm1, %v397_v40  ;;  %v357_v21 = vld [vmem:[%s14604_s24 + $0x110] sm:$0xff]  ;;  %v14228_v22 = vpack.c.bf16 %v1954_v17, %v1953_v16  ;;  %v415_v25 = vld [vmem:[%s14604_s24 + $0x2e0] sm:$0xff]  ;;  %v416_v27 = vld [vmem:[%s14604_s24 + $0x2e8] sm:$0xff] }
  0x3a   : > { %12234 = vmatprep.mubr.msk.f32.mxu0 %vm459_vm1, %v335_v24  ;;  %14211 = vmatpush3.bf16.xpose.msra.mxu1 %v14208_v31  ;;  %v358_v24 = vld [vmem:[%s14604_s24 + $0x118] sm:$0xff]  ;;  %v359_v26 = vld [vmem:[%s14604_s24 + $0x120] sm:$0xff]  ;;  %v417_v29 = vld [vmem:[%s14604_s24 + $0x2f0] sm:$0xff] }
  0x3b   : > { %14213 = vmatprep.subr.bf16.mxu1 %v14212_v42  ;;  %v418_v31 = vld [vmem:[%s14604_s24 + $0x2f8] sm:$0xff]  ;;  %v363_v34 = vld [vmem:[%s14604_s24 + $0x140] sm:$0xff]  ;;  %v364_v36 = vld [vmem:[%s14604_s24 + $0x148] sm:$0xff] }
  0x3c   : > { %12328 = vmatmul.mubr.msk.f32.gmra.mrb[10].mxu1 %vm459_vm1, %v398_v43  ;;  %v362_v32 = vld [vmem:[%s14604_s24 + $0x138] sm:$0xff]  ;;  %v421_v37 = vld [vmem:[%s14604_s24 + $0x310] sm:$0xff]  ;;  %v424_v43 = vld [vmem:[%s14604_s24 + $0x328] sm:$0xff] }
  0x3d   : > { %12235 = vmatmul.mubr.msk.f32.gmra.mrb[12].mxu0 %vm459_vm1, %v336_v28  ;;  %12330 = vmatprep.mubr.msk.f32.mxu1 %vm459_vm1, %v399_v45  ;;  %v360_v28 = vld [vmem:[%s14604_s24 + $0x128] sm:$0xff]  ;;  %v365_v38 = vld [vmem:[%s14604_s24 + $0x150] sm:$0xff]  ;;  %v366_v40 = vld [vmem:[%s14604_s24 + $0x158] sm:$0xff] }
  0x3e   : > { %12237 = vmatprep.mubr.msk.f32.mxu0 %vm459_vm1, %v337_v30  ;;  %v361_v30 = vld [vmem:[%s14604_s24 + $0x130] sm:$0xff]  ;;  %v426_v47 = vld [vmem:[%s14604_s24 + $0x338] sm:$0xff]  ;;  %v375_v58 = vld [vmem:[%s14604_s24 + $0x1a0] sm:$0xff] }
  0x3f   : > { %v425_v45 = vld [vmem:[%s14604_s24 + $0x330] sm:$0xff]  ;;  %v370_v48 = vld [vmem:[%s14604_s24 + $0x178] sm:$0xff]  ;;  %v432_v59 = vld [vmem:[%s14604_s24 + $0x368] sm:$0xff] }
  0x40   : > { %12331 = vmatmul.mubr.msk.f32.gmra.mrb[12].mxu1 %vm459_vm1, %v400_v49  ;;  %v427_v49 = vld [vmem:[%s14604_s24 + $0x340] sm:$0xff]  ;;  %v437_v5 = vld [vmem:[%s14604_s24 + $0x390] sm:$0xff]  ;;  %v386_v16 = vld [vmem:[%s14604_s24 + $0x1f8] sm:$0xff] }
  0x41   : > { %12238 = vmatmul.mubr.msk.f32.gmra.mrb[14].mxu0 %vm459_vm1, %v338_v33  ;;  %12333 = vmatprep.mubr.msk.f32.mxu1 %vm459_vm1, %v401_v51  ;;  %v419_v33 = vld [vmem:[%s14604_s24 + $0x300] sm:$0xff]  ;;  %v428_v51 = vld [vmem:[%s14604_s24 + $0x348] sm:$0xff]  ;;  %v381_v6 = vld [vmem:[%s14604_s24 + $0x1d0] sm:$0xff] }
  0x42   : > { %12240 = vmatprep.mubr.msk.f32.mxu0 %vm459_vm1, %v339_v35  ;;  %14215 = vmatpush3.bf16.xpose.msra.mxu1 %v14212_v42  ;;  %v420_v35 = vld [vmem:[%s14604_s24 + $0x308] sm:$0xff]  ;;  %v367_v42 = vld [vmem:[%s14604_s24 + $0x160] sm:$0xff] }
  0x43   : > { %14217 = vmatprep.subr.bf16.mxu1 %v14216_v53  ;;  %v443_v17 = vld [vmem:[%s14604_s24 + $0x3c0] sm:$0xff] }
  0x44   : > { %12334 = vmatmul.mubr.msk.f32.gmra.mrb[14].mxu1 %vm459_vm1, %v402_v54  ;;  %v373_v54 = vld [vmem:[%s14604_s24 + $0x190] sm:$0xff] }
  0x45   : > { %12241 = vmatmul.mubr.msk.f32.gmra.mrb[16].mxu0 %vm459_vm1, %v340_v39  ;;  %12336 = vmatprep.mubr.msk.f32.mxu1 %vm459_vm1, %v403_v56  ;;  %v422_v39 = vld [vmem:[%s14604_s24 + $0x318] sm:$0xff] }
  0x46   : > { %12243 = vmatprep.mubr.msk.f32.mxu0 %vm459_vm1, %v341_v41  ;;  %v423_v41 = vld [vmem:[%s14604_s24 + $0x320] sm:$0xff]  ;;  %v374_v56 = vld [vmem:[%s14604_s24 + $0x198] sm:$0xff] }
  0x48   : > { %12337 = vmatmul.mubr.msk.f32.gmra.mrb[16].mxu1 %vm459_vm1, %v404_v60  ;;  %v376_v60 = vld [vmem:[%s14604_s24 + $0x1a8] sm:$0xff] }
  0x49   : > { %12244 = vmatmul.mubr.msk.f32.gmra.mrb[18].mxu0 %vm459_vm1, %v342_v44  ;;  %12339 = vmatprep.mubr.msk.f32.mxu1 %vm459_vm1, %v405_v62  ;;  %v368_v44 = vld [vmem:[%s14604_s24 + $0x168] sm:$0xff]  ;;  %v377_v62 = vld [vmem:[%s14604_s24 + $0x1b0] sm:$0xff] }
  0x4a   : > { %12246 = vmatprep.mubr.msk.f32.mxu0 %vm459_vm1, %v343_v46  ;;  %14219 = vmatpush3.bf16.xpose.msra.mxu1 %v14216_v53  ;;  %v369_v46 = vld [vmem:[%s14604_s24 + $0x170] sm:$0xff] }
  0x4b   : > { %14221 = vmatprep.subr.bf16.mxu1 %v14220_v0  ;;  %v429_v53 = vld [vmem:[%s14604_s24 + $0x350] sm:$0xff] }
  0x4c   : > { %12340 = vmatmul.mubr.msk.f32.gmra.mrb[18].mxu1 %vm459_vm1, %v406_v1  ;;  %v435_v1 = vld [vmem:[%s14604_s24 + $0x380] sm:$0xff] }
  0x4d   : > { %12247 = vmatmul.mubr.msk.f32.gmra.mrb[20].mxu0 %vm459_vm1, %v344_v50  ;;  %12342 = vmatprep.mubr.msk.f32.mxu1 %vm459_vm1, %v407_v3  ;;  %v371_v50 = vld [vmem:[%s14604_s24 + $0x180] sm:$0xff]  ;;  %v436_v3 = vld [vmem:[%s14604_s24 + $0x388] sm:$0xff] }
  0x4e   : > { %12249 = vmatprep.mubr.msk.f32.mxu0 %vm459_vm1, %v345_v52  ;;  %v372_v52 = vld [vmem:[%s14604_s24 + $0x188] sm:$0xff] }
  0x50   : > { %12343 = vmatmul.mubr.msk.f32.gmra.mrb[20].mxu1 %vm459_vm1, %v408_v7  ;;  %v438_v7 = vld [vmem:[%s14604_s24 + $0x398] sm:$0xff] }
  0x51   : > { %12250 = vmatmul.mubr.msk.f32.gmra.mrb[22].mxu0 %vm459_vm1, %v346_v55  ;;  %12345 = vmatprep.mubr.msk.f32.mxu1 %vm459_vm1, %v409_v9  ;;  %v430_v55 = vld [vmem:[%s14604_s24 + $0x358] sm:$0xff]  ;;  %v439_v9 = vld [vmem:[%s14604_s24 + $0x3a0] sm:$0xff] }
  0x52   : > { %12252 = vmatprep.mubr.msk.f32.mxu0 %vm459_vm1, %v347_v57  ;;  %14223 = vmatpush3.bf16.xpose.msra.mxu1 %v14220_v0  ;;  %v431_v57 = vld [vmem:[%s14604_s24 + $0x360] sm:$0xff]  ;;  %v378_v0 = vld [vmem:[%s14604_s24 + $0x1b8] sm:$0xff] }
  0x53   : > { %14225 = vmatprep.subr.bf16.mxu1 %v14224_v11 }
  0x54   : > { %12346 = vmatmul.mubr.msk.f32.gmra.mrb[22].mxu1 %vm459_vm1, %v410_v12  ;;  %v384_v12 = vld [vmem:[%s14604_s24 + $0x1e8] sm:$0xff] }
  0x55   : > { %12253 = vmatmul.mubr.msk.f32.gmra.mrb[24].mxu0 %vm459_vm1, %v348_v61  ;;  %12348 = vmatprep.mubr.msk.f32.mxu1 %vm459_vm1, %v411_v14  ;;  %v433_v61 = vld [vmem:[%s14604_s24 + $0x370] sm:$0xff] }
  0x56   : > { %12255 = vmatprep.mubr.msk.f32.mxu0 %vm459_vm1, %v349_v63  ;;  %v434_v63 = vld [vmem:[%s14604_s24 + $0x378] sm:$0xff]  ;;  %v385_v14 = vld [vmem:[%s14604_s24 + $0x1f0] sm:$0xff] }
  0x58   : > { %12349 = vmatmul.mubr.msk.f32.gmra.mrb[24].mxu1 %vm459_vm1, %v412_v18  ;;  %v444_v18 = vld [vmem:[%s14604_s24 + $0x3c8] sm:$0xff] }
  0x59   : > { %12256 = vmatmul.mubr.msk.f32.gmra.mrb[26].mxu0 %vm459_vm1, %v350_v2  ;;  %12351 = vmatprep.mubr.msk.f32.mxu1 %vm459_vm1, %v413_v20  ;;  %v379_v2 = vld [vmem:[%s14604_s24 + $0x1c0] sm:$0xff]  ;;  %v446_v20 = vld [vmem:[%s14604_s24 + $0x3d8] sm:$0xff] }
  0x5a   : > { %12258 = vmatprep.mubr.msk.f32.mxu0 %vm459_vm1, %v351_v4  ;;  %14227 = vmatpush3.bf16.xpose.msra.mxu1 %v14224_v11  ;;  %v380_v4 = vld [vmem:[%s14604_s24 + $0x1c8] sm:$0xff] }
  0x5b   : > { %14229 = vmatprep.subr.bf16.mxu1 %v14228_v22  ;;  %v440_v11 = vld [vmem:[%s14604_s24 + $0x3a8] sm:$0xff] }
  0x5c   : > { %12352 = vmatmul.mubr.msk.f32.gmra.mrb[26].mxu1 %vm459_vm1, %v414_v23  ;;  %v449_v23 = vld [vmem:[%s14604_s24 + $0x3f0] sm:$0xff] }
  0x5d   : > { %12259 = vmatmul.mubr.msk.f32.gmra.mrb[28].mxu0 %vm459_vm1, %v352_v8  ;;  %12354 = vmatprep.mubr.msk.f32.mxu1 %vm459_vm1, %v415_v25  ;;  %v382_v8 = vld [vmem:[%s14604_s24 + $0x1d8] sm:$0xff]  ;;  %v10816_v25 = vld [vmem:[%s18010_s4 + $0x80] sm:$0xff] }
  0x5e   : > { %12261 = vmatprep.mubr.msk.f32.mxu0 %vm459_vm1, %v353_v10  ;;  %v383_v10 = vld [vmem:[%s14604_s24 + $0x1e0] sm:$0xff] }
  0x60   : > { %12355 = vmatmul.mubr.msk.f32.gmra.mrb[28].mxu1 %vm459_vm1, %v416_v27 }
  0x61   : > { %12262 = vmatmul.mubr.msk.f32.gmra.mrb[30].mxu0 %vm459_vm1, %v354_v13  ;;  %12357 = vmatprep.mubr.msk.f32.mxu1 %vm459_vm1, %v417_v29  ;;  %v441_v13 = vld [vmem:[%s14604_s24 + $0x3b0] sm:$0xff]  ;;  %v10819_v29 = vld [vmem:[%s18010_s4 + $0x98] sm:$0xff] }
  0x62   : > { %12264 = vmatprep.mubr.msk.f32.mxu0 %vm459_vm1, %v355_v15  ;;  %14231 = vmatpush3.bf16.xpose.msra.mxu1 %v14228_v22  ;;  %v442_v15 = vld [vmem:[%s14604_s24 + $0x3b8] sm:$0xff]  ;;  %v448_v22 = vld [vmem:[%s14604_s24 + $0x3e8] sm:$0xff] }
  0x64   : > { %12358 = vmatmul.mubr.msk.f32.gmra.mrb[30].mxu1 %vm459_vm1, %v418_v31  ;;  %v14919_v31 = vld [vmem:[%s18009_s3] ss:$0 sm:$0xff] }
  0x65   : > { %12265 = vmatmul.mubr.msk.f32.gmra.mrb[32].mxu0 %vm459_vm1, %v356_v19  ;;  %12360 = vmatprep.mubr.msk.f32.mxu1 %vm459_vm1, %v419_v33  ;;  %v445_v19 = vld [vmem:[%s14604_s24 + $0x3d0] sm:$0xff] }
  0x66   : > { %12267 = vmatprep.mubr.msk.f32.mxu0 %vm459_vm1, %v357_v21  ;;  %v447_v21 = vld [vmem:[%s14604_s24 + $0x3e0] sm:$0xff] }
  0x68   : > { %12361 = vmatmul.mubr.msk.f32.gmra.mrb[32].mxu1 %vm459_vm1, %v420_v35  ;;  %v10821_v35 = vld [vmem:[%s18010_s4 + $0xa8] sm:$0xff] }
  0x69   : > { %12268 = vmatmul.mubr.msk.f32.gmra.mrb[34].mxu0 %vm459_vm1, %v358_v24  ;;  %12363 = vmatprep.mubr.msk.f32.mxu1 %vm459_vm1, %v421_v37  ;;  %v450_v24 = vld [vmem:[%s14604_s24 + $0x3f8] sm:$0xff]  ;;  %s1553_s24 = sld [smem:[#allocation2]] }
  0x6a   : > { %12270 = vmatprep.mubr.msk.f32.mxu0 %vm459_vm1, %v359_v26  ;;  %v10817_v26 = vld [vmem:[%s18010_s4 + $0x88] sm:$0xff] }
  0x6b   : > { %v14232_v27 = vpack.c.bf16 %v10817_v26, %v10816_v25 }
  0x6c   : > { %12364 = vmatmul.mubr.msk.f32.gmra.mrb[34].mxu1 %vm459_vm1, %v422_v39 }
  0x6d   : > { %12271 = vmatmul.mubr.msk.f32.gmra.mrb[36].mxu0 %vm459_vm1, %v360_v28  ;;  %12366 = vmatprep.mubr.msk.f32.mxu1 %vm459_vm1, %v423_v41  ;;  %v10818_v28 = vld [vmem:[%s18010_s4 + $0x90] sm:$0xff] }
  0x6e   : > { %12273 = vmatprep.mubr.msk.f32.mxu0 %vm459_vm1, %v361_v30  ;;  %14233 = vmatprep.subr.bf16.mxu0 %v14232_v27  ;;  %v14236_v30 = vpack.c.bf16 %v10819_v29, %v10818_v28 }
  0x6f   : > { %14235 = vmatpush3.bf16.xpose.msra.mxu0 %v14232_v27  ;;  %v14921_v33 = vstv %s1553_s24 }
  0x70   : > { %12367 = vmatmul.mubr.msk.f32.gmra.mrb[36].mxu1 %vm459_vm1, %v424_v43  ;;  %14237 = vmatprep.subr.bf16.mxu0 %v14236_v30 }
  0x71   : > { %12274 = vmatmul.mubr.msk.f32.gmra.mrb[38].mxu0 %vm459_vm1, %v362_v32  ;;  %12369 = vmatprep.mubr.msk.f32.mxu1 %vm459_vm1, %v425_v45 }
  0x72   : > { %12276 = vmatprep.mubr.msk.f32.mxu0 %vm459_vm1, %v363_v34  ;;  %v10820_v34 = vld [vmem:[%s18010_s4 + $0xa0] sm:$0xff] }
  0x74   : > { %12370 = vmatmul.mubr.msk.f32.gmra.mrb[38].mxu1 %vm459_vm1, %v426_v47 }
  0x75   : > { %12277 = vmatmul.mubr.msk.f32.gmra.mrb[40].mxu0 %vm459_vm1, %v364_v36  ;;  %12372 = vmatprep.mubr.msk.f32.mxu1 %vm459_vm1, %v427_v49 }
  0x76   : > { %12279 = vmatprep.mubr.msk.f32.mxu0 %vm459_vm1, %v365_v38  ;;  %v14240_v38 = vpack.c.bf16 %v10821_v35, %v10820_v34  ;;  %v10822_v34 = vld [vmem:[%s18010_s4 + $0xb0] sm:$0xff]  ;;  %v10823_v35 = vld [vmem:[%s18010_s4 + $0xb8] sm:$0xff] }
  0x77   : > { %14239 = vmatpush3.bf16.xpose.msra.mxu0 %v14236_v30 }
  0x78   : > { %12373 = vmatmul.mubr.msk.f32.gmra.mrb[40].mxu1 %vm459_vm1, %v428_v51  ;;  %14241 = vmatprep.subr.bf16.mxu0 %v14240_v38 }
  0x79   : > { %12280 = vmatmul.mubr.msk.f32.gmra.mrb[42].mxu0 %vm459_vm1, %v366_v40  ;;  %12375 = vmatprep.mubr.msk.f32.mxu1 %vm459_vm1, %v429_v53 }
  0x7a   : > { %12282 = vmatprep.mubr.msk.f32.mxu0 %vm459_vm1, %v367_v42 }
  0x7c   : > { %12376 = vmatmul.mubr.msk.f32.gmra.mrb[42].mxu1 %vm459_vm1, %v430_v55 }
  0x7d   : > { %12283 = vmatmul.mubr.msk.f32.gmra.mrb[44].mxu0 %vm459_vm1, %v368_v44  ;;  %12378 = vmatprep.mubr.msk.f32.mxu1 %vm459_vm1, %v431_v57 }
  0x7e   : > { %12285 = vmatprep.mubr.msk.f32.mxu0 %vm459_vm1, %v369_v46 }
  0x7f   : > { %14243 = vmatpush3.bf16.xpose.msra.mxu0 %v14240_v38 }
  0x80   : > { %12379 = vmatmul.mubr.msk.f32.gmra.mrb[44].mxu1 %vm459_vm1, %v432_v59 }
  0x81   : > { %12286 = vmatmul.mubr.msk.f32.gmra.mrb[46].mxu0 %vm459_vm1, %v370_v48  ;;  %12381 = vmatprep.mubr.msk.f32.mxu1 %vm459_vm1, %v433_v61 }
  0x82   : > { %12288 = vmatprep.mubr.msk.f32.mxu0 %vm459_vm1, %v371_v50 }
  0x84   : > { %12382 = vmatmul.mubr.msk.f32.gmra.mrb[46].mxu1 %vm459_vm1, %v434_v63 }
  0x85   : > { %12289 = vmatmul.mubr.msk.f32.gmra.mrb[48].mxu0 %vm459_vm1, %v372_v52  ;;  %12384 = vmatprep.mubr.msk.f32.mxu1 %vm459_vm1, %v435_v1 }
  0x86   : > { %12291 = vmatprep.mubr.msk.f32.mxu0 %vm459_vm1, %v373_v54 }
  0x88   : > { %12385 = vmatmul.mubr.msk.f32.gmra.mrb[48].mxu1 %vm459_vm1, %v436_v3 }
  0x89   : > { %12292 = vmatmul.mubr.msk.f32.gmra.mrb[50].mxu0 %vm459_vm1, %v374_v56  ;;  %12387 = vmatprep.mubr.msk.f32.mxu1 %vm459_vm1, %v437_v5 }
  0x8a   : > { %12294 = vmatprep.mubr.msk.f32.mxu0 %vm459_vm1, %v375_v58 }
  0x8c   : > { %12388 = vmatmul.mubr.msk.f32.gmra.mrb[50].mxu1 %vm459_vm1, %v438_v7 }
  0x8d   : > { %12295 = vmatmul.mubr.msk.f32.gmra.mrb[52].mxu0 %vm459_vm1, %v376_v60  ;;  %12390 = vmatprep.mubr.msk.f32.mxu1 %vm459_vm1, %v439_v9 }
  0x8e   : > { %12297 = vmatprep.mubr.msk.f32.mxu0 %vm459_vm1, %v377_v62 }
  0x90   : > { %12391 = vmatmul.mubr.msk.f32.gmra.mrb[52].mxu1 %vm459_vm1, %v440_v11 }
  0x91   : > { %12298 = vmatmul.mubr.msk.f32.gmra.mrb[54].mxu0 %vm459_vm1, %v378_v0  ;;  %12393 = vmatprep.mubr.msk.f32.mxu1 %vm459_vm1, %v441_v13 }
  0x92   : > { %12300 = vmatprep.mubr.msk.f32.mxu0 %vm459_vm1, %v379_v2 }
  0x94   : > { %12394 = vmatmul.mubr.msk.f32.gmra.mrb[54].mxu1 %vm459_vm1, %v442_v15 }
  0x95   : > { %12301 = vmatmul.mubr.msk.f32.gmra.mrb[56].mxu0 %vm459_vm1, %v380_v4  ;;  %12396 = vmatprep.mubr.msk.f32.mxu1 %vm459_vm1, %v443_v17 }
  0x96   : > { %12303 = vmatprep.mubr.msk.f32.mxu0 %vm459_vm1, %v381_v6 }
  0x98   : > { %12397 = vmatmul.mubr.msk.f32.gmra.mrb[56].mxu1 %vm459_vm1, %v444_v18 }
  0x99   : > { %12304 = vmatmul.mubr.msk.f32.gmra.mrb[58].mxu0 %vm459_vm1, %v382_v8  ;;  %12399 = vmatprep.mubr.msk.f32.mxu1 %vm459_vm1, %v445_v19 }
  0x9a   : > { %12306 = vmatprep.mubr.msk.f32.mxu0 %vm459_vm1, %v383_v10 }
  0x9c   : > { %12400 = vmatmul.mubr.msk.f32.gmra.mrb[58].mxu1 %vm459_vm1, %v446_v20 }
  0x9d   : > { %12307 = vmatmul.mubr.msk.f32.gmra.mrb[60].mxu0 %vm459_vm1, %v384_v12  ;;  %12402 = vmatprep.mubr.msk.f32.mxu1 %vm459_vm1, %v447_v21 }
  0x9e   : > { %12309 = vmatprep.mubr.msk.f32.mxu0 %vm459_vm1, %v385_v14 }
  0xa0   : > { %12403 = vmatmul.mubr.msk.f32.gmra.mrb[60].mxu1 %vm459_vm1, %v448_v22 }
  0xa1   : > { %12310 = vmatmul.mubr.msk.f32.gmra.mrb[62].mxu0 %vm459_vm1, %v386_v16  ;;  %12405 = vmatprep.mubr.msk.f32.mxu1 %vm459_vm1, %v449_v23 }
  0xa4   : > { %12406 = vmatmul.mubr.msk.f32.gmra.mrb[62].mxu1 %vm459_vm1, %v450_v24 }
  0xf8   : > { %v12218_v32 = vpop.f32.mrb[0].mxu0 }
  0xf9   : > { %v920_v36 = vadd.f32 %v12218_v32, %v14919_v31  ;;  %v914_v37 = vpop.f32.mrb[1].mxu0 }
  0xfa   : > { %v915_v39 = vadd.f32 %v14919_v31, %v914_v37 }
  0xfb   : > { %v1684_v40 = vmul.f32 %v14921_v33, %v920_v36  ;;  %vm1555_vm3 = vcmp.ge.f32.partialorder %v920_v36, 0.0  ;;  %v14944_v1 = vpop.f32.mrb[0].mxu1 }
  0xfc   : > { %v12221_v41 = vpop.f32.mrb[2].mxu0  ;;  %vm1554_vm2 = vcmp.ge.f32.partialorder %v915_v39, 0.0  ;;  %v1683_v42 = vmul.f32 %v14921_v33, %v915_v39  ;;  %v14947_v4 = vpop.f32.mrb[1].mxu1 }
  0xfd   : > { %v930_v43 = vadd.f32 %v12221_v41, %v14919_v31  ;;  %v924_v44 = vpop.f32.mrb[3].mxu0  ;;  %v1812_v47 = vsel %vm1555_vm3, %v920_v36, %v1684_v40 }
  0xfe   : > { %v925_v45 = vadd.f32 %v14919_v31, %v924_v44  ;;  %v1811_v46 = vsel %vm1554_vm2, %v915_v39, %v1683_v42 }
  0xff   : > { %12440 = vmatprep.mubr.f32.mxu1 %v1811_v46  ;;  %v1686_v48 = vmul.f32 %v14921_v33, %v930_v43  ;;  %vm1557_vm5 = vcmp.ge.f32.partialorder %v930_v43, 0.0  ;;  %v14952_v11 = vpop.f32.mrb[2].mxu1 }
 0x100   : > { %v12224_v49 = vpop.f32.mrb[4].mxu0  ;;  %12441 = vmatmul.mubr.f32.vlgmr.msra.gmra.mrb[64].mxu1 %v1812_v47  ;;  %vm1556_vm4 = vcmp.ge.f32.partialorder %v925_v45, 0.0  ;;  %v1685_v50 = vmul.f32 %v14921_v33, %v925_v45  ;;  %v14955_v14 = vpop.f32.mrb[3].mxu1 }
 0x101   : > { %v940_v51 = vadd.f32 %v12224_v49, %v14919_v31  ;;  %v934_v52 = vpop.f32.mrb[5].mxu0  ;;  %v1814_v55 = vsel %vm1557_vm5, %v930_v43, %v1686_v48  ;;  %v14244_v43 = vpack.c.bf16 %v10823_v35, %v10822_v34 }
 0x102   : > { %v935_v53 = vadd.f32 %v14919_v31, %v934_v52  ;;  %v1813_v54 = vsel %vm1556_vm4, %v925_v45, %v1685_v50 }
 0x103   : > { %12443 = vmatprep.mubr.f32.mxu1 %v1813_v54  ;;  %v1688_v56 = vmul.f32 %v14921_v33, %v940_v51  ;;  %vm1559_vm7 = vcmp.ge.f32.partialorder %v940_v51, 0.0  ;;  %v14960_v21 = vpop.f32.mrb[4].mxu1  ;;  %14245 = vmatprep.subr.bf16.mxu0 %v14244_v43 }
 0x104   : > { %v12227_v57 = vpop.f32.mrb[6].mxu0  ;;  %12444 = vmatmul.mubr.f32.gmra.mrb[66].mxu1 %v1814_v55  ;;  %vm1558_vm6 = vcmp.ge.f32.partialorder %v935_v53, 0.0  ;;  %v1687_v58 = vmul.f32 %v14921_v33, %v935_v53  ;;  %v14963_v24 = vpop.f32.mrb[5].mxu1  ;;  %14247 = vmatpush3.bf16.xpose.msra.mxu0 %v14244_v43 }
 0x105   : > { %v950_v59 = vadd.f32 %v12227_v57, %v14919_v31  ;;  %v944_v60 = vpop.f32.mrb[7].mxu0  ;;  %v1816_v63 = vsel %vm1559_vm7, %v940_v51, %v1688_v56 }
 0x106   : > { %v945_v61 = vadd.f32 %v14919_v31, %v944_v60  ;;  %v1815_v62 = vsel %vm1558_vm6, %v935_v53, %v1687_v58 }
 0x107   : > { %12446 = vmatprep.mubr.f32.mxu1 %v1815_v62  ;;  %v1690_v0 = vmul.f32 %v14921_v33, %v950_v59  ;;  %vm1561_vm9 = vcmp.ge.f32.partialorder %v950_v59, 0.0  ;;  %v14968_v32 = vpop.f32.mrb[6].mxu1 }
 0x108   : > { %v12230_v2 = vpop.f32.mrb[8].mxu0  ;;  %12447 = vmatmul.mubr.f32.gmra.mrb[68].mxu1 %v1816_v63  ;;  %vm1560_vm8 = vcmp.ge.f32.partialorder %v945_v61, 0.0  ;;  %v1689_v3 = vmul.f32 %v14921_v33, %v945_v61  ;;  %v14977_v38 = vpop.f32.mrb[7].mxu1 }
 0x109   : > { %v960_v5 = vadd.f32 %v12230_v2, %v14919_v31  ;;  %v954_v6 = vpop.f32.mrb[9].mxu0  ;;  %v1818_v9 = vsel %vm1561_vm9, %v950_v59, %v1690_v0 }
 0x10a   : > { %v955_v7 = vadd.f32 %v14919_v31, %v954_v6  ;;  %v1817_v8 = vsel %vm1560_vm8, %v945_v61, %v1689_v3 }
 0x10b   : > { %12449 = vmatprep.mubr.f32.mxu1 %v1817_v8  ;;  %v1692_v10 = vmul.f32 %v14921_v33, %v960_v5  ;;  %vm1563_vm11 = vcmp.ge.f32.partialorder %v960_v5, 0.0  ;;  %v14982_v46 = vpop.f32.mrb[8].mxu1 }
 0x10c   : > { %v12233_v12 = vpop.f32.mrb[10].mxu0  ;;  %12450 = vmatmul.mubr.f32.gmra.mrb[70].mxu1 %v1818_v9  ;;  %vm1562_vm10 = vcmp.ge.f32.partialorder %v955_v7, 0.0  ;;  %v1691_v13 = vmul.f32 %v14921_v33, %v955_v7  ;;  %v14985_v49 = vpop.f32.mrb[9].mxu1 }
 0x10d   : > { %v970_v15 = vadd.f32 %v12233_v12, %v14919_v31  ;;  %v964_v16 = vpop.f32.mrb[11].mxu0  ;;  %v1820_v19 = vsel %vm1563_vm11, %v960_v5, %v1692_v10 }
 0x10e   : > { %v965_v17 = vadd.f32 %v14919_v31, %v964_v16  ;;  %v1819_v18 = vsel %vm1562_vm10, %v955_v7, %v1691_v13 }
 0x10f   : > { %12452 = vmatprep.mubr.f32.mxu1 %v1819_v18  ;;  %v1694_v20 = vmul.f32 %v14921_v33, %v970_v15  ;;  %vm1565_vm13 = vcmp.ge.f32.partialorder %v970_v15, 0.0  ;;  %v14990_v56 = vpop.f32.mrb[10].mxu1  ;;  %v10825_v18 = vld [vmem:[%s18010_s4 + $0xc8] sm:$0xff] }
 0x110   : > { %v12236_v22 = vpop.f32.mrb[12].mxu0  ;;  %12453 = vmatmul.mubr.f32.gmra.mrb[72].mxu1 %v1820_v19  ;;  %vm1564_vm12 = vcmp.ge.f32.partialorder %v965_v17, 0.0  ;;  %v1693_v23 = vmul.f32 %v14921_v33, %v965_v17  ;;  %v14993_v59 = vpop.f32.mrb[11].mxu1 }
 0x111   : > { %v980_v25 = vadd.f32 %v12236_v22, %v14919_v31  ;;  %v974_v26 = vpop.f32.mrb[13].mxu0  ;;  %v1822_v29 = vsel %vm1565_vm13, %v970_v15, %v1694_v20 }
 0x112   : > { %v975_v27 = vadd.f32 %v14919_v31, %v974_v26  ;;  %v1821_v28 = vsel %vm1564_vm12, %v965_v17, %v1693_v23  ;;  %v10824_v17 = vld [vmem:[%s18010_s4 + $0xc0] sm:$0xff] }
 0x113   : > { %12455 = vmatprep.mubr.f32.mxu1 %v1821_v28  ;;  %v1696_v30 = vmul.f32 %v14921_v33, %v980_v25  ;;  %vm1567_vm15 = vcmp.ge.f32.partialorder %v980_v25, 0.0  ;;  %v14998_v3 = vpop.f32.mrb[12].mxu1  ;;  %v14248_v28 = vpack.c.bf16 %v10825_v18, %v10824_v17 }
 0x114   : > { %v12239_v36 = vpop.f32.mrb[14].mxu0  ;;  %12456 = vmatmul.mubr.f32.gmra.mrb[74].mxu1 %v1822_v29  ;;  %vm1566_vm14 = vcmp.ge.f32.partialorder %v975_v27, 0.0  ;;  %v1695_v37 = vmul.f32 %v14921_v33, %v975_v27  ;;  %v15001_v7 = vpop.f32.mrb[13].mxu1 }
 0x115   : > { %v990_v39 = vadd.f32 %v12239_v36, %v14919_v31  ;;  %v984_v40 = vpop.f32.mrb[15].mxu0  ;;  %v1824_v44 = vsel %vm1567_vm15, %v980_v25, %v1696_v30  ;;  %14249 = vmatprep.subr.bf16.mxu0 %v14248_v28 }
 0x116   : > { %v985_v41 = vadd.f32 %v14919_v31, %v984_v40  ;;  %v1823_v42 = vsel %vm1566_vm14, %v975_v27, %v1695_v37  ;;  %14251 = vmatpush3.bf16.xpose.msra.mxu0 %v14248_v28 }
 0x117   : > { %12458 = vmatprep.mubr.f32.mxu1 %v1823_v42  ;;  %v1698_v45 = vmul.f32 %v14921_v33, %v990_v39  ;;  %vm1569_vm2 = vcmp.ge.f32.partialorder %v990_v39, 0.0  ;;  %v15006_v16 = vpop.f32.mrb[14].mxu1 }
 0x118   : > { %v12242_v47 = vpop.f32.mrb[16].mxu0  ;;  %12459 = vmatmul.mubr.f32.gmra.mrb[76].mxu1 %v1824_v44  ;;  %vm1568_vm0 = vcmp.ge.f32.partialorder %v985_v41, 0.0  ;;  %v1697_v48 = vmul.f32 %v14921_v33, %v985_v41  ;;  %v15015_v22 = vpop.f32.mrb[15].mxu1 }
 0x119   : > { %v1000_v50 = vadd.f32 %v12242_v47, %v14919_v31  ;;  %v994_v51 = vpop.f32.mrb[17].mxu0  ;;  %v1826_v54 = vsel %vm1569_vm2, %v990_v39, %v1698_v45 }
 0x11a   : > { %v995_v52 = vadd.f32 %v14919_v31, %v994_v51  ;;  %v1825_v53 = vsel %vm1568_vm0, %v985_v41, %v1697_v48 }
 0x11b   : > { %12461 = vmatprep.mubr.f32.mxu1 %v1825_v53  ;;  %v1700_v55 = vmul.f32 %v14921_v33, %v1000_v50  ;;  %vm1571_vm4 = vcmp.ge.f32.partialorder %v1000_v50, 0.0  ;;  %v15020_v34 = vpop.f32.mrb[16].mxu1 }
 0x11c   : > { %v12245_v57 = vpop.f32.mrb[18].mxu0  ;;  %12462 = vmatmul.mubr.f32.gmra.mrb[78].mxu1 %v1826_v54  ;;  %vm1570_vm3 = vcmp.ge.f32.partialorder %v995_v52, 0.0  ;;  %v1699_v58 = vmul.f32 %v14921_v33, %v995_v52  ;;  %v15023_v37 = vpop.f32.mrb[17].mxu1 }
 0x11d   : > { %v1010_v60 = vadd.f32 %v12245_v57, %v14919_v31  ;;  %v1004_v61 = vpop.f32.mrb[19].mxu0  ;;  %v1828_v0 = vsel %vm1571_vm4, %v1000_v50, %v1700_v55 }
 0x11e   : > { %v1005_v62 = vadd.f32 %v14919_v31, %v1004_v61  ;;  %v1827_v63 = vsel %vm1570_vm3, %v995_v52, %v1699_v58 }
 0x11f   : > { %12464 = vmatprep.mubr.f32.mxu1 %v1827_v63  ;;  %v1702_v2 = vmul.f32 %v14921_v33, %v1010_v60  ;;  %vm1573_vm6 = vcmp.ge.f32.partialorder %v1010_v60, 0.0  ;;  %v15028_v45 = vpop.f32.mrb[18].mxu1 }
 0x120   : > { %v12248_v5 = vpop.f32.mrb[20].mxu0  ;;  %12465 = vmatmul.mubr.f32.gmra.mrb[80].mxu1 %v1828_v0  ;;  %vm1572_vm5 = vcmp.ge.f32.partialorder %v1005_v62, 0.0  ;;  %v1701_v6 = vmul.f32 %v14921_v33, %v1005_v62  ;;  %v15031_v50 = vpop.f32.mrb[19].mxu1 }
 0x121   : > { %v1020_v8 = vadd.f32 %v12248_v5, %v14919_v31  ;;  %v1014_v9 = vpop.f32.mrb[21].mxu0  ;;  %v1830_v13 = vsel %vm1573_vm6, %v1010_v60, %v1702_v2 }
 0x122   : > { %v1015_v10 = vadd.f32 %v14919_v31, %v1014_v9  ;;  %v1829_v12 = vsel %vm1572_vm5, %v1005_v62, %v1701_v6 }
 0x123   : > { %12467 = vmatprep.mubr.f32.mxu1 %v1829_v12  ;;  %v1704_v15 = vmul.f32 %v14921_v33, %v1020_v8  ;;  %vm1575_vm8 = vcmp.ge.f32.partialorder %v1020_v8, 0.0  ;;  %v15036_v58 = vpop.f32.mrb[20].mxu1  ;;  %v10827_v12 = vld [vmem:[%s18010_s4 + $0xd8] sm:$0xff] }
 0x124   : > { %v12251_v19 = vpop.f32.mrb[22].mxu0  ;;  %12468 = vmatmul.mubr.f32.gmra.mrb[82].mxu1 %v1830_v13  ;;  %vm1574_vm7 = vcmp.ge.f32.partialorder %v1015_v10, 0.0  ;;  %v1703_v20 = vmul.f32 %v14921_v33, %v1015_v10  ;;  %v15039_v62 = vpop.f32.mrb[21].mxu1 }
 0x125   : > { %v1030_v23 = vadd.f32 %v12251_v19, %v14919_v31  ;;  %v1024_v25 = vpop.f32.mrb[23].mxu0  ;;  %v1832_v29 = vsel %vm1575_vm8, %v1020_v8, %v1704_v15 }
 0x126   : > { %v1025_v26 = vadd.f32 %v14919_v31, %v1024_v25  ;;  %v1831_v27 = vsel %vm1574_vm7, %v1015_v10, %v1703_v20  ;;  %v10826_v10 = vld [vmem:[%s18010_s4 + $0xd0] sm:$0xff] }
 0x127   : > { %12470 = vmatprep.mubr.f32.mxu1 %v1831_v27  ;;  %v1706_v30 = vmul.f32 %v14921_v33, %v1030_v23  ;;  %vm1577_vm10 = vcmp.ge.f32.partialorder %v1030_v23, 0.0  ;;  %v15044_v9 = vpop.f32.mrb[22].mxu1  ;;  %v14252_v25 = vpack.c.bf16 %v10827_v12, %v10826_v10 }
 0x128   : > { %v12254_v35 = vpop.f32.mrb[24].mxu0  ;;  %12471 = vmatmul.mubr.f32.gmra.mrb[84].mxu1 %v1832_v29  ;;  %vm1576_vm9 = vcmp.ge.f32.partialorder %v1025_v26, 0.0  ;;  %v1705_v36 = vmul.f32 %v14921_v33, %v1025_v26  ;;  %v15053_v17 = vpop.f32.mrb[23].mxu1 }
 0x129   : > { %v1040_v39 = vadd.f32 %v12254_v35, %v14919_v31  ;;  %v1034_v40 = vpop.f32.mrb[25].mxu0  ;;  %v1834_v43 = vsel %vm1577_vm10, %v1030_v23, %v1706_v30  ;;  %14253 = vmatprep.subr.bf16.mxu0 %v14252_v25 }
 0x12a   : > { %v1035_v41 = vadd.f32 %v14919_v31, %v1034_v40  ;;  %v1833_v42 = vsel %vm1576_vm9, %v1025_v26, %v1705_v36  ;;  %14255 = vmatpush3.bf16.xpose.msra.mxu0 %v14252_v25 }
 0x12b   : > { %12473 = vmatprep.mubr.f32.mxu1 %v1833_v42  ;;  %v1708_v44 = vmul.f32 %v14921_v33, %v1040_v39  ;;  %vm1579_vm12 = vcmp.ge.f32.partialorder %v1040_v39, 0.0  ;;  %v15058_v28 = vpop.f32.mrb[24].mxu1 }
 0x12c   : > { %v12257_v47 = vpop.f32.mrb[26].mxu0  ;;  %12474 = vmatmul.mubr.f32.gmra.mrb[86].mxu1 %v1834_v43  ;;  %vm1578_vm11 = vcmp.ge.f32.partialorder %v1035_v41, 0.0  ;;  %v1707_v48 = vmul.f32 %v14921_v33, %v1035_v41  ;;  %v15061_v35 = vpop.f32.mrb[25].mxu1 }
 0x12d   : > { %v1050_v51 = vadd.f32 %v12257_v47, %v14919_v31  ;;  %v1044_v52 = vpop.f32.mrb[27].mxu0  ;;  %v1836_v55 = vsel %vm1579_vm12, %v1040_v39, %v1708_v44 }
 0x12e   : > { %v1045_v53 = vadd.f32 %v14919_v31, %v1044_v52  ;;  %v1835_v54 = vsel %vm1578_vm11, %v1035_v41, %v1707_v48 }
 0x12f   : > { %12476 = vmatprep.mubr.f32.mxu1 %v1835_v54  ;;  %v1710_v57 = vmul.f32 %v14921_v33, %v1050_v51  ;;  %vm1581_vm14 = vcmp.ge.f32.partialorder %v1050_v51, 0.0  ;;  %v15066_v44 = vpop.f32.mrb[26].mxu1 }
 0x130   : > { %v12260_v60 = vpop.f32.mrb[28].mxu0  ;;  %12477 = vmatmul.mubr.f32.gmra.mrb[88].mxu1 %v1836_v55  ;;  %vm1580_vm13 = vcmp.ge.f32.partialorder %v1045_v53, 0.0  ;;  %v1709_v61 = vmul.f32 %v14921_v33, %v1045_v53 }
 0x131   : > { %v1060_v63 = vadd.f32 %v12260_v60, %v14919_v31  ;;  %v1054_v0 = vpop.f32.mrb[29].mxu0  ;;  %v1838_v6 = vsel %vm1581_vm14, %v1050_v51, %v1710_v57  ;;  %v15069_v51 = vpop.f32.mrb[27].mxu1 }
 0x132   : > { %v1055_v2 = vadd.f32 %v14919_v31, %v1054_v0  ;;  %v1837_v5 = vsel %vm1580_vm13, %v1045_v53, %v1709_v61 }
 0x133   : > { %12479 = vmatprep.mubr.f32.mxu1 %v1837_v5  ;;  %v1712_v8 = vmul.f32 %v14921_v33, %v1060_v63  ;;  %vm1583_vm0 = vcmp.ge.f32.partialorder %v1060_v63, 0.0  ;;  %v15074_v61 = vpop.f32.mrb[28].mxu1 }
 0x134   : > { %v12263_v13 = vpop.f32.mrb[30].mxu0  ;;  %12480 = vmatmul.mubr.f32.gmra.mrb[90].mxu1 %v1838_v6  ;;  %vm1582_vm15 = vcmp.ge.f32.partialorder %v1055_v2, 0.0  ;;  %v1711_v15 = vmul.f32 %v14921_v33, %v1055_v2 }
 0x135   : > { %v1070_v18 = vadd.f32 %v12263_v13, %v14919_v31  ;;  %v1064_v19 = vpop.f32.mrb[31].mxu0  ;;  %v1840_v26 = vsel %vm1583_vm0, %v1060_v63, %v1712_v8 }
 0x136   : > { %v1065_v20 = vadd.f32 %v14919_v31, %v1064_v19  ;;  %v1839_v23 = vsel %vm1582_vm15, %v1055_v2, %v1711_v15  ;;  %v15077_v2 = vpop.f32.mrb[29].mxu1  ;;  %v10836_v19 = vld [vmem:[%s18010_s4 + $0x108] sm:$0xff] }
 0x137   : > { %12482 = vmatprep.mubr.f32.mxu1 %v1839_v23  ;;  %v1714_v27 = vmul.f32 %v14921_v33, %v1070_v18  ;;  %vm1585_vm3 = vcmp.ge.f32.partialorder %v1070_v18, 0.0  ;;  %v15082_v15 = vpop.f32.mrb[30].mxu1 }
 0x138   : > { %v12266_v29 = vpop.f32.mrb[32].mxu0  ;;  %12483 = vmatmul.mubr.f32.gmra.mrb[92].mxu1 %v1840_v26  ;;  %vm1584_vm2 = vcmp.ge.f32.partialorder %v1065_v20, 0.0  ;;  %v1713_v30 = vmul.f32 %v14921_v33, %v1065_v20  ;;  %v15091_v25 = vpop.f32.mrb[31].mxu1 }
 0x139   : > { %v1080_v36 = vadd.f32 %v12266_v29, %v14919_v31  ;;  %v1074_v39 = vpop.f32.mrb[33].mxu0  ;;  %v1842_v42 = vsel %vm1585_vm3, %v1070_v18, %v1714_v27  ;;  %v10835_v18 = vld [vmem:[%s18010_s4 + $0x100] sm:$0xff] }
 0x13a   : > { %v1075_v40 = vadd.f32 %v14919_v31, %v1074_v39  ;;  %v1841_v41 = vsel %vm1584_vm2, %v1065_v20, %v1713_v30 }
 0x13b   : > { %12485 = vmatprep.mubr.f32.mxu1 %v1841_v41  ;;  %v1716_v43 = vmul.f32 %v14921_v33, %v1080_v36  ;;  %vm1587_vm5 = vcmp.ge.f32.partialorder %v1080_v36, 0.0  ;;  %v15096_v41 = vpop.f32.mrb[32].mxu1 }
 0x13c   : > { %v12269_v47 = vpop.f32.mrb[34].mxu0  ;;  %12486 = vmatmul.mubr.f32.gmra.mrb[94].mxu1 %v1842_v42  ;;  %vm1586_vm4 = vcmp.ge.f32.partialorder %v1075_v40, 0.0  ;;  %v1715_v48 = vmul.f32 %v14921_v33, %v1075_v40  ;;  %v10828_v42 = vld [vmem:[%s18010_s4 + $0xe0] sm:$0xff] }
 0x13d   : > { %v1090_v52 = vadd.f32 %v12269_v47, %v14919_v31  ;;  %v1084_v53 = vpop.f32.mrb[35].mxu0  ;;  %v1844_v57 = vsel %vm1587_vm5, %v1080_v36, %v1716_v43  ;;  %v14264_v36 = vpack.c.bf16 %v10836_v19, %v10835_v18  ;;  %v10829_v43 = vld [vmem:[%s18010_s4 + $0xe8] sm:$0xff] }
 0x13e   : > { %v1085_v54 = vadd.f32 %v14919_v31, %v1084_v53  ;;  %v1843_v55 = vsel %vm1586_vm4, %v1075_v40, %v1715_v48 }
 0x13f   : > { %12488 = vmatprep.mubr.f32.mxu1 %v1843_v55  ;;  %v1718_v60 = vmul.f32 %v14921_v33, %v1090_v52  ;;  %vm1589_vm7 = vcmp.ge.f32.partialorder %v1090_v52, 0.0  ;;  %14265 = vmatprep.subr.bf16.mxu1 %v14264_v36 }
 0x140   : > { %v12272_v63 = vpop.f32.mrb[36].mxu0  ;;  %12489 = vmatmul.mubr.f32.gmra.mrb[96].mxu1 %v1844_v57  ;;  %vm1588_vm6 = vcmp.ge.f32.partialorder %v1085_v54, 0.0  ;;  %v1717_v0 = vmul.f32 %v14921_v33, %v1085_v54 }
 0x141   : > { %v1100_v5 = vadd.f32 %v12272_v63, %v14919_v31  ;;  %v1094_v6 = vpop.f32.mrb[37].mxu0  ;;  %v1846_v12 = vsel %vm1589_vm7, %v1090_v52, %v1718_v60  ;;  %v15105_v52 = vpop.f32.mrb[33].mxu1  ;;  %14267 = vmatpush3.bf16.xpose.msra.mxu1 %v14264_v36  ;;  %v14256_v60 = vpack.c.bf16 %v10829_v43, %v10828_v42 }
 0x142   : > { %v1095_v8 = vadd.f32 %v14919_v31, %v1094_v6  ;;  %v1845_v10 = vsel %vm1588_vm6, %v1085_v54, %v1717_v0 }
 0x143   : > { %12491 = vmatprep.mubr.f32.mxu1 %v1845_v10  ;;  %v1720_v13 = vmul.f32 %v14921_v33, %v1100_v5  ;;  %vm1591_vm9 = vcmp.ge.f32.partialorder %v1100_v5, 0.0  ;;  %14257 = vmatprep.subr.bf16.mxu0 %v14256_v60 }
 0x144   : > { %v12275_v20 = vpop.f32.mrb[38].mxu0  ;;  %12492 = vmatmul.mubr.f32.gmra.mrb[98].mxu1 %v1846_v12  ;;  %vm1590_vm8 = vcmp.ge.f32.partialorder %v1095_v8, 0.0  ;;  %v1719_v23 = vmul.f32 %v14921_v33, %v1095_v8  ;;  %14259 = vmatpush3.bf16.xpose.msra.mxu0 %v14256_v60 }
 0x145   : > { %v1110_v26 = vadd.f32 %v12275_v20, %v14919_v31  ;;  %v1104_v27 = vpop.f32.mrb[39].mxu0  ;;  %v1848_v39 = vsel %vm1591_vm9, %v1100_v5, %v1720_v13  ;;  %v15110_v5 = vpop.f32.mrb[34].mxu1 }
 0x146   : > { %v1105_v29 = vadd.f32 %v14919_v31, %v1104_v27  ;;  %v1847_v30 = vsel %vm1590_vm8, %v1095_v8, %v1719_v23  ;;  %v15113_v10 = vpop.f32.mrb[35].mxu1 }
 0x147   : > { %12494 = vmatprep.mubr.f32.mxu1 %v1847_v30  ;;  %v1722_v40 = vmul.f32 %v14921_v33, %v1110_v26  ;;  %vm1593_vm11 = vcmp.ge.f32.partialorder %v1110_v26, 0.0 }
 0x148   : > { %v12278_v47 = vpop.f32.mrb[40].mxu0  ;;  %12495 = vmatmul.mubr.f32.gmra.mrb[100].mxu1 %v1848_v39  ;;  %vm1592_vm10 = vcmp.ge.f32.partialorder %v1105_v29, 0.0  ;;  %v1721_v48 = vmul.f32 %v14921_v33, %v1105_v29 }
 0x149   : > { %v1120_v53 = vadd.f32 %v12278_v47, %v14919_v31  ;;  %v1114_v54 = vpop.f32.mrb[41].mxu0  ;;  %v1850_v63 = vsel %vm1593_vm11, %v1110_v26, %v1722_v40  ;;  %v15118_v26 = vpop.f32.mrb[36].mxu1 }
 0x14a   : > { %v1115_v55 = vadd.f32 %v14919_v31, %v1114_v54  ;;  %v1849_v57 = vsel %vm1592_vm10, %v1105_v29, %v1721_v48  ;;  %v15121_v30 = vpop.f32.mrb[37].mxu1 }
 0x14b   : > { %12497 = vmatprep.mubr.f32.mxu1 %v1849_v57  ;;  %v1724_v0 = vmul.f32 %v14921_v33, %v1120_v53  ;;  %vm1595_vm13 = vcmp.ge.f32.partialorder %v1120_v53, 0.0  ;;  %v15126_v48 = vpop.f32.mrb[38].mxu1 }
 0x14c   : > { %v12281_v6 = vpop.f32.mrb[42].mxu0  ;;  %12498 = vmatmul.mubr.f32.gmra.mrb[102].mxu1 %v1850_v63  ;;  %vm1594_vm12 = vcmp.ge.f32.partialorder %v1115_v55, 0.0  ;;  %v1723_v8 = vmul.f32 %v14921_v33, %v1115_v55 }
 0x14d   : > { %v1130_v12 = vadd.f32 %v12281_v6, %v14919_v31  ;;  %v1124_v13 = vpop.f32.mrb[43].mxu0  ;;  %v1852_v20 = vsel %vm1595_vm13, %v1120_v53, %v1724_v0 }
 0x14e   : > { %v1125_v18 = vadd.f32 %v14919_v31, %v1124_v13  ;;  %v1851_v19 = vsel %vm1594_vm12, %v1115_v55, %v1723_v8  ;;  %v15129_v55 = vpop.f32.mrb[39].mxu1  ;;  %v10830_v13 = vld [vmem:[%s18010_s4 + $0xf0] sm:$0xff] }
 0x14f   : > { %12500 = vmatprep.mubr.f32.mxu1 %v1851_v19  ;;  %v1726_v23 = vmul.f32 %v14921_v33, %v1130_v12  ;;  %vm1597_vm15 = vcmp.ge.f32.partialorder %v1130_v12, 0.0 }
 0x150   : > { %v12284_v27 = vpop.f32.mrb[44].mxu0  ;;  %12501 = vmatmul.mubr.f32.gmra.mrb[104].mxu1 %v1852_v20  ;;  %vm1596_vm14 = vcmp.ge.f32.partialorder %v1125_v18, 0.0  ;;  %v1725_v29 = vmul.f32 %v14921_v33, %v1125_v18 }
 0x151   : > { %v1140_v36 = vadd.f32 %v12284_v27, %v14919_v31  ;;  %v1134_v39 = vpop.f32.mrb[45].mxu0  ;;  %v1854_v43 = vsel %vm1597_vm15, %v1130_v12, %v1726_v23  ;;  %v15134_v12 = vpop.f32.mrb[40].mxu1 }
 0x152   : > { %v1135_v40 = vadd.f32 %v14919_v31, %v1134_v39  ;;  %v1853_v42 = vsel %vm1596_vm14, %v1125_v18, %v1725_v29  ;;  %v10831_v18 = vld [vmem:[%s18010_s4 + $0xf8] sm:$0xff]  ;;  %v15143_v23 = vpop.f32.mrb[41].mxu1 }
 0x153   : > { %12503 = vmatprep.mubr.f32.mxu1 %v1853_v42  ;;  %v1728_v47 = vmul.f32 %v14921_v33, %v1140_v36  ;;  %vm1599_vm2 = vcmp.ge.f32.partialorder %v1140_v36, 0.0 }
 0x154   : > { %v12287_v53 = vpop.f32.mrb[46].mxu0  ;;  %12504 = vmatmul.mubr.f32.gmra.mrb[106].mxu1 %v1854_v43  ;;  %vm1598_vm0 = vcmp.ge.f32.partialorder %v1135_v40, 0.0  ;;  %v1727_v54 = vmul.f32 %v14921_v33, %v1135_v40 }
 0x155   : > { %v1150_v57 = vadd.f32 %v12287_v53, %v14919_v31  ;;  %v1144_v60 = vpop.f32.mrb[47].mxu0  ;;  %v1856_v6 = vsel %vm1599_vm2, %v1140_v36, %v1728_v47  ;;  %v15148_v47 = vpop.f32.mrb[42].mxu1 }
 0x156   : > { %v1145_v63 = vadd.f32 %v14919_v31, %v1144_v60  ;;  %v1855_v0 = vsel %vm1598_vm0, %v1135_v40, %v1727_v54  ;;  %v14260_v40 = vpack.c.bf16 %v10831_v18, %v10830_v13  ;;  %18017 = vst [vmem:[#allocation5_spill] sm:$0xff] %v15148_v47  ;;  %v15151_v60 = vpop.f32.mrb[43].mxu1 }
 0x157   : > { %12506 = vmatprep.mubr.f32.mxu1 %v1855_v0  ;;  %v1730_v8 = vmul.f32 %v14921_v33, %v1150_v57  ;;  %vm1601_vm4 = vcmp.ge.f32.partialorder %v1150_v57, 0.0  ;;  %v15156_v18 = vpop.f32.mrb[44].mxu1 }
 0x158   : > { %v12290_v19 = vpop.f32.mrb[48].mxu0  ;;  %12507 = vmatmul.mubr.f32.gmra.mrb[108].mxu1 %v1856_v6  ;;  %vm1600_vm3 = vcmp.ge.f32.partialorder %v1145_v63, 0.0  ;;  %v1729_v20 = vmul.f32 %v14921_v33, %v1145_v63  ;;  %14261 = vmatprep.subr.bf16.mxu0 %v14260_v40  ;;  %18018 = vst [vmem:[#allocation6_spill] sm:$0xff] %v15156_v18 }
 0x159   : > { %v1160_v27 = vadd.f32 %v12290_v19, %v14919_v31  ;;  %v1154_v29 = vpop.f32.mrb[49].mxu0  ;;  %v1858_v42 = vsel %vm1601_vm4, %v1150_v57, %v1730_v8  ;;  %14263 = vmatpush3.bf16.xpose.msra.mxu0 %v14260_v40 }
 0x15a   : > { %v1155_v36 = vadd.f32 %v14919_v31, %v1154_v29  ;;  %v1857_v39 = vsel %vm1600_vm3, %v1145_v63, %v1729_v20  ;;  %v15159_v29 = vpop.f32.mrb[45].mxu1 }
 0x15b   : > { %12509 = vmatprep.mubr.f32.mxu1 %v1857_v39  ;;  %v1732_v43 = vmul.f32 %v14921_v33, %v1160_v27  ;;  %vm1603_vm6 = vcmp.ge.f32.partialorder %v1160_v27, 0.0  ;;  %18019 = vst [vmem:[#allocation7_spill] sm:$0xff] %v15159_v29 }
 0x15c   : > { %v12293_v53 = vpop.f32.mrb[50].mxu0  ;;  %12510 = vmatmul.mubr.f32.gmra.mrb[110].mxu1 %v1858_v42  ;;  %vm1602_vm5 = vcmp.ge.f32.partialorder %v1155_v36, 0.0  ;;  %v1731_v54 = vmul.f32 %v14921_v33, %v1155_v36 }
 0x15d   : > { %v1170_v0 = vadd.f32 %v12293_v53, %v14919_v31  ;;  %v1164_v6 = vpop.f32.mrb[51].mxu0  ;;  %v1860_v8 = vsel %vm1603_vm6, %v1160_v27, %v1732_v43  ;;  %v15164_v53 = vpop.f32.mrb[46].mxu1 }
 0x15e   : > { %v1165_v63 = vadd.f32 %v14919_v31, %v1164_v6  ;;  %v1859_v57 = vsel %vm1602_vm5, %v1155_v36, %v1731_v54  ;;  %18020 = vst [vmem:[#allocation8_spill] sm:$0xff] %v15164_v53 }
 0x15f   : > { %12512 = vmatprep.mubr.f32.mxu1 %v1859_v57  ;;  %v1734_v13 = vmul.f32 %v14921_v33, %v1170_v0  ;;  %vm1605_vm8 = vcmp.ge.f32.partialorder %v1170_v0, 0.0  ;;  %v15167_v57 = vpop.f32.mrb[47].mxu1 }
 0x160   : > { %v12296_v19 = vpop.f32.mrb[52].mxu0  ;;  %12513 = vmatmul.mubr.f32.gmra.mrb[112].mxu1 %v1860_v8  ;;  %vm1604_vm7 = vcmp.ge.f32.partialorder %v1165_v63, 0.0  ;;  %v1733_v20 = vmul.f32 %v14921_v33, %v1165_v63  ;;  %18021 = vst [vmem:[#allocation9_spill] sm:$0xff] %v15167_v57  ;;  %v10837_v8 = vld [vmem:[%s18010_s4 + $0x110] sm:$0xff] }
 0x161   : > { %v1180_v39 = vadd.f32 %v12296_v19, %v14919_v31  ;;  %v1174_v40 = vpop.f32.mrb[53].mxu0  ;;  %v1862_v27 = vsel %vm1605_vm8, %v1170_v0, %v1734_v13  ;;  %v10838_v0 = vld [vmem:[%s18010_s4 + $0x118] sm:$0xff] }
 0x162   : > { %v1175_v42 = vadd.f32 %v14919_v31, %v1174_v40  ;;  %v1861_v36 = vsel %vm1604_vm7, %v1165_v63, %v1733_v20  ;;  %v14268_v53 = vpack.c.bf16 %v10838_v0, %v10837_v8 }
 0x163   : > { %12515 = vmatprep.mubr.f32.mxu1 %v1861_v36  ;;  %v1736_v43 = vmul.f32 %v14921_v33, %v1180_v39  ;;  %vm1607_vm10 = vcmp.ge.f32.partialorder %v1180_v39, 0.0 }
 0x164   : > { %v12299_v54 = vpop.f32.mrb[54].mxu0  ;;  %12516 = vmatmul.mubr.f32.gmra.mrb[114].mxu1 %v1862_v27  ;;  %vm1606_vm9 = vcmp.ge.f32.partialorder %v1175_v42, 0.0  ;;  %v1735_v6 = vmul.f32 %v14921_v33, %v1175_v42  ;;  %v15178_v27 = vpop.f32.mrb[48].mxu1  ;;  %14269 = vmatprep.subr.bf16.mxu1 %v14268_v53 }
 0x165   : > { %v1190_v63 = vadd.f32 %v12299_v54, %v14919_v31  ;;  %v1184_v13 = vpop.f32.mrb[55].mxu0  ;;  %v1864_v40 = vsel %vm1607_vm10, %v1180_v39, %v1736_v43  ;;  %v15181_v29 = vpop.f32.mrb[49].mxu1  ;;  %14271 = vmatpush3.bf16.xpose.msra.mxu1 %v14268_v53 }
 0x166   : > { %v1185_v19 = vadd.f32 %v14919_v31, %v1184_v13  ;;  %v1863_v20 = vsel %vm1606_vm9, %v1175_v42, %v1735_v6  ;;  %v15186_v8 = vpop.f32.mrb[50].mxu1 }
 0x167   : > { %12518 = vmatprep.mubr.f32.mxu1 %v1863_v20  ;;  %v1738_v36 = vmul.f32 %v14921_v33, %v1190_v63  ;;  %vm1609_vm12 = vcmp.ge.f32.partialorder %v1190_v63, 0.0  ;;  %18022 = vst [vmem:[#allocation10_spill] sm:$0xff] %v15186_v8  ;;  %v15189_v20 = vpop.f32.mrb[51].mxu1 }
 0x168   : > { %v12302_v57 = vpop.f32.mrb[56].mxu0  ;;  %12519 = vmatmul.mubr.f32.gmra.mrb[116].mxu1 %v1864_v40  ;;  %vm1608_vm11 = vcmp.ge.f32.partialorder %v1185_v19, 0.0  ;;  %v1737_v18 = vmul.f32 %v14921_v33, %v1185_v19 }
 0x169   : > { %v1200_v54 = vadd.f32 %v12302_v57, %v14919_v31  ;;  %v1194_v47 = vpop.f32.mrb[57].mxu0  ;;  %v1866_v43 = vsel %vm1609_vm12, %v1190_v63, %v1738_v36 }
 0x16a   : > { %v1195_v42 = vadd.f32 %v14919_v31, %v1194_v47  ;;  %v1865_v39 = vsel %vm1608_vm11, %v1185_v19, %v1737_v18  ;;  %v15194_v19 = vpop.f32.mrb[52].mxu1 }
 0x16b   : > { %12521 = vmatprep.mubr.f32.mxu1 %v1865_v39  ;;  %v1740_v6 = vmul.f32 %v14921_v33, %v1200_v54  ;;  %vm1611_vm14 = vcmp.ge.f32.partialorder %v1200_v54, 0.0  ;;  %18023 = vst [vmem:[#allocation11_spill] sm:$0xff] %v15194_v19 }
 0x16c   : > { %v12305_v0 = vpop.f32.mrb[58].mxu0  ;;  %12522 = vmatmul.mubr.f32.gmra.mrb[118].mxu1 %v1866_v43  ;;  %vm1610_vm13 = vcmp.ge.f32.partialorder %v1195_v42, 0.0  ;;  %v1739_v13 = vmul.f32 %v14921_v33, %v1195_v42  ;;  %v15197_v43 = vpop.f32.mrb[53].mxu1 }
 0x16d   : > { %v1210_v57 = vadd.f32 %v12305_v0, %v14919_v31  ;;  %v1204_v40 = vpop.f32.mrb[59].mxu0  ;;  %v1868_v53 = vsel %vm1611_vm14, %v1200_v54, %v1740_v6  ;;  %v1235_v54 = vadd.f32 %v14919_v31, %v14947_v4 }
 0x16e   : > { %v1205_v47 = vadd.f32 %v14919_v31, %v1204_v40  ;;  %v1867_v18 = vsel %vm1610_vm13, %v1195_v42, %v1739_v13 }
 0x16f   : > { %12524 = vmatprep.mubr.f32.mxu1 %v1867_v18  ;;  %v1742_v63 = vmul.f32 %v14921_v33, %v1210_v57  ;;  %vm1613_vm0 = vcmp.ge.f32.partialorder %v1210_v57, 0.0  ;;  %v15204_v18 = vpop.f32.mrb[54].mxu1  ;;  %vm1618_vm6 = vcmp.ge.f32.partialorder %v1235_v54, 0.0 }
 0x170   : > { %v12308_v36 = vpop.f32.mrb[60].mxu0  ;;  %12525 = vmatmul.mubr.f32.gmra.mrb[120].mxu1 %v1868_v53  ;;  %vm1612_vm15 = vcmp.ge.f32.partialorder %v1205_v47, 0.0  ;;  %v1741_v39 = vmul.f32 %v14921_v33, %v1205_v47  ;;  %18024 = vst [vmem:[#allocation12_spill] sm:$0xff] %v15204_v18 }
 0x171   : > { %v1220_v0 = vadd.f32 %v12308_v36, %v14919_v31  ;;  %v1214_v8 = vpop.f32.mrb[61].mxu0  ;;  %v1870_v6 = vsel %vm1613_vm0, %v1210_v57, %v1742_v63  ;;  %v15207_v36 = vpop.f32.mrb[55].mxu1  ;;  %v1240_v57 = vadd.f32 %v14944_v1, %v14919_v31 }
 0x172   : > { %v1215_v40 = vadd.f32 %v14919_v31, %v1214_v8  ;;  %v1869_v42 = vsel %vm1612_vm15, %v1205_v47, %v1741_v39  ;;  %18025 = vst [vmem:[#allocation13_spill] sm:$0xff] %v15207_v36  ;;  %v15215_v18 = vpop.f32.mrb[56].mxu1  ;;  %v1245_v36 = vadd.f32 %v14919_v31, %v14955_v14  ;;  %v1250_v14 = vadd.f32 %v14952_v11, %v14919_v31 }
 0x173   : > { %12527 = vmatprep.mubr.f32.mxu1 %v1869_v42  ;;  %v1744_v13 = vmul.f32 %v14921_v33, %v1220_v0  ;;  %vm1615_vm3 = vcmp.ge.f32.partialorder %v1220_v0, 0.0  ;;  %18026 = vst [vmem:[#allocation14_spill] sm:$0xff] %v15215_v18  ;;  %vm1619_vm7 = vcmp.ge.f32.partialorder %v1240_v57, 0.0  ;;  %v1260_v11 = vadd.f32 %v14960_v21, %v14919_v31  ;;  %v15251_v21 = vld [vmem:[%s18009_s3] ss:$0 sm:$0xff] }
 0x174   : > { %v12311_v53 = vpop.f32.mrb[62].mxu0  ;;  %12528 = vmatmul.mubr.f32.gmra.mrb[122].mxu1 %v1870_v6  ;;  %vm1614_vm2 = vcmp.ge.f32.partialorder %v1215_v40, 0.0  ;;  %v1743_v19 = vmul.f32 %v14921_v33, %v1215_v40  ;;  %v1747_v6 = vmul.f32 %v14921_v33, %v1235_v54  ;;  %vm1620_vm8 = vcmp.ge.f32.partialorder %v1245_v36, 0.0 }
 0x175   : > { %v1230_v8 = vadd.f32 %v12311_v53, %v14919_v31  ;;  %v1224_v47 = vpop.f32.mrb[63].mxu0  ;;  %v1872_v63 = vsel %vm1615_vm3, %v1220_v0, %v1744_v13  ;;  %v10839_v0 = vld [vmem:[%s18010_s4 + $0x120] sm:$0xff]  ;;  %vm1621_vm9 = vcmp.ge.f32.partialorder %v1250_v14, 0.0  ;;  %vm1623_vm11 = vcmp.ge.f32.partialorder %v1260_v11, 0.0 }
 0x176   : > { %v1225_v39 = vadd.f32 %v14919_v31, %v1224_v47  ;;  %v1871_v4 = vsel %vm1614_vm2, %v1215_v40, %v1743_v19  ;;  %v15220_v19 = vpop.f32.mrb[57].mxu1  ;;  %v10840_v40 = vld [vmem:[%s18010_s4 + $0x128] sm:$0xff]  ;;  %v1748_v47 = vmul.f32 %v14921_v33, %v1240_v57 }
 0x177   : > { %12530 = vmatprep.mubr.f32.mxu1 %v1871_v4  ;;  %v1746_v42 = vmul.f32 %v14921_v33, %v1230_v8  ;;  %vm1617_vm5 = vcmp.ge.f32.partialorder %v1230_v8, 0.0  ;;  %18027 = vst [vmem:[#allocation15_spill] sm:$0xff] %v15220_v19  ;;  %v15231_v4 = vpop.f32.mrb[58].mxu1  ;;  %v14272_v19 = vpack.c.bf16 %v10840_v40, %v10839_v0 }
 0x178   : > { %12531 = vmatmul.mubr.f32.gmra.mrb[124].mxu1 %v1872_v63  ;;  %vm1616_vm4 = vcmp.ge.f32.partialorder %v1225_v39, 0.0  ;;  %v1745_v53 = vmul.f32 %v14921_v33, %v1225_v39  ;;  %v1875_v63 = vsel %vm1618_vm6, %v1235_v54, %v1747_v6  ;;  %v15236_v18 = vpop.f32.mrb[59].mxu1 }
 0x179   : > { %v1874_v13 = vsel %vm1617_vm5, %v1230_v8, %v1746_v42  ;;  %v1876_v8 = vsel %vm1619_vm7, %v1240_v57, %v1748_v47  ;;  %v1750_v42 = vmul.f32 %v14921_v33, %v1250_v14  ;;  %14273 = vmatprep.subr.bf16.mxu1 %v14272_v19  ;;  %v1270_v57 = vadd.f32 %v15251_v21, %v14968_v32 }
 0x17a   : > { %v1873_v1 = vsel %vm1616_vm4, %v1225_v39, %v1745_v53  ;;  %v1255_v39 = vadd.f32 %v14919_v31, %v14963_v24  ;;  %v1749_v53 = vmul.f32 %v14921_v33, %v1245_v36  ;;  %v1265_v24 = vadd.f32 %v14919_v31, %v14977_v38  ;;  %14275 = vmatpush3.bf16.xpose.msra.mxu1 %v14272_v19 }
 0x17b   : > { %12533 = vmatprep.mubr.f32.mxu1 %v1873_v1  ;;  %v15241_v1 = vpop.f32.mrb[60].mxu1  ;;  %v1878_v0 = vsel %vm1621_vm9, %v1250_v14, %v1750_v42  ;;  %v1752_v31 = vmul.f32 %v14921_v33, %v1260_v11  ;;  %v1280_v32 = vadd.f32 %v15251_v21, %v14982_v46  ;;  %vm1625_vm13 = vcmp.ge.f32.partialorder %v1270_v57, 0.0 }
 0x17c   : > { %12534 = vmatmul.mubr.f32.gmra.mrb[126].mxu1 %v1874_v13  ;;  %v1877_v54 = vsel %vm1620_vm8, %v1245_v36, %v1749_v53  ;;  %v1751_v6 = vmul.f32 %v14921_v33, %v1255_v39  ;;  %v15246_v13 = vpop.f32.mrb[61].mxu1  ;;  %vm1622_vm10 = vcmp.ge.f32.partialorder %v1255_v39, 0.0  ;;  %v1275_v36 = vadd.f32 %v15251_v21, %v14985_v49 }
 0x17d   : > { %12536 = vmatprep.mubr.f32.mxu1 %v1875_v63  ;;  %v15256_v38 = vpop.f32.mrb[62].mxu1  ;;  %v1753_v19 = vmul.f32 %v14921_v33, %v1265_v24  ;;  %vm1624_vm12 = vcmp.ge.f32.partialorder %v1265_v24, 0.0  ;;  %v1880_v14 = vsel %vm1623_vm11, %v1260_v11, %v1752_v31  ;;  %v1754_v63 = vmul.f32 %v14921_v33, %v1270_v57 }
 0x17e   : > { %v1879_v40 = vsel %vm1622_vm10, %v1255_v39, %v1751_v6  ;;  %v15261_v47 = vpop.f32.mrb[63].mxu1  ;;  %v1285_v53 = vadd.f32 %v15251_v21, %v14993_v59  ;;  %v1755_v39 = vmul.f32 %v14921_v33, %v1275_v36  ;;  %vm1626_vm14 = vcmp.ge.f32.partialorder %v1275_v36, 0.0 }
 0x17f   : > { %v1881_v49 = vsel %vm1624_vm12, %v1265_v24, %v1753_v19  ;;  %v1882_v42 = vsel %vm1625_vm13, %v1270_v57, %v1754_v63  ;;  %v1295_v46 = vadd.f32 %v15251_v21, %v15001_v7  ;;  %vm1627_vm15 = vcmp.ge.f32.partialorder %v1280_v32, 0.0 }
 0x180   : > { %12537 = vmatmul.mubr.f32.gmra.mrb[128].mxu1 %v1876_v8  ;;  %v1290_v8 = vadd.f32 %v15251_v21, %v14990_v56  ;;  %v1883_v11 = vsel %vm1626_vm14, %v1275_v36, %v1755_v39  ;;  %v1757_v59 = vmul.f32 %v14921_v33, %v1285_v53  ;;  %vm1628_vm0 = vcmp.ge.f32.partialorder %v1285_v53, 0.0 }
 0x181   : > { %12539 = vmatprep.mubr.f32.mxu1 %v1877_v54  ;;  %v1756_v54 = vmul.f32 %v14921_v33, %v1280_v32  ;;  %v1300_v24 = vadd.f32 %v15251_v21, %v14998_v3  ;;  %v1305_v56 = vadd.f32 %v15251_v21, %v15015_v22  ;;  %v1759_v7 = vmul.f32 %v14921_v33, %v1295_v46 }
 0x182   : > { %v1885_v57 = vsel %vm1628_vm0, %v1285_v53, %v1757_v59  ;;  %vm1629_vm2 = vcmp.ge.f32.partialorder %v1290_v8, 0.0  ;;  %vm1630_vm3 = vcmp.ge.f32.partialorder %v1295_v46, 0.0  ;;  %v1310_v31 = vadd.f32 %v15251_v21, %v15006_v16  ;;  %v10842_v16 = vld [vmem:[%s18010_s4 + $0x138] sm:$0xff] }
 0x183   : > { %v1884_v6 = vsel %vm1627_vm15, %v1280_v32, %v1756_v54  ;;  %v1315_v3 = vadd.f32 %v15251_v21, %v15023_v37  ;;  %v1887_v19 = vsel %vm1630_vm3, %v1295_v46, %v1759_v7  ;;  %vm1631_vm4 = vcmp.ge.f32.partialorder %v1300_v24, 0.0  ;;  %v10841_v32 = vld [vmem:[%s18010_s4 + $0x130] sm:$0xff] }
 0x184   : > { %12540 = vmatmul.mubr.f32.gmra.mrb[130].mxu1 %v1878_v0  ;;  %v1758_v0 = vmul.f32 %v14921_v33, %v1290_v8  ;;  %v1761_v22 = vmul.f32 %v14921_v33, %v1305_v56  ;;  %vm1632_vm5 = vcmp.ge.f32.partialorder %v1305_v56, 0.0  ;;  %v1320_v63 = vadd.f32 %v15251_v21, %v15020_v34 }
 0x185   : > { %12542 = vmatprep.mubr.f32.mxu1 %v1879_v40  ;;  %v1760_v40 = vmul.f32 %v14921_v33, %v1300_v24  ;;  %v1762_v53 = vmul.f32 %v14921_v33, %v1310_v31  ;;  %vm1633_vm6 = vcmp.ge.f32.partialorder %v1310_v31, 0.0  ;;  %vm1634_vm7 = vcmp.ge.f32.partialorder %v1315_v3, 0.0 }
 0x186   : > { %v1886_v36 = vsel %vm1629_vm2, %v1290_v8, %v1758_v0  ;;  %v1889_v39 = vsel %vm1632_vm5, %v1305_v56, %v1761_v22  ;;  %v1763_v8 = vmul.f32 %v14921_v33, %v1315_v3  ;;  %v1764_v34 = vmul.f32 %v14921_v33, %v1320_v63 }
 0x187   : > { %v1888_v37 = vsel %vm1631_vm4, %v1300_v24, %v1760_v40  ;;  %v1890_v54 = vsel %vm1633_vm6, %v1310_v31, %v1762_v53  ;;  %v1335_v46 = vadd.f32 %v15251_v21, %v15039_v62  ;;  %vm1635_vm8 = vcmp.ge.f32.partialorder %v1320_v63, 0.0 }
 0x188   : > { %12543 = vmatmul.mubr.f32.gmra.mrb[132].mxu1 %v1880_v14  ;;  %v14276_v14 = vpack.c.bf16 %v10842_v16, %v10841_v32  ;;  %v1340_v59 = vadd.f32 %v15251_v21, %v15036_v58  ;;  %v1892_v24 = vsel %vm1635_vm8, %v1320_v63, %v1764_v34  ;;  %v1350_v56 = vadd.f32 %v15251_v21, %v15044_v9  ;;  %v10843_v34 = vld [vmem:[%s18010_s4 + $0x140] sm:$0xff] }
 0x189   : > { %12545 = vmatprep.mubr.f32.mxu1 %v1881_v49  ;;  %v1325_v49 = vadd.f32 %v15251_v21, %v15031_v50  ;;  %v1891_v50 = vsel %vm1634_vm7, %v1315_v3, %v1763_v8  ;;  %v1767_v62 = vmul.f32 %v14921_v33, %v1335_v46  ;;  %vm1638_vm11 = vcmp.ge.f32.partialorder %v1335_v46, 0.0 }
 0x18a   : > { %14277 = vmatprep.subr.bf16.mxu1 %v14276_v14  ;;  %v1768_v7 = vmul.f32 %v14921_v33, %v1340_v59  ;;  %v1355_v58 = vadd.f32 %v15251_v21, %v15061_v35  ;;  %vm1639_vm12 = vcmp.ge.f32.partialorder %v1340_v59, 0.0  ;;  %v1770_v3 = vmul.f32 %v14921_v33, %v1350_v56 }
 0x18b   : > { %14279 = vmatpush3.bf16.xpose.msra.mxu1 %v14276_v14  ;;  %vm1636_vm9 = vcmp.ge.f32.partialorder %v1325_v49, 0.0  ;;  %v1895_v31 = vsel %vm1638_vm11, %v1335_v46, %v1767_v62  ;;  %v1365_v9 = vadd.f32 %v15251_v21, %v15069_v51  ;;  %vm1641_vm14 = vcmp.ge.f32.partialorder %v1350_v56, 0.0 }
 0x18c   : > { %12546 = vmatmul.mubr.f32.gmra.mrb[134].mxu1 %v1882_v42  ;;  %v1330_v42 = vadd.f32 %v15251_v21, %v15028_v45  ;;  %v1345_v45 = vadd.f32 %v15251_v21, %v15053_v17  ;;  %v1896_v40 = vsel %vm1639_vm12, %v1340_v59, %v1768_v7  ;;  %v1771_v35 = vmul.f32 %v14921_v33, %v1355_v58 }
 0x18d   : > { %12548 = vmatprep.mubr.f32.mxu1 %v1883_v11  ;;  %v1765_v11 = vmul.f32 %v14921_v33, %v1325_v49  ;;  %vm1642_vm15 = vcmp.ge.f32.partialorder %v1355_v58, 0.0  ;;  %v1370_v22 = vadd.f32 %v15251_v21, %v15066_v44  ;;  %v1898_v32 = vsel %vm1641_vm14, %v1350_v56, %v1770_v3 }
 0x18e   : > { %vm1637_vm10 = vcmp.ge.f32.partialorder %v1330_v42, 0.0  ;;  %v1769_v17 = vmul.f32 %v14921_v33, %v1345_v45  ;;  %vm1640_vm13 = vcmp.ge.f32.partialorder %v1345_v45, 0.0  ;;  %v1899_v14 = vsel %vm1642_vm15, %v1355_v58, %v1771_v35 }
 0x18f   : > { %v1893_v0 = vsel %vm1636_vm9, %v1325_v49, %v1765_v11  ;;  %v1773_v51 = vmul.f32 %v14921_v33, %v1365_v9  ;;  %vm1644_vm2 = vcmp.ge.f32.partialorder %v1365_v9, 0.0  ;;  %v1380_v63 = vadd.f32 %v15251_v21, %v15074_v61 }
 0x190   : > { %12549 = vmatmul.mubr.f32.gmra.mrb[136].mxu1 %v1884_v6  ;;  %v1766_v6 = vmul.f32 %v14921_v33, %v1330_v42  ;;  %v1774_v53 = vmul.f32 %v14921_v33, %v1370_v22  ;;  %v1385_v44 = vadd.f32 %v15251_v21, %v15091_v25  ;;  %vm1645_vm3 = vcmp.ge.f32.partialorder %v1370_v22, 0.0 }
 0x191   : > { %12551 = vmatprep.mubr.f32.mxu1 %v1885_v57  ;;  %v1901_v49 = vsel %vm1644_vm2, %v1365_v9, %v1773_v51  ;;  %v1395_v61 = vadd.f32 %v15251_v21, %v15105_v52  ;;  %vm1647_vm5 = vcmp.ge.f32.partialorder %v1380_v63, 0.0  ;;  %v1405_v59 = vadd.f32 %v15251_v21, %v15113_v10 }
 0x192   : > { %v1894_v57 = vsel %vm1637_vm10, %v1330_v42, %v1766_v6  ;;  %v1902_v8 = vsel %vm1645_vm3, %v1370_v22, %v1774_v53  ;;  %v1776_v42 = vmul.f32 %v14921_v33, %v1380_v63  ;;  %v1777_v25 = vmul.f32 %v14921_v33, %v1385_v44 }
 0x193   : > { %vm1648_vm6 = vcmp.ge.f32.partialorder %v1385_v44, 0.0  ;;  %v1779_v6 = vmul.f32 %v14921_v33, %v1395_v61  ;;  %vm1650_vm8 = vcmp.ge.f32.partialorder %v1395_v61, 0.0  ;;  %v1415_v62 = vadd.f32 %v15251_v21, %v15121_v30 }
 0x194   : > { %12552 = vmatmul.mubr.f32.gmra.mrb[138].mxu1 %v1886_v36  ;;  %v1360_v36 = vadd.f32 %v15251_v21, %v15058_v28  ;;  %v1375_v28 = vadd.f32 %v15251_v21, %v15077_v2  ;;  %v1904_v52 = vsel %vm1647_vm5, %v1380_v63, %v1776_v42  ;;  %v1781_v56 = vmul.f32 %v14921_v33, %v1405_v59 }
 0x195   : > { %12554 = vmatprep.mubr.f32.mxu1 %v1887_v19  ;;  %v1897_v19 = vsel %vm1640_vm13, %v1345_v45, %v1769_v17  ;;  %v1410_v45 = vadd.f32 %v15251_v21, %v15110_v5  ;;  %v1907_v10 = vsel %vm1650_vm8, %v1395_v61, %v1779_v6  ;;  %vm1652_vm10 = vcmp.ge.f32.partialorder %v1405_v59, 0.0  ;;  %v15392_v61 = vld [vmem:[%s18011_s5] ss:$0 sm:$0xff] }
 0x196   : > { %v1772_v16 = vmul.f32 %v14921_v33, %v1360_v36  ;;  %vm1643_vm0 = vcmp.ge.f32.partialorder %v1360_v36, 0.0  ;;  %v1775_v2 = vmul.f32 %v14921_v33, %v1375_v28  ;;  %vm1646_vm4 = vcmp.ge.f32.partialorder %v1375_v28, 0.0 }
 0x197   : > { %v1782_v58 = vmul.f32 %v14921_v33, %v1410_v45  ;;  %v1425_v5 = vadd.f32 %v15251_v21, %v15129_v55  ;;  %vm1653_vm11 = vcmp.ge.f32.partialorder %v1410_v45, 0.0  ;;  %v1783_v30 = vmul.f32 %v14921_v33, %v1415_v62 }
 0x198   : > { %12555 = vmatmul.mubr.f32.gmra.mrb[140].mxu1 %v1888_v37  ;;  %v1900_v37 = vsel %vm1643_vm0, %v1360_v36, %v1772_v16  ;;  %vm1654_vm12 = vcmp.ge.f32.partialorder %v1415_v62, 0.0  ;;  %v1430_v17 = vadd.f32 %v15251_v21, %v15126_v48  ;;  %v1440_v9 = vadd.f32 %v15251_v21, %v15134_v12  ;;  %v18029_v12 = vld [vmem:[#allocation7_spill] sm:$0xff] }
 0x199   : > { %12557 = vmatprep.mubr.f32.mxu1 %v1889_v39  ;;  %v1390_v39 = vadd.f32 %v15251_v21, %v15082_v15  ;;  %v10844_v15 = vld [vmem:[%s18010_s4 + $0x148] sm:$0xff]  ;;  %v1910_v36 = vsel %vm1653_vm11, %v1410_v45, %v1782_v58  ;;  %v1911_v3 = vsel %vm1654_vm12, %v1415_v62, %v1783_v30  ;;  %v1785_v55 = vmul.f32 %v14921_v33, %v1425_v5 }
 0x19a   : > { %v14280_v46 = vpack.c.bf16 %v10844_v15, %v10843_v34  ;;  %vm1656_vm14 = vcmp.ge.f32.partialorder %v1425_v5, 0.0  ;;  %v1786_v35 = vmul.f32 %v14921_v33, %v1430_v17  ;;  %v1445_v48 = vadd.f32 %v15251_v21, %v15151_v60 }
 0x19b   : > { %v1778_v11 = vmul.f32 %v14921_v33, %v1390_v39  ;;  %vm1649_vm7 = vcmp.ge.f32.partialorder %v1390_v39, 0.0  ;;  %v1913_v22 = vsel %vm1656_vm14, %v1425_v5, %v1785_v55  ;;  %vm1657_vm15 = vcmp.ge.f32.partialorder %v1430_v17, 0.0 }
 0x19c   : > { %12558 = vmatmul.mubr.f32.gmra.mrb[142].mxu1 %v1890_v54  ;;  %v1903_v54 = vsel %vm1646_vm4, %v1375_v28, %v1775_v2  ;;  %14281 = vmatprep.subr.bf16.mxu1 %v14280_v46  ;;  %v1914_v28 = vsel %vm1657_vm15, %v1430_v17, %v1786_v35  ;;  %v1455_v51 = vadd.f32 %v15251_v21, %v18029_v12  ;;  %vm1659_vm2 = vcmp.ge.f32.partialorder %v1440_v9, 0.0  ;;  %v18031_v2 = vld [vmem:[#allocation9_spill] sm:$0xff] }
 0x19d   : > { %12560 = vmatprep.mubr.f32.mxu1 %v1891_v50  ;;  %v1400_v50 = vadd.f32 %v15251_v21, %v15096_v41  ;;  %14283 = vmatpush3.bf16.xpose.msra.mxu1 %v14280_v46  ;;  %v1789_v60 = vmul.f32 %v14921_v33, %v1445_v48  ;;  %vm1660_vm3 = vcmp.ge.f32.partialorder %v1445_v48, 0.0  ;;  %v15397_v46 = vstv %s10815_s14 }
 0x19e   : > { %v1791_v42 = vmul.f32 %v14921_v33, %v1455_v51  ;;  %vm1662_vm5 = vcmp.ge.f32.partialorder %v1455_v51, 0.0  ;;  %v1480_v45 = vadd.f32 %v15251_v21, %v15178_v27  ;;  %v1485_v62 = vadd.f32 %v15251_v21, %v15189_v20  ;;  %v18033_v20 = vld [vmem:[#allocation10_spill] sm:$0xff] }
 0x19f   : > { %v1780_v41 = vmul.f32 %v14921_v33, %v1400_v50  ;;  %vm1651_vm9 = vcmp.ge.f32.partialorder %v1400_v50, 0.0 }
 0x1a0   : > { %12561 = vmatmul.mubr.f32.gmra.mrb[144].mxu1 %v1892_v24  ;;  %v1905_v24 = vsel %vm1648_vm6, %v1385_v44, %v1777_v25  ;;  %v18032_v25 = vld [vmem:[#allocation8_spill] sm:$0xff]  ;;  %vm1667_vm12 = vcmp.ge.f32.partialorder %v1480_v45, 0.0  ;;  %vm1668_vm15 = vcmp.ge.f32.partialorder %v1485_v62, 0.0 }
 0x1a1   : > { %12563 = vmatprep.mubr.f32.mxu1 %v1893_v0  ;;  %v1906_v0 = vsel %vm1649_vm7, %v1390_v39, %v1778_v11  ;;  %v1908_v7 = vsel %vm1651_vm9, %v1400_v50, %v1780_v41  ;;  %v1465_v39 = vadd.f32 %v15251_v21, %v18031_v2  ;;  %v1470_v34 = vadd.f32 %v15251_v21, %v18032_v25  ;;  %v10845_v41 = vld [vmem:[%s18010_s4 + $0x150] sm:$0xff]  ;;  %v18035_v2 = vld [vmem:[#allocation13_spill] sm:$0xff] }
 0x1a3   : > { %v1793_v6 = vmul.f32 %v14921_v33, %v1465_v39  ;;  %vm1664_vm7 = vcmp.ge.f32.partialorder %v1465_v39, 0.0  ;;  %v1794_v58 = vmul.f32 %v14921_v33, %v1470_v34 }
 0x1a4   : > { %12564 = vmatmul.mubr.f32.gmra.mrb[146].mxu1 %v1894_v57  ;;  %v1420_v57 = vadd.f32 %v15251_v21, %v15118_v26  ;;  %v1435_v26 = vadd.f32 %v15251_v21, %v15143_v23 }
 0x1a5   : > { %12566 = vmatprep.mubr.f32.mxu1 %v1895_v31  ;;  %v1909_v31 = vsel %vm1652_vm10, %v1405_v59, %v1781_v56  ;;  %v1921_v30 = vsel %vm1664_vm7, %v1465_v39, %v1793_v6  ;;  %vm1665_vm10 = vcmp.ge.f32.partialorder %v1470_v34, 0.0  ;;  %v1505_v39 = vadd.f32 %v15251_v21, %v18035_v2 }
 0x1a6   : > { %vm1655_vm13 = vcmp.ge.f32.partialorder %v1420_v57, 0.0  ;;  %v1787_v23 = vmul.f32 %v14921_v33, %v1435_v26  ;;  %vm1658_vm0 = vcmp.ge.f32.partialorder %v1435_v26, 0.0  ;;  %v1922_v35 = vsel %vm1665_vm10, %v1470_v34, %v1794_v58  ;;  %v18036_v34 = vld [vmem:[#allocation12_spill] sm:$0xff] }
 0x1a8   : > { %12567 = vmatmul.mubr.f32.gmra.mrb[148].mxu1 %v1896_v40  ;;  %v1784_v40 = vmul.f32 %v14921_v33, %v1420_v57  ;;  %v1915_v63 = vsel %vm1658_vm0, %v1435_v26, %v1787_v23 }
 0x1a9   : > { %12569 = vmatprep.mubr.f32.mxu1 %v1897_v19 }
 0x1aa   : > { %v1912_v19 = vsel %vm1655_vm13, %v1420_v57, %v1784_v40 }
 0x1ac   : > { %12570 = vmatmul.mubr.f32.gmra.mrb[150].mxu1 %v1898_v32  ;;  %v18028_v32 = vld [vmem:[#allocation5_spill] sm:$0xff] }
 0x1ad   : > { %12572 = vmatprep.mubr.f32.mxu1 %v1899_v14  ;;  %v1450_v16 = vadd.f32 %v15251_v21, %v18028_v32  ;;  %v1788_v14 = vmul.f32 %v14921_v33, %v1440_v9 }
 0x1af   : > { %v1916_v44 = vsel %vm1659_vm2, %v1440_v9, %v1788_v14  ;;  %vm1661_vm4 = vcmp.ge.f32.partialorder %v1450_v16, 0.0  ;;  %v1796_v9 = vmul.f32 %v14921_v33, %v1480_v45  ;;  %v18034_v14 = vld [vmem:[#allocation11_spill] sm:$0xff] }
 0x1b0   : > { %12573 = vmatmul.mubr.f32.gmra.mrb[152].mxu1 %v1900_v37  ;;  %v18030_v37 = vld [vmem:[#allocation6_spill] sm:$0xff]  ;;  %v1500_v12 = vadd.f32 %v15251_v21, %v18034_v14 }
 0x1b1   : > { %12575 = vmatprep.mubr.f32.mxu1 %v1901_v49  ;;  %v1460_v53 = vadd.f32 %v15251_v21, %v18030_v37  ;;  %v1790_v49 = vmul.f32 %v14921_v33, %v1450_v16 }
 0x1b3   : > { %v1918_v50 = vsel %vm1661_vm4, %v1450_v16, %v1790_v49  ;;  %vm1663_vm6 = vcmp.ge.f32.partialorder %v1460_v53, 0.0 }
 0x1b4   : > { %12576 = vmatmul.mubr.f32.gmra.mrb[154].mxu1 %v1902_v8  ;;  %v1917_v8 = vsel %vm1660_vm3, %v1445_v48, %v1789_v60 }
 0x1b5   : > { %12578 = vmatprep.mubr.f32.mxu1 %v1903_v54  ;;  %v1792_v54 = vmul.f32 %v14921_v33, %v1460_v53 }
 0x1b7   : > { %v1920_v56 = vsel %vm1663_vm6, %v1460_v53, %v1792_v54 }
 0x1b8   : > { %12579 = vmatmul.mubr.f32.gmra.mrb[156].mxu1 %v1904_v52  ;;  %v1475_v52 = vadd.f32 %v15251_v21, %v15181_v29  ;;  %v10846_v29 = vld [vmem:[%s18010_s4 + $0x158] sm:$0xff] }
 0x1b9   : > { %12581 = vmatprep.mubr.f32.mxu1 %v1905_v24  ;;  %v1919_v24 = vsel %vm1662_vm5, %v1455_v51, %v1791_v42  ;;  %v14284_v57 = vpack.c.bf16 %v10846_v29, %v10845_v41  ;;  %vm1671_vm5 = vcmp.ge.f32.partialorder %v1500_v12, 0.0  ;;  %v18037_v41 = vld [vmem:[#allocation15_spill] sm:$0xff] }
 0x1ba   : > { %v1795_v17 = vmul.f32 %v14921_v33, %v1475_v52  ;;  %vm1666_vm11 = vcmp.ge.f32.partialorder %v1475_v52, 0.0  ;;  %v1515_v29 = vadd.f32 %v15251_v21, %v18037_v41 }
 0x1bb   : > { %14285 = vmatprep.subr.bf16.mxu1 %v14284_v57 }
 0x1bc   : > { %12582 = vmatmul.mubr.f32.gmra.mrb[158].mxu1 %v1906_v0  ;;  %v1923_v16 = vsel %vm1666_vm11, %v1475_v52, %v1795_v17 }
 0x1bd   : > { %12584 = vmatprep.mubr.f32.mxu1 %v1907_v10  ;;  %14287 = vmatpush3.bf16.xpose.msra.mxu1 %v14284_v57  ;;  %v1801_v57 = vmul.f32 %v14921_v33, %v1505_v39 }
 0x1c0   : > { %12585 = vmatmul.mubr.f32.gmra.mrb[160].mxu1 %v1908_v7 }
 0x1c1   : > { %12587 = vmatprep.mubr.f32.mxu1 %v1909_v31 }
 0x1c4   : > { %12588 = vmatmul.mubr.f32.gmra.mrb[162].mxu1 %v1910_v36  ;;  %v1490_v36 = vadd.f32 %v15251_v21, %v18033_v20 }
 0x1c5   : > { %12590 = vmatprep.mubr.f32.mxu1 %v1911_v3 }
 0x1c6   : > { %vm1669_vm0 = vcmp.ge.f32.partialorder %v1490_v36, 0.0  ;;  %v1798_v49 = vmul.f32 %v14921_v33, %v1490_v36 }
 0x1c8   : > { %12591 = vmatmul.mubr.f32.gmra.mrb[164].mxu1 %v1912_v19 }
 0x1c9   : > { %12593 = vmatprep.mubr.f32.mxu1 %v1913_v22  ;;  %v1495_v22 = vadd.f32 %v15251_v21, %v15197_v43  ;;  %v1924_v43 = vsel %vm1667_vm12, %v1480_v45, %v1796_v9  ;;  %v1926_v45 = vsel %vm1669_vm0, %v1490_v36, %v1798_v49  ;;  %vm1674_vm12 = vcmp.ge.f32.partialorder %v1515_v29, 0.0 }
 0x1cb   : > { %v1799_v25 = vmul.f32 %v14921_v33, %v1495_v22  ;;  %vm1670_vm4 = vcmp.ge.f32.partialorder %v1495_v22, 0.0 }
 0x1cc   : > { %12594 = vmatmul.mubr.f32.gmra.mrb[166].mxu1 %v1914_v28  ;;  %v1797_v28 = vmul.f32 %v14921_v33, %v1485_v62 }
 0x1cd   : > { %12596 = vmatprep.mubr.f32.mxu1 %v1915_v63 }
 0x1ce   : > { %v1925_v54 = vsel %vm1668_vm15, %v1485_v62, %v1797_v28 }
 0x1d0   : > { %12597 = vmatmul.mubr.f32.gmra.mrb[168].mxu1 %v1916_v44 }
 0x1d1   : > { %12599 = vmatprep.mubr.f32.mxu1 %v1917_v8 }
 0x1d3   : > { %v12442_v15 = vpop.f32.mrb[64].mxu1 }
 0x1d4   : > { %v2034_v11 = vadd.f32 %v12442_v15, %v15392_v61  ;;  %v2028_v59 = vpop.f32.mrb[65].mxu1  ;;  %12600 = vmatmul.mubr.f32.gmra.mrb[170].mxu1 %v1918_v50  ;;  %v1510_v15 = vadd.f32 %v15251_v21, %v18036_v34 }
 0x1d5   : > { %v2029_v0 = vadd.f32 %v15392_v61, %v2028_v59  ;;  %12602 = vmatprep.mubr.f32.mxu1 %v1919_v24  ;;  %v1800_v24 = vmul.f32 %v14921_v33, %v1500_v12 }
 0x1d6   : > { %v2798_v10 = vmul.f32 %v15397_v46, %v2034_v11  ;;  %vm2669_vm9 = vcmp.ge.f32.partialorder %v2034_v11, 0.0 }
 0x1d7   : > { %v12445_v27 = vpop.f32.mrb[66].mxu1  ;;  %vm2668_vm8 = vcmp.ge.f32.partialorder %v2029_v0, 0.0  ;;  %v2797_v7 = vmul.f32 %v15397_v46, %v2029_v0 }
 0x1d8   : > { %v2044_v5 = vadd.f32 %v12445_v27, %v15392_v61  ;;  %v2038_v31 = vpop.f32.mrb[67].mxu1  ;;  %12603 = vmatmul.mubr.f32.gmra.mrb[172].mxu1 %v1920_v56  ;;  %v2926_v3 = vsel %vm2669_vm9, %v2034_v11, %v2798_v10  ;;  %v1927_v56 = vsel %vm1670_vm4, %v1495_v22, %v1799_v25  ;;  %v18038_v27 = vld [vmem:[#allocation14_spill] sm:$0xff]  ;;  %vm1673_vm9 = vcmp.ge.f32.partialorder %v1510_v15, 0.0 }
 0x1d9   : > { %v2039_v40 = vadd.f32 %v15392_v61, %v2038_v31  ;;  %12605 = vmatprep.mubr.f32.mxu1 %v1921_v30  ;;  %v2925_v26 = vsel %vm2668_vm8, %v2029_v0, %v2797_v7  ;;  %v1520_v7 = vadd.f32 %v15251_v21, %v18038_v27  ;;  %vm1672_vm8 = vcmp.ge.f32.partialorder %v1505_v39, 0.0 }
 0x1da   : > { %12664 = vmatprep.mubr.f32.mxu0 %v2925_v26  ;;  %v2800_v55 = vmul.f32 %v15397_v46, %v2044_v5  ;;  %vm2671_vm14 = vcmp.ge.f32.partialorder %v2044_v5, 0.0  ;;  %v1928_v30 = vsel %vm1671_vm5, %v1500_v12, %v1800_v24  ;;  %v1525_v26 = vadd.f32 %v15251_v21, %v15236_v18 }
 0x1db   : > { %v12448_v19 = vpop.f32.mrb[68].mxu1  ;;  %12665 = vmatmul.mubr.f32.vlgmr.msra.gmra.mrb[64].mxu0 %v2926_v3  ;;  %vm2670_vm13 = vcmp.ge.f32.partialorder %v2039_v40, 0.0  ;;  %v2799_v48 = vmul.f32 %v15397_v46, %v2039_v40  ;;  %v1929_v9 = vsel %vm1672_vm8, %v1505_v39, %v1801_v57  ;;  %v1550_v24 = vadd.f32 %v15251_v21, %v15256_v38  ;;  %v10848_v38 = vld [vmem:[%s18010_s4 + $0x168] sm:$0xff] }
 0x1dc   : > { %v2054_v23 = vadd.f32 %v12448_v19, %v15392_v61  ;;  %v2048_v32 = vpop.f32.mrb[69].mxu1  ;;  %12606 = vmatmul.mubr.f32.gmra.mrb[174].mxu1 %v1922_v35  ;;  %v2928_v60 = vsel %vm2671_vm14, %v2044_v5, %v2800_v55  ;;  %v1803_v19 = vmul.f32 %v14921_v33, %v1515_v29  ;;  %v1530_v35 = vadd.f32 %v15251_v21, %v15231_v4 }
 0x1dd   : > { %v2049_v51 = vadd.f32 %v15392_v61, %v2048_v32  ;;  %12608 = vmatprep.mubr.f32.mxu1 %v1923_v16  ;;  %v2927_v63 = vsel %vm2670_vm13, %v2039_v40, %v2799_v48  ;;  %v1802_v40 = vmul.f32 %v14921_v33, %v1510_v15  ;;  %vm1675_vm13 = vcmp.ge.f32.partialorder %v1520_v7, 0.0 }
 0x1de   : > { %12667 = vmatprep.mubr.f32.mxu0 %v2927_v63  ;;  %v2802_v37 = vmul.f32 %v15397_v46, %v2054_v23  ;;  %vm2673_vm3 = vcmp.ge.f32.partialorder %v2054_v23, 0.0  ;;  %v1804_v32 = vmul.f32 %v14921_v33, %v1520_v7  ;;  %v1535_v4 = vadd.f32 %v15251_v21, %v15246_v13 }
 0x1df   : > { %v12451_v53 = vpop.f32.mrb[70].mxu1  ;;  %12668 = vmatmul.mubr.f32.gmra.mrb[66].mxu0 %v2928_v60  ;;  %vm2672_vm2 = vcmp.ge.f32.partialorder %v2049_v51, 0.0  ;;  %v2801_v44 = vmul.f32 %v15397_v46, %v2049_v51  ;;  %v1930_v28 = vsel %vm1673_vm9, %v1510_v15, %v1802_v40  ;;  %v1931_v63 = vsel %vm1674_vm12, %v1515_v29, %v1803_v19 }
 0x1e0   : > { %v2064_v8 = vadd.f32 %v12451_v53, %v15392_v61  ;;  %v2058_v42 = vpop.f32.mrb[71].mxu1  ;;  %12609 = vmatmul.mubr.f32.gmra.mrb[176].mxu1 %v1924_v43  ;;  %v2930_v11 = vsel %vm2673_vm3, %v2054_v23, %v2802_v37  ;;  %v1805_v60 = vmul.f32 %v14921_v33, %v1525_v26  ;;  %vm1676_vm0 = vcmp.ge.f32.partialorder %v1525_v26, 0.0 }
 0x1e1   : > { %v2059_v50 = vadd.f32 %v15392_v61, %v2058_v42  ;;  %12611 = vmatprep.mubr.f32.mxu1 %v1925_v54  ;;  %v2929_v52 = vsel %vm2672_vm2, %v2049_v51, %v2801_v44  ;;  %v1806_v53 = vmul.f32 %v14921_v33, %v1530_v35  ;;  %v1540_v44 = vadd.f32 %v15251_v21, %v15241_v1 }
 0x1e2   : > { %12670 = vmatprep.mubr.f32.mxu0 %v2929_v52  ;;  %v2804_v59 = vmul.f32 %v15397_v46, %v2064_v8  ;;  %vm2675_vm7 = vcmp.ge.f32.partialorder %v2064_v8, 0.0  ;;  %vm1677_vm2 = vcmp.ge.f32.partialorder %v1530_v35, 0.0  ;;  %v1932_v39 = vsel %vm1675_vm13, %v1520_v7, %v1804_v32 }
 0x1e3   : > { %v12454_v6 = vpop.f32.mrb[72].mxu1  ;;  %12671 = vmatmul.mubr.f32.gmra.mrb[68].mxu0 %v2930_v11  ;;  %vm2674_vm6 = vcmp.ge.f32.partialorder %v2059_v50, 0.0  ;;  %v2803_v0 = vmul.f32 %v15397_v46, %v2059_v50  ;;  %v1545_v42 = vadd.f32 %v15251_v21, %v15261_v47  ;;  %v1933_v1 = vsel %vm1676_vm0, %v1525_v26, %v1805_v60  ;;  %v10847_v21 = vld [vmem:[%s18010_s4 + $0x160] sm:$0xff] }
 0x1e4   : > { %v2074_v62 = vadd.f32 %v12454_v6, %v15392_v61  ;;  %v2068_v10 = vpop.f32.mrb[73].mxu1  ;;  %12612 = vmatmul.mubr.f32.gmra.mrb[178].mxu1 %v1926_v45  ;;  %v2932_v31 = vsel %vm2675_vm7, %v2064_v8, %v2804_v59  ;;  %v1807_v34 = vmul.f32 %v14921_v33, %v1535_v4  ;;  %v1934_v52 = vsel %vm1677_vm2, %v1530_v35, %v1806_v53 }
 0x1e5   : > { %v2069_v58 = vadd.f32 %v15392_v61, %v2068_v10  ;;  %12614 = vmatprep.mubr.f32.mxu1 %v1927_v56  ;;  %v2931_v5 = vsel %vm2674_vm6, %v2059_v50, %v2803_v0  ;;  %vm1678_vm5 = vcmp.ge.f32.partialorder %v1535_v4, 0.0  ;;  %vm1679_vm6 = vcmp.ge.f32.partialorder %v1540_v44, 0.0 }
 0x1e6   : > { %12673 = vmatprep.mubr.f32.mxu0 %v2931_v5  ;;  %v2806_v17 = vmul.f32 %v15397_v46, %v2074_v62  ;;  %vm2677_vm11 = vcmp.ge.f32.partialorder %v2074_v62, 0.0  ;;  %v1808_v47 = vmul.f32 %v14921_v33, %v1540_v44  ;;  %v1935_v29 = vsel %vm1678_vm5, %v1535_v4, %v1807_v34 }
 0x1e7   : > { %v12457_v20 = vpop.f32.mrb[74].mxu1  ;;  %12674 = vmatmul.mubr.f32.gmra.mrb[70].mxu0 %v2932_v31  ;;  %vm2676_vm10 = vcmp.ge.f32.partialorder %v2069_v58, 0.0  ;;  %v2805_v36 = vmul.f32 %v15397_v46, %v2069_v58  ;;  %vm1680_vm9 = vcmp.ge.f32.partialorder %v1545_v42, 0.0  ;;  %vm1681_vm12 = vcmp.ge.f32.partialorder %v1550_v24, 0.0 }
 0x1e8   : > { %v2084_v3 = vadd.f32 %v12457_v20, %v15392_v61  ;;  %v2078_v55 = vpop.f32.mrb[75].mxu1  ;;  %12615 = vmatmul.mubr.f32.gmra.mrb[180].mxu1 %v1928_v30  ;;  %v2934_v23 = vsel %vm2677_vm11, %v2074_v62, %v2806_v17  ;;  %v1809_v62 = vmul.f32 %v14921_v33, %v1545_v42  ;;  %v1936_v27 = vsel %vm1679_vm6, %v1540_v44, %v1808_v47 }
 0x1e9   : > { %v2079_v48 = vadd.f32 %v15392_v61, %v2078_v55  ;;  %12617 = vmatprep.mubr.f32.mxu1 %v1929_v9  ;;  %v2933_v22 = vsel %vm2676_vm10, %v2069_v58, %v2805_v36  ;;  %v14288_v58 = vpack.c.bf16 %v10848_v38, %v10847_v21  ;;  %v1810_v30 = vmul.f32 %v14921_v33, %v1550_v24  ;;  %v10854_v38 = vld [vmem:[%s18010_s4 + $0x180] sm:$0xff] }
 0x1ea   : > { %12676 = vmatprep.mubr.f32.mxu0 %v2933_v22  ;;  %v2808_v18 = vmul.f32 %v15397_v46, %v2084_v3  ;;  %vm2679_vm15 = vcmp.ge.f32.partialorder %v2084_v3, 0.0  ;;  %v1937_v36 = vsel %vm1680_vm9, %v1545_v42, %v1809_v62 }
 0x1eb   : > { %v12460_v16 = vpop.f32.mrb[76].mxu1  ;;  %12677 = vmatmul.mubr.f32.gmra.mrb[72].mxu0 %v2934_v23  ;;  %vm2678_vm14 = vcmp.ge.f32.partialorder %v2079_v48, 0.0  ;;  %v2807_v14 = vmul.f32 %v15397_v46, %v2079_v48  ;;  %14289 = vmatprep.subr.bf16.mxu1 %v14288_v58  ;;  %v1938_v33 = vsel %vm1681_vm12, %v1550_v24, %v1810_v30 }
 0x1ec   : > { %v2094_v12 = vadd.f32 %v12460_v16, %v15392_v61  ;;  %v2088_v51 = vpop.f32.mrb[77].mxu1  ;;  %12618 = vmatmul.mubr.f32.gmra.mrb[182].mxu1 %v1930_v28  ;;  %v2936_v13 = vsel %vm2679_vm15, %v2084_v3, %v2808_v18 }
 0x1ed   : > { %v2089_v43 = vadd.f32 %v15392_v61, %v2088_v51  ;;  %12620 = vmatprep.mubr.f32.mxu1 %v1931_v63  ;;  %v2935_v37 = vsel %vm2678_vm14, %v2079_v48, %v2807_v14  ;;  %14291 = vmatpush3.bf16.xpose.msra.mxu1 %v14288_v58 }
 0x1ee   : > { %12679 = vmatprep.mubr.f32.mxu0 %v2935_v37  ;;  %v2810_v49 = vmul.f32 %v15397_v46, %v2094_v12  ;;  %vm2681_vm4 = vcmp.ge.f32.partialorder %v2094_v12, 0.0 }
 0x1ef   : > { %v12463_v2 = vpop.f32.mrb[78].mxu1  ;;  %12680 = vmatmul.mubr.f32.gmra.mrb[74].mxu0 %v2936_v13  ;;  %vm2680_vm3 = vcmp.ge.f32.partialorder %v2089_v43, 0.0  ;;  %v2809_v8 = vmul.f32 %v15397_v46, %v2089_v43 }
 0x1f0   : > { %v2104_v54 = vadd.f32 %v12463_v2, %v15392_v61  ;;  %v2098_v25 = vpop.f32.mrb[79].mxu1  ;;  %12621 = vmatmul.mubr.f32.gmra.mrb[184].mxu1 %v1932_v39  ;;  %v2938_v11 = vsel %vm2681_vm4, %v2094_v12, %v2810_v49 }
 0x1f1   : > { %v2099_v15 = vadd.f32 %v15392_v61, %v2098_v25  ;;  %12623 = vmatprep.mubr.f32.mxu1 %v1933_v1  ;;  %v2937_v50 = vsel %vm2680_vm3, %v2089_v43, %v2809_v8 }
 0x1f2   : > { %12682 = vmatprep.mubr.f32.mxu0 %v2937_v50  ;;  %v2812_v59 = vmul.f32 %v15397_v46, %v2104_v54  ;;  %vm2683_vm8 = vcmp.ge.f32.partialorder %v2104_v54, 0.0 }
 0x1f3   : > { %v12466_v6 = vpop.f32.mrb[80].mxu1  ;;  %12683 = vmatmul.mubr.f32.gmra.mrb[76].mxu0 %v2938_v11  ;;  %vm2682_vm7 = vcmp.ge.f32.partialorder %v2099_v15, 0.0  ;;  %v2811_v45 = vmul.f32 %v15397_v46, %v2099_v15 }
 0x1f4   : > { %v2114_v0 = vadd.f32 %v12466_v6, %v15392_v61  ;;  %v2108_v41 = vpop.f32.mrb[81].mxu1  ;;  %12624 = vmatmul.mubr.f32.gmra.mrb[186].mxu1 %v1934_v52  ;;  %v2940_v57 = vsel %vm2683_vm8, %v2104_v54, %v2812_v59 }
 0x1f5   : > { %v2109_v10 = vadd.f32 %v15392_v61, %v2108_v41  ;;  %12626 = vmatprep.mubr.f32.mxu1 %v1935_v29  ;;  %v2939_v56 = vsel %vm2682_vm7, %v2099_v15, %v2811_v45 }
 0x1f6   : > { %12685 = vmatprep.mubr.f32.mxu0 %v2939_v56  ;;  %v2814_v7 = vmul.f32 %v15397_v46, %v2114_v0  ;;  %vm2685_vm11 = vcmp.ge.f32.partialorder %v2114_v0, 0.0 }
 0x1f7   : > { %v12469_v5 = vpop.f32.mrb[82].mxu1  ;;  %12686 = vmatmul.mubr.f32.gmra.mrb[78].mxu0 %v2940_v57  ;;  %vm2684_vm10 = vcmp.ge.f32.partialorder %v2109_v10, 0.0  ;;  %v2813_v31 = vmul.f32 %v15397_v46, %v2109_v10  ;;  %v10855_v57 = vld [vmem:[%s18010_s4 + $0x188] sm:$0xff] }
 0x1f8   : > { %v2124_v17 = vadd.f32 %v12469_v5, %v15392_v61  ;;  %v2118_v20 = vpop.f32.mrb[83].mxu1  ;;  %12627 = vmatmul.mubr.f32.gmra.mrb[188].mxu1 %v1936_v27  ;;  %v2942_v3 = vsel %vm2685_vm11, %v2114_v0, %v2814_v7  ;;  %v14296_v58 = vpack.c.bf16 %v10855_v57, %v10854_v38 }
 0x1f9   : > { %v2119_v40 = vadd.f32 %v15392_v61, %v2118_v20  ;;  %12629 = vmatprep.mubr.f32.mxu1 %v1937_v36  ;;  %v2941_v26 = vsel %vm2684_vm10, %v2109_v10, %v2813_v31 }
 0x1fa   : > { %12688 = vmatprep.mubr.f32.mxu0 %v2941_v26  ;;  %v2816_v55 = vmul.f32 %v15397_v46, %v2124_v17  ;;  %vm2687_vm14 = vcmp.ge.f32.partialorder %v2124_v17, 0.0  ;;  %14297 = vmatprep.subr.bf16.mxu0 %v14296_v58  ;;  %v10850_v26 = vld [vmem:[%s18010_s4 + $0x178] sm:$0xff] }
 0x1fb   : > { %v12472_v9 = vpop.f32.mrb[84].mxu1  ;;  %12689 = vmatmul.mubr.f32.gmra.mrb[80].mxu0 %v2942_v3  ;;  %vm2686_vm13 = vcmp.ge.f32.partialorder %v2119_v40, 0.0  ;;  %v2815_v19 = vmul.f32 %v15397_v46, %v2119_v40 }
 0x1fc   : > { %v2134_v35 = vadd.f32 %v12472_v9, %v15392_v61  ;;  %v2128_v48 = vpop.f32.mrb[85].mxu1  ;;  %12630 = vmatmul.mubr.f32.gmra.mrb[190].mxu1 %v1938_v33  ;;  %v2944_v18 = vsel %vm2687_vm14, %v2124_v17, %v2816_v55  ;;  %14299 = vmatpush3.bf16.xpose.msra.mxu0 %v14296_v58 }
 0x1fd   : > { %v2129_v22 = vadd.f32 %v15392_v61, %v2128_v48  ;;  %v2943_v23 = vsel %vm2686_vm13, %v2119_v40, %v2815_v19  ;;  %v10849_v40 = vld [vmem:[%s18010_s4 + $0x170] sm:$0xff] }
 0x1fe   : > { %12691 = vmatprep.mubr.f32.mxu0 %v2943_v23  ;;  %v2818_v32 = vmul.f32 %v15397_v46, %v2134_v35  ;;  %vm2689_vm0 = vcmp.ge.f32.partialorder %v2134_v35, 0.0  ;;  %v14292_v9 = vpack.c.bf16 %v10850_v26, %v10849_v40 }
 0x1ff   : > { %v12475_v16 = vpop.f32.mrb[86].mxu1  ;;  %12692 = vmatmul.mubr.f32.gmra.mrb[82].mxu0 %v2944_v18  ;;  %vm2688_vm15 = vcmp.ge.f32.partialorder %v2129_v22, 0.0  ;;  %v2817_v28 = vmul.f32 %v15397_v46, %v2129_v22 }
 0x200   : > { %v2144_v14 = vadd.f32 %v12475_v16, %v15392_v61  ;;  %v2138_v4 = vpop.f32.mrb[87].mxu1  ;;  %v2946_v63 = vsel %vm2689_vm0, %v2134_v35, %v2818_v32  ;;  %14293 = vmatprep.subr.bf16.mxu1 %v14292_v9 }
 0x201   : > { %v2139_v12 = vadd.f32 %v15392_v61, %v2138_v4  ;;  %v2945_v51 = vsel %vm2688_vm15, %v2129_v22, %v2817_v28  ;;  %14295 = vmatpush3.bf16.xpose.msra.mxu1 %v14292_v9 }
 0x202   : > { %12694 = vmatprep.mubr.f32.mxu0 %v2945_v51  ;;  %v2820_v60 = vmul.f32 %v15397_v46, %v2144_v14  ;;  %vm2691_vm3 = vcmp.ge.f32.partialorder %v2144_v14, 0.0 }
 0x203   : > { %v12478_v43 = vpop.f32.mrb[88].mxu1  ;;  %12695 = vmatmul.mubr.f32.gmra.mrb[84].mxu0 %v2946_v63  ;;  %vm2690_vm2 = vcmp.ge.f32.partialorder %v2139_v12, 0.0  ;;  %v2819_v37 = vmul.f32 %v15397_v46, %v2139_v12 }
 0x204   : > { %v2154_v53 = vadd.f32 %v12478_v43, %v15392_v61  ;;  %v2148_v44 = vpop.f32.mrb[89].mxu1  ;;  %v2948_v2 = vsel %vm2691_vm3, %v2144_v14, %v2820_v60 }
 0x205   : > { %v2149_v13 = vadd.f32 %v15392_v61, %v2148_v44  ;;  %v2947_v49 = vsel %vm2690_vm2, %v2139_v12, %v2819_v37 }
 0x206   : > { %12697 = vmatprep.mubr.f32.mxu0 %v2947_v49  ;;  %v2822_v39 = vmul.f32 %v15397_v46, %v2154_v53  ;;  %vm2693_vm5 = vcmp.ge.f32.partialorder %v2154_v53, 0.0 }
 0x207   : > { %v12481_v8 = vpop.f32.mrb[90].mxu1  ;;  %12698 = vmatmul.mubr.f32.gmra.mrb[86].mxu0 %v2948_v2  ;;  %vm2692_vm4 = vcmp.ge.f32.partialorder %v2149_v13, 0.0  ;;  %v2821_v42 = vmul.f32 %v15397_v46, %v2149_v13 }
 0x208   : > { %v2164_v54 = vadd.f32 %v12481_v8, %v15392_v61  ;;  %v2158_v25 = vpop.f32.mrb[91].mxu1  ;;  %v2950_v15 = vsel %vm2693_vm5, %v2154_v53, %v2822_v39 }
 0x209   : > { %v2159_v1 = vadd.f32 %v15392_v61, %v2158_v25  ;;  %v2949_v34 = vsel %vm2692_vm4, %v2149_v13, %v2821_v42 }
 0x20a   : > { %12700 = vmatprep.mubr.f32.mxu0 %v2949_v34  ;;  %v2824_v50 = vmul.f32 %v15397_v46, %v2164_v54  ;;  %vm2695_vm7 = vcmp.ge.f32.partialorder %v2164_v54, 0.0 }
 0x20b   : > { %v12484_v52 = vpop.f32.mrb[92].mxu1  ;;  %12701 = vmatmul.mubr.f32.gmra.mrb[88].mxu0 %v2950_v15  ;;  %vm2694_vm6 = vcmp.ge.f32.partialorder %v2159_v1, 0.0  ;;  %v2823_v11 = vmul.f32 %v15397_v46, %v2159_v1 }
 0x20c   : > { %v2174_v59 = vadd.f32 %v12484_v52, %v15392_v61  ;;  %v2168_v47 = vpop.f32.mrb[93].mxu1  ;;  %v2952_v45 = vsel %vm2695_vm7, %v2164_v54, %v2824_v50 }
 0x20d   : > { %v2169_v24 = vadd.f32 %v15392_v61, %v2168_v47  ;;  %v2951_v6 = vsel %vm2694_vm6, %v2159_v1, %v2823_v11 }
 0x20e   : > { %12703 = vmatprep.mubr.f32.mxu0 %v2951_v6  ;;  %v2826_v0 = vmul.f32 %v15397_v46, %v2174_v59  ;;  %vm2697_vm9 = vcmp.ge.f32.partialorder %v2174_v59, 0.0 }
 0x20f   : > { %v12487_v41 = vpop.f32.mrb[94].mxu1  ;;  %12704 = vmatmul.mubr.f32.gmra.mrb[90].mxu0 %v2952_v45  ;;  %vm2696_vm8 = vcmp.ge.f32.partialorder %v2169_v24, 0.0  ;;  %v2825_v29 = vmul.f32 %v15397_v46, %v2169_v24 }
 0x210   : > { %v2184_v62 = vadd.f32 %v12487_v41, %v15392_v61  ;;  %v2178_v10 = vpop.f32.mrb[95].mxu1  ;;  %v2954_v27 = vsel %vm2697_vm9, %v2174_v59, %v2826_v0 }
 0x211   : > { %v2179_v56 = vadd.f32 %v15392_v61, %v2178_v10  ;;  %v2953_v21 = vsel %vm2696_vm8, %v2169_v24, %v2825_v29 }
 0x212   : > { %12706 = vmatprep.mubr.f32.mxu0 %v2953_v21  ;;  %v2828_v7 = vmul.f32 %v15397_v46, %v2184_v62  ;;  %vm2699_vm11 = vcmp.ge.f32.partialorder %v2184_v62, 0.0 }
 0x213   : > { %v12490_v5 = vpop.f32.mrb[96].mxu1  ;;  %12707 = vmatmul.mubr.f32.gmra.mrb[92].mxu0 %v2954_v27  ;;  %vm2698_vm10 = vcmp.ge.f32.partialorder %v2179_v56, 0.0  ;;  %v2827_v31 = vmul.f32 %v15397_v46, %v2179_v56 }
 0x214   : > { %v2194_v30 = vadd.f32 %v12490_v5, %v15392_v61  ;;  %v2188_v17 = vpop.f32.mrb[97].mxu1  ;;  %v2956_v3 = vsel %vm2699_vm11, %v2184_v62, %v2828_v7 }
 0x215   : > { %v2189_v20 = vadd.f32 %v15392_v61, %v2188_v17  ;;  %v2955_v36 = vsel %vm2698_vm10, %v2179_v56, %v2827_v31  ;;  %v10856_v17 = vld [vmem:[%s18010_s4 + $0x190] sm:$0xff] }
 0x216   : > { %12709 = vmatprep.mubr.f32.mxu0 %v2955_v36  ;;  %v2830_v55 = vmul.f32 %v15397_v46, %v2194_v30  ;;  %vm2701_vm13 = vcmp.ge.f32.partialorder %v2194_v30, 0.0 }
 0x217   : > { %v12493_v33 = vpop.f32.mrb[98].mxu1  ;;  %12710 = vmatmul.mubr.f32.gmra.mrb[94].mxu0 %v2956_v3  ;;  %vm2700_vm12 = vcmp.ge.f32.partialorder %v2189_v20, 0.0  ;;  %v2829_v19 = vmul.f32 %v15397_v46, %v2189_v20 }
 0x218   : > { %v2204_v35 = vadd.f32 %v12493_v33, %v15392_v61  ;;  %v2198_v48 = vpop.f32.mrb[99].mxu1  ;;  %v2958_v18 = vsel %vm2701_vm13, %v2194_v30, %v2830_v55 }
 0x219   : > { %v2199_v22 = vadd.f32 %v15392_v61, %v2198_v48  ;;  %v2957_v23 = vsel %vm2700_vm12, %v2189_v20, %v2829_v19  ;;  %v10857_v20 = vld [vmem:[%s18010_s4 + $0x198] sm:$0xff] }
 0x21a   : > { %12712 = vmatprep.mubr.f32.mxu0 %v2957_v23  ;;  %v2832_v32 = vmul.f32 %v15397_v46, %v2204_v35  ;;  %vm2703_vm15 = vcmp.ge.f32.partialorder %v2204_v35, 0.0  ;;  %v14300_v26 = vpack.c.bf16 %v10857_v20, %v10856_v17 }
 0x21b   : > { %v12496_v16 = vpop.f32.mrb[100].mxu1  ;;  %12713 = vmatmul.mubr.f32.gmra.mrb[96].mxu0 %v2958_v18  ;;  %vm2702_vm14 = vcmp.ge.f32.partialorder %v2199_v22, 0.0  ;;  %v2831_v28 = vmul.f32 %v15397_v46, %v2199_v22 }
 0x21c   : > { %v2214_v14 = vadd.f32 %v12496_v16, %v15392_v61  ;;  %v2208_v4 = vpop.f32.mrb[101].mxu1  ;;  %v2960_v63 = vsel %vm2703_vm15, %v2204_v35, %v2832_v32  ;;  %14301 = vmatprep.subr.bf16.mxu0 %v14300_v26 }
 0x21d   : > { %v2209_v12 = vadd.f32 %v15392_v61, %v2208_v4  ;;  %v2959_v51 = vsel %vm2702_vm14, %v2199_v22, %v2831_v28  ;;  %14303 = vmatpush3.bf16.xpose.msra.mxu0 %v14300_v26 }
 0x21e   : > { %12715 = vmatprep.mubr.f32.mxu0 %v2959_v51  ;;  %v2834_v60 = vmul.f32 %v15397_v46, %v2214_v14  ;;  %vm2705_vm2 = vcmp.ge.f32.partialorder %v2214_v14, 0.0 }
 0x21f   : > { %v12499_v43 = vpop.f32.mrb[102].mxu1  ;;  %12716 = vmatmul.mubr.f32.gmra.mrb[98].mxu0 %v2960_v63  ;;  %vm2704_vm0 = vcmp.ge.f32.partialorder %v2209_v12, 0.0  ;;  %v2833_v37 = vmul.f32 %v15397_v46, %v2209_v12 }
 0x220   : > { %v2224_v53 = vadd.f32 %v12499_v43, %v15392_v61  ;;  %v2218_v44 = vpop.f32.mrb[103].mxu1  ;;  %v2962_v2 = vsel %vm2705_vm2, %v2214_v14, %v2834_v60 }
 0x221   : > { %v2219_v13 = vadd.f32 %v15392_v61, %v2218_v44  ;;  %v2961_v49 = vsel %vm2704_vm0, %v2209_v12, %v2833_v37 }
 0x222   : > { %12718 = vmatprep.mubr.f32.mxu0 %v2961_v49  ;;  %v2836_v39 = vmul.f32 %v15397_v46, %v2224_v53  ;;  %vm2707_vm4 = vcmp.ge.f32.partialorder %v2224_v53, 0.0 }
 0x223   : > { %v12502_v8 = vpop.f32.mrb[104].mxu1  ;;  %12719 = vmatmul.mubr.f32.gmra.mrb[100].mxu0 %v2962_v2  ;;  %vm2706_vm3 = vcmp.ge.f32.partialorder %v2219_v13, 0.0  ;;  %v2835_v42 = vmul.f32 %v15397_v46, %v2219_v13 }
 0x224   : > { %v2234_v54 = vadd.f32 %v12502_v8, %v15392_v61  ;;  %v2228_v25 = vpop.f32.mrb[105].mxu1  ;;  %v2964_v15 = vsel %vm2707_vm4, %v2224_v53, %v2836_v39 }
 0x225   : > { %v2229_v1 = vadd.f32 %v15392_v61, %v2228_v25  ;;  %v2963_v34 = vsel %vm2706_vm3, %v2219_v13, %v2835_v42 }
 0x226   : > { %12721 = vmatprep.mubr.f32.mxu0 %v2963_v34  ;;  %v2838_v50 = vmul.f32 %v15397_v46, %v2234_v54  ;;  %vm2709_vm6 = vcmp.ge.f32.partialorder %v2234_v54, 0.0 }
 0x227   : > { %v12505_v52 = vpop.f32.mrb[106].mxu1  ;;  %12722 = vmatmul.mubr.f32.gmra.mrb[102].mxu0 %v2964_v15  ;;  %vm2708_vm5 = vcmp.ge.f32.partialorder %v2229_v1, 0.0  ;;  %v2837_v11 = vmul.f32 %v15397_v46, %v2229_v1 }
 0x228   : > { %v2244_v59 = vadd.f32 %v12505_v52, %v15392_v61  ;;  %v2238_v47 = vpop.f32.mrb[107].mxu1  ;;  %v2966_v45 = vsel %vm2709_vm6, %v2234_v54, %v2838_v50 }
 0x229   : > { %v2239_v24 = vadd.f32 %v15392_v61, %v2238_v47  ;;  %v2965_v6 = vsel %vm2708_vm5, %v2229_v1, %v2837_v11 }
 0x22a   : > { %12724 = vmatprep.mubr.f32.mxu0 %v2965_v6  ;;  %v2840_v0 = vmul.f32 %v15397_v46, %v2244_v59  ;;  %vm2711_vm8 = vcmp.ge.f32.partialorder %v2244_v59, 0.0 }
 0x22b   : > { %v12508_v41 = vpop.f32.mrb[108].mxu1  ;;  %12725 = vmatmul.mubr.f32.gmra.mrb[104].mxu0 %v2966_v45  ;;  %vm2710_vm7 = vcmp.ge.f32.partialorder %v2239_v24, 0.0  ;;  %v2839_v29 = vmul.f32 %v15397_v46, %v2239_v24 }
 0x22c   : > { %v2254_v62 = vadd.f32 %v12508_v41, %v15392_v61  ;;  %v2248_v10 = vpop.f32.mrb[109].mxu1  ;;  %v2968_v38 = vsel %vm2711_vm8, %v2244_v59, %v2840_v0 }
 0x22d   : > { %v2249_v56 = vadd.f32 %v15392_v61, %v2248_v10  ;;  %v2967_v21 = vsel %vm2710_vm7, %v2239_v24, %v2839_v29 }
 0x22e   : > { %12727 = vmatprep.mubr.f32.mxu0 %v2967_v21  ;;  %v2842_v57 = vmul.f32 %v15397_v46, %v2254_v62  ;;  %vm2713_vm10 = vcmp.ge.f32.partialorder %v2254_v62, 0.0 }
 0x22f   : > { %v12511_v27 = vpop.f32.mrb[110].mxu1  ;;  %12728 = vmatmul.mubr.f32.gmra.mrb[106].mxu0 %v2968_v38  ;;  %vm2712_vm9 = vcmp.ge.f32.partialorder %v2249_v56, 0.0  ;;  %v2841_v7 = vmul.f32 %v15397_v46, %v2249_v56 }
 0x230   : > { %v2264_v58 = vadd.f32 %v12511_v27, %v15392_v61  ;;  %v2258_v5 = vpop.f32.mrb[111].mxu1  ;;  %v2970_v36 = vsel %vm2713_vm10, %v2254_v62, %v2842_v57 }
 0x231   : > { %v2259_v31 = vadd.f32 %v15392_v61, %v2258_v5  ;;  %v2969_v30 = vsel %vm2712_vm9, %v2249_v56, %v2841_v7 }
 0x232   : > { %12730 = vmatprep.mubr.f32.mxu0 %v2969_v30  ;;  %v2844_v40 = vmul.f32 %v15397_v46, %v2264_v58  ;;  %vm2715_vm12 = vcmp.ge.f32.partialorder %v2264_v58, 0.0 }
 0x233   : > { %v12514_v3 = vpop.f32.mrb[112].mxu1  ;;  %12731 = vmatmul.mubr.f32.gmra.mrb[108].mxu0 %v2970_v36  ;;  %vm2714_vm11 = vcmp.ge.f32.partialorder %v2259_v31, 0.0  ;;  %v2843_v55 = vmul.f32 %v15397_v46, %v2259_v31 }
 0x234   : > { %v2274_v9 = vadd.f32 %v12514_v3, %v15392_v61  ;;  %v2268_v33 = vpop.f32.mrb[113].mxu1  ;;  %v2972_v48 = vsel %vm2715_vm12, %v2264_v58, %v2844_v40  ;;  %v10858_v3 = vld [vmem:[%s18010_s4 + $0x1a0] sm:$0xff] }
 0x235   : > { %v2269_v19 = vadd.f32 %v15392_v61, %v2268_v33  ;;  %v2971_v35 = vsel %vm2714_vm11, %v2259_v31, %v2843_v55  ;;  %v10859_v55 = vld [vmem:[%s18010_s4 + $0x1a8] sm:$0xff] }
 0x236   : > { %12733 = vmatprep.mubr.f32.mxu0 %v2971_v35  ;;  %v2846_v22 = vmul.f32 %v15397_v46, %v2274_v9  ;;  %vm2717_vm14 = vcmp.ge.f32.partialorder %v2274_v9, 0.0 }
 0x237   : > { %v12517_v23 = vpop.f32.mrb[114].mxu1  ;;  %12734 = vmatmul.mubr.f32.gmra.mrb[110].mxu0 %v2972_v48  ;;  %vm2716_vm13 = vcmp.ge.f32.partialorder %v2269_v19, 0.0  ;;  %v2845_v18 = vmul.f32 %v15397_v46, %v2269_v19 }
 0x238   : > { %v2284_v32 = vadd.f32 %v12517_v23, %v15392_v61  ;;  %v2278_v16 = vpop.f32.mrb[115].mxu1  ;;  %v2974_v4 = vsel %vm2717_vm14, %v2274_v9, %v2846_v22 }
 0x239   : > { %v2279_v28 = vadd.f32 %v15392_v61, %v2278_v16  ;;  %v2973_v14 = vsel %vm2716_vm13, %v2269_v19, %v2845_v18  ;;  %v14304_v19 = vpack.c.bf16 %v10859_v55, %v10858_v3  ;;  %v15633_v18 = vld [vmem:[%s18011_s5] ss:$0 sm:$0xff] }
 0x23a   : > { %12736 = vmatprep.mubr.f32.mxu0 %v2973_v14  ;;  %v2848_v12 = vmul.f32 %v15397_v46, %v2284_v32  ;;  %vm2719_vm0 = vcmp.ge.f32.partialorder %v2284_v32, 0.0 }
 0x23b   : > { %v12520_v51 = vpop.f32.mrb[116].mxu1  ;;  %12737 = vmatmul.mubr.f32.gmra.mrb[112].mxu0 %v2974_v4  ;;  %vm2718_vm15 = vcmp.ge.f32.partialorder %v2279_v28, 0.0  ;;  %v2847_v63 = vmul.f32 %v15397_v46, %v2279_v28  ;;  %14305 = vmatprep.subr.bf16.mxu0 %v14304_v19 }
 0x23c   : > { %v2294_v60 = vadd.f32 %v12520_v51, %v15392_v61  ;;  %v2288_v43 = vpop.f32.mrb[117].mxu1  ;;  %v2976_v44 = vsel %vm2719_vm0, %v2284_v32, %v2848_v12  ;;  %14307 = vmatpush3.bf16.xpose.msra.mxu0 %v14304_v19  ;;  %v10861_v19 = vld [vmem:[%s18010_s4 + $0x1b8] sm:$0xff] }
 0x23d   : > { %v2289_v37 = vadd.f32 %v15392_v61, %v2288_v43  ;;  %v2975_v53 = vsel %vm2718_vm15, %v2279_v28, %v2847_v63 }
 0x23e   : > { %12739 = vmatprep.mubr.f32.mxu0 %v2975_v53  ;;  %v2850_v13 = vmul.f32 %v15397_v46, %v2294_v60  ;;  %vm2721_vm3 = vcmp.ge.f32.partialorder %v2294_v60, 0.0 }
 0x23f   : > { %v12523_v49 = vpop.f32.mrb[118].mxu1  ;;  %12740 = vmatmul.mubr.f32.gmra.mrb[114].mxu0 %v2976_v44  ;;  %vm2720_vm2 = vcmp.ge.f32.partialorder %v2289_v37, 0.0  ;;  %v2849_v2 = vmul.f32 %v15397_v46, %v2289_v37 }
 0x240   : > { %v2304_v39 = vadd.f32 %v12523_v49, %v15392_v61  ;;  %v2298_v8 = vpop.f32.mrb[119].mxu1  ;;  %v2978_v25 = vsel %vm2721_vm3, %v2294_v60, %v2850_v13 }
 0x241   : > { %v2299_v42 = vadd.f32 %v15392_v61, %v2298_v8  ;;  %v2977_v54 = vsel %vm2720_vm2, %v2289_v37, %v2849_v2 }
 0x242   : > { %12742 = vmatprep.mubr.f32.mxu0 %v2977_v54  ;;  %v2852_v1 = vmul.f32 %v15397_v46, %v2304_v39  ;;  %vm2723_vm5 = vcmp.ge.f32.partialorder %v2304_v39, 0.0 }
 0x243   : > { %v12526_v34 = vpop.f32.mrb[120].mxu1  ;;  %12743 = vmatmul.mubr.f32.gmra.mrb[116].mxu0 %v2978_v25  ;;  %vm2722_vm4 = vcmp.ge.f32.partialorder %v2299_v42, 0.0  ;;  %v2851_v15 = vmul.f32 %v15397_v46, %v2299_v42 }
 0x244   : > { %v2314_v50 = vadd.f32 %v12526_v34, %v15392_v61  ;;  %v2308_v52 = vpop.f32.mrb[121].mxu1  ;;  %v2980_v47 = vsel %vm2723_vm5, %v2304_v39, %v2852_v1 }
 0x245   : > { %v2309_v11 = vadd.f32 %v15392_v61, %v2308_v52  ;;  %v2979_v59 = vsel %vm2722_vm4, %v2299_v42, %v2851_v15 }
 0x246   : > { %12745 = vmatprep.mubr.f32.mxu0 %v2979_v59  ;;  %v2854_v24 = vmul.f32 %v15397_v46, %v2314_v50  ;;  %vm2725_vm7 = vcmp.ge.f32.partialorder %v2314_v50, 0.0 }
 0x247   : > { %v12529_v6 = vpop.f32.mrb[122].mxu1  ;;  %12746 = vmatmul.mubr.f32.gmra.mrb[118].mxu0 %v2980_v47  ;;  %vm2724_vm6 = vcmp.ge.f32.partialorder %v2309_v11, 0.0  ;;  %v2853_v45 = vmul.f32 %v15397_v46, %v2309_v11 }
 0x248   : > { %v2324_v0 = vadd.f32 %v12529_v6, %v15392_v61  ;;  %v2318_v41 = vpop.f32.mrb[123].mxu1  ;;  %v2982_v10 = vsel %vm2725_vm7, %v2314_v50, %v2854_v24 }
 0x249   : > { %v2319_v29 = vadd.f32 %v15392_v61, %v2318_v41  ;;  %v2981_v62 = vsel %vm2724_vm6, %v2309_v11, %v2853_v45 }
 0x24a   : > { %12748 = vmatprep.mubr.f32.mxu0 %v2981_v62  ;;  %v2856_v56 = vmul.f32 %v15397_v46, %v2324_v0  ;;  %vm2727_vm9 = vcmp.ge.f32.partialorder %v2324_v0, 0.0 }
 0x24b   : > { %v12532_v21 = vpop.f32.mrb[124].mxu1  ;;  %12749 = vmatmul.mubr.f32.gmra.mrb[120].mxu0 %v2982_v10  ;;  %vm2726_vm8 = vcmp.ge.f32.partialorder %v2319_v29, 0.0  ;;  %v2855_v38 = vmul.f32 %v15397_v46, %v2319_v29 }
 0x24c   : > { %v2334_v57 = vadd.f32 %v12532_v21, %v15392_v61  ;;  %v2328_v27 = vpop.f32.mrb[125].mxu1  ;;  %v2984_v5 = vsel %vm2727_vm9, %v2324_v0, %v2856_v56 }
 0x24d   : > { %v2329_v7 = vadd.f32 %v15392_v61, %v2328_v27  ;;  %v2983_v58 = vsel %vm2726_vm8, %v2319_v29, %v2855_v38 }
 0x24e   : > { %12751 = vmatprep.mubr.f32.mxu0 %v2983_v58  ;;  %v2858_v31 = vmul.f32 %v15397_v46, %v2334_v57  ;;  %vm2729_vm11 = vcmp.ge.f32.partialorder %v2334_v57, 0.0 }
 0x24f   : > { %v12535_v30 = vpop.f32.mrb[126].mxu1  ;;  %12752 = vmatmul.mubr.f32.gmra.mrb[122].mxu0 %v2984_v5  ;;  %vm2728_vm10 = vcmp.ge.f32.partialorder %v2329_v7, 0.0  ;;  %v2857_v17 = vmul.f32 %v15397_v46, %v2329_v7 }
 0x250   : > { %v2344_v20 = vadd.f32 %v12535_v30, %v15392_v61  ;;  %v2338_v36 = vpop.f32.mrb[127].mxu1  ;;  %v2986_v9 = vsel %vm2729_vm11, %v2334_v57, %v2858_v31 }
 0x251   : > { %v2339_v40 = vadd.f32 %v15392_v61, %v2338_v36  ;;  %v2985_v26 = vsel %vm2728_vm10, %v2329_v7, %v2857_v17 }
 0x252   : > { %12754 = vmatprep.mubr.f32.mxu0 %v2985_v26  ;;  %v2860_v33 = vmul.f32 %v15397_v46, %v2344_v20  ;;  %vm2731_vm13 = vcmp.ge.f32.partialorder %v2344_v20, 0.0 }
 0x253   : > { %v12538_v35 = vpop.f32.mrb[128].mxu1  ;;  %12755 = vmatmul.mubr.f32.gmra.mrb[124].mxu0 %v2986_v9  ;;  %vm2730_vm12 = vcmp.ge.f32.partialorder %v2339_v40, 0.0  ;;  %v2859_v48 = vmul.f32 %v15397_v46, %v2339_v40 }
 0x254   : > { %v2354_v22 = vadd.f32 %v12538_v35, %v15392_v61  ;;  %v2348_v23 = vpop.f32.mrb[129].mxu1  ;;  %v2988_v28 = vsel %vm2731_vm13, %v2344_v20, %v2860_v33  ;;  %v10860_v33 = vld [vmem:[%s18010_s4 + $0x1b0] sm:$0xff] }
 0x255   : > { %v2349_v32 = vadd.f32 %v15633_v18, %v2348_v23  ;;  %v2987_v16 = vsel %vm2730_vm12, %v2339_v40, %v2859_v48 }
 0x256   : > { %12757 = vmatprep.mubr.f32.mxu0 %v2987_v16  ;;  %v2862_v14 = vmul.f32 %v15397_v46, %v2354_v22  ;;  %vm2733_vm15 = vcmp.ge.f32.partialorder %v2354_v22, 0.0 }
 0x257   : > { %v12541_v4 = vpop.f32.mrb[130].mxu1  ;;  %12758 = vmatmul.mubr.f32.gmra.mrb[126].mxu0 %v2988_v28  ;;  %vm2732_vm14 = vcmp.ge.f32.partialorder %v2349_v32, 0.0  ;;  %v2861_v61 = vmul.f32 %v15397_v46, %v2349_v32 }
 0x258   : > { %v2364_v12 = vadd.f32 %v15633_v18, %v12541_v4  ;;  %v2358_v51 = vpop.f32.mrb[131].mxu1  ;;  %v2990_v43 = vsel %vm2733_vm15, %v2354_v22, %v2862_v14  ;;  %v14308_v22 = vpack.c.bf16 %v10861_v19, %v10860_v33 }
 0x259   : > { %v2359_v63 = vadd.f32 %v15633_v18, %v2358_v51  ;;  %v2989_v60 = vsel %vm2732_vm14, %v2349_v32, %v2861_v61 }
 0x25a   : > { %12760 = vmatprep.mubr.f32.mxu0 %v2989_v60  ;;  %v2864_v37 = vmul.f32 %v15397_v46, %v2364_v12  ;;  %vm2735_vm2 = vcmp.ge.f32.partialorder %v2364_v12, 0.0  ;;  %14309 = vmatprep.subr.bf16.mxu0 %v14308_v22 }
 0x25b   : > { %v12544_v53 = vpop.f32.mrb[132].mxu1  ;;  %12761 = vmatmul.mubr.f32.gmra.mrb[128].mxu0 %v2990_v43  ;;  %vm2734_vm0 = vcmp.ge.f32.partialorder %v2359_v63, 0.0  ;;  %v2863_v44 = vmul.f32 %v15397_v46, %v2359_v63 }
 0x25c   : > { %v2374_v13 = vadd.f32 %v15633_v18, %v12544_v53  ;;  %v2368_v49 = vpop.f32.mrb[133].mxu1  ;;  %v2992_v8 = vsel %vm2735_vm2, %v2364_v12, %v2864_v37  ;;  %14311 = vmatpush3.bf16.xpose.msra.mxu0 %v14308_v22 }
 0x25d   : > { %v2369_v2 = vadd.f32 %v15633_v18, %v2368_v49  ;;  %v2991_v39 = vsel %vm2734_vm0, %v2359_v63, %v2863_v44 }
 0x25e   : > { %12763 = vmatprep.mubr.f32.mxu0 %v2991_v39  ;;  %v2866_v42 = vmul.f32 %v15397_v46, %v2374_v13  ;;  %vm2737_vm4 = vcmp.ge.f32.partialorder %v2374_v13, 0.0 }
 0x25f   : > { %v12547_v54 = vpop.f32.mrb[134].mxu1  ;;  %12764 = vmatmul.mubr.f32.gmra.mrb[130].mxu0 %v2992_v8  ;;  %vm2736_vm3 = vcmp.ge.f32.partialorder %v2369_v2, 0.0  ;;  %v2865_v25 = vmul.f32 %v15397_v46, %v2369_v2 }
 0x260   : > { %v2384_v1 = vadd.f32 %v15633_v18, %v12547_v54  ;;  %v2378_v34 = vpop.f32.mrb[135].mxu1  ;;  %v2994_v52 = vsel %vm2737_vm4, %v2374_v13, %v2866_v42 }
 0x261   : > { %v2379_v15 = vadd.f32 %v15633_v18, %v2378_v34  ;;  %v2993_v50 = vsel %vm2736_vm3, %v2369_v2, %v2865_v25 }
 0x262   : > { %12766 = vmatprep.mubr.f32.mxu0 %v2993_v50  ;;  %v2868_v11 = vmul.f32 %v15397_v46, %v2384_v1  ;;  %vm2739_vm6 = vcmp.ge.f32.partialorder %v2384_v1, 0.0 }
 0x263   : > { %v12550_v59 = vpop.f32.mrb[136].mxu1  ;;  %12767 = vmatmul.mubr.f32.gmra.mrb[132].mxu0 %v2994_v52  ;;  %vm2738_vm5 = vcmp.ge.f32.partialorder %v2379_v15, 0.0  ;;  %v2867_v47 = vmul.f32 %v15397_v46, %v2379_v15 }
 0x264   : > { %v2394_v24 = vadd.f32 %v15633_v18, %v12550_v59  ;;  %v2388_v6 = vpop.f32.mrb[137].mxu1  ;;  %v2996_v41 = vsel %vm2739_vm6, %v2384_v1, %v2868_v11 }
 0x265   : > { %v2389_v45 = vadd.f32 %v15633_v18, %v2388_v6  ;;  %v2995_v0 = vsel %vm2738_vm5, %v2379_v15, %v2867_v47 }
 0x266   : > { %12769 = vmatprep.mubr.f32.mxu0 %v2995_v0  ;;  %v2870_v29 = vmul.f32 %v15397_v46, %v2394_v24  ;;  %vm2741_vm8 = vcmp.ge.f32.partialorder %v2394_v24, 0.0 }
 0x267   : > { %v12553_v62 = vpop.f32.mrb[138].mxu1  ;;  %12770 = vmatmul.mubr.f32.gmra.mrb[134].mxu0 %v2996_v41  ;;  %vm2740_vm7 = vcmp.ge.f32.partialorder %v2389_v45, 0.0  ;;  %v2869_v10 = vmul.f32 %v15397_v46, %v2389_v45 }
 0x268   : > { %v2404_v56 = vadd.f32 %v15633_v18, %v12553_v62  ;;  %v2398_v21 = vpop.f32.mrb[139].mxu1  ;;  %v2998_v27 = vsel %vm2741_vm8, %v2394_v24, %v2870_v29 }
 0x269   : > { %v2399_v38 = vadd.f32 %v15633_v18, %v2398_v21  ;;  %v2997_v57 = vsel %vm2740_vm7, %v2389_v45, %v2869_v10 }
 0x26a   : > { %12772 = vmatprep.mubr.f32.mxu0 %v2997_v57  ;;  %v2872_v7 = vmul.f32 %v15397_v46, %v2404_v56  ;;  %vm2743_vm10 = vcmp.ge.f32.partialorder %v2404_v56, 0.0 }
 0x26b   : > { %v12556_v58 = vpop.f32.mrb[140].mxu1  ;;  %12773 = vmatmul.mubr.f32.gmra.mrb[136].mxu0 %v2998_v27  ;;  %vm2742_vm9 = vcmp.ge.f32.partialorder %v2399_v38, 0.0  ;;  %v2871_v5 = vmul.f32 %v15397_v46, %v2399_v38 }
 0x26c   : > { %v2414_v31 = vadd.f32 %v15633_v18, %v12556_v58  ;;  %v2408_v30 = vpop.f32.mrb[141].mxu1  ;;  %v3000_v36 = vsel %vm2743_vm10, %v2404_v56, %v2872_v7 }
 0x26d   : > { %v2409_v17 = vadd.f32 %v15633_v18, %v2408_v30  ;;  %v2999_v20 = vsel %vm2742_vm9, %v2399_v38, %v2871_v5 }
 0x26e   : > { %12775 = vmatprep.mubr.f32.mxu0 %v2999_v20  ;;  %v2874_v40 = vmul.f32 %v15397_v46, %v2414_v31  ;;  %vm2745_vm12 = vcmp.ge.f32.partialorder %v2414_v31, 0.0 }
 0x26f   : > { %v12559_v26 = vpop.f32.mrb[142].mxu1  ;;  %12776 = vmatmul.mubr.f32.gmra.mrb[138].mxu0 %v3000_v36  ;;  %vm2744_vm11 = vcmp.ge.f32.partialorder %v2409_v17, 0.0  ;;  %v2873_v3 = vmul.f32 %v15397_v46, %v2409_v17 }
 0x270   : > { %v2424_v55 = vadd.f32 %v15633_v18, %v12559_v26  ;;  %v2418_v9 = vpop.f32.mrb[143].mxu1  ;;  %v3002_v23 = vsel %vm2745_vm12, %v2414_v31, %v2874_v40 }
 0x271   : > { %v2419_v35 = vadd.f32 %v15633_v18, %v2418_v9  ;;  %v3001_v48 = vsel %vm2744_vm11, %v2409_v17, %v2873_v3 }
 0x272   : > { %12778 = vmatprep.mubr.f32.mxu0 %v3001_v48  ;;  %v2876_v32 = vmul.f32 %v15397_v46, %v2424_v55  ;;  %vm2747_vm14 = vcmp.ge.f32.partialorder %v2424_v55, 0.0 }
 0x273   : > { %v12562_v16 = vpop.f32.mrb[144].mxu1  ;;  %12779 = vmatmul.mubr.f32.gmra.mrb[140].mxu0 %v3002_v23  ;;  %vm2746_vm13 = vcmp.ge.f32.partialorder %v2419_v35, 0.0  ;;  %v2875_v28 = vmul.f32 %v15397_v46, %v2419_v35  ;;  %v10862_v23 = vld [vmem:[%s18010_s4 + $0x1c0] sm:$0xff] }
 0x274   : > { %v2434_v14 = vadd.f32 %v15633_v18, %v12562_v16  ;;  %v2428_v4 = vpop.f32.mrb[145].mxu1  ;;  %v3004_v51 = vsel %vm2747_vm14, %v2424_v55, %v2876_v32  ;;  %v10863_v32 = vld [vmem:[%s18010_s4 + $0x1c8] sm:$0xff] }
 0x275   : > { %v2429_v61 = vadd.f32 %v15633_v18, %v2428_v4  ;;  %v3003_v12 = vsel %vm2746_vm13, %v2419_v35, %v2875_v28 }
 0x276   : > { %12781 = vmatprep.mubr.f32.mxu0 %v3003_v12  ;;  %v2878_v63 = vmul.f32 %v15397_v46, %v2434_v14  ;;  %vm2749_vm0 = vcmp.ge.f32.partialorder %v2434_v14, 0.0 }
 0x277   : > { %v12565_v60 = vpop.f32.mrb[146].mxu1  ;;  %12782 = vmatmul.mubr.f32.gmra.mrb[142].mxu0 %v3004_v51  ;;  %vm2748_vm15 = vcmp.ge.f32.partialorder %v2429_v61, 0.0  ;;  %v2877_v43 = vmul.f32 %v15397_v46, %v2429_v61 }
 0x278   : > { %v2444_v37 = vadd.f32 %v15633_v18, %v12565_v60  ;;  %v2438_v53 = vpop.f32.mrb[147].mxu1  ;;  %v3006_v49 = vsel %vm2749_vm0, %v2434_v14, %v2878_v63  ;;  %v14312_v14 = vpack.c.bf16 %v10863_v32, %v10862_v23  ;;  %v15741_v32 = vstv %s10834_s13 }
 0x279   : > { %v2439_v44 = vadd.f32 %v15633_v18, %v2438_v53  ;;  %v3005_v13 = vsel %vm2748_vm15, %v2429_v61, %v2877_v43 }
 0x27a   : > { %12784 = vmatprep.mubr.f32.mxu0 %v3005_v13  ;;  %v2880_v2 = vmul.f32 %v15397_v46, %v2444_v37  ;;  %vm2751_vm3 = vcmp.ge.f32.partialorder %v2444_v37, 0.0  ;;  %14313 = vmatprep.subr.bf16.mxu0 %v14312_v14 }
 0x27b   : > { %v12568_v39 = vpop.f32.mrb[148].mxu1  ;;  %12785 = vmatmul.mubr.f32.gmra.mrb[144].mxu0 %v3006_v49  ;;  %vm2750_vm2 = vcmp.ge.f32.partialorder %v2439_v44, 0.0  ;;  %v2879_v8 = vmul.f32 %v15397_v46, %v2439_v44 }
 0x27c   : > { %v2454_v42 = vadd.f32 %v15633_v18, %v12568_v39  ;;  %v2448_v54 = vpop.f32.mrb[149].mxu1  ;;  %v3008_v34 = vsel %vm2751_vm3, %v2444_v37, %v2880_v2  ;;  %14315 = vmatpush3.bf16.xpose.msra.mxu0 %v14312_v14 }
 0x27d   : > { %v2449_v25 = vadd.f32 %v15633_v18, %v2448_v54  ;;  %v3007_v1 = vsel %vm2750_vm2, %v2439_v44, %v2879_v8 }
 0x27e   : > { %12787 = vmatprep.mubr.f32.mxu0 %v3007_v1  ;;  %v2882_v15 = vmul.f32 %v15397_v46, %v2454_v42  ;;  %vm2753_vm5 = vcmp.ge.f32.partialorder %v2454_v42, 0.0 }
 0x27f   : > { %v12571_v50 = vpop.f32.mrb[150].mxu1  ;;  %12788 = vmatmul.mubr.f32.gmra.mrb[146].mxu0 %v3008_v34  ;;  %vm2752_vm4 = vcmp.ge.f32.partialorder %v2449_v25, 0.0  ;;  %v2881_v52 = vmul.f32 %v15397_v46, %v2449_v25 }
 0x280   : > { %v2464_v11 = vadd.f32 %v15633_v18, %v12571_v50  ;;  %v2458_v59 = vpop.f32.mrb[151].mxu1  ;;  %v3010_v6 = vsel %vm2753_vm5, %v2454_v42, %v2882_v15 }
 0x281   : > { %v2459_v47 = vadd.f32 %v15633_v18, %v2458_v59  ;;  %v3009_v24 = vsel %vm2752_vm4, %v2449_v25, %v2881_v52 }
 0x282   : > { %12790 = vmatprep.mubr.f32.mxu0 %v3009_v24  ;;  %v2884_v45 = vmul.f32 %v15397_v46, %v2464_v11  ;;  %vm2755_vm7 = vcmp.ge.f32.partialorder %v2464_v11, 0.0 }
 0x283   : > { %v12574_v0 = vpop.f32.mrb[152].mxu1  ;;  %12791 = vmatmul.mubr.f32.gmra.mrb[148].mxu0 %v3010_v6  ;;  %vm2754_vm6 = vcmp.ge.f32.partialorder %v2459_v47, 0.0  ;;  %v2883_v41 = vmul.f32 %v15397_v46, %v2459_v47 }
 0x284   : > { %v2474_v29 = vadd.f32 %v15633_v18, %v12574_v0  ;;  %v2468_v62 = vpop.f32.mrb[153].mxu1  ;;  %v3012_v21 = vsel %vm2755_vm7, %v2464_v11, %v2884_v45 }
 0x285   : > { %v2469_v10 = vadd.f32 %v15633_v18, %v2468_v62  ;;  %v3011_v56 = vsel %vm2754_vm6, %v2459_v47, %v2883_v41 }
 0x286   : > { %12793 = vmatprep.mubr.f32.mxu0 %v3011_v56  ;;  %v2886_v38 = vmul.f32 %v15397_v46, %v2474_v29  ;;  %vm2757_vm9 = vcmp.ge.f32.partialorder %v2474_v29, 0.0 }
 0x287   : > { %v12577_v57 = vpop.f32.mrb[154].mxu1  ;;  %12794 = vmatmul.mubr.f32.gmra.mrb[150].mxu0 %v3012_v21  ;;  %vm2756_vm8 = vcmp.ge.f32.partialorder %v2469_v10, 0.0  ;;  %v2885_v27 = vmul.f32 %v15397_v46, %v2469_v10 }
 0x288   : > { %v2484_v7 = vadd.f32 %v15633_v18, %v12577_v57  ;;  %v2478_v58 = vpop.f32.mrb[155].mxu1  ;;  %v3014_v30 = vsel %vm2757_vm9, %v2474_v29, %v2886_v38 }
 0x289   : > { %v2479_v5 = vadd.f32 %v15633_v18, %v2478_v58  ;;  %v3013_v31 = vsel %vm2756_vm8, %v2469_v10, %v2885_v27 }
 0x28a   : > { %12796 = vmatprep.mubr.f32.mxu0 %v3013_v31  ;;  %v2888_v17 = vmul.f32 %v15397_v46, %v2484_v7  ;;  %vm2759_vm11 = vcmp.ge.f32.partialorder %v2484_v7, 0.0 }
 0x28b   : > { %v12580_v20 = vpop.f32.mrb[156].mxu1  ;;  %12797 = vmatmul.mubr.f32.gmra.mrb[152].mxu0 %v3014_v30  ;;  %vm2758_vm10 = vcmp.ge.f32.partialorder %v2479_v5, 0.0  ;;  %v2887_v36 = vmul.f32 %v15397_v46, %v2479_v5 }
 0x28c   : > { %v2494_v40 = vadd.f32 %v15633_v18, %v12580_v20  ;;  %v2488_v26 = vpop.f32.mrb[157].mxu1  ;;  %v3016_v9 = vsel %vm2759_vm11, %v2484_v7, %v2888_v17 }
 0x28d   : > { %v2489_v3 = vadd.f32 %v15633_v18, %v2488_v26  ;;  %v3015_v55 = vsel %vm2758_vm10, %v2479_v5, %v2887_v36 }
 0x28e   : > { %12799 = vmatprep.mubr.f32.mxu0 %v3015_v55  ;;  %v2890_v33 = vmul.f32 %v15397_v46, %v2494_v40  ;;  %vm2761_vm13 = vcmp.ge.f32.partialorder %v2494_v40, 0.0 }
 0x28f   : > { %v12583_v19 = vpop.f32.mrb[158].mxu1  ;;  %12800 = vmatmul.mubr.f32.gmra.mrb[154].mxu0 %v3016_v9  ;;  %vm2760_vm12 = vcmp.ge.f32.partialorder %v2489_v3, 0.0  ;;  %v2889_v35 = vmul.f32 %v15397_v46, %v2489_v3 }
 0x290   : > { %v2504_v48 = vadd.f32 %v15633_v18, %v12583_v19  ;;  %v2498_v22 = vpop.f32.mrb[159].mxu1  ;;  %v3018_v4 = vsel %vm2761_vm13, %v2494_v40, %v2890_v33 }
 0x291   : > { %v2499_v16 = vadd.f32 %v15633_v18, %v2498_v22  ;;  %v3017_v28 = vsel %vm2760_vm12, %v2489_v3, %v2889_v35  ;;  %v15738_v35 = vld [vmem:[%s18011_s5 + $0x1] ss:$0 sm:$0xff] }
 0x292   : > { %12802 = vmatprep.mubr.f32.mxu0 %v3017_v28  ;;  %v2892_v61 = vmul.f32 %v15397_v46, %v2504_v48  ;;  %vm2763_vm15 = vcmp.ge.f32.partialorder %v2504_v48, 0.0 }
 0x293   : > { %v12586_v12 = vpop.f32.mrb[160].mxu1  ;;  %12803 = vmatmul.mubr.f32.gmra.mrb[156].mxu0 %v3018_v4  ;;  %vm2762_vm14 = vcmp.ge.f32.partialorder %v2499_v16, 0.0  ;;  %v2891_v51 = vmul.f32 %v15397_v46, %v2499_v16 }
 0x294   : > { %v2514_v63 = vadd.f32 %v15633_v18, %v12586_v12  ;;  %v2508_v60 = vpop.f32.mrb[161].mxu1  ;;  %v3020_v53 = vsel %vm2763_vm15, %v2504_v48, %v2892_v61 }
 0x295   : > { %v2509_v43 = vadd.f32 %v15633_v18, %v2508_v60  ;;  %v3019_v37 = vsel %vm2762_vm14, %v2499_v16, %v2891_v51 }
 0x296   : > { %12805 = vmatprep.mubr.f32.mxu0 %v3019_v37  ;;  %v2894_v44 = vmul.f32 %v15397_v46, %v2514_v63  ;;  %vm2765_vm2 = vcmp.ge.f32.partialorder %v2514_v63, 0.0 }
 0x297   : > { %v12589_v13 = vpop.f32.mrb[162].mxu1  ;;  %12806 = vmatmul.mubr.f32.gmra.mrb[158].mxu0 %v3020_v53  ;;  %vm2764_vm0 = vcmp.ge.f32.partialorder %v2509_v43, 0.0  ;;  %v2893_v49 = vmul.f32 %v15397_v46, %v2509_v43 }
 0x298   : > { %v2524_v2 = vadd.f32 %v15633_v18, %v12589_v13  ;;  %v2518_v39 = vpop.f32.mrb[163].mxu1  ;;  %v3022_v54 = vsel %vm2765_vm2, %v2514_v63, %v2894_v44 }
 0x299   : > { %v2519_v8 = vadd.f32 %v15633_v18, %v2518_v39  ;;  %v3021_v42 = vsel %vm2764_vm0, %v2509_v43, %v2893_v49 }
 0x29a   : > { %12808 = vmatprep.mubr.f32.mxu0 %v3021_v42  ;;  %v2896_v25 = vmul.f32 %v15397_v46, %v2524_v2  ;;  %vm2767_vm4 = vcmp.ge.f32.partialorder %v2524_v2, 0.0 }
 0x29b   : > { %v12592_v1 = vpop.f32.mrb[164].mxu1  ;;  %12809 = vmatmul.mubr.f32.gmra.mrb[160].mxu0 %v3022_v54  ;;  %vm2766_vm3 = vcmp.ge.f32.partialorder %v2519_v8, 0.0  ;;  %v2895_v34 = vmul.f32 %v15397_v46, %v2519_v8 }
 0x29c   : > { %v2534_v15 = vadd.f32 %v15633_v18, %v12592_v1  ;;  %v2528_v50 = vpop.f32.mrb[165].mxu1  ;;  %v3024_v59 = vsel %vm2767_vm4, %v2524_v2, %v2896_v25 }
 0x29d   : > { %v2529_v52 = vadd.f32 %v15633_v18, %v2528_v50  ;;  %v3023_v11 = vsel %vm2766_vm3, %v2519_v8, %v2895_v34 }
 0x29e   : > { %12811 = vmatprep.mubr.f32.mxu0 %v3023_v11  ;;  %v2898_v47 = vmul.f32 %v15397_v46, %v2534_v15  ;;  %vm2769_vm6 = vcmp.ge.f32.partialorder %v2534_v15, 0.0 }
 0x29f   : > { %v12595_v24 = vpop.f32.mrb[166].mxu1  ;;  %12812 = vmatmul.mubr.f32.gmra.mrb[162].mxu0 %v3024_v59  ;;  %vm2768_vm5 = vcmp.ge.f32.partialorder %v2529_v52, 0.0  ;;  %v2897_v6 = vmul.f32 %v15397_v46, %v2529_v52 }
 0x2a0   : > { %v2544_v45 = vadd.f32 %v15633_v18, %v12595_v24  ;;  %v2538_v0 = vpop.f32.mrb[167].mxu1  ;;  %v3026_v62 = vsel %vm2769_vm6, %v2534_v15, %v2898_v47 }
 0x2a1   : > { %v2539_v41 = vadd.f32 %v15633_v18, %v2538_v0  ;;  %v3025_v29 = vsel %vm2768_vm5, %v2529_v52, %v2897_v6 }
 0x2a2   : > { %12814 = vmatprep.mubr.f32.mxu0 %v3025_v29  ;;  %v2900_v10 = vmul.f32 %v15397_v46, %v2544_v45  ;;  %vm2771_vm8 = vcmp.ge.f32.partialorder %v2544_v45, 0.0 }
 0x2a3   : > { %v12598_v56 = vpop.f32.mrb[168].mxu1  ;;  %12815 = vmatmul.mubr.f32.gmra.mrb[164].mxu0 %v3026_v62  ;;  %vm2770_vm7 = vcmp.ge.f32.partialorder %v2539_v41, 0.0  ;;  %v2899_v21 = vmul.f32 %v15397_v46, %v2539_v41 }
 0x2a4   : > { %v2554_v38 = vadd.f32 %v15633_v18, %v12598_v56  ;;  %v2548_v57 = vpop.f32.mrb[169].mxu1  ;;  %v3028_v58 = vsel %vm2771_vm8, %v2544_v45, %v2900_v10 }
 0x2a5   : > { %v2549_v27 = vadd.f32 %v15633_v18, %v2548_v57  ;;  %v3027_v7 = vsel %vm2770_vm7, %v2539_v41, %v2899_v21 }
 0x2a6   : > { %12817 = vmatprep.mubr.f32.mxu0 %v3027_v7  ;;  %v2902_v5 = vmul.f32 %v15397_v46, %v2554_v38  ;;  %vm2773_vm10 = vcmp.ge.f32.partialorder %v2554_v38, 0.0 }
 0x2a7   : > { %v12601_v31 = vpop.f32.mrb[170].mxu1  ;;  %12818 = vmatmul.mubr.f32.gmra.mrb[166].mxu0 %v3028_v58  ;;  %vm2772_vm9 = vcmp.ge.f32.partialorder %v2549_v27, 0.0  ;;  %v2901_v30 = vmul.f32 %v15397_v46, %v2549_v27 }
 0x2a8   : > { %v2564_v17 = vadd.f32 %v15633_v18, %v12601_v31  ;;  %v2558_v20 = vpop.f32.mrb[171].mxu1  ;;  %v3030_v26 = vsel %vm2773_vm10, %v2554_v38, %v2902_v5 }
 0x2a9   : > { %v2559_v36 = vadd.f32 %v15633_v18, %v2558_v20  ;;  %v3029_v40 = vsel %vm2772_vm9, %v2549_v27, %v2901_v30 }
 0x2aa   : > { %12820 = vmatprep.mubr.f32.mxu0 %v3029_v40  ;;  %v2904_v3 = vmul.f32 %v15397_v46, %v2564_v17  ;;  %vm2775_vm12 = vcmp.ge.f32.partialorder %v2564_v17, 0.0 }
 0x2ab   : > { %v12604_v55 = vpop.f32.mrb[172].mxu1  ;;  %12821 = vmatmul.mubr.f32.gmra.mrb[168].mxu0 %v3030_v26  ;;  %vm2774_vm11 = vcmp.ge.f32.partialorder %v2559_v36, 0.0  ;;  %v2903_v9 = vmul.f32 %v15397_v46, %v2559_v36 }
 0x2ac   : > { %v2574_v33 = vadd.f32 %v15633_v18, %v12604_v55  ;;  %v2568_v19 = vpop.f32.mrb[173].mxu1  ;;  %v3032_v16 = vsel %vm2775_vm12, %v2564_v17, %v2904_v3 }
 0x2ad   : > { %v2569_v48 = vadd.f32 %v15633_v18, %v2568_v19  ;;  %v3031_v22 = vsel %vm2774_vm11, %v2559_v36, %v2903_v9 }
 0x2ae   : > { %v12666_v23 = vpop.f32.mrb[64].mxu0  ;;  %12823 = vmatprep.mubr.f32.mxu0 %v3031_v22  ;;  %vm2777_vm13 = vcmp.ge.f32.partialorder %v2574_v33, 0.0  ;;  %v2906_v28 = vmul.f32 %v15397_v46, %v2574_v33 }
 0x2af   : > { %v3150_v14 = vadd.f32 %v12666_v23, %v15738_v35  ;;  %v12607_v4 = vpop.f32.mrb[174].mxu1  ;;  %v3144_v61 = vpop.f32.mrb[65].mxu0  ;;  %12824 = vmatmul.mubr.f32.gmra.mrb[170].mxu0 %v3032_v16  ;;  %vm2776_vm14 = vcmp.ge.f32.partialorder %v2569_v48, 0.0  ;;  %v2905_v12 = vmul.f32 %v15397_v46, %v2569_v48 }
 0x2b0   : > { %v2584_v51 = vadd.f32 %v15633_v18, %v12607_v4  ;;  %v3145_v63 = vadd.f32 %v15738_v35, %v3144_v61  ;;  %v2578_v60 = vpop.f32.mrb[175].mxu1  ;;  %v3034_v43 = vsel %vm2777_vm13, %v2574_v33, %v2906_v28 }
 0x2b1   : > { %v3914_v37 = vmul.f32 %v15741_v32, %v3150_v14  ;;  %v2579_v53 = vadd.f32 %v15633_v18, %v2578_v60  ;;  %v3033_v44 = vsel %vm2776_vm14, %v2569_v48, %v2905_v12  ;;  %vm3785_vm15 = vcmp.ge.f32.partialorder %v3150_v14, 0.0 }
 0x2b2   : > { %v12669_v13 = vpop.f32.mrb[66].mxu0  ;;  %12826 = vmatprep.mubr.f32.mxu0 %v3033_v44  ;;  %vm3784_vm0 = vcmp.ge.f32.partialorder %v3145_v63, 0.0  ;;  %v3913_v49 = vmul.f32 %v15741_v32, %v3145_v63  ;;  %vm2779_vm2 = vcmp.ge.f32.partialorder %v2584_v51, 0.0  ;;  %v2908_v2 = vmul.f32 %v15397_v46, %v2584_v51 }
 0x2b3   : > { %v3160_v39 = vadd.f32 %v12669_v13, %v15738_v35  ;;  %v12610_v8 = vpop.f32.mrb[176].mxu1  ;;  %v3154_v42 = vpop.f32.mrb[67].mxu0  ;;  %12827 = vmatmul.mubr.f32.gmra.mrb[172].mxu0 %v3034_v43  ;;  %vm2778_vm3 = vcmp.ge.f32.partialorder %v2579_v53, 0.0  ;;  %v2907_v54 = vmul.f32 %v15397_v46, %v2579_v53  ;;  %v4042_v25 = vsel %vm3785_vm15, %v3150_v14, %v3914_v37 }
 0x2b4   : > { %v2594_v1 = vadd.f32 %v15633_v18, %v12610_v8  ;;  %v3155_v34 = vadd.f32 %v15738_v35, %v3154_v42  ;;  %v2588_v15 = vpop.f32.mrb[177].mxu1  ;;  %v4041_v50 = vsel %vm3784_vm0, %v3145_v63, %v3913_v49  ;;  %v3036_v52 = vsel %vm2779_vm2, %v2584_v51, %v2908_v2 }
 0x2b5   : > { %v2589_v11 = vadd.f32 %v15633_v18, %v2588_v15  ;;  %12888 = vmatprep.mubr.f32.mxu1 %v4041_v50  ;;  %v3035_v59 = vsel %vm2778_vm3, %v2579_v53, %v2907_v54  ;;  %vm3787_vm4 = vcmp.ge.f32.partialorder %v3160_v39, 0.0  ;;  %v3916_v47 = vmul.f32 %v15741_v32, %v3160_v39 }
 0x2b6   : > { %v12672_v24 = vpop.f32.mrb[68].mxu0  ;;  %12829 = vmatprep.mubr.f32.mxu0 %v3035_v59  ;;  %12889 = vmatmul.mubr.f32.vlgmr.msra.gmra.mrb[192].mxu1 %v4042_v25  ;;  %vm3786_vm5 = vcmp.ge.f32.partialorder %v3155_v34, 0.0  ;;  %v3915_v6 = vmul.f32 %v15741_v32, %v3155_v34  ;;  %vm2781_vm6 = vcmp.ge.f32.partialorder %v2594_v1, 0.0  ;;  %v2910_v45 = vmul.f32 %v15397_v46, %v2594_v1 }
 0x2b7   : > { %v3170_v0 = vadd.f32 %v12672_v24, %v15738_v35  ;;  %v12613_v41 = vpop.f32.mrb[178].mxu1  ;;  %v3164_v29 = vpop.f32.mrb[69].mxu0  ;;  %12830 = vmatmul.mubr.f32.gmra.mrb[174].mxu0 %v3036_v52  ;;  %vm2780_vm7 = vcmp.ge.f32.partialorder %v2589_v11, 0.0  ;;  %v2909_v62 = vmul.f32 %v15397_v46, %v2589_v11  ;;  %v4044_v10 = vsel %vm3787_vm4, %v3160_v39, %v3916_v47 }
 0x2b8   : > { %v2604_v56 = vadd.f32 %v15633_v18, %v12613_v41  ;;  %v3165_v21 = vadd.f32 %v15738_v35, %v3164_v29  ;;  %v2598_v38 = vpop.f32.mrb[179].mxu1  ;;  %v4043_v57 = vsel %vm3786_vm5, %v3155_v34, %v3915_v6  ;;  %v3038_v27 = vsel %vm2781_vm6, %v2594_v1, %v2910_v45 }
 0x2b9   : > { %v2599_v7 = vadd.f32 %v15633_v18, %v2598_v38  ;;  %12891 = vmatprep.mubr.f32.mxu1 %v4043_v57  ;;  %v3037_v58 = vsel %vm2780_vm7, %v2589_v11, %v2909_v62  ;;  %vm3789_vm8 = vcmp.ge.f32.partialorder %v3170_v0, 0.0  ;;  %v3918_v5 = vmul.f32 %v15741_v32, %v3170_v0 }
 0x2ba   : > { %v12675_v31 = vpop.f32.mrb[70].mxu0  ;;  %12832 = vmatprep.mubr.f32.mxu0 %v3037_v58  ;;  %12892 = vmatmul.mubr.f32.gmra.mrb[194].mxu1 %v4044_v10  ;;  %vm3788_vm9 = vcmp.ge.f32.partialorder %v3165_v21, 0.0  ;;  %v3917_v30 = vmul.f32 %v15741_v32, %v3165_v21  ;;  %vm2783_vm10 = vcmp.ge.f32.partialorder %v2604_v56, 0.0  ;;  %v2912_v17 = vmul.f32 %v15397_v46, %v2604_v56 }
 0x2bb   : > { %v3180_v20 = vadd.f32 %v12675_v31, %v15738_v35  ;;  %v12616_v36 = vpop.f32.mrb[180].mxu1  ;;  %v3174_v40 = vpop.f32.mrb[71].mxu0  ;;  %12833 = vmatmul.mubr.f32.gmra.mrb[176].mxu0 %v3038_v27  ;;  %vm2782_vm11 = vcmp.ge.f32.partialorder %v2599_v7, 0.0  ;;  %v2911_v26 = vmul.f32 %v15397_v46, %v2599_v7  ;;  %v4046_v3 = vsel %vm3789_vm8, %v3170_v0, %v3918_v5 }
 0x2bc   : > { %v2614_v55 = vadd.f32 %v15633_v18, %v12616_v36  ;;  %v3175_v9 = vadd.f32 %v15738_v35, %v3174_v40  ;;  %v2608_v33 = vpop.f32.mrb[181].mxu1  ;;  %v4045_v19 = vsel %vm3788_vm9, %v3165_v21, %v3917_v30  ;;  %v3040_v48 = vsel %vm2783_vm10, %v2604_v56, %v2912_v17 }
 0x2bd   : > { %v2609_v22 = vadd.f32 %v15633_v18, %v2608_v33  ;;  %12894 = vmatprep.mubr.f32.mxu1 %v4045_v19  ;;  %v3039_v23 = vsel %vm2782_vm11, %v2599_v7, %v2911_v26  ;;  %vm3791_vm12 = vcmp.ge.f32.partialorder %v3180_v20, 0.0  ;;  %v3920_v16 = vmul.f32 %v15741_v32, %v3180_v20 }
 0x2be   : > { %v12678_v28 = vpop.f32.mrb[72].mxu0  ;;  %12835 = vmatprep.mubr.f32.mxu0 %v3039_v23  ;;  %12895 = vmatmul.mubr.f32.gmra.mrb[196].mxu1 %v4046_v3  ;;  %vm3790_vm13 = vcmp.ge.f32.partialorder %v3175_v9, 0.0  ;;  %v3919_v14 = vmul.f32 %v15741_v32, %v3175_v9  ;;  %vm2785_vm14 = vcmp.ge.f32.partialorder %v2614_v55, 0.0  ;;  %v2914_v4 = vmul.f32 %v15397_v46, %v2614_v55 }
 0x2bf   : > { %v3190_v61 = vadd.f32 %v12678_v28, %v15738_v35  ;;  %v12619_v12 = vpop.f32.mrb[182].mxu1  ;;  %v3184_v51 = vpop.f32.mrb[73].mxu0  ;;  %12836 = vmatmul.mubr.f32.gmra.mrb[178].mxu0 %v3040_v48  ;;  %vm2784_vm15 = vcmp.ge.f32.partialorder %v2609_v22, 0.0  ;;  %v2913_v63 = vmul.f32 %v15397_v46, %v2609_v22  ;;  %v4048_v60 = vsel %vm3791_vm12, %v3180_v20, %v3920_v16 }
 0x2c0   : > { %v2624_v43 = vadd.f32 %v15633_v18, %v12619_v12  ;;  %v3185_v37 = vadd.f32 %v15738_v35, %v3184_v51  ;;  %v2618_v53 = vpop.f32.mrb[183].mxu1  ;;  %v4047_v44 = vsel %vm3790_vm13, %v3175_v9, %v3919_v14  ;;  %v3042_v13 = vsel %vm2785_vm14, %v2614_v55, %v2914_v4 }
 0x2c1   : > { %v2619_v49 = vadd.f32 %v15633_v18, %v2618_v53  ;;  %12897 = vmatprep.mubr.f32.mxu1 %v4047_v44  ;;  %v3041_v2 = vsel %vm2784_vm15, %v2609_v22, %v2913_v63  ;;  %vm3793_vm0 = vcmp.ge.f32.partialorder %v3190_v61, 0.0  ;;  %v3922_v39 = vmul.f32 %v15741_v32, %v3190_v61 }
 0x2c2   : > { %v12681_v8 = vpop.f32.mrb[74].mxu0  ;;  %12838 = vmatprep.mubr.f32.mxu0 %v3041_v2  ;;  %12898 = vmatmul.mubr.f32.gmra.mrb[198].mxu1 %v4048_v60  ;;  %vm3792_vm2 = vcmp.ge.f32.partialorder %v3185_v37, 0.0  ;;  %v3921_v42 = vmul.f32 %v15741_v32, %v3185_v37  ;;  %vm2787_vm3 = vcmp.ge.f32.partialorder %v2624_v43, 0.0  ;;  %v2916_v54 = vmul.f32 %v15397_v46, %v2624_v43 }
 0x2c3   : > { %v3200_v25 = vadd.f32 %v12681_v8, %v15738_v35  ;;  %v12622_v1 = vpop.f32.mrb[184].mxu1  ;;  %v3194_v34 = vpop.f32.mrb[75].mxu0  ;;  %12839 = vmatmul.mubr.f32.gmra.mrb[180].mxu0 %v3042_v13  ;;  %vm2786_vm4 = vcmp.ge.f32.partialorder %v2619_v49, 0.0  ;;  %v2915_v15 = vmul.f32 %v15397_v46, %v2619_v49  ;;  %v4050_v50 = vsel %vm3793_vm0, %v3190_v61, %v3922_v39 }
 0x2c4   : > { %v2634_v52 = vadd.f32 %v15633_v18, %v12622_v1  ;;  %v3195_v11 = vadd.f32 %v15738_v35, %v3194_v34  ;;  %v2628_v59 = vpop.f32.mrb[185].mxu1  ;;  %v4049_v47 = vsel %vm3792_vm2, %v3185_v37, %v3921_v42  ;;  %v3044_v24 = vsel %vm2787_vm3, %v2624_v43, %v2916_v54  ;;  %v10864_v1 = vld [vmem:[%s18010_s4 + $0x1d0] sm:$0xff]  ;;  %v10865_v34 = vld [vmem:[%s18010_s4 + $0x1d8] sm:$0xff] }
 0x2c5   : > { %v2629_v6 = vadd.f32 %v15633_v18, %v2628_v59  ;;  %12900 = vmatprep.mubr.f32.mxu1 %v4049_v47  ;;  %v3043_v45 = vsel %vm2786_vm4, %v2619_v49, %v2915_v15  ;;  %vm3795_vm5 = vcmp.ge.f32.partialorder %v3200_v25, 0.0  ;;  %v3924_v0 = vmul.f32 %v15741_v32, %v3200_v25 }
 0x2c6   : > { %v12684_v41 = vpop.f32.mrb[76].mxu0  ;;  %12841 = vmatprep.mubr.f32.mxu0 %v3043_v45  ;;  %12901 = vmatmul.mubr.f32.gmra.mrb[200].mxu1 %v4050_v50  ;;  %vm3794_vm6 = vcmp.ge.f32.partialorder %v3195_v11, 0.0  ;;  %v3923_v29 = vmul.f32 %v15741_v32, %v3195_v11  ;;  %vm2789_vm7 = vcmp.ge.f32.partialorder %v2634_v52, 0.0  ;;  %v2918_v62 = vmul.f32 %v15397_v46, %v2634_v52 }
 0x2c7   : > { %v3210_v10 = vadd.f32 %v12684_v41, %v15738_v35  ;;  %v12625_v56 = vpop.f32.mrb[186].mxu1  ;;  %v3204_v21 = vpop.f32.mrb[77].mxu0  ;;  %12842 = vmatmul.mubr.f32.gmra.mrb[182].mxu0 %v3044_v24  ;;  %vm2788_vm8 = vcmp.ge.f32.partialorder %v2629_v6, 0.0  ;;  %v2917_v38 = vmul.f32 %v15397_v46, %v2629_v6  ;;  %v4052_v57 = vsel %vm3795_vm5, %v3200_v25, %v3924_v0 }
 0x2c8   : > { %v2644_v27 = vadd.f32 %v15633_v18, %v12625_v56  ;;  %v3205_v7 = vadd.f32 %v15738_v35, %v3204_v21  ;;  %v2638_v58 = vpop.f32.mrb[187].mxu1  ;;  %v4051_v5 = vsel %vm3794_vm6, %v3195_v11, %v3923_v29  ;;  %v3046_v31 = vsel %vm2789_vm7, %v2634_v52, %v2918_v62  ;;  %v10866_v52 = vld [vmem:[%s18010_s4 + $0x1e0] sm:$0xff]  ;;  %v10867_v11 = vld [vmem:[%s18010_s4 + $0x1e8] sm:$0xff] }
 0x2c9   : > { %v2639_v30 = vadd.f32 %v15633_v18, %v2638_v58  ;;  %12903 = vmatprep.mubr.f32.mxu1 %v4051_v5  ;;  %v3045_v17 = vsel %vm2788_vm8, %v2629_v6, %v2917_v38  ;;  %vm3797_vm9 = vcmp.ge.f32.partialorder %v3210_v10, 0.0  ;;  %v3926_v20 = vmul.f32 %v15741_v32, %v3210_v10 }
 0x2ca   : > { %v12687_v36 = vpop.f32.mrb[78].mxu0  ;;  %12844 = vmatprep.mubr.f32.mxu0 %v3045_v17  ;;  %12904 = vmatmul.mubr.f32.gmra.mrb[202].mxu1 %v4052_v57  ;;  %vm3796_vm10 = vcmp.ge.f32.partialorder %v3205_v7, 0.0  ;;  %v3925_v40 = vmul.f32 %v15741_v32, %v3205_v7  ;;  %vm2791_vm11 = vcmp.ge.f32.partialorder %v2644_v27, 0.0  ;;  %v2920_v26 = vmul.f32 %v15397_v46, %v2644_v27 }
 0x2cb   : > { %v3220_v3 = vadd.f32 %v12687_v36, %v15738_v35  ;;  %v12628_v55 = vpop.f32.mrb[188].mxu1  ;;  %v3214_v9 = vpop.f32.mrb[79].mxu0  ;;  %12845 = vmatmul.mubr.f32.gmra.mrb[184].mxu0 %v3046_v31  ;;  %vm2790_vm12 = vcmp.ge.f32.partialorder %v2639_v30, 0.0  ;;  %v2919_v33 = vmul.f32 %v15397_v46, %v2639_v30  ;;  %v4054_v19 = vsel %vm3797_vm9, %v3210_v10, %v3926_v20 }
 0x2cc   : > { %v2654_v48 = vadd.f32 %v15633_v18, %v12628_v55  ;;  %v3215_v22 = vadd.f32 %v15738_v35, %v3214_v9  ;;  %v2648_v23 = vpop.f32.mrb[189].mxu1  ;;  %v4053_v16 = vsel %vm3796_vm10, %v3205_v7, %v3925_v40  ;;  %v3048_v28 = vsel %vm2791_vm11, %v2644_v27, %v2920_v26 }
 0x2cd   : > { %v2649_v14 = vadd.f32 %v15633_v18, %v2648_v23  ;;  %12906 = vmatprep.mubr.f32.mxu1 %v4053_v16  ;;  %v3047_v4 = vsel %vm2790_vm12, %v2639_v30, %v2919_v33  ;;  %vm3799_vm13 = vcmp.ge.f32.partialorder %v3220_v3, 0.0  ;;  %v3928_v61 = vmul.f32 %v15741_v32, %v3220_v3 }
 0x2ce   : > { %v12690_v12 = vpop.f32.mrb[80].mxu0  ;;  %12847 = vmatprep.mubr.f32.mxu0 %v3047_v4  ;;  %12907 = vmatmul.mubr.f32.gmra.mrb[204].mxu1 %v4054_v19  ;;  %vm3798_vm14 = vcmp.ge.f32.partialorder %v3215_v22, 0.0  ;;  %v3927_v51 = vmul.f32 %v15741_v32, %v3215_v22  ;;  %vm2793_vm15 = vcmp.ge.f32.partialorder %v2654_v48, 0.0  ;;  %v2922_v63 = vmul.f32 %v15397_v46, %v2654_v48 }
 0x2cf   : > { %v3230_v60 = vadd.f32 %v12690_v12, %v15738_v35  ;;  %v12631_v43 = vpop.f32.mrb[190].mxu1  ;;  %v3224_v37 = vpop.f32.mrb[81].mxu0  ;;  %12848 = vmatmul.mubr.f32.gmra.mrb[186].mxu0 %v3048_v28  ;;  %vm2792_vm0 = vcmp.ge.f32.partialorder %v2649_v14, 0.0  ;;  %v2921_v53 = vmul.f32 %v15397_v46, %v2649_v14  ;;  %v4056_v39 = vsel %vm3799_vm13, %v3220_v3, %v3928_v61 }
 0x2d0   : > { %v2664_v44 = vadd.f32 %v15633_v18, %v12631_v43  ;;  %v3225_v13 = vadd.f32 %v15738_v35, %v3224_v37  ;;  %v2658_v49 = vpop.f32.mrb[191].mxu1  ;;  %v4055_v2 = vsel %vm3798_vm14, %v3215_v22, %v3927_v51  ;;  %v3050_v54 = vsel %vm2793_vm15, %v2654_v48, %v2922_v63 }
 0x2d1   : > { %v2659_v8 = vadd.f32 %v15633_v18, %v2658_v49  ;;  %12909 = vmatprep.mubr.f32.mxu1 %v4055_v2  ;;  %v3049_v42 = vsel %vm2792_vm0, %v2649_v14, %v2921_v53  ;;  %v3930_v25 = vmul.f32 %v15741_v32, %v3230_v60  ;;  %vm3801_vm3 = vcmp.ge.f32.partialorder %v3230_v60, 0.0 }
 0x2d2   : > { %v12693_v15 = vpop.f32.mrb[82].mxu0  ;;  %12850 = vmatprep.mubr.f32.mxu0 %v3049_v42  ;;  %12910 = vmatmul.mubr.f32.gmra.mrb[206].mxu1 %v4056_v39  ;;  %vm3800_vm2 = vcmp.ge.f32.partialorder %v3225_v13, 0.0  ;;  %v3929_v18 = vmul.f32 %v15741_v32, %v3225_v13  ;;  %v2924_v50 = vmul.f32 %v15397_v46, %v2664_v44  ;;  %vm2795_vm5 = vcmp.ge.f32.partialorder %v2664_v44, 0.0 }
 0x2d3   : > { %v3240_v59 = vadd.f32 %v12693_v15, %v15738_v35  ;;  %v3234_v47 = vpop.f32.mrb[83].mxu0  ;;  %12851 = vmatmul.mubr.f32.gmra.mrb[188].mxu0 %v3050_v54  ;;  %vm2794_vm4 = vcmp.ge.f32.partialorder %v2659_v8, 0.0  ;;  %v2923_v24 = vmul.f32 %v15397_v46, %v2659_v8  ;;  %v14316_v0 = vpack.c.bf16 %v10865_v34, %v10864_v1 }
 0x2d4   : > { %v3235_v6 = vadd.f32 %v15738_v35, %v3234_v47  ;;  %v4057_v45 = vsel %vm3800_vm2, %v3225_v13, %v3929_v18  ;;  %v4058_v29 = vsel %vm3801_vm3, %v3230_v60, %v3930_v25  ;;  %v14320_v10 = vpack.c.bf16 %v10867_v11, %v10866_v52  ;;  %v10874_v52 = vld [vmem:[%s18010_s4 + $0x208] sm:$0xff] }
 0x2d5   : > { %12912 = vmatprep.mubr.f32.mxu1 %v4057_v45  ;;  %v3051_v41 = vsel %vm2794_vm4, %v2659_v8, %v2923_v24  ;;  %v3932_v62 = vmul.f32 %v15741_v32, %v3240_v59  ;;  %v3052_v21 = vsel %vm2795_vm5, %v2664_v44, %v2924_v50  ;;  %vm3803_vm7 = vcmp.ge.f32.partialorder %v3240_v59, 0.0  ;;  %14317 = vmatprep.subr.bf16.mxu0 %v14316_v0  ;;  %v10873_v50 = vld [vmem:[%s18010_s4 + $0x200] sm:$0xff] }
 0x2d6   : > { %v12696_v56 = vpop.f32.mrb[84].mxu0  ;;  %12853 = vmatprep.mubr.f32.mxu0 %v3051_v41  ;;  %12913 = vmatmul.mubr.f32.gmra.mrb[208].mxu1 %v4058_v29  ;;  %vm3802_vm6 = vcmp.ge.f32.partialorder %v3235_v6, 0.0  ;;  %v3931_v38 = vmul.f32 %v15741_v32, %v3235_v6  ;;  %v14328_v47 = vpack.c.bf16 %v10874_v52, %v10873_v50 }
 0x2d7   : > { %v3250_v46 = vadd.f32 %v12696_v56, %v15738_v35  ;;  %v3244_v57 = vpop.f32.mrb[85].mxu0  ;;  %12854 = vmatmul.mubr.f32.gmra.mrb[190].mxu0 %v3052_v21  ;;  %v4060_v58 = vsel %vm3803_vm7, %v3240_v59, %v3932_v62  ;;  %v10868_v62 = vld [vmem:[%s18010_s4 + $0x1f0] sm:$0xff] }
 0x2d8   : > { %v3245_v27 = vadd.f32 %v15738_v35, %v3244_v57  ;;  %v4059_v7 = vsel %vm3802_vm6, %v3235_v6, %v3931_v38  ;;  %14319 = vmatpush3.bf16.xpose.msra.mxu0 %v14316_v0  ;;  %14329 = vmatprep.subr.bf16.mxu1 %v14328_v47 }
 0x2d9   : > { %12915 = vmatprep.mubr.f32.mxu1 %v4059_v7  ;;  %v3934_v5 = vmul.f32 %v15741_v32, %v3250_v46  ;;  %14321 = vmatprep.subr.bf16.mxu0 %v14320_v10  ;;  %vm3805_vm9 = vcmp.ge.f32.partialorder %v3250_v46, 0.0 }
 0x2da   : > { %v12699_v31 = vpop.f32.mrb[86].mxu0  ;;  %12916 = vmatmul.mubr.f32.gmra.mrb[210].mxu1 %v4060_v58  ;;  %vm3804_vm8 = vcmp.ge.f32.partialorder %v3245_v27, 0.0  ;;  %v3933_v30 = vmul.f32 %v15741_v32, %v3245_v27 }
 0x2db   : > { %v3260_v17 = vadd.f32 %v12699_v31, %v15738_v35  ;;  %v3254_v20 = vpop.f32.mrb[87].mxu0  ;;  %v4062_v26 = vsel %vm3805_vm9, %v3250_v46, %v3934_v5  ;;  %14331 = vmatpush3.bf16.xpose.msra.mxu1 %v14328_v47 }
 0x2dc   : > { %v3255_v36 = vadd.f32 %v15738_v35, %v3254_v20  ;;  %v4061_v40 = vsel %vm3804_vm8, %v3245_v27, %v3933_v30 }
 0x2dd   : > { %12918 = vmatprep.mubr.f32.mxu1 %v4061_v40  ;;  %v3936_v3 = vmul.f32 %v15741_v32, %v3260_v17  ;;  %vm3807_vm11 = vcmp.ge.f32.partialorder %v3260_v17, 0.0 }
 0x2de   : > { %v12702_v55 = vpop.f32.mrb[88].mxu0  ;;  %12919 = vmatmul.mubr.f32.gmra.mrb[212].mxu1 %v4062_v26  ;;  %vm3806_vm10 = vcmp.ge.f32.partialorder %v3255_v36, 0.0  ;;  %v3935_v9 = vmul.f32 %v15741_v32, %v3255_v36 }
 0x2df   : > { %v3270_v33 = vadd.f32 %v12702_v55, %v15738_v35  ;;  %v3264_v19 = vpop.f32.mrb[89].mxu0  ;;  %v4064_v23 = vsel %vm3807_vm11, %v3260_v17, %v3936_v3 }
 0x2e0   : > { %v3265_v48 = vadd.f32 %v15738_v35, %v3264_v19  ;;  %v4063_v22 = vsel %vm3806_vm10, %v3255_v36, %v3935_v9  ;;  %14323 = vmatpush3.bf16.xpose.msra.mxu0 %v14320_v10  ;;  %v10869_v10 = vld [vmem:[%s18010_s4 + $0x1f8] sm:$0xff] }
 0x2e1   : > { %12921 = vmatprep.mubr.f32.mxu1 %v4063_v22  ;;  %v3938_v16 = vmul.f32 %v15741_v32, %v3270_v33  ;;  %vm3809_vm13 = vcmp.ge.f32.partialorder %v3270_v33, 0.0  ;;  %v14324_v38 = vpack.c.bf16 %v10869_v10, %v10868_v62 }
 0x2e2   : > { %v12705_v28 = vpop.f32.mrb[90].mxu0  ;;  %12922 = vmatmul.mubr.f32.gmra.mrb[214].mxu1 %v4064_v23  ;;  %vm3808_vm12 = vcmp.ge.f32.partialorder %v3265_v48, 0.0  ;;  %v3937_v14 = vmul.f32 %v15741_v32, %v3265_v48 }
 0x2e3   : > { %v3280_v4 = vadd.f32 %v12705_v28, %v15738_v35  ;;  %v3274_v61 = vpop.f32.mrb[91].mxu0  ;;  %v4066_v63 = vsel %vm3809_vm13, %v3270_v33, %v3938_v16  ;;  %14325 = vmatprep.subr.bf16.mxu0 %v14324_v38 }
 0x2e4   : > { %v3275_v12 = vadd.f32 %v15738_v35, %v3274_v61  ;;  %v4065_v51 = vsel %vm3808_vm12, %v3265_v48, %v3937_v14 }
 0x2e5   : > { %12924 = vmatprep.mubr.f32.mxu1 %v4065_v51  ;;  %v3940_v60 = vmul.f32 %v15741_v32, %v3280_v4  ;;  %vm3811_vm15 = vcmp.ge.f32.partialorder %v3280_v4, 0.0 }
 0x2e6   : > { %v12708_v43 = vpop.f32.mrb[92].mxu0  ;;  %12925 = vmatmul.mubr.f32.gmra.mrb[216].mxu1 %v4066_v63  ;;  %vm3810_vm14 = vcmp.ge.f32.partialorder %v3275_v12, 0.0  ;;  %v3939_v37 = vmul.f32 %v15741_v32, %v3275_v12 }
 0x2e7   : > { %v3290_v53 = vadd.f32 %v12708_v43, %v15738_v35  ;;  %v3284_v44 = vpop.f32.mrb[93].mxu0  ;;  %v4068_v2 = vsel %vm3811_vm15, %v3280_v4, %v3940_v60 }
 0x2e8   : > { %v3285_v13 = vadd.f32 %v15738_v35, %v3284_v44  ;;  %v4067_v49 = vsel %vm3810_vm14, %v3275_v12, %v3939_v37  ;;  %14327 = vmatpush3.bf16.xpose.msra.mxu0 %v14324_v38 }
 0x2e9   : > { %12927 = vmatprep.mubr.f32.mxu1 %v4067_v49  ;;  %v3942_v39 = vmul.f32 %v15741_v32, %v3290_v53  ;;  %vm3813_vm2 = vcmp.ge.f32.partialorder %v3290_v53, 0.0 }
 0x2ea   : > { %v12711_v8 = vpop.f32.mrb[94].mxu0  ;;  %12928 = vmatmul.mubr.f32.gmra.mrb[218].mxu1 %v4068_v2  ;;  %vm3812_vm0 = vcmp.ge.f32.partialorder %v3285_v13, 0.0  ;;  %v3941_v42 = vmul.f32 %v15741_v32, %v3285_v13 }
 0x2eb   : > { %v3300_v54 = vadd.f32 %v12711_v8, %v15738_v35  ;;  %v3294_v25 = vpop.f32.mrb[95].mxu0  ;;  %v4070_v15 = vsel %vm3813_vm2, %v3290_v53, %v3942_v39 }
 0x2ec   : > { %v3295_v1 = vadd.f32 %v15738_v35, %v3294_v25  ;;  %v4069_v34 = vsel %vm3812_vm0, %v3285_v13, %v3941_v42 }
 0x2ed   : > { %12930 = vmatprep.mubr.f32.mxu1 %v4069_v34  ;;  %v3944_v18 = vmul.f32 %v15741_v32, %v3300_v54  ;;  %vm3815_vm4 = vcmp.ge.f32.partialorder %v3300_v54, 0.0 }
 0x2ee   : > { %v12714_v11 = vpop.f32.mrb[96].mxu0  ;;  %12931 = vmatmul.mubr.f32.gmra.mrb[220].mxu1 %v4070_v15  ;;  %vm3814_vm3 = vcmp.ge.f32.partialorder %v3295_v1, 0.0  ;;  %v3943_v59 = vmul.f32 %v15741_v32, %v3295_v1 }
 0x2ef   : > { %v3310_v24 = vadd.f32 %v12714_v11, %v15738_v35  ;;  %v3304_v6 = vpop.f32.mrb[97].mxu0  ;;  %v4072_v41 = vsel %vm3815_vm4, %v3300_v54, %v3944_v18 }
 0x2f0   : > { %v3305_v45 = vadd.f32 %v15738_v35, %v3304_v6  ;;  %v4071_v0 = vsel %vm3814_vm3, %v3295_v1, %v3943_v59 }
 0x2f1   : > { %12933 = vmatprep.mubr.f32.mxu1 %v4071_v0  ;;  %v3946_v29 = vmul.f32 %v15741_v32, %v3310_v24  ;;  %vm3817_vm6 = vcmp.ge.f32.partialorder %v3310_v24, 0.0  ;;  %v10875_v0 = vld [vmem:[%s18010_s4 + $0x210] sm:$0xff] }
 0x2f2   : > { %v12717_v56 = vpop.f32.mrb[98].mxu0  ;;  %12934 = vmatmul.mubr.f32.gmra.mrb[222].mxu1 %v4072_v41  ;;  %vm3816_vm5 = vcmp.ge.f32.partialorder %v3305_v45, 0.0  ;;  %v3945_v21 = vmul.f32 %v15741_v32, %v3305_v45  ;;  %v10876_v41 = vld [vmem:[%s18010_s4 + $0x218] sm:$0xff] }
 0x2f3   : > { %v3320_v46 = vadd.f32 %v12717_v56, %v15738_v35  ;;  %v3314_v57 = vpop.f32.mrb[99].mxu0  ;;  %v4074_v58 = vsel %vm3817_vm6, %v3310_v24, %v3946_v29  ;;  %v14332_v10 = vpack.c.bf16 %v10876_v41, %v10875_v0 }
 0x2f4   : > { %v3315_v27 = vadd.f32 %v15738_v35, %v3314_v57  ;;  %v4073_v7 = vsel %vm3816_vm5, %v3305_v45, %v3945_v21 }
 0x2f5   : > { %12936 = vmatprep.mubr.f32.mxu1 %v4073_v7  ;;  %v3948_v5 = vmul.f32 %v15741_v32, %v3320_v46  ;;  %vm3819_vm8 = vcmp.ge.f32.partialorder %v3320_v46, 0.0  ;;  %14333 = vmatprep.subr.bf16.mxu1 %v14332_v10 }
 0x2f6   : > { %v12720_v31 = vpop.f32.mrb[100].mxu0  ;;  %12937 = vmatmul.mubr.f32.gmra.mrb[224].mxu1 %v4074_v58  ;;  %vm3818_vm7 = vcmp.ge.f32.partialorder %v3315_v27, 0.0  ;;  %v3947_v30 = vmul.f32 %v15741_v32, %v3315_v27 }
 0x2f7   : > { %v3330_v17 = vadd.f32 %v12720_v31, %v15738_v35  ;;  %v3324_v20 = vpop.f32.mrb[101].mxu0  ;;  %v4076_v26 = vsel %vm3819_vm8, %v3320_v46, %v3948_v5  ;;  %14335 = vmatpush3.bf16.xpose.msra.mxu1 %v14332_v10 }
 0x2f8   : > { %v3325_v36 = vadd.f32 %v15738_v35, %v3324_v20  ;;  %v4075_v40 = vsel %vm3818_vm7, %v3315_v27, %v3947_v30 }
 0x2f9   : > { %12939 = vmatprep.mubr.f32.mxu1 %v4075_v40  ;;  %v3950_v3 = vmul.f32 %v15741_v32, %v3330_v17  ;;  %vm3821_vm10 = vcmp.ge.f32.partialorder %v3330_v17, 0.0 }
 0x2fa   : > { %v12723_v55 = vpop.f32.mrb[102].mxu0  ;;  %12940 = vmatmul.mubr.f32.gmra.mrb[226].mxu1 %v4076_v26  ;;  %vm3820_vm9 = vcmp.ge.f32.partialorder %v3325_v36, 0.0  ;;  %v3949_v9 = vmul.f32 %v15741_v32, %v3325_v36 }
 0x2fb   : > { %v3340_v33 = vadd.f32 %v12723_v55, %v15738_v35  ;;  %v3334_v19 = vpop.f32.mrb[103].mxu0  ;;  %v4078_v23 = vsel %vm3821_vm10, %v3330_v17, %v3950_v3 }
 0x2fc   : > { %v3335_v48 = vadd.f32 %v15738_v35, %v3334_v19  ;;  %v4077_v22 = vsel %vm3820_vm9, %v3325_v36, %v3949_v9 }
 0x2fd   : > { %12942 = vmatprep.mubr.f32.mxu1 %v4077_v22  ;;  %v3952_v16 = vmul.f32 %v15741_v32, %v3340_v33  ;;  %vm3823_vm12 = vcmp.ge.f32.partialorder %v3340_v33, 0.0 }
 0x2fe   : > { %v12726_v28 = vpop.f32.mrb[104].mxu0  ;;  %12943 = vmatmul.mubr.f32.gmra.mrb[228].mxu1 %v4078_v23  ;;  %vm3822_vm11 = vcmp.ge.f32.partialorder %v3335_v48, 0.0  ;;  %v3951_v14 = vmul.f32 %v15741_v32, %v3335_v48 }
 0x2ff   : > { %v3350_v4 = vadd.f32 %v12726_v28, %v15738_v35  ;;  %v3344_v61 = vpop.f32.mrb[105].mxu0  ;;  %v4080_v63 = vsel %vm3823_vm12, %v3340_v33, %v3952_v16 }
 0x300   : > { %v3345_v12 = vadd.f32 %v15738_v35, %v3344_v61  ;;  %v4079_v51 = vsel %vm3822_vm11, %v3335_v48, %v3951_v14 }
 0x301   : > { %12945 = vmatprep.mubr.f32.mxu1 %v4079_v51  ;;  %v3954_v60 = vmul.f32 %v15741_v32, %v3350_v4  ;;  %vm3825_vm14 = vcmp.ge.f32.partialorder %v3350_v4, 0.0 }
 0x302   : > { %v12729_v43 = vpop.f32.mrb[106].mxu0  ;;  %12946 = vmatmul.mubr.f32.gmra.mrb[230].mxu1 %v4080_v63  ;;  %vm3824_vm13 = vcmp.ge.f32.partialorder %v3345_v12, 0.0  ;;  %v3953_v37 = vmul.f32 %v15741_v32, %v3345_v12 }
 0x303   : > { %v3360_v53 = vadd.f32 %v12729_v43, %v15738_v35  ;;  %v3354_v44 = vpop.f32.mrb[107].mxu0  ;;  %v4082_v2 = vsel %vm3825_vm14, %v3350_v4, %v3954_v60 }
 0x304   : > { %v3355_v13 = vadd.f32 %v15738_v35, %v3354_v44  ;;  %v4081_v49 = vsel %vm3824_vm13, %v3345_v12, %v3953_v37 }
 0x305   : > { %12948 = vmatprep.mubr.f32.mxu1 %v4081_v49  ;;  %v3956_v39 = vmul.f32 %v15741_v32, %v3360_v53  ;;  %vm3827_vm0 = vcmp.ge.f32.partialorder %v3360_v53, 0.0 }
 0x306   : > { %v12732_v8 = vpop.f32.mrb[108].mxu0  ;;  %12949 = vmatmul.mubr.f32.gmra.mrb[232].mxu1 %v4082_v2  ;;  %vm3826_vm15 = vcmp.ge.f32.partialorder %v3355_v13, 0.0  ;;  %v3955_v42 = vmul.f32 %v15741_v32, %v3355_v13 }
 0x307   : > { %v3370_v54 = vadd.f32 %v12732_v8, %v15738_v35  ;;  %v3364_v25 = vpop.f32.mrb[109].mxu0  ;;  %v4084_v15 = vsel %vm3827_vm0, %v3360_v53, %v3956_v39 }
 0x308   : > { %v3365_v1 = vadd.f32 %v15738_v35, %v3364_v25  ;;  %v4083_v34 = vsel %vm3826_vm15, %v3355_v13, %v3955_v42 }
 0x309   : > { %12951 = vmatprep.mubr.f32.mxu1 %v4083_v34  ;;  %v3958_v18 = vmul.f32 %v15741_v32, %v3370_v54  ;;  %vm3829_vm3 = vcmp.ge.f32.partialorder %v3370_v54, 0.0 }
 0x30a   : > { %v12735_v50 = vpop.f32.mrb[110].mxu0  ;;  %12952 = vmatmul.mubr.f32.gmra.mrb[234].mxu1 %v4084_v15  ;;  %vm3828_vm2 = vcmp.ge.f32.partialorder %v3365_v1, 0.0  ;;  %v3957_v52 = vmul.f32 %v15741_v32, %v3365_v1 }
 0x30b   : > { %v3380_v11 = vadd.f32 %v12735_v50, %v15738_v35  ;;  %v3374_v59 = vpop.f32.mrb[111].mxu0  ;;  %v4086_v6 = vsel %vm3829_vm3, %v3370_v54, %v3958_v18 }
 0x30c   : > { %v3375_v47 = vadd.f32 %v15738_v35, %v3374_v59  ;;  %v4085_v24 = vsel %vm3828_vm2, %v3365_v1, %v3957_v52 }
 0x30d   : > { %12954 = vmatprep.mubr.f32.mxu1 %v4085_v24  ;;  %v3960_v45 = vmul.f32 %v15741_v32, %v3380_v11  ;;  %vm3831_vm5 = vcmp.ge.f32.partialorder %v3380_v11, 0.0 }
 0x30e   : > { %v12738_v29 = vpop.f32.mrb[112].mxu0  ;;  %12955 = vmatmul.mubr.f32.gmra.mrb[236].mxu1 %v4086_v6  ;;  %vm3830_vm4 = vcmp.ge.f32.partialorder %v3375_v47, 0.0  ;;  %v3959_v62 = vmul.f32 %v15741_v32, %v3375_v47 }
 0x30f   : > { %v3390_v56 = vadd.f32 %v12738_v29, %v15738_v35  ;;  %v3384_v21 = vpop.f32.mrb[113].mxu0  ;;  %v4088_v57 = vsel %vm3831_vm5, %v3380_v11, %v3960_v45  ;;  %v15940_v45 = vld [vmem:[%s18011_s5 + $0x1] ss:$0 sm:$0xff] }
 0x310   : > { %v3385_v38 = vadd.f32 %v15738_v35, %v3384_v21  ;;  %v4087_v46 = vsel %vm3830_vm4, %v3375_v47, %v3959_v62  ;;  %v10878_v21 = vld [vmem:[%s18010_s4 + $0x228] sm:$0xff] }
 0x311   : > { %12957 = vmatprep.mubr.f32.mxu1 %v4087_v46  ;;  %v3962_v27 = vmul.f32 %v15741_v32, %v3390_v56  ;;  %vm3833_vm7 = vcmp.ge.f32.partialorder %v3390_v56, 0.0 }
 0x312   : > { %v12741_v7 = vpop.f32.mrb[114].mxu0  ;;  %12958 = vmatmul.mubr.f32.gmra.mrb[238].mxu1 %v4088_v57  ;;  %vm3832_vm6 = vcmp.ge.f32.partialorder %v3385_v38, 0.0  ;;  %v3961_v58 = vmul.f32 %v15741_v32, %v3385_v38 }
 0x313   : > { %v3400_v5 = vadd.f32 %v12741_v7, %v15738_v35  ;;  %v3394_v31 = vpop.f32.mrb[115].mxu0  ;;  %v4090_v20 = vsel %vm3833_vm7, %v3390_v56, %v3962_v27  ;;  %v10877_v56 = vld [vmem:[%s18010_s4 + $0x220] sm:$0xff] }
 0x314   : > { %v3395_v30 = vadd.f32 %v15738_v35, %v3394_v31  ;;  %v4089_v17 = vsel %vm3832_vm6, %v3385_v38, %v3961_v58  ;;  %v14336_v57 = vpack.c.bf16 %v10878_v21, %v10877_v56  ;;  %v10879_v21 = vld [vmem:[%s18010_s4 + $0x230] sm:$0xff] }
 0x315   : > { %12960 = vmatprep.mubr.f32.mxu1 %v4089_v17  ;;  %v3964_v36 = vmul.f32 %v15741_v32, %v3400_v5  ;;  %vm3835_vm9 = vcmp.ge.f32.partialorder %v3400_v5, 0.0 }
 0x316   : > { %v12744_v40 = vpop.f32.mrb[116].mxu0  ;;  %12961 = vmatmul.mubr.f32.gmra.mrb[240].mxu1 %v4090_v20  ;;  %vm3834_vm8 = vcmp.ge.f32.partialorder %v3395_v30, 0.0  ;;  %v3963_v26 = vmul.f32 %v15741_v32, %v3395_v30  ;;  %14337 = vmatprep.subr.bf16.mxu1 %v14336_v57 }
 0x317   : > { %v3410_v3 = vadd.f32 %v12744_v40, %v15738_v35  ;;  %v3404_v55 = vpop.f32.mrb[117].mxu0  ;;  %v4092_v19 = vsel %vm3835_vm9, %v3400_v5, %v3964_v36  ;;  %14339 = vmatpush3.bf16.xpose.msra.mxu1 %v14336_v57 }
 0x318   : > { %v3405_v9 = vadd.f32 %v15738_v35, %v3404_v55  ;;  %v4091_v33 = vsel %vm3834_vm8, %v3395_v30, %v3963_v26 }
 0x319   : > { %12963 = vmatprep.mubr.f32.mxu1 %v4091_v33  ;;  %v3966_v48 = vmul.f32 %v15741_v32, %v3410_v3  ;;  %vm3837_vm11 = vcmp.ge.f32.partialorder %v3410_v3, 0.0 }
 0x31a   : > { %v12747_v22 = vpop.f32.mrb[118].mxu0  ;;  %12964 = vmatmul.mubr.f32.gmra.mrb[242].mxu1 %v4092_v19  ;;  %vm3836_vm10 = vcmp.ge.f32.partialorder %v3405_v9, 0.0  ;;  %v3965_v23 = vmul.f32 %v15741_v32, %v3405_v9 }
 0x31b   : > { %v3420_v16 = vadd.f32 %v12747_v22, %v15738_v35  ;;  %v3414_v28 = vpop.f32.mrb[119].mxu0  ;;  %v4094_v61 = vsel %vm3837_vm11, %v3410_v3, %v3966_v48 }
 0x31c   : > { %v3415_v14 = vadd.f32 %v15738_v35, %v3414_v28  ;;  %v4093_v4 = vsel %vm3836_vm10, %v3405_v9, %v3965_v23 }
 0x31d   : > { %12966 = vmatprep.mubr.f32.mxu1 %v4093_v4  ;;  %v3968_v12 = vmul.f32 %v15741_v32, %v3420_v16  ;;  %vm3839_vm13 = vcmp.ge.f32.partialorder %v3420_v16, 0.0 }
 0x31e   : > { %v12750_v51 = vpop.f32.mrb[120].mxu0  ;;  %12967 = vmatmul.mubr.f32.gmra.mrb[244].mxu1 %v4094_v61  ;;  %vm3838_vm12 = vcmp.ge.f32.partialorder %v3415_v14, 0.0  ;;  %v3967_v63 = vmul.f32 %v15741_v32, %v3415_v14 }
 0x31f   : > { %v3430_v60 = vadd.f32 %v12750_v51, %v15738_v35  ;;  %v3424_v43 = vpop.f32.mrb[121].mxu0  ;;  %v4096_v44 = vsel %vm3839_vm13, %v3420_v16, %v3968_v12 }
 0x320   : > { %v3425_v37 = vadd.f32 %v15738_v35, %v3424_v43  ;;  %v4095_v53 = vsel %vm3838_vm12, %v3415_v14, %v3967_v63 }
 0x321   : > { %12969 = vmatprep.mubr.f32.mxu1 %v4095_v53  ;;  %v3970_v13 = vmul.f32 %v15741_v32, %v3430_v60  ;;  %vm3841_vm15 = vcmp.ge.f32.partialorder %v3430_v60, 0.0 }
 0x322   : > { %v12753_v49 = vpop.f32.mrb[122].mxu0  ;;  %12970 = vmatmul.mubr.f32.gmra.mrb[246].mxu1 %v4096_v44  ;;  %vm3840_vm14 = vcmp.ge.f32.partialorder %v3425_v37, 0.0  ;;  %v3969_v2 = vmul.f32 %v15741_v32, %v3425_v37 }
 0x323   : > { %v3440_v39 = vadd.f32 %v12753_v49, %v15738_v35  ;;  %v3434_v8 = vpop.f32.mrb[123].mxu0  ;;  %v4098_v25 = vsel %vm3841_vm15, %v3430_v60, %v3970_v13 }
 0x324   : > { %v3435_v42 = vadd.f32 %v15738_v35, %v3434_v8  ;;  %v4097_v54 = vsel %vm3840_vm14, %v3425_v37, %v3969_v2 }
 0x325   : > { %12972 = vmatprep.mubr.f32.mxu1 %v4097_v54  ;;  %v3972_v1 = vmul.f32 %v15741_v32, %v3440_v39  ;;  %vm3843_vm2 = vcmp.ge.f32.partialorder %v3440_v39, 0.0 }
 0x326   : > { %v12756_v34 = vpop.f32.mrb[124].mxu0  ;;  %12973 = vmatmul.mubr.f32.gmra.mrb[248].mxu1 %v4098_v25  ;;  %vm3842_vm0 = vcmp.ge.f32.partialorder %v3435_v42, 0.0  ;;  %v3971_v15 = vmul.f32 %v15741_v32, %v3435_v42 }
 0x327   : > { %v3450_v18 = vadd.f32 %v12756_v34, %v15738_v35  ;;  %v3444_v50 = vpop.f32.mrb[125].mxu0  ;;  %v4100_v59 = vsel %vm3843_vm2, %v3440_v39, %v3972_v1 }
 0x328   : > { %v3445_v52 = vadd.f32 %v15738_v35, %v3444_v50  ;;  %v4099_v11 = vsel %vm3842_vm0, %v3435_v42, %v3971_v15 }
 0x329   : > { %12975 = vmatprep.mubr.f32.mxu1 %v4099_v11  ;;  %v3974_v47 = vmul.f32 %v15741_v32, %v3450_v18  ;;  %vm3845_vm4 = vcmp.ge.f32.partialorder %v3450_v18, 0.0 }
 0x32a   : > { %v12759_v24 = vpop.f32.mrb[126].mxu0  ;;  %12976 = vmatmul.mubr.f32.gmra.mrb[250].mxu1 %v4100_v59  ;;  %vm3844_vm3 = vcmp.ge.f32.partialorder %v3445_v52, 0.0  ;;  %v3973_v6 = vmul.f32 %v15741_v32, %v3445_v52 }
 0x32b   : > { %v3460_v0 = vadd.f32 %v15940_v45, %v12759_v24  ;;  %v3454_v41 = vpop.f32.mrb[127].mxu0  ;;  %v4102_v62 = vsel %vm3845_vm4, %v3450_v18, %v3974_v47 }
 0x32c   : > { %v3455_v35 = vadd.f32 %v15940_v45, %v3454_v41  ;;  %v4101_v29 = vsel %vm3844_vm3, %v3445_v52, %v3973_v6 }
 0x32d   : > { %12978 = vmatprep.mubr.f32.mxu1 %v4101_v29  ;;  %v3976_v10 = vmul.f32 %v15741_v32, %v3460_v0  ;;  %vm3847_vm6 = vcmp.ge.f32.partialorder %v3460_v0, 0.0 }
 0x32e   : > { %v12762_v38 = vpop.f32.mrb[128].mxu0  ;;  %12979 = vmatmul.mubr.f32.gmra.mrb[252].mxu1 %v4102_v62  ;;  %vm3846_vm5 = vcmp.ge.f32.partialorder %v3455_v35, 0.0  ;;  %v3975_v46 = vmul.f32 %v15741_v32, %v3455_v35 }
 0x32f   : > { %v3470_v27 = vadd.f32 %v15940_v45, %v12762_v38  ;;  %v3464_v7 = vpop.f32.mrb[129].mxu0  ;;  %v4104_v30 = vsel %vm3847_vm6, %v3460_v0, %v3976_v10  ;;  %v10880_v38 = vld [vmem:[%s18010_s4 + $0x238] sm:$0xff] }
 0x330   : > { %v3465_v58 = vadd.f32 %v15940_v45, %v3464_v7  ;;  %v4103_v5 = vsel %vm3846_vm5, %v3455_v35, %v3975_v46 }
 0x331   : > { %v3978_v31 = vmul.f32 %v15741_v32, %v3470_v27  ;;  %12981 = vmatprep.mubr.f32.mxu1 %v4103_v5  ;;  %vm3849_vm8 = vcmp.ge.f32.partialorder %v3470_v27, 0.0 }
 0x332   : > { %v12765_v17 = vpop.f32.mrb[130].mxu0  ;;  %12982 = vmatmul.mubr.f32.gmra.mrb[254].mxu1 %v4104_v30  ;;  %vm3848_vm7 = vcmp.ge.f32.partialorder %v3465_v58, 0.0  ;;  %v3977_v20 = vmul.f32 %v15741_v32, %v3465_v58 }
 0x333   : > { %v3480_v36 = vadd.f32 %v15940_v45, %v12765_v17  ;;  %v3474_v40 = vpop.f32.mrb[131].mxu0  ;;  %v4106_v9 = vsel %vm3849_vm8, %v3470_v27, %v3978_v31  ;;  %v14340_v27 = vpack.c.bf16 %v10880_v38, %v10879_v21 }
 0x334   : > { %v3475_v26 = vadd.f32 %v15940_v45, %v3474_v40  ;;  %v4105_v3 = vsel %vm3848_vm7, %v3465_v58, %v3977_v20 }
 0x335   : > { %v3980_v55 = vmul.f32 %v15741_v32, %v3480_v36  ;;  %12984 = vmatprep.mubr.f32.mxu1 %v4105_v3  ;;  %vm3851_vm10 = vcmp.ge.f32.partialorder %v3480_v36, 0.0  ;;  %14341 = vmatprep.subr.bf16.mxu1 %v14340_v27 }
 0x336   : > { %v12768_v33 = vpop.f32.mrb[132].mxu0  ;;  %12985 = vmatmul.mubr.f32.gmra.mrb[0].mxu1 %v4106_v9  ;;  %vm3850_vm9 = vcmp.ge.f32.partialorder %v3475_v26, 0.0  ;;  %v3979_v19 = vmul.f32 %v15741_v32, %v3475_v26 }
 0x337   : > { %v3490_v48 = vadd.f32 %v15940_v45, %v12768_v33  ;;  %v3484_v22 = vpop.f32.mrb[133].mxu0  ;;  %v4108_v14 = vsel %vm3851_vm10, %v3480_v36, %v3980_v55  ;;  %14343 = vmatpush3.bf16.xpose.msra.mxu1 %v14340_v27 }
 0x338   : > { %v3485_v23 = vadd.f32 %v15940_v45, %v3484_v22  ;;  %v4107_v16 = vsel %vm3850_vm9, %v3475_v26, %v3979_v19 }
 0x339   : > { %v3982_v28 = vmul.f32 %v15741_v32, %v3490_v48  ;;  %12987 = vmatprep.mubr.f32.mxu1 %v4107_v16  ;;  %vm3853_vm12 = vcmp.ge.f32.partialorder %v3490_v48, 0.0 }
 0x33a   : > { %v12771_v4 = vpop.f32.mrb[134].mxu0  ;;  %12988 = vmatmul.mubr.f32.gmra.mrb[2].mxu1 %v4108_v14  ;;  %vm3852_vm11 = vcmp.ge.f32.partialorder %v3485_v23, 0.0  ;;  %v3981_v61 = vmul.f32 %v15741_v32, %v3485_v23 }
 0x33b   : > { %v3500_v12 = vadd.f32 %v15940_v45, %v12771_v4  ;;  %v3494_v51 = vpop.f32.mrb[135].mxu0  ;;  %v4110_v37 = vsel %vm3853_vm12, %v3490_v48, %v3982_v28 }
 0x33c   : > { %v3495_v63 = vadd.f32 %v15940_v45, %v3494_v51  ;;  %v4109_v60 = vsel %vm3852_vm11, %v3485_v23, %v3981_v61 }
 0x33d   : > { %v3984_v43 = vmul.f32 %v15741_v32, %v3500_v12  ;;  %12990 = vmatprep.mubr.f32.mxu1 %v4109_v60  ;;  %vm3855_vm14 = vcmp.ge.f32.partialorder %v3500_v12, 0.0 }
 0x33e   : > { %v12774_v53 = vpop.f32.mrb[136].mxu0  ;;  %12991 = vmatmul.mubr.f32.gmra.mrb[4].mxu1 %v4110_v37  ;;  %vm3854_vm13 = vcmp.ge.f32.partialorder %v3495_v63, 0.0  ;;  %v3983_v44 = vmul.f32 %v15741_v32, %v3495_v63 }
 0x33f   : > { %v3510_v13 = vadd.f32 %v15940_v45, %v12774_v53  ;;  %v3504_v49 = vpop.f32.mrb[137].mxu0  ;;  %v4112_v42 = vsel %vm3855_vm14, %v3500_v12, %v3984_v43 }
 0x340   : > { %v3505_v2 = vadd.f32 %v15940_v45, %v3504_v49  ;;  %v4111_v39 = vsel %vm3854_vm13, %v3495_v63, %v3983_v44 }
 0x341   : > { %v3986_v8 = vmul.f32 %v15741_v32, %v3510_v13  ;;  %12993 = vmatprep.mubr.f32.mxu1 %v4111_v39  ;;  %vm3857_vm0 = vcmp.ge.f32.partialorder %v3510_v13, 0.0 }
 0x342   : > { %v12777_v54 = vpop.f32.mrb[138].mxu0  ;;  %12994 = vmatmul.mubr.f32.gmra.mrb[6].mxu1 %v4112_v42  ;;  %vm3856_vm15 = vcmp.ge.f32.partialorder %v3505_v2, 0.0  ;;  %v3985_v25 = vmul.f32 %v15741_v32, %v3505_v2 }
 0x343   : > { %v3520_v1 = vadd.f32 %v15940_v45, %v12777_v54  ;;  %v3514_v34 = vpop.f32.mrb[139].mxu0  ;;  %v4114_v52 = vsel %vm3857_vm0, %v3510_v13, %v3986_v8 }
 0x344   : > { %v3515_v15 = vadd.f32 %v15940_v45, %v3514_v34  ;;  %v4113_v18 = vsel %vm3856_vm15, %v3505_v2, %v3985_v25 }
 0x345   : > { %v3988_v50 = vmul.f32 %v15741_v32, %v3520_v1  ;;  %12996 = vmatprep.mubr.f32.mxu1 %v4113_v18  ;;  %vm3859_vm3 = vcmp.ge.f32.partialorder %v3520_v1, 0.0 }
 0x346   : > { %v12780_v11 = vpop.f32.mrb[140].mxu0  ;;  %12997 = vmatmul.mubr.f32.gmra.mrb[8].mxu1 %v4114_v52  ;;  %vm3858_vm2 = vcmp.ge.f32.partialorder %v3515_v15, 0.0  ;;  %v3987_v59 = vmul.f32 %v15741_v32, %v3515_v15 }
 0x347   : > { %v3530_v47 = vadd.f32 %v15940_v45, %v12780_v11  ;;  %v3524_v24 = vpop.f32.mrb[141].mxu0  ;;  %v4116_v35 = vsel %vm3859_vm3, %v3520_v1, %v3988_v50 }
 0x348   : > { %v3525_v6 = vadd.f32 %v15940_v45, %v3524_v24  ;;  %v4115_v0 = vsel %vm3858_vm2, %v3515_v15, %v3987_v59 }
 0x349   : > { %v3990_v41 = vmul.f32 %v15741_v32, %v3530_v47  ;;  %12999 = vmatprep.mubr.f32.mxu1 %v4115_v0  ;;  %vm3861_vm5 = vcmp.ge.f32.partialorder %v3530_v47, 0.0 }
 0x34a   : > { %v12783_v29 = vpop.f32.mrb[142].mxu0  ;;  %13000 = vmatmul.mubr.f32.gmra.mrb[10].mxu1 %v4116_v35  ;;  %vm3860_vm4 = vcmp.ge.f32.partialorder %v3525_v6, 0.0  ;;  %v3989_v62 = vmul.f32 %v15741_v32, %v3525_v6 }
 0x34b   : > { %v3540_v10 = vadd.f32 %v15940_v45, %v12783_v29  ;;  %v3534_v56 = vpop.f32.mrb[143].mxu0  ;;  %v4118_v58 = vsel %vm3861_vm5, %v3530_v47, %v3990_v41 }
 0x34c   : > { %v3535_v46 = vadd.f32 %v15940_v45, %v3534_v56  ;;  %v4117_v57 = vsel %vm3860_vm4, %v3525_v6, %v3989_v62 }
 0x34d   : > { %v3992_v7 = vmul.f32 %v15741_v32, %v3540_v10  ;;  %13002 = vmatprep.mubr.f32.mxu1 %v4117_v57  ;;  %vm3863_vm7 = vcmp.ge.f32.partialorder %v3540_v10, 0.0 }
 0x34e   : > { %v12786_v5 = vpop.f32.mrb[144].mxu0  ;;  %13003 = vmatmul.mubr.f32.gmra.mrb[12].mxu1 %v4118_v58  ;;  %vm3862_vm6 = vcmp.ge.f32.partialorder %v3535_v46, 0.0  ;;  %v3991_v31 = vmul.f32 %v15741_v32, %v3535_v46  ;;  %v10882_v58 = vld [vmem:[%s18010_s4 + $0x248] sm:$0xff] }
 0x34f   : > { %v3550_v30 = vadd.f32 %v15940_v45, %v12786_v5  ;;  %v3544_v17 = vpop.f32.mrb[145].mxu0  ;;  %v4120_v26 = vsel %vm3863_vm7, %v3540_v10, %v3992_v7  ;;  %v10881_v7 = vld [vmem:[%s18010_s4 + $0x240] sm:$0xff] }
 0x350   : > { %v3545_v20 = vadd.f32 %v15940_v45, %v3544_v17  ;;  %v4119_v36 = vsel %vm3862_vm6, %v3535_v46, %v3991_v31 }
 0x351   : > { %v3994_v40 = vmul.f32 %v15741_v32, %v3550_v30  ;;  %13005 = vmatprep.mubr.f32.mxu1 %v4119_v36  ;;  %vm3865_vm9 = vcmp.ge.f32.partialorder %v3550_v30, 0.0 }
 0x352   : > { %v12789_v3 = vpop.f32.mrb[146].mxu0  ;;  %13006 = vmatmul.mubr.f32.gmra.mrb[14].mxu1 %v4120_v26  ;;  %vm3864_vm8 = vcmp.ge.f32.partialorder %v3545_v20, 0.0  ;;  %v3993_v55 = vmul.f32 %v15741_v32, %v3545_v20 }
 0x353   : > { %v3560_v9 = vadd.f32 %v15940_v45, %v12789_v3  ;;  %v3554_v33 = vpop.f32.mrb[147].mxu0  ;;  %v4122_v23 = vsel %vm3865_vm9, %v3550_v30, %v3994_v40  ;;  %v14344_v30 = vpack.c.bf16 %v10882_v58, %v10881_v7 }
 0x354   : > { %v3555_v19 = vadd.f32 %v15940_v45, %v3554_v33  ;;  %v4121_v48 = vsel %vm3864_vm8, %v3545_v20, %v3993_v55 }
 0x355   : > { %v3996_v22 = vmul.f32 %v15741_v32, %v3560_v9  ;;  %13008 = vmatprep.mubr.f32.mxu1 %v4121_v48  ;;  %vm3867_vm11 = vcmp.ge.f32.partialorder %v3560_v9, 0.0  ;;  %14345 = vmatprep.subr.bf16.mxu1 %v14344_v30 }
 0x356   : > { %v12792_v16 = vpop.f32.mrb[148].mxu0  ;;  %13009 = vmatmul.mubr.f32.gmra.mrb[16].mxu1 %v4122_v23  ;;  %vm3866_vm10 = vcmp.ge.f32.partialorder %v3555_v19, 0.0  ;;  %v3995_v28 = vmul.f32 %v15741_v32, %v3555_v19 }
 0x357   : > { %v3570_v14 = vadd.f32 %v15940_v45, %v12792_v16  ;;  %v3564_v4 = vpop.f32.mrb[149].mxu0  ;;  %v4124_v63 = vsel %vm3867_vm11, %v3560_v9, %v3996_v22  ;;  %14347 = vmatpush3.bf16.xpose.msra.mxu1 %v14344_v30 }
 0x358   : > { %v3565_v61 = vadd.f32 %v15940_v45, %v3564_v4  ;;  %v4123_v12 = vsel %vm3866_vm10, %v3555_v19, %v3995_v28 }
 0x359   : > { %v3998_v51 = vmul.f32 %v15741_v32, %v3570_v14  ;;  %13011 = vmatprep.mubr.f32.mxu1 %v4123_v12  ;;  %vm3869_vm13 = vcmp.ge.f32.partialorder %v3570_v14, 0.0 }
 0x35a   : > { %v12795_v60 = vpop.f32.mrb[150].mxu0  ;;  %13012 = vmatmul.mubr.f32.gmra.mrb[18].mxu1 %v4124_v63  ;;  %vm3868_vm12 = vcmp.ge.f32.partialorder %v3565_v61, 0.0  ;;  %v3997_v43 = vmul.f32 %v15741_v32, %v3565_v61 }
 0x35b   : > { %v3580_v37 = vadd.f32 %v15940_v45, %v12795_v60  ;;  %v3574_v53 = vpop.f32.mrb[151].mxu0  ;;  %v4126_v2 = vsel %vm3869_vm13, %v3570_v14, %v3998_v51 }
 0x35c   : > { %v3575_v44 = vadd.f32 %v15940_v45, %v3574_v53  ;;  %v4125_v13 = vsel %vm3868_vm12, %v3565_v61, %v3997_v43 }
 0x35d   : > { %v4000_v49 = vmul.f32 %v15741_v32, %v3580_v37  ;;  %13014 = vmatprep.mubr.f32.mxu1 %v4125_v13  ;;  %vm3871_vm15 = vcmp.ge.f32.partialorder %v3580_v37, 0.0 }
 0x35e   : > { %v12798_v39 = vpop.f32.mrb[152].mxu0  ;;  %13015 = vmatmul.mubr.f32.gmra.mrb[20].mxu1 %v4126_v2  ;;  %vm3870_vm14 = vcmp.ge.f32.partialorder %v3575_v44, 0.0  ;;  %v3999_v8 = vmul.f32 %v15741_v32, %v3575_v44 }
 0x35f   : > { %v3590_v42 = vadd.f32 %v15940_v45, %v12798_v39  ;;  %v3584_v54 = vpop.f32.mrb[153].mxu0  ;;  %v4128_v15 = vsel %vm3871_vm15, %v3580_v37, %v4000_v49 }
 0x360   : > { %v3585_v25 = vadd.f32 %v15940_v45, %v3584_v54  ;;  %v4127_v1 = vsel %vm3870_vm14, %v3575_v44, %v3999_v8 }
 0x361   : > { %v4002_v34 = vmul.f32 %v15741_v32, %v3590_v42  ;;  %13017 = vmatprep.mubr.f32.mxu1 %v4127_v1  ;;  %vm3873_vm2 = vcmp.ge.f32.partialorder %v3590_v42, 0.0 }
 0x362   : > { %v12801_v18 = vpop.f32.mrb[154].mxu0  ;;  %13018 = vmatmul.mubr.f32.gmra.mrb[22].mxu1 %v4128_v15  ;;  %vm3872_vm0 = vcmp.ge.f32.partialorder %v3585_v25, 0.0  ;;  %v4001_v50 = vmul.f32 %v15741_v32, %v3585_v25 }
 0x363   : > { %v3600_v52 = vadd.f32 %v15940_v45, %v12801_v18  ;;  %v3594_v11 = vpop.f32.mrb[155].mxu0  ;;  %v4130_v6 = vsel %vm3873_vm2, %v3590_v42, %v4002_v34 }
 0x364   : > { %v3595_v59 = vadd.f32 %v15940_v45, %v3594_v11  ;;  %v4129_v47 = vsel %vm3872_vm0, %v3585_v25, %v4001_v50 }
 0x365   : > { %v4004_v24 = vmul.f32 %v15741_v32, %v3600_v52  ;;  %13020 = vmatprep.mubr.f32.mxu1 %v4129_v47  ;;  %vm3875_vm4 = vcmp.ge.f32.partialorder %v3600_v52, 0.0 }
 0x366   : > { %v12804_v0 = vpop.f32.mrb[156].mxu0  ;;  %13021 = vmatmul.mubr.f32.gmra.mrb[24].mxu1 %v4130_v6  ;;  %vm3874_vm3 = vcmp.ge.f32.partialorder %v3595_v59, 0.0  ;;  %v4003_v41 = vmul.f32 %v15741_v32, %v3595_v59 }
 0x367   : > { %v3610_v35 = vadd.f32 %v15940_v45, %v12804_v0  ;;  %v3604_v29 = vpop.f32.mrb[157].mxu0  ;;  %v4132_v21 = vsel %vm3875_vm4, %v3600_v52, %v4004_v24 }
 0x368   : > { %v3605_v62 = vadd.f32 %v15940_v45, %v3604_v29  ;;  %v4131_v10 = vsel %vm3874_vm3, %v3595_v59, %v4003_v41 }
 0x369   : > { %v4006_v56 = vmul.f32 %v15741_v32, %v3610_v35  ;;  %13023 = vmatprep.mubr.f32.mxu1 %v4131_v10  ;;  %vm3877_vm6 = vcmp.ge.f32.partialorder %v3610_v35, 0.0 }
 0x36a   : > { %v12807_v38 = vpop.f32.mrb[158].mxu0  ;;  %13024 = vmatmul.mubr.f32.gmra.mrb[26].mxu1 %v4132_v21  ;;  %vm3876_vm5 = vcmp.ge.f32.partialorder %v3605_v62, 0.0  ;;  %v4005_v46 = vmul.f32 %v15741_v32, %v3605_v62 }
 0x36b   : > { %v3620_v57 = vadd.f32 %v15940_v45, %v12807_v38  ;;  %v3614_v27 = vpop.f32.mrb[159].mxu0  ;;  %v4134_v20 = vsel %vm3877_vm6, %v3610_v35, %v4006_v56 }
 0x36c   : > { %v3615_v5 = vadd.f32 %v15940_v45, %v3614_v27  ;;  %v4133_v31 = vsel %vm3876_vm5, %v3605_v62, %v4005_v46  ;;  %v16056_v46 = vld [vmem:[%s18011_s5 + $0x2] ss:$0 sm:$0xff] }
 0x36d   : > { %v4008_v17 = vmul.f32 %v15741_v32, %v3620_v57  ;;  %13026 = vmatprep.mubr.f32.mxu1 %v4133_v31  ;;  %vm3879_vm8 = vcmp.ge.f32.partialorder %v3620_v57, 0.0 }
 0x36e   : > { %v12810_v36 = vpop.f32.mrb[160].mxu0  ;;  %13027 = vmatmul.mubr.f32.gmra.mrb[28].mxu1 %v4134_v20  ;;  %vm3878_vm7 = vcmp.ge.f32.partialorder %v3615_v5, 0.0  ;;  %v4007_v40 = vmul.f32 %v15741_v32, %v3615_v5 }
 0x36f   : > { %v3630_v26 = vadd.f32 %v15940_v45, %v12810_v36  ;;  %v3624_v3 = vpop.f32.mrb[161].mxu0  ;;  %v4136_v19 = vsel %vm3879_vm8, %v3620_v57, %v4008_v17 }
 0x370   : > { %v3625_v55 = vadd.f32 %v15940_v45, %v3624_v3  ;;  %v4135_v9 = vsel %vm3878_vm7, %v3615_v5, %v4007_v40  ;;  %v16060_v5 = vstv %s10853_s12 }
 0x371   : > { %v4010_v33 = vmul.f32 %v15741_v32, %v3630_v26  ;;  %13029 = vmatprep.mubr.f32.mxu1 %v4135_v9  ;;  %vm3881_vm10 = vcmp.ge.f32.partialorder %v3630_v26, 0.0 }
 0x372   : > { %v12813_v48 = vpop.f32.mrb[162].mxu0  ;;  %13030 = vmatmul.mubr.f32.gmra.mrb[30].mxu1 %v4136_v19  ;;  %vm3880_vm9 = vcmp.ge.f32.partialorder %v3625_v55, 0.0  ;;  %v4009_v22 = vmul.f32 %v15741_v32, %v3625_v55 }
 0x373   : > { %v3640_v23 = vadd.f32 %v15940_v45, %v12813_v48  ;;  %v3634_v16 = vpop.f32.mrb[163].mxu0  ;;  %v4138_v61 = vsel %vm3881_vm10, %v3630_v26, %v4010_v33 }
 0x374   : > { %v3635_v28 = vadd.f32 %v15940_v45, %v3634_v16  ;;  %v4137_v14 = vsel %vm3880_vm9, %v3625_v55, %v4009_v22 }
 0x375   : > { %v4012_v4 = vmul.f32 %v15741_v32, %v3640_v23  ;;  %13032 = vmatprep.mubr.f32.mxu1 %v4137_v14  ;;  %vm3883_vm12 = vcmp.ge.f32.partialorder %v3640_v23, 0.0 }
 0x376   : > { %v12816_v12 = vpop.f32.mrb[164].mxu0  ;;  %13033 = vmatmul.mubr.f32.gmra.mrb[32].mxu1 %v4138_v61  ;;  %vm3882_vm11 = vcmp.ge.f32.partialorder %v3635_v28, 0.0  ;;  %v4011_v51 = vmul.f32 %v15741_v32, %v3635_v28 }
 0x377   : > { %v3650_v63 = vadd.f32 %v15940_v45, %v12816_v12  ;;  %v3644_v60 = vpop.f32.mrb[165].mxu0  ;;  %v4140_v44 = vsel %vm3883_vm12, %v3640_v23, %v4012_v4 }
 0x378   : > { %v3645_v43 = vadd.f32 %v15940_v45, %v3644_v60  ;;  %v4139_v37 = vsel %vm3882_vm11, %v3635_v28, %v4011_v51 }
 0x379   : > { %v4014_v53 = vmul.f32 %v15741_v32, %v3650_v63  ;;  %13035 = vmatprep.mubr.f32.mxu1 %v4139_v37  ;;  %vm3885_vm14 = vcmp.ge.f32.partialorder %v3650_v63, 0.0 }
 0x37a   : > { %v12819_v13 = vpop.f32.mrb[166].mxu0  ;;  %13036 = vmatmul.mubr.f32.gmra.mrb[34].mxu1 %v4140_v44  ;;  %vm3884_vm13 = vcmp.ge.f32.partialorder %v3645_v43, 0.0  ;;  %v4013_v49 = vmul.f32 %v15741_v32, %v3645_v43 }
 0x37b   : > { %v3660_v2 = vadd.f32 %v15940_v45, %v12819_v13  ;;  %v3654_v39 = vpop.f32.mrb[167].mxu0  ;;  %v4142_v25 = vsel %vm3885_vm14, %v3650_v63, %v4014_v53 }
 0x37c   : > { %v3655_v8 = vadd.f32 %v15940_v45, %v3654_v39  ;;  %v4141_v42 = vsel %vm3884_vm13, %v3645_v43, %v4013_v49 }
 0x37d   : > { %v4016_v54 = vmul.f32 %v15741_v32, %v3660_v2  ;;  %13038 = vmatprep.mubr.f32.mxu1 %v4141_v42  ;;  %vm3887_vm0 = vcmp.ge.f32.partialorder %v3660_v2, 0.0 }
 0x37e   : > { %v12822_v1 = vpop.f32.mrb[168].mxu0  ;;  %13039 = vmatmul.mubr.f32.gmra.mrb[36].mxu1 %v4142_v25  ;;  %vm3886_vm15 = vcmp.ge.f32.partialorder %v3655_v8, 0.0  ;;  %v4015_v34 = vmul.f32 %v15741_v32, %v3655_v8 }
 0x37f   : > { %v3670_v15 = vadd.f32 %v15940_v45, %v12822_v1  ;;  %v3664_v18 = vpop.f32.mrb[169].mxu0  ;;  %v4144_v59 = vsel %vm3887_vm0, %v3660_v2, %v4016_v54 }
 0x380   : > { %v3665_v50 = vadd.f32 %v15940_v45, %v3664_v18  ;;  %v4143_v52 = vsel %vm3886_vm15, %v3655_v8, %v4015_v34 }
 0x381   : > { %v4018_v11 = vmul.f32 %v15741_v32, %v3670_v15  ;;  %13041 = vmatprep.mubr.f32.mxu1 %v4143_v52  ;;  %vm3889_vm3 = vcmp.ge.f32.partialorder %v3670_v15, 0.0 }
 0x382   : > { %v12825_v47 = vpop.f32.mrb[170].mxu0  ;;  %13042 = vmatmul.mubr.f32.gmra.mrb[38].mxu1 %v4144_v59  ;;  %vm3888_vm2 = vcmp.ge.f32.partialorder %v3665_v50, 0.0  ;;  %v4017_v24 = vmul.f32 %v15741_v32, %v3665_v50 }
 0x383   : > { %v3680_v6 = vadd.f32 %v15940_v45, %v12825_v47  ;;  %v3674_v0 = vpop.f32.mrb[171].mxu0  ;;  %v4146_v62 = vsel %vm3889_vm3, %v3670_v15, %v4018_v11 }
 0x384   : > { %v3675_v41 = vadd.f32 %v15940_v45, %v3674_v0  ;;  %v4145_v35 = vsel %vm3888_vm2, %v3665_v50, %v4017_v24 }
 0x385   : > { %v4020_v29 = vmul.f32 %v15741_v32, %v3680_v6  ;;  %13044 = vmatprep.mubr.f32.mxu1 %v4145_v35  ;;  %vm3891_vm5 = vcmp.ge.f32.partialorder %v3680_v6, 0.0 }
 0x386   : > { %v12828_v10 = vpop.f32.mrb[172].mxu0  ;;  %13045 = vmatmul.mubr.f32.gmra.mrb[40].mxu1 %v4146_v62  ;;  %vm3890_vm4 = vcmp.ge.f32.partialorder %v3675_v41, 0.0  ;;  %v4019_v56 = vmul.f32 %v15741_v32, %v3675_v41 }
 0x387   : > { %v3690_v21 = vadd.f32 %v15940_v45, %v12828_v10  ;;  %v3684_v38 = vpop.f32.mrb[173].mxu0  ;;  %v4148_v31 = vsel %vm3891_vm5, %v3680_v6, %v4020_v29 }
 0x388   : > { %v3685_v57 = vadd.f32 %v15940_v45, %v3684_v38  ;;  %v4147_v27 = vsel %vm3890_vm4, %v3675_v41, %v4019_v56 }
 0x389   : > { %v4022_v7 = vmul.f32 %v15741_v32, %v3690_v21  ;;  %v12890_v58 = vpop.f32.mrb[192].mxu1  ;;  %13047 = vmatprep.mubr.f32.mxu1 %v4147_v27  ;;  %vm3893_vm6 = vcmp.ge.f32.partialorder %v3690_v21, 0.0 }
 0x38a   : > { %v4266_v30 = vadd.f32 %v12890_v58, %v16056_v46  ;;  %v12831_v17 = vpop.f32.mrb[174].mxu0  ;;  %v4260_v20 = vpop.f32.mrb[193].mxu1  ;;  %13048 = vmatmul.mubr.f32.gmra.mrb[42].mxu1 %v4148_v31  ;;  %vm3892_vm7 = vcmp.ge.f32.partialorder %v3685_v57, 0.0  ;;  %v4021_v36 = vmul.f32 %v15741_v32, %v3685_v57 }
 0x38b   : > { %v3700_v40 = vadd.f32 %v15940_v45, %v12831_v17  ;;  %v4261_v26 = vadd.f32 %v16056_v46, %v4260_v20  ;;  %v3694_v3 = vpop.f32.mrb[175].mxu0  ;;  %v4150_v55 = vsel %vm3893_vm6, %v3690_v21, %v4022_v7 }
 0x38c   : > { %v5030_v9 = vmul.f32 %v16060_v5, %v4266_v30  ;;  %v3695_v33 = vadd.f32 %v15940_v45, %v3694_v3  ;;  %v4149_v19 = vsel %vm3892_vm7, %v3685_v57, %v4021_v36  ;;  %vm4901_vm8 = vcmp.ge.f32.partialorder %v4266_v30, 0.0 }
 0x38d   : > { %v4024_v48 = vmul.f32 %v15741_v32, %v3700_v40  ;;  %v12893_v22 = vpop.f32.mrb[194].mxu1  ;;  %13050 = vmatprep.mubr.f32.mxu1 %v4149_v19  ;;  %vm4900_vm9 = vcmp.ge.f32.partialorder %v4261_v26, 0.0  ;;  %v5029_v23 = vmul.f32 %v16060_v5, %v4261_v26  ;;  %vm3895_vm10 = vcmp.ge.f32.partialorder %v3700_v40, 0.0 }
 0x38e   : > { %v4276_v16 = vadd.f32 %v12893_v22, %v16056_v46  ;;  %v12834_v28 = vpop.f32.mrb[176].mxu0  ;;  %v4270_v14 = vpop.f32.mrb[195].mxu1  ;;  %13051 = vmatmul.mubr.f32.gmra.mrb[44].mxu1 %v4150_v55  ;;  %vm3894_vm11 = vcmp.ge.f32.partialorder %v3695_v33, 0.0  ;;  %v4023_v4 = vmul.f32 %v15741_v32, %v3695_v33  ;;  %v5158_v61 = vsel %vm4901_vm8, %v4266_v30, %v5030_v9 }
 0x38f   : > { %v3710_v12 = vadd.f32 %v15940_v45, %v12834_v28  ;;  %v4271_v51 = vadd.f32 %v16056_v46, %v4270_v14  ;;  %v3704_v63 = vpop.f32.mrb[177].mxu0  ;;  %v5157_v60 = vsel %vm4900_vm9, %v4261_v26, %v5029_v23  ;;  %v4152_v43 = vsel %vm3895_vm10, %v3700_v40, %v4024_v48 }
 0x390   : > { %v3705_v37 = vadd.f32 %v15940_v45, %v3704_v63  ;;  %13112 = vmatprep.mubr.f32.mxu0 %v5157_v60  ;;  %v4151_v53 = vsel %vm3894_vm11, %v3695_v33, %v4023_v4  ;;  %vm4903_vm12 = vcmp.ge.f32.partialorder %v4276_v16, 0.0  ;;  %v5032_v44 = vmul.f32 %v16060_v5, %v4276_v16 }
 0x391   : > { %v4026_v13 = vmul.f32 %v15741_v32, %v3710_v12  ;;  %v12896_v49 = vpop.f32.mrb[196].mxu1  ;;  %13053 = vmatprep.mubr.f32.mxu1 %v4151_v53  ;;  %13113 = vmatmul.mubr.f32.vlgmr.msra.gmra.mrb[192].mxu0 %v5158_v61  ;;  %vm4902_vm13 = vcmp.ge.f32.partialorder %v4271_v51, 0.0  ;;  %v5031_v2 = vmul.f32 %v16060_v5, %v4271_v51  ;;  %vm3897_vm14 = vcmp.ge.f32.partialorder %v3710_v12, 0.0 }
 0x392   : > { %v4286_v39 = vadd.f32 %v12896_v49, %v16056_v46  ;;  %v12837_v8 = vpop.f32.mrb[178].mxu0  ;;  %v4280_v42 = vpop.f32.mrb[197].mxu1  ;;  %13054 = vmatmul.mubr.f32.gmra.mrb[46].mxu1 %v4152_v43  ;;  %vm3896_vm15 = vcmp.ge.f32.partialorder %v3705_v37, 0.0  ;;  %v4025_v54 = vmul.f32 %v15741_v32, %v3705_v37  ;;  %v5160_v25 = vsel %vm4903_vm12, %v4276_v16, %v5032_v44 }
 0x393   : > { %v3720_v1 = vadd.f32 %v15940_v45, %v12837_v8  ;;  %v4281_v34 = vadd.f32 %v16056_v46, %v4280_v42  ;;  %v3714_v15 = vpop.f32.mrb[179].mxu0  ;;  %v5159_v18 = vsel %vm4902_vm13, %v4271_v51, %v5031_v2  ;;  %v4154_v50 = vsel %vm3897_vm14, %v3710_v12, %v4026_v13 }
 0x394   : > { %v3715_v52 = vadd.f32 %v15940_v45, %v3714_v15  ;;  %13115 = vmatprep.mubr.f32.mxu0 %v5159_v18  ;;  %v4153_v11 = vsel %vm3896_vm15, %v3705_v37, %v4025_v54  ;;  %vm4905_vm0 = vcmp.ge.f32.partialorder %v4286_v39, 0.0  ;;  %v5034_v59 = vmul.f32 %v16060_v5, %v4286_v39 }
 0x395   : > { %v4028_v47 = vmul.f32 %v15741_v32, %v3720_v1  ;;  %v12899_v24 = vpop.f32.mrb[198].mxu1  ;;  %13056 = vmatprep.mubr.f32.mxu1 %v4153_v11  ;;  %13116 = vmatmul.mubr.f32.gmra.mrb[194].mxu0 %v5160_v25  ;;  %vm4904_vm2 = vcmp.ge.f32.partialorder %v4281_v34, 0.0  ;;  %v5033_v6 = vmul.f32 %v16060_v5, %v4281_v34  ;;  %vm3899_vm3 = vcmp.ge.f32.partialorder %v3720_v1, 0.0 }
 0x396   : > { %v4296_v0 = vadd.f32 %v12899_v24, %v16056_v46  ;;  %v12840_v41 = vpop.f32.mrb[180].mxu0  ;;  %v4290_v35 = vpop.f32.mrb[199].mxu1  ;;  %13057 = vmatmul.mubr.f32.gmra.mrb[48].mxu1 %v4154_v50  ;;  %vm3898_vm4 = vcmp.ge.f32.partialorder %v3715_v52, 0.0  ;;  %v4027_v29 = vmul.f32 %v15741_v32, %v3715_v52  ;;  %v5162_v62 = vsel %vm4905_vm0, %v4286_v39, %v5034_v59 }
 0x397   : > { %v3730_v10 = vadd.f32 %v15940_v45, %v12840_v41  ;;  %v4291_v56 = vadd.f32 %v16056_v46, %v4290_v35  ;;  %v3724_v21 = vpop.f32.mrb[181].mxu0  ;;  %v5161_v38 = vsel %vm4904_vm2, %v4281_v34, %v5033_v6  ;;  %v4156_v57 = vsel %vm3899_vm3, %v3720_v1, %v4028_v47 }
 0x398   : > { %v3725_v27 = vadd.f32 %v15940_v45, %v3724_v21  ;;  %13118 = vmatprep.mubr.f32.mxu0 %v5161_v38  ;;  %v4155_v7 = vsel %vm3898_vm4, %v3715_v52, %v4027_v29  ;;  %vm4907_vm5 = vcmp.ge.f32.partialorder %v4296_v0, 0.0  ;;  %v5036_v58 = vmul.f32 %v16060_v5, %v4296_v0 }
 0x399   : > { %v4030_v31 = vmul.f32 %v15741_v32, %v3730_v10  ;;  %v12902_v30 = vpop.f32.mrb[200].mxu1  ;;  %13059 = vmatprep.mubr.f32.mxu1 %v4155_v7  ;;  %13119 = vmatmul.mubr.f32.gmra.mrb[196].mxu0 %v5162_v62  ;;  %vm4906_vm6 = vcmp.ge.f32.partialorder %v4291_v56, 0.0  ;;  %v5035_v17 = vmul.f32 %v16060_v5, %v4291_v56  ;;  %vm3901_vm7 = vcmp.ge.f32.partialorder %v3730_v10, 0.0 }
 0x39a   : > { %v4306_v20 = vadd.f32 %v12902_v30, %v16056_v46  ;;  %v12843_v36 = vpop.f32.mrb[182].mxu0  ;;  %v4300_v40 = vpop.f32.mrb[201].mxu1  ;;  %13060 = vmatmul.mubr.f32.gmra.mrb[50].mxu1 %v4156_v57  ;;  %vm3900_vm8 = vcmp.ge.f32.partialorder %v3725_v27, 0.0  ;;  %v4029_v26 = vmul.f32 %v15741_v32, %v3725_v27  ;;  %v5164_v3 = vsel %vm4907_vm5, %v4296_v0, %v5036_v58 }
 0x39b   : > { %v3740_v55 = vadd.f32 %v15940_v45, %v12843_v36  ;;  %v4301_v9 = vadd.f32 %v16056_v46, %v4300_v40  ;;  %v3734_v33 = vpop.f32.mrb[183].mxu0  ;;  %v5163_v19 = vsel %vm4906_vm6, %v4291_v56, %v5035_v17  ;;  %v4158_v48 = vsel %vm3901_vm7, %v3730_v10, %v4030_v31 }
 0x39c   : > { %v3735_v22 = vadd.f32 %v15940_v45, %v3734_v33  ;;  %13121 = vmatprep.mubr.f32.mxu0 %v5163_v19  ;;  %v4157_v23 = vsel %vm3900_vm8, %v3725_v27, %v4029_v26  ;;  %vm4909_vm9 = vcmp.ge.f32.partialorder %v4306_v20, 0.0  ;;  %v5038_v16 = vmul.f32 %v16060_v5, %v4306_v20 }
 0x39d   : > { %v4032_v28 = vmul.f32 %v15741_v32, %v3740_v55  ;;  %v12905_v14 = vpop.f32.mrb[202].mxu1  ;;  %13062 = vmatprep.mubr.f32.mxu1 %v4157_v23  ;;  %13122 = vmatmul.mubr.f32.gmra.mrb[198].mxu0 %v5164_v3  ;;  %vm4908_vm10 = vcmp.ge.f32.partialorder %v4301_v9, 0.0  ;;  %v5037_v4 = vmul.f32 %v16060_v5, %v4301_v9  ;;  %vm3903_vm11 = vcmp.ge.f32.partialorder %v3740_v55, 0.0 }
 0x39e   : > { %v4316_v61 = vadd.f32 %v12905_v14, %v16056_v46  ;;  %v12846_v12 = vpop.f32.mrb[184].mxu0  ;;  %v4310_v51 = vpop.f32.mrb[203].mxu1  ;;  %13063 = vmatmul.mubr.f32.gmra.mrb[52].mxu1 %v4158_v48  ;;  %vm3902_vm12 = vcmp.ge.f32.partialorder %v3735_v22, 0.0  ;;  %v4031_v63 = vmul.f32 %v15741_v32, %v3735_v22  ;;  %v5166_v60 = vsel %vm4909_vm9, %v4306_v20, %v5038_v16 }
 0x39f   : > { %v3750_v43 = vadd.f32 %v15940_v45, %v12846_v12  ;;  %v4311_v37 = vadd.f32 %v16056_v46, %v4310_v51  ;;  %v3744_v53 = vpop.f32.mrb[185].mxu0  ;;  %v5165_v44 = vsel %vm4908_vm10, %v4301_v9, %v5037_v4  ;;  %v4160_v13 = vsel %vm3903_vm11, %v3740_v55, %v4032_v28  ;;  %v10883_v12 = vld [vmem:[%s18010_s4 + $0x250] sm:$0xff]  ;;  %v10884_v51 = vld [vmem:[%s18010_s4 + $0x258] sm:$0xff] }
 0x3a0   : > { %v3745_v49 = vadd.f32 %v15940_v45, %v3744_v53  ;;  %13124 = vmatprep.mubr.f32.mxu0 %v5165_v44  ;;  %v4159_v2 = vsel %vm3902_vm12, %v3735_v22, %v4031_v63  ;;  %vm4911_vm13 = vcmp.ge.f32.partialorder %v4316_v61, 0.0  ;;  %v5040_v39 = vmul.f32 %v16060_v5, %v4316_v61 }
 0x3a1   : > { %v4034_v8 = vmul.f32 %v15741_v32, %v3750_v43  ;;  %v12908_v42 = vpop.f32.mrb[204].mxu1  ;;  %13065 = vmatprep.mubr.f32.mxu1 %v4159_v2  ;;  %13125 = vmatmul.mubr.f32.gmra.mrb[200].mxu0 %v5166_v60  ;;  %vm4910_vm14 = vcmp.ge.f32.partialorder %v4311_v37, 0.0  ;;  %v5039_v54 = vmul.f32 %v16060_v5, %v4311_v37  ;;  %vm3905_vm15 = vcmp.ge.f32.partialorder %v3750_v43, 0.0 }
 0x3a2   : > { %v4326_v25 = vadd.f32 %v12908_v42, %v16056_v46  ;;  %v12849_v1 = vpop.f32.mrb[186].mxu0  ;;  %v4320_v34 = vpop.f32.mrb[205].mxu1  ;;  %13066 = vmatmul.mubr.f32.gmra.mrb[54].mxu1 %v4160_v13  ;;  %vm3904_vm0 = vcmp.ge.f32.partialorder %v3745_v49, 0.0  ;;  %v4033_v15 = vmul.f32 %v15741_v32, %v3745_v49  ;;  %v5168_v18 = vsel %vm4911_vm13, %v4316_v61, %v5040_v39 }
 0x3a3   : > { %v3760_v50 = vadd.f32 %v15940_v45, %v12849_v1  ;;  %v4321_v52 = vadd.f32 %v16056_v46, %v4320_v34  ;;  %v3754_v11 = vpop.f32.mrb[187].mxu0  ;;  %v5167_v59 = vsel %vm4910_vm14, %v4311_v37, %v5039_v54  ;;  %v4162_v47 = vsel %vm3905_vm15, %v3750_v43, %v4034_v8  ;;  %v10885_v43 = vld [vmem:[%s18010_s4 + $0x260] sm:$0xff]  ;;  %v10886_v37 = vld [vmem:[%s18010_s4 + $0x268] sm:$0xff] }
 0x3a4   : > { %v3755_v24 = vadd.f32 %v15940_v45, %v3754_v11  ;;  %13127 = vmatprep.mubr.f32.mxu0 %v5167_v59  ;;  %v4161_v6 = vsel %vm3904_vm0, %v3745_v49, %v4033_v15  ;;  %vm4913_vm2 = vcmp.ge.f32.partialorder %v4326_v25, 0.0  ;;  %v5042_v0 = vmul.f32 %v16060_v5, %v4326_v25 }
 0x3a5   : > { %v4036_v41 = vmul.f32 %v15741_v32, %v3760_v50  ;;  %v12911_v35 = vpop.f32.mrb[206].mxu1  ;;  %13068 = vmatprep.mubr.f32.mxu1 %v4161_v6  ;;  %13128 = vmatmul.mubr.f32.gmra.mrb[202].mxu0 %v5168_v18  ;;  %vm4912_vm3 = vcmp.ge.f32.partialorder %v4321_v52, 0.0  ;;  %v5041_v29 = vmul.f32 %v16060_v5, %v4321_v52  ;;  %vm3907_vm4 = vcmp.ge.f32.partialorder %v3760_v50, 0.0 }
 0x3a6   : > { %v4336_v62 = vadd.f32 %v12911_v35, %v16056_v46  ;;  %v12852_v10 = vpop.f32.mrb[188].mxu0  ;;  %v4330_v56 = vpop.f32.mrb[207].mxu1  ;;  %13069 = vmatmul.mubr.f32.gmra.mrb[56].mxu1 %v4162_v47  ;;  %vm3906_vm5 = vcmp.ge.f32.partialorder %v3755_v24, 0.0  ;;  %v4035_v21 = vmul.f32 %v15741_v32, %v3755_v24  ;;  %v5170_v38 = vsel %vm4913_vm2, %v4326_v25, %v5042_v0 }
 0x3a7   : > { %v3770_v57 = vadd.f32 %v15940_v45, %v12852_v10  ;;  %v4331_v27 = vadd.f32 %v16056_v46, %v4330_v56  ;;  %v3764_v7 = vpop.f32.mrb[189].mxu0  ;;  %v5169_v58 = vsel %vm4912_vm3, %v4321_v52, %v5041_v29  ;;  %v4164_v31 = vsel %vm3907_vm4, %v3760_v50, %v4036_v41 }
 0x3a8   : > { %v3765_v30 = vadd.f32 %v15940_v45, %v3764_v7  ;;  %13130 = vmatprep.mubr.f32.mxu0 %v5169_v58  ;;  %v4163_v17 = vsel %vm3906_vm5, %v3755_v24, %v4035_v21  ;;  %vm4915_vm6 = vcmp.ge.f32.partialorder %v4336_v62, 0.0  ;;  %v5044_v20 = vmul.f32 %v16060_v5, %v4336_v62 }
 0x3a9   : > { %v4038_v36 = vmul.f32 %v15741_v32, %v3770_v57  ;;  %v12914_v40 = vpop.f32.mrb[208].mxu1  ;;  %13071 = vmatprep.mubr.f32.mxu1 %v4163_v17  ;;  %13131 = vmatmul.mubr.f32.gmra.mrb[204].mxu0 %v5170_v38  ;;  %vm4914_vm7 = vcmp.ge.f32.partialorder %v4331_v27, 0.0  ;;  %v5043_v26 = vmul.f32 %v16060_v5, %v4331_v27  ;;  %vm3909_vm8 = vcmp.ge.f32.partialorder %v3770_v57, 0.0 }
 0x3aa   : > { %v4346_v3 = vadd.f32 %v12914_v40, %v16056_v46  ;;  %v12855_v55 = vpop.f32.mrb[190].mxu0  ;;  %v4340_v9 = vpop.f32.mrb[209].mxu1  ;;  %13072 = vmatmul.mubr.f32.gmra.mrb[58].mxu1 %v4164_v31  ;;  %vm3908_vm9 = vcmp.ge.f32.partialorder %v3765_v30, 0.0  ;;  %v4037_v33 = vmul.f32 %v15741_v32, %v3765_v30  ;;  %v5172_v16 = vsel %vm4915_vm6, %v4336_v62, %v5044_v20 }
 0x3ab   : > { %v3780_v19 = vadd.f32 %v15940_v45, %v12855_v55  ;;  %v4341_v48 = vadd.f32 %v16056_v46, %v4340_v9  ;;  %v3774_v22 = vpop.f32.mrb[191].mxu0  ;;  %v5171_v23 = vsel %vm4914_vm7, %v4331_v27, %v5043_v26  ;;  %v4166_v4 = vsel %vm3909_vm8, %v3770_v57, %v4038_v36 }
 0x3ac   : > { %v3775_v28 = vadd.f32 %v15940_v45, %v3774_v22  ;;  %13133 = vmatprep.mubr.f32.mxu0 %v5171_v23  ;;  %v4165_v14 = vsel %vm3908_vm9, %v3765_v30, %v4037_v33  ;;  %v5046_v61 = vmul.f32 %v16060_v5, %v4346_v3  ;;  %vm4917_vm11 = vcmp.ge.f32.partialorder %v4346_v3, 0.0 }
 0x3ad   : > { %v4040_v63 = vmul.f32 %v15741_v32, %v3780_v19  ;;  %v12917_v60 = vpop.f32.mrb[210].mxu1  ;;  %13074 = vmatprep.mubr.f32.mxu1 %v4165_v14  ;;  %13134 = vmatmul.mubr.f32.gmra.mrb[206].mxu0 %v5172_v16  ;;  %vm4916_vm10 = vcmp.ge.f32.partialorder %v4341_v48, 0.0  ;;  %v5045_v45 = vmul.f32 %v16060_v5, %v4341_v48  ;;  %vm3911_vm13 = vcmp.ge.f32.partialorder %v3780_v19, 0.0 }
 0x3ae   : > { %v4356_v53 = vadd.f32 %v12917_v60, %v16056_v46  ;;  %v4350_v44 = vpop.f32.mrb[211].mxu1  ;;  %13075 = vmatmul.mubr.f32.gmra.mrb[60].mxu1 %v4166_v4  ;;  %vm3910_vm12 = vcmp.ge.f32.partialorder %v3775_v28, 0.0  ;;  %v4039_v13 = vmul.f32 %v15741_v32, %v3775_v28  ;;  %v14348_v39 = vpack.c.bf16 %v10884_v51, %v10883_v12 }
 0x3af   : > { %v4351_v49 = vadd.f32 %v16056_v46, %v4350_v44  ;;  %v5173_v2 = vsel %vm4916_vm10, %v4341_v48, %v5045_v45  ;;  %v5174_v42 = vsel %vm4917_vm11, %v4346_v3, %v5046_v61  ;;  %v14352_v25 = vpack.c.bf16 %v10886_v37, %v10885_v43  ;;  %v10892_v45 = vld [vmem:[%s18010_s4 + $0x280] sm:$0xff]  ;;  %v10893_v43 = vld [vmem:[%s18010_s4 + $0x288] sm:$0xff] }
 0x3b0   : > { %13136 = vmatprep.mubr.f32.mxu0 %v5173_v2  ;;  %v4167_v8 = vsel %vm3910_vm12, %v3775_v28, %v4039_v13  ;;  %v5048_v54 = vmul.f32 %v16060_v5, %v4356_v53  ;;  %v4168_v34 = vsel %vm3911_vm13, %v3780_v19, %v4040_v63  ;;  %vm4919_vm15 = vcmp.ge.f32.partialorder %v4356_v53, 0.0  ;;  %14349 = vmatprep.subr.bf16.mxu1 %v14348_v39 }
 0x3b1   : > { %v12920_v1 = vpop.f32.mrb[212].mxu1  ;;  %13077 = vmatprep.mubr.f32.mxu1 %v4167_v8  ;;  %13137 = vmatmul.mubr.f32.gmra.mrb[208].mxu0 %v5174_v42  ;;  %vm4918_vm14 = vcmp.ge.f32.partialorder %v4351_v49, 0.0  ;;  %v5047_v15 = vmul.f32 %v16060_v5, %v4351_v49  ;;  %v14360_v44 = vpack.c.bf16 %v10893_v43, %v10892_v45 }
 0x3b2   : > { %v4366_v32 = vadd.f32 %v12920_v1, %v16056_v46  ;;  %v4360_v18 = vpop.f32.mrb[213].mxu1  ;;  %13078 = vmatmul.mubr.f32.gmra.mrb[62].mxu1 %v4168_v34  ;;  %v5176_v11 = vsel %vm4919_vm15, %v4356_v53, %v5048_v54  ;;  %v10887_v54 = vld [vmem:[%s18010_s4 + $0x270] sm:$0xff] }
 0x3b3   : > { %v4361_v50 = vadd.f32 %v16056_v46, %v4360_v18  ;;  %v5175_v52 = vsel %vm4918_vm14, %v4351_v49, %v5047_v15  ;;  %14351 = vmatpush3.bf16.xpose.msra.mxu1 %v14348_v39  ;;  %14361 = vmatprep.subr.bf16.mxu0 %v14360_v44 }
 0x3b4   : > { %13139 = vmatprep.mubr.f32.mxu0 %v5175_v52  ;;  %v5050_v59 = vmul.f32 %v16060_v5, %v4366_v32  ;;  %14353 = vmatprep.subr.bf16.mxu1 %v14352_v25  ;;  %vm4921_vm2 = vcmp.ge.f32.partialorder %v4366_v32, 0.0 }
 0x3b5   : > { %v12923_v47 = vpop.f32.mrb[214].mxu1  ;;  %13140 = vmatmul.mubr.f32.gmra.mrb[210].mxu0 %v5176_v11  ;;  %vm4920_vm0 = vcmp.ge.f32.partialorder %v4361_v50, 0.0  ;;  %v5049_v24 = vmul.f32 %v16060_v5, %v4361_v50 }
 0x3b6   : > { %v4376_v6 = vadd.f32 %v12923_v47, %v16056_v46  ;;  %v4370_v0 = vpop.f32.mrb[215].mxu1  ;;  %v5178_v29 = vsel %vm4921_vm2, %v4366_v32, %v5050_v59  ;;  %14363 = vmatpush3.bf16.xpose.msra.mxu0 %v14360_v44 }
 0x3b7   : > { %v4371_v41 = vadd.f32 %v16056_v46, %v4370_v0  ;;  %v5177_v35 = vsel %vm4920_vm0, %v4361_v50, %v5049_v24 }
 0x3b8   : > { %13142 = vmatprep.mubr.f32.mxu0 %v5177_v35  ;;  %v5052_v62 = vmul.f32 %v16060_v5, %v4376_v6  ;;  %vm4923_vm4 = vcmp.ge.f32.partialorder %v4376_v6, 0.0 }
 0x3b9   : > { %v12926_v10 = vpop.f32.mrb[216].mxu1  ;;  %13143 = vmatmul.mubr.f32.gmra.mrb[212].mxu0 %v5178_v29  ;;  %vm4922_vm3 = vcmp.ge.f32.partialorder %v4371_v41, 0.0  ;;  %v5051_v56 = vmul.f32 %v16060_v5, %v4371_v41 }
 0x3ba   : > { %v4386_v21 = vadd.f32 %v12926_v10, %v16056_v46  ;;  %v4380_v38 = vpop.f32.mrb[217].mxu1  ;;  %v5180_v7 = vsel %vm4923_vm4, %v4376_v6, %v5052_v62 }
 0x3bb   : > { %v4381_v57 = vadd.f32 %v16056_v46, %v4380_v38  ;;  %v5179_v27 = vsel %vm4922_vm3, %v4371_v41, %v5051_v56  ;;  %14355 = vmatpush3.bf16.xpose.msra.mxu1 %v14352_v25  ;;  %v10888_v25 = vld [vmem:[%s18010_s4 + $0x278] sm:$0xff] }
 0x3bc   : > { %13145 = vmatprep.mubr.f32.mxu0 %v5179_v27  ;;  %v5054_v58 = vmul.f32 %v16060_v5, %v4386_v21  ;;  %vm4925_vm6 = vcmp.ge.f32.partialorder %v4386_v21, 0.0  ;;  %v14356_v15 = vpack.c.bf16 %v10888_v25, %v10887_v54  ;;  %v10895_v54 = vld [vmem:[%s18010_s4 + $0x298] sm:$0xff] }
 0x3bd   : > { %v12929_v31 = vpop.f32.mrb[218].mxu1  ;;  %13146 = vmatmul.mubr.f32.gmra.mrb[214].mxu0 %v5180_v7  ;;  %vm4924_vm5 = vcmp.ge.f32.partialorder %v4381_v57, 0.0  ;;  %v5053_v30 = vmul.f32 %v16060_v5, %v4381_v57 }
 0x3be   : > { %v4396_v17 = vadd.f32 %v12929_v31, %v16056_v46  ;;  %v4390_v20 = vpop.f32.mrb[219].mxu1  ;;  %v5182_v26 = vsel %vm4925_vm6, %v4386_v21, %v5054_v58  ;;  %14357 = vmatprep.subr.bf16.mxu1 %v14356_v15 }
 0x3bf   : > { %v4391_v36 = vadd.f32 %v16056_v46, %v4390_v20  ;;  %v5181_v40 = vsel %vm4924_vm5, %v4381_v57, %v5053_v30 }
 0x3c0   : > { %13148 = vmatprep.mubr.f32.mxu0 %v5181_v40  ;;  %v5056_v3 = vmul.f32 %v16060_v5, %v4396_v17  ;;  %vm4927_vm8 = vcmp.ge.f32.partialorder %v4396_v17, 0.0 }
 0x3c1   : > { %v12932_v55 = vpop.f32.mrb[220].mxu1  ;;  %13149 = vmatmul.mubr.f32.gmra.mrb[216].mxu0 %v5182_v26  ;;  %vm4926_vm7 = vcmp.ge.f32.partialorder %v4391_v36, 0.0  ;;  %v5055_v9 = vmul.f32 %v16060_v5, %v4391_v36 }
 0x3c2   : > { %v4406_v33 = vadd.f32 %v12932_v55, %v16056_v46  ;;  %v4400_v19 = vpop.f32.mrb[221].mxu1  ;;  %v5184_v23 = vsel %vm4927_vm8, %v4396_v17, %v5056_v3 }
 0x3c3   : > { %v4401_v48 = vadd.f32 %v16056_v46, %v4400_v19  ;;  %v5183_v22 = vsel %vm4926_vm7, %v4391_v36, %v5055_v9  ;;  %14359 = vmatpush3.bf16.xpose.msra.mxu1 %v14356_v15 }
 0x3c4   : > { %13151 = vmatprep.mubr.f32.mxu0 %v5183_v22  ;;  %v5058_v16 = vmul.f32 %v16060_v5, %v4406_v33  ;;  %vm4929_vm10 = vcmp.ge.f32.partialorder %v4406_v33, 0.0 }
 0x3c5   : > { %v12935_v28 = vpop.f32.mrb[222].mxu1  ;;  %13152 = vmatmul.mubr.f32.gmra.mrb[218].mxu0 %v5184_v23  ;;  %vm4928_vm9 = vcmp.ge.f32.partialorder %v4401_v48, 0.0  ;;  %v5057_v14 = vmul.f32 %v16060_v5, %v4401_v48 }
 0x3c6   : > { %v4416_v4 = vadd.f32 %v12935_v28, %v16056_v46  ;;  %v4410_v61 = vpop.f32.mrb[223].mxu1  ;;  %v5186_v63 = vsel %vm4929_vm10, %v4406_v33, %v5058_v16 }
 0x3c7   : > { %v4411_v12 = vadd.f32 %v16056_v46, %v4410_v61  ;;  %v5185_v51 = vsel %vm4928_vm9, %v4401_v48, %v5057_v14 }
 0x3c8   : > { %13154 = vmatprep.mubr.f32.mxu0 %v5185_v51  ;;  %v5060_v60 = vmul.f32 %v16060_v5, %v4416_v4  ;;  %vm4931_vm12 = vcmp.ge.f32.partialorder %v4416_v4, 0.0 }
 0x3c9   : > { %v12938_v37 = vpop.f32.mrb[224].mxu1  ;;  %13155 = vmatmul.mubr.f32.gmra.mrb[220].mxu0 %v5186_v63  ;;  %vm4930_vm11 = vcmp.ge.f32.partialorder %v4411_v12, 0.0  ;;  %v5059_v53 = vmul.f32 %v16060_v5, %v4411_v12 }
 0x3ca   : > { %v4426_v13 = vadd.f32 %v12938_v37, %v16056_v46  ;;  %v4420_v49 = vpop.f32.mrb[225].mxu1  ;;  %v5188_v8 = vsel %vm4931_vm12, %v4416_v4, %v5060_v60 }
 0x3cb   : > { %v4421_v2 = vadd.f32 %v16056_v46, %v4420_v49  ;;  %v5187_v39 = vsel %vm4930_vm11, %v4411_v12, %v5059_v53 }
 0x3cc   : > { %13157 = vmatprep.mubr.f32.mxu0 %v5187_v39  ;;  %v5062_v42 = vmul.f32 %v16060_v5, %v4426_v13  ;;  %vm4933_vm14 = vcmp.ge.f32.partialorder %v4426_v13, 0.0 }
 0x3cd   : > { %v12941_v1 = vpop.f32.mrb[226].mxu1  ;;  %13158 = vmatmul.mubr.f32.gmra.mrb[222].mxu0 %v5188_v8  ;;  %vm4932_vm13 = vcmp.ge.f32.partialorder %v4421_v2, 0.0  ;;  %v5061_v34 = vmul.f32 %v16060_v5, %v4421_v2 }
 0x3ce   : > { %v4436_v32 = vadd.f32 %v12941_v1, %v16056_v46  ;;  %v4430_v18 = vpop.f32.mrb[227].mxu1  ;;  %v5190_v11 = vsel %vm4933_vm14, %v4426_v13, %v5062_v42  ;;  %v10894_v42 = vld [vmem:[%s18010_s4 + $0x290] sm:$0xff] }
 0x3cf   : > { %v4431_v50 = vadd.f32 %v16056_v46, %v4430_v18  ;;  %v5189_v52 = vsel %vm4932_vm13, %v4421_v2, %v5061_v34  ;;  %v14364_v34 = vpack.c.bf16 %v10895_v54, %v10894_v42 }
 0x3d0   : > { %13160 = vmatprep.mubr.f32.mxu0 %v5189_v52  ;;  %v5064_v59 = vmul.f32 %v16060_v5, %v4436_v32  ;;  %vm4935_vm0 = vcmp.ge.f32.partialorder %v4436_v32, 0.0 }
 0x3d1   : > { %v12944_v47 = vpop.f32.mrb[228].mxu1  ;;  %13161 = vmatmul.mubr.f32.gmra.mrb[224].mxu0 %v5190_v11  ;;  %vm4934_vm15 = vcmp.ge.f32.partialorder %v4431_v50, 0.0  ;;  %v5063_v24 = vmul.f32 %v16060_v5, %v4431_v50  ;;  %14365 = vmatprep.subr.bf16.mxu0 %v14364_v34 }
 0x3d2   : > { %v4446_v6 = vadd.f32 %v12944_v47, %v16056_v46  ;;  %v4440_v0 = vpop.f32.mrb[229].mxu1  ;;  %v5192_v29 = vsel %vm4935_vm0, %v4436_v32, %v5064_v59  ;;  %14367 = vmatpush3.bf16.xpose.msra.mxu0 %v14364_v34  ;;  %v10897_v34 = vld [vmem:[%s18010_s4 + $0x2a8] sm:$0xff] }
 0x3d3   : > { %v4441_v41 = vadd.f32 %v16056_v46, %v4440_v0  ;;  %v5191_v35 = vsel %vm4934_vm15, %v4431_v50, %v5063_v24 }
 0x3d4   : > { %13163 = vmatprep.mubr.f32.mxu0 %v5191_v35  ;;  %v5066_v62 = vmul.f32 %v16060_v5, %v4446_v6  ;;  %vm4937_vm3 = vcmp.ge.f32.partialorder %v4446_v6, 0.0 }
 0x3d5   : > { %v12947_v10 = vpop.f32.mrb[230].mxu1  ;;  %13164 = vmatmul.mubr.f32.gmra.mrb[226].mxu0 %v5192_v29  ;;  %vm4936_vm2 = vcmp.ge.f32.partialorder %v4441_v41, 0.0  ;;  %v5065_v56 = vmul.f32 %v16060_v5, %v4441_v41 }
 0x3d6   : > { %v4456_v21 = vadd.f32 %v12947_v10, %v16056_v46  ;;  %v4450_v38 = vpop.f32.mrb[231].mxu1  ;;  %v5194_v7 = vsel %vm4937_vm3, %v4446_v6, %v5066_v62 }
 0x3d7   : > { %v4451_v57 = vadd.f32 %v16056_v46, %v4450_v38  ;;  %v5193_v27 = vsel %vm4936_vm2, %v4441_v41, %v5065_v56 }
 0x3d8   : > { %13166 = vmatprep.mubr.f32.mxu0 %v5193_v27  ;;  %v5068_v58 = vmul.f32 %v16060_v5, %v4456_v21  ;;  %vm4939_vm5 = vcmp.ge.f32.partialorder %v4456_v21, 0.0 }
 0x3d9   : > { %v12950_v31 = vpop.f32.mrb[232].mxu1  ;;  %13167 = vmatmul.mubr.f32.gmra.mrb[228].mxu0 %v5194_v7  ;;  %vm4938_vm4 = vcmp.ge.f32.partialorder %v4451_v57, 0.0  ;;  %v5067_v30 = vmul.f32 %v16060_v5, %v4451_v57 }
 0x3da   : > { %v4466_v17 = vadd.f32 %v12950_v31, %v16056_v46  ;;  %v4460_v20 = vpop.f32.mrb[233].mxu1  ;;  %v5196_v26 = vsel %vm4939_vm5, %v4456_v21, %v5068_v58 }
 0x3db   : > { %v4461_v36 = vadd.f32 %v16056_v46, %v4460_v20  ;;  %v5195_v40 = vsel %vm4938_vm4, %v4451_v57, %v5067_v30 }
 0x3dc   : > { %13169 = vmatprep.mubr.f32.mxu0 %v5195_v40  ;;  %v5070_v3 = vmul.f32 %v16060_v5, %v4466_v17  ;;  %vm4941_vm7 = vcmp.ge.f32.partialorder %v4466_v17, 0.0 }
 0x3dd   : > { %v12953_v55 = vpop.f32.mrb[234].mxu1  ;;  %13170 = vmatmul.mubr.f32.gmra.mrb[230].mxu0 %v5196_v26  ;;  %vm4940_vm6 = vcmp.ge.f32.partialorder %v4461_v36, 0.0  ;;  %v5069_v9 = vmul.f32 %v16060_v5, %v4461_v36 }
 0x3de   : > { %v4476_v33 = vadd.f32 %v12953_v55, %v16056_v46  ;;  %v4470_v19 = vpop.f32.mrb[235].mxu1  ;;  %v5198_v23 = vsel %vm4941_vm7, %v4466_v17, %v5070_v3 }
 0x3df   : > { %v4471_v48 = vadd.f32 %v16056_v46, %v4470_v19  ;;  %v5197_v22 = vsel %vm4940_vm6, %v4461_v36, %v5069_v9 }
 0x3e0   : > { %13172 = vmatprep.mubr.f32.mxu0 %v5197_v22  ;;  %v5072_v16 = vmul.f32 %v16060_v5, %v4476_v33  ;;  %vm4943_vm9 = vcmp.ge.f32.partialorder %v4476_v33, 0.0 }
 0x3e1   : > { %v12956_v28 = vpop.f32.mrb[236].mxu1  ;;  %13173 = vmatmul.mubr.f32.gmra.mrb[232].mxu0 %v5198_v23  ;;  %vm4942_vm8 = vcmp.ge.f32.partialorder %v4471_v48, 0.0  ;;  %v5071_v14 = vmul.f32 %v16060_v5, %v4471_v48 }
 0x3e2   : > { %v4486_v4 = vadd.f32 %v12956_v28, %v16056_v46  ;;  %v4480_v61 = vpop.f32.mrb[237].mxu1  ;;  %v5200_v63 = vsel %vm4943_vm9, %v4476_v33, %v5072_v16 }
 0x3e3   : > { %v4481_v12 = vadd.f32 %v16056_v46, %v4480_v61  ;;  %v5199_v51 = vsel %vm4942_vm8, %v4471_v48, %v5071_v14 }
 0x3e4   : > { %13175 = vmatprep.mubr.f32.mxu0 %v5199_v51  ;;  %v5074_v60 = vmul.f32 %v16060_v5, %v4486_v4  ;;  %vm4945_vm11 = vcmp.ge.f32.partialorder %v4486_v4, 0.0 }
 0x3e5   : > { %v12959_v45 = vpop.f32.mrb[238].mxu1  ;;  %13176 = vmatmul.mubr.f32.gmra.mrb[234].mxu0 %v5200_v63  ;;  %vm4944_vm10 = vcmp.ge.f32.partialorder %v4481_v12, 0.0  ;;  %v5073_v43 = vmul.f32 %v16060_v5, %v4481_v12 }
 0x3e6   : > { %v4496_v37 = vadd.f32 %v12959_v45, %v16056_v46  ;;  %v4490_v53 = vpop.f32.mrb[239].mxu1  ;;  %v5202_v49 = vsel %vm4945_vm11, %v4486_v4, %v5074_v60 }
 0x3e7   : > { %v4491_v44 = vadd.f32 %v16056_v46, %v4490_v53  ;;  %v5201_v13 = vsel %vm4944_vm10, %v4481_v12, %v5073_v43 }
 0x3e8   : > { %13178 = vmatprep.mubr.f32.mxu0 %v5201_v13  ;;  %v5076_v2 = vmul.f32 %v16060_v5, %v4496_v37  ;;  %vm4947_vm13 = vcmp.ge.f32.partialorder %v4496_v37, 0.0 }
 0x3e9   : > { %v12962_v39 = vpop.f32.mrb[240].mxu1  ;;  %13179 = vmatmul.mubr.f32.gmra.mrb[236].mxu0 %v5202_v49  ;;  %vm4946_vm12 = vcmp.ge.f32.partialorder %v4491_v44, 0.0  ;;  %v5075_v8 = vmul.f32 %v16060_v5, %v4491_v44 }
 0x3ea   : > { %v4506_v25 = vadd.f32 %v12962_v39, %v16056_v46  ;;  %v4500_v1 = vpop.f32.mrb[241].mxu1  ;;  %v5204_v18 = vsel %vm4947_vm13, %v4496_v37, %v5076_v2  ;;  %v16257_v2 = vld [vmem:[%s18011_s5 + $0x2] ss:$0 sm:$0xff] }
 0x3eb   : > { %v4501_v15 = vadd.f32 %v16056_v46, %v4500_v1  ;;  %v5203_v32 = vsel %vm4946_vm12, %v4491_v44, %v5075_v8  ;;  %v10896_v1 = vld [vmem:[%s18010_s4 + $0x2a0] sm:$0xff] }
 0x3ec   : > { %13181 = vmatprep.mubr.f32.mxu0 %v5203_v32  ;;  %v5078_v50 = vmul.f32 %v16060_v5, %v4506_v25  ;;  %vm4949_vm15 = vcmp.ge.f32.partialorder %v4506_v25, 0.0 }
 0x3ed   : > { %v12965_v52 = vpop.f32.mrb[242].mxu1  ;;  %13182 = vmatmul.mubr.f32.gmra.mrb[238].mxu0 %v5204_v18  ;;  %vm4948_vm14 = vcmp.ge.f32.partialorder %v4501_v15, 0.0  ;;  %v5077_v11 = vmul.f32 %v16060_v5, %v4501_v15  ;;  %v14368_v18 = vpack.c.bf16 %v10897_v34, %v10896_v1 }
 0x3ee   : > { %v4516_v59 = vadd.f32 %v12965_v52, %v16056_v46  ;;  %v4510_v47 = vpop.f32.mrb[243].mxu1  ;;  %v5206_v0 = vsel %vm4949_vm15, %v4506_v25, %v5078_v50 }
 0x3ef   : > { %v4511_v24 = vadd.f32 %v16056_v46, %v4510_v47  ;;  %v5205_v6 = vsel %vm4948_vm14, %v4501_v15, %v5077_v11  ;;  %14369 = vmatprep.subr.bf16.mxu0 %v14368_v18 }
 0x3f0   : > { %13184 = vmatprep.mubr.f32.mxu0 %v5205_v6  ;;  %v5080_v41 = vmul.f32 %v16060_v5, %v4516_v59  ;;  %vm4951_vm2 = vcmp.ge.f32.partialorder %v4516_v59, 0.0  ;;  %14371 = vmatpush3.bf16.xpose.msra.mxu0 %v14368_v18  ;;  %v10899_v18 = vld [vmem:[%s18010_s4 + $0x2b8] sm:$0xff] }
 0x3f1   : > { %v12968_v35 = vpop.f32.mrb[244].mxu1  ;;  %13185 = vmatmul.mubr.f32.gmra.mrb[240].mxu0 %v5206_v0  ;;  %vm4950_vm0 = vcmp.ge.f32.partialorder %v4511_v24, 0.0  ;;  %v5079_v29 = vmul.f32 %v16060_v5, %v4511_v24 }
 0x3f2   : > { %v4526_v62 = vadd.f32 %v12968_v35, %v16056_v46  ;;  %v4520_v10 = vpop.f32.mrb[245].mxu1  ;;  %v5208_v38 = vsel %vm4951_vm2, %v4516_v59, %v5080_v41 }
 0x3f3   : > { %v4521_v56 = vadd.f32 %v16056_v46, %v4520_v10  ;;  %v5207_v21 = vsel %vm4950_vm0, %v4511_v24, %v5079_v29 }
 0x3f4   : > { %13187 = vmatprep.mubr.f32.mxu0 %v5207_v21  ;;  %v5082_v57 = vmul.f32 %v16060_v5, %v4526_v62  ;;  %vm4953_vm4 = vcmp.ge.f32.partialorder %v4526_v62, 0.0 }
 0x3f5   : > { %v12971_v27 = vpop.f32.mrb[246].mxu1  ;;  %13188 = vmatmul.mubr.f32.gmra.mrb[242].mxu0 %v5208_v38  ;;  %vm4952_vm3 = vcmp.ge.f32.partialorder %v4521_v56, 0.0  ;;  %v5081_v7 = vmul.f32 %v16060_v5, %v4521_v56 }
 0x3f6   : > { %v4536_v58 = vadd.f32 %v12971_v27, %v16056_v46  ;;  %v4530_v31 = vpop.f32.mrb[247].mxu1  ;;  %v5210_v20 = vsel %vm4953_vm4, %v4526_v62, %v5082_v57 }
 0x3f7   : > { %v4531_v30 = vadd.f32 %v16056_v46, %v4530_v31  ;;  %v5209_v17 = vsel %vm4952_vm3, %v4521_v56, %v5081_v7 }
 0x3f8   : > { %13190 = vmatprep.mubr.f32.mxu0 %v5209_v17  ;;  %v5084_v36 = vmul.f32 %v16060_v5, %v4536_v58  ;;  %vm4955_vm6 = vcmp.ge.f32.partialorder %v4536_v58, 0.0 }
 0x3f9   : > { %v12974_v40 = vpop.f32.mrb[248].mxu1  ;;  %13191 = vmatmul.mubr.f32.gmra.mrb[244].mxu0 %v5210_v20  ;;  %vm4954_vm5 = vcmp.ge.f32.partialorder %v4531_v30, 0.0  ;;  %v5083_v26 = vmul.f32 %v16060_v5, %v4531_v30 }
 0x3fa   : > { %v4546_v3 = vadd.f32 %v12974_v40, %v16056_v46  ;;  %v4540_v55 = vpop.f32.mrb[249].mxu1  ;;  %v5212_v19 = vsel %vm4955_vm6, %v4536_v58, %v5084_v36 }
 0x3fb   : > { %v4541_v9 = vadd.f32 %v16056_v46, %v4540_v55  ;;  %v5211_v33 = vsel %vm4954_vm5, %v4531_v30, %v5083_v26 }
 0x3fc   : > { %13193 = vmatprep.mubr.f32.mxu0 %v5211_v33  ;;  %v5086_v48 = vmul.f32 %v16060_v5, %v4546_v3  ;;  %vm4957_vm8 = vcmp.ge.f32.partialorder %v4546_v3, 0.0 }
 0x3fd   : > { %v12977_v22 = vpop.f32.mrb[250].mxu1  ;;  %13194 = vmatmul.mubr.f32.gmra.mrb[246].mxu0 %v5212_v19  ;;  %vm4956_vm7 = vcmp.ge.f32.partialorder %v4541_v9, 0.0  ;;  %v5085_v23 = vmul.f32 %v16060_v5, %v4541_v9 }
 0x3fe   : > { %v4556_v16 = vadd.f32 %v12977_v22, %v16056_v46  ;;  %v4550_v28 = vpop.f32.mrb[251].mxu1  ;;  %v5214_v61 = vsel %vm4957_vm8, %v4546_v3, %v5086_v48 }
 0x3ff   : > { %v4551_v14 = vadd.f32 %v16056_v46, %v4550_v28  ;;  %v5213_v4 = vsel %vm4956_vm7, %v4541_v9, %v5085_v23 }
 0x400   : > { %13196 = vmatprep.mubr.f32.mxu0 %v5213_v4  ;;  %v5088_v12 = vmul.f32 %v16060_v5, %v4556_v16  ;;  %vm4959_vm10 = vcmp.ge.f32.partialorder %v4556_v16, 0.0 }
 0x401   : > { %v12980_v51 = vpop.f32.mrb[252].mxu1  ;;  %13197 = vmatmul.mubr.f32.gmra.mrb[248].mxu0 %v5214_v61  ;;  %vm4958_vm9 = vcmp.ge.f32.partialorder %v4551_v14, 0.0  ;;  %v5087_v63 = vmul.f32 %v16060_v5, %v4551_v14 }
 0x402   : > { %v4566_v60 = vadd.f32 %v12980_v51, %v16056_v46  ;;  %v4560_v45 = vpop.f32.mrb[253].mxu1  ;;  %v5216_v53 = vsel %vm4959_vm10, %v4556_v16, %v5088_v12 }
 0x403   : > { %v4561_v43 = vadd.f32 %v16056_v46, %v4560_v45  ;;  %v5215_v37 = vsel %vm4958_vm9, %v4551_v14, %v5087_v63 }
 0x404   : > { %13199 = vmatprep.mubr.f32.mxu0 %v5215_v37  ;;  %v5090_v44 = vmul.f32 %v16060_v5, %v4566_v60  ;;  %vm4961_vm12 = vcmp.ge.f32.partialorder %v4566_v60, 0.0 }
 0x405   : > { %v12983_v13 = vpop.f32.mrb[254].mxu1  ;;  %13200 = vmatmul.mubr.f32.gmra.mrb[250].mxu0 %v5216_v53  ;;  %vm4960_vm11 = vcmp.ge.f32.partialorder %v4561_v43, 0.0  ;;  %v5089_v49 = vmul.f32 %v16060_v5, %v4561_v43 }
 0x406   : > { %v4576_v39 = vadd.f32 %v16257_v2, %v12983_v13  ;;  %v4570_v8 = vpop.f32.mrb[255].mxu1  ;;  %v5218_v54 = vsel %vm4961_vm12, %v4566_v60, %v5090_v44 }
 0x407   : > { %v4571_v46 = vadd.f32 %v16257_v2, %v4570_v8  ;;  %v5217_v42 = vsel %vm4960_vm11, %v4561_v43, %v5089_v49 }
 0x408   : > { %13202 = vmatprep.mubr.f32.mxu0 %v5217_v42  ;;  %v5092_v25 = vmul.f32 %v16060_v5, %v4576_v39  ;;  %vm4963_vm14 = vcmp.ge.f32.partialorder %v4576_v39, 0.0 }
 0x409   : > { %v12986_v15 = vpop.f32.mrb[0].mxu1  ;;  %13203 = vmatmul.mubr.f32.gmra.mrb[252].mxu0 %v5218_v54  ;;  %vm4962_vm13 = vcmp.ge.f32.partialorder %v4571_v46, 0.0  ;;  %v5091_v32 = vmul.f32 %v16060_v5, %v4571_v46 }
 0x40a   : > { %v4586_v50 = vadd.f32 %v16257_v2, %v12986_v15  ;;  %v4580_v52 = vpop.f32.mrb[1].mxu1  ;;  %v5220_v24 = vsel %vm4963_vm14, %v4576_v39, %v5092_v25 }
 0x40b   : > { %v4581_v11 = vadd.f32 %v16257_v2, %v4580_v52  ;;  %v5219_v59 = vsel %vm4962_vm13, %v4571_v46, %v5091_v32  ;;  %v10898_v32 = vld [vmem:[%s18010_s4 + $0x2b0] sm:$0xff] }
 0x40c   : > { %v5094_v47 = vmul.f32 %v16060_v5, %v4586_v50  ;;  %13205 = vmatprep.mubr.f32.mxu0 %v5219_v59  ;;  %vm4965_vm0 = vcmp.ge.f32.partialorder %v4586_v50, 0.0 }
 0x40d   : > { %v12989_v6 = vpop.f32.mrb[2].mxu1  ;;  %13206 = vmatmul.mubr.f32.gmra.mrb[254].mxu0 %v5220_v24  ;;  %vm4964_vm15 = vcmp.ge.f32.partialorder %v4581_v11, 0.0  ;;  %v5093_v0 = vmul.f32 %v16060_v5, %v4581_v11 }
 0x40e   : > { %v4596_v41 = vadd.f32 %v16257_v2, %v12989_v6  ;;  %v4590_v35 = vpop.f32.mrb[3].mxu1  ;;  %v5222_v56 = vsel %vm4965_vm0, %v4586_v50, %v5094_v47 }
 0x40f   : > { %v4591_v29 = vadd.f32 %v16257_v2, %v4590_v35  ;;  %v5221_v62 = vsel %vm4964_vm15, %v4581_v11, %v5093_v0  ;;  %v14372_v11 = vpack.c.bf16 %v10899_v18, %v10898_v32 }
 0x410   : > { %v5096_v10 = vmul.f32 %v16060_v5, %v4596_v41  ;;  %13208 = vmatprep.mubr.f32.mxu0 %v5221_v62  ;;  %vm4967_vm3 = vcmp.ge.f32.partialorder %v4596_v41, 0.0 }
 0x411   : > { %v12992_v21 = vpop.f32.mrb[4].mxu1  ;;  %13209 = vmatmul.mubr.f32.gmra.mrb[0].mxu0 %v5222_v56  ;;  %vm4966_vm2 = vcmp.ge.f32.partialorder %v4591_v29, 0.0  ;;  %v5095_v38 = vmul.f32 %v16060_v5, %v4591_v29  ;;  %14373 = vmatprep.subr.bf16.mxu0 %v14372_v11 }
 0x412   : > { %v4606_v57 = vadd.f32 %v16257_v2, %v12992_v21  ;;  %v4600_v27 = vpop.f32.mrb[5].mxu1  ;;  %v5224_v30 = vsel %vm4967_vm3, %v4596_v41, %v5096_v10  ;;  %14375 = vmatpush3.bf16.xpose.msra.mxu0 %v14372_v11 }
 0x413   : > { %v4601_v7 = vadd.f32 %v16257_v2, %v4600_v27  ;;  %v5223_v58 = vsel %vm4966_vm2, %v4591_v29, %v5095_v38 }
 0x414   : > { %v5098_v31 = vmul.f32 %v16060_v5, %v4606_v57  ;;  %13211 = vmatprep.mubr.f32.mxu0 %v5223_v58  ;;  %vm4969_vm5 = vcmp.ge.f32.partialorder %v4606_v57, 0.0 }
 0x415   : > { %v12995_v17 = vpop.f32.mrb[6].mxu1  ;;  %13212 = vmatmul.mubr.f32.gmra.mrb[2].mxu0 %v5224_v30  ;;  %vm4968_vm4 = vcmp.ge.f32.partialorder %v4601_v7, 0.0  ;;  %v5097_v20 = vmul.f32 %v16060_v5, %v4601_v7 }
 0x416   : > { %v4616_v36 = vadd.f32 %v16257_v2, %v12995_v17  ;;  %v4610_v40 = vpop.f32.mrb[7].mxu1  ;;  %v5226_v9 = vsel %vm4969_vm5, %v4606_v57, %v5098_v31 }
 0x417   : > { %v4611_v26 = vadd.f32 %v16257_v2, %v4610_v40  ;;  %v5225_v3 = vsel %vm4968_vm4, %v4601_v7, %v5097_v20 }
 0x418   : > { %v5100_v55 = vmul.f32 %v16060_v5, %v4616_v36  ;;  %13214 = vmatprep.mubr.f32.mxu0 %v5225_v3  ;;  %vm4971_vm7 = vcmp.ge.f32.partialorder %v4616_v36, 0.0 }
 0x419   : > { %v12998_v33 = vpop.f32.mrb[8].mxu1  ;;  %13215 = vmatmul.mubr.f32.gmra.mrb[4].mxu0 %v5226_v9  ;;  %vm4970_vm6 = vcmp.ge.f32.partialorder %v4611_v26, 0.0  ;;  %v5099_v19 = vmul.f32 %v16060_v5, %v4611_v26 }
 0x41a   : > { %v4626_v48 = vadd.f32 %v16257_v2, %v12998_v33  ;;  %v4620_v22 = vpop.f32.mrb[9].mxu1  ;;  %v5228_v14 = vsel %vm4971_vm7, %v4616_v36, %v5100_v55 }
 0x41b   : > { %v4621_v23 = vadd.f32 %v16257_v2, %v4620_v22  ;;  %v5227_v16 = vsel %vm4970_vm6, %v4611_v26, %v5099_v19 }
 0x41c   : > { %v5102_v28 = vmul.f32 %v16060_v5, %v4626_v48  ;;  %13217 = vmatprep.mubr.f32.mxu0 %v5227_v16  ;;  %vm4973_vm9 = vcmp.ge.f32.partialorder %v4626_v48, 0.0 }
 0x41d   : > { %v13001_v4 = vpop.f32.mrb[10].mxu1  ;;  %13218 = vmatmul.mubr.f32.gmra.mrb[6].mxu0 %v5228_v14  ;;  %vm4972_vm8 = vcmp.ge.f32.partialorder %v4621_v23, 0.0  ;;  %v5101_v61 = vmul.f32 %v16060_v5, %v4621_v23 }
 0x41e   : > { %v4636_v12 = vadd.f32 %v16257_v2, %v13001_v4  ;;  %v4630_v51 = vpop.f32.mrb[11].mxu1  ;;  %v5230_v43 = vsel %vm4973_vm9, %v4626_v48, %v5102_v28 }
 0x41f   : > { %v4631_v63 = vadd.f32 %v16257_v2, %v4630_v51  ;;  %v5229_v60 = vsel %vm4972_vm8, %v4621_v23, %v5101_v61 }
 0x420   : > { %v5104_v45 = vmul.f32 %v16060_v5, %v4636_v12  ;;  %13220 = vmatprep.mubr.f32.mxu0 %v5229_v60  ;;  %vm4975_vm11 = vcmp.ge.f32.partialorder %v4636_v12, 0.0 }
 0x421   : > { %v13004_v37 = vpop.f32.mrb[12].mxu1  ;;  %13221 = vmatmul.mubr.f32.gmra.mrb[8].mxu0 %v5230_v43  ;;  %vm4974_vm10 = vcmp.ge.f32.partialorder %v4631_v63, 0.0  ;;  %v5103_v53 = vmul.f32 %v16060_v5, %v4631_v63 }
 0x422   : > { %v4646_v44 = vadd.f32 %v16257_v2, %v13004_v37  ;;  %v4640_v13 = vpop.f32.mrb[13].mxu1  ;;  %v5232_v46 = vsel %vm4975_vm11, %v4636_v12, %v5104_v45 }
 0x423   : > { %v4641_v49 = vadd.f32 %v16257_v2, %v4640_v13  ;;  %v5231_v39 = vsel %vm4974_vm10, %v4631_v63, %v5103_v53 }
 0x424   : > { %v5106_v8 = vmul.f32 %v16060_v5, %v4646_v44  ;;  %13223 = vmatprep.mubr.f32.mxu0 %v5231_v39  ;;  %vm4977_vm13 = vcmp.ge.f32.partialorder %v4646_v44, 0.0 }
 0x425   : > { %v13007_v42 = vpop.f32.mrb[14].mxu1  ;;  %13224 = vmatmul.mubr.f32.gmra.mrb[10].mxu0 %v5232_v46  ;;  %vm4976_vm12 = vcmp.ge.f32.partialorder %v4641_v49, 0.0  ;;  %v5105_v54 = vmul.f32 %v16060_v5, %v4641_v49 }
 0x426   : > { %v4656_v25 = vadd.f32 %v16257_v2, %v13007_v42  ;;  %v4650_v1 = vpop.f32.mrb[15].mxu1  ;;  %v5234_v52 = vsel %vm4977_vm13, %v4646_v44, %v5106_v8 }
 0x427   : > { %v4651_v34 = vadd.f32 %v16257_v2, %v4650_v1  ;;  %v5233_v15 = vsel %vm4976_vm12, %v4641_v49, %v5105_v54 }
 0x428   : > { %v5108_v50 = vmul.f32 %v16060_v5, %v4656_v25  ;;  %13226 = vmatprep.mubr.f32.mxu0 %v5233_v15  ;;  %vm4979_vm15 = vcmp.ge.f32.partialorder %v4656_v25, 0.0 }
 0x429   : > { %v13010_v59 = vpop.f32.mrb[16].mxu1  ;;  %13227 = vmatmul.mubr.f32.gmra.mrb[12].mxu0 %v5234_v52  ;;  %vm4978_vm14 = vcmp.ge.f32.partialorder %v4651_v34, 0.0  ;;  %v5107_v47 = vmul.f32 %v16060_v5, %v4651_v34 }
 0x42a   : > { %v4666_v24 = vadd.f32 %v16257_v2, %v13010_v59  ;;  %v4660_v6 = vpop.f32.mrb[17].mxu1  ;;  %v5236_v29 = vsel %vm4979_vm15, %v4656_v25, %v5108_v50  ;;  %v10900_v59 = vld [vmem:[%s18010_s4 + $0x2c0] sm:$0xff] }
 0x42b   : > { %v4661_v0 = vadd.f32 %v16257_v2, %v4660_v6  ;;  %v5235_v41 = vsel %vm4978_vm14, %v4651_v34, %v5107_v47  ;;  %v10901_v47 = vld [vmem:[%s18010_s4 + $0x2c8] sm:$0xff] }
 0x42c   : > { %v5110_v35 = vmul.f32 %v16060_v5, %v4666_v24  ;;  %13229 = vmatprep.mubr.f32.mxu0 %v5235_v41  ;;  %vm4981_vm2 = vcmp.ge.f32.partialorder %v4666_v24, 0.0 }
 0x42d   : > { %v13013_v62 = vpop.f32.mrb[18].mxu1  ;;  %13230 = vmatmul.mubr.f32.gmra.mrb[14].mxu0 %v5236_v29  ;;  %vm4980_vm0 = vcmp.ge.f32.partialorder %v4661_v0, 0.0  ;;  %v5109_v10 = vmul.f32 %v16060_v5, %v4661_v0 }
 0x42e   : > { %v4676_v56 = vadd.f32 %v16257_v2, %v13013_v62  ;;  %v4670_v21 = vpop.f32.mrb[19].mxu1  ;;  %v5238_v7 = vsel %vm4981_vm2, %v4666_v24, %v5110_v35 }
 0x42f   : > { %v4671_v38 = vadd.f32 %v16257_v2, %v4670_v21  ;;  %v5237_v57 = vsel %vm4980_vm0, %v4661_v0, %v5109_v10  ;;  %v14376_v0 = vpack.c.bf16 %v10901_v47, %v10900_v59  ;;  %v16377_v59 = vstv %s10872_s11 }
 0x430   : > { %v5112_v27 = vmul.f32 %v16060_v5, %v4676_v56  ;;  %13232 = vmatprep.mubr.f32.mxu0 %v5237_v57  ;;  %vm4983_vm4 = vcmp.ge.f32.partialorder %v4676_v56, 0.0 }
 0x431   : > { %v13016_v58 = vpop.f32.mrb[20].mxu1  ;;  %13233 = vmatmul.mubr.f32.gmra.mrb[16].mxu0 %v5238_v7  ;;  %vm4982_vm3 = vcmp.ge.f32.partialorder %v4671_v38, 0.0  ;;  %v5111_v31 = vmul.f32 %v16060_v5, %v4671_v38  ;;  %14377 = vmatprep.subr.bf16.mxu0 %v14376_v0 }
 0x432   : > { %v4686_v30 = vadd.f32 %v16257_v2, %v13016_v58  ;;  %v4680_v17 = vpop.f32.mrb[21].mxu1  ;;  %v5240_v26 = vsel %vm4983_vm4, %v4676_v56, %v5112_v27  ;;  %14379 = vmatpush3.bf16.xpose.msra.mxu0 %v14376_v0 }
 0x433   : > { %v4681_v20 = vadd.f32 %v16257_v2, %v4680_v17  ;;  %v5239_v36 = vsel %vm4982_vm3, %v4671_v38, %v5111_v31 }
 0x434   : > { %v5114_v40 = vmul.f32 %v16060_v5, %v4686_v30  ;;  %13235 = vmatprep.mubr.f32.mxu0 %v5239_v36  ;;  %vm4985_vm6 = vcmp.ge.f32.partialorder %v4686_v30, 0.0 }
 0x435   : > { %v13019_v3 = vpop.f32.mrb[22].mxu1  ;;  %13236 = vmatmul.mubr.f32.gmra.mrb[18].mxu0 %v5240_v26  ;;  %vm4984_vm5 = vcmp.ge.f32.partialorder %v4681_v20, 0.0  ;;  %v5113_v55 = vmul.f32 %v16060_v5, %v4681_v20 }
 0x436   : > { %v4696_v9 = vadd.f32 %v16257_v2, %v13019_v3  ;;  %v4690_v33 = vpop.f32.mrb[23].mxu1  ;;  %v5242_v23 = vsel %vm4985_vm6, %v4686_v30, %v5114_v40 }
 0x437   : > { %v4691_v19 = vadd.f32 %v16257_v2, %v4690_v33  ;;  %v5241_v48 = vsel %vm4984_vm5, %v4681_v20, %v5113_v55 }
 0x438   : > { %v5116_v22 = vmul.f32 %v16060_v5, %v4696_v9  ;;  %13238 = vmatprep.mubr.f32.mxu0 %v5241_v48  ;;  %vm4987_vm8 = vcmp.ge.f32.partialorder %v4696_v9, 0.0 }
 0x439   : > { %v13022_v16 = vpop.f32.mrb[24].mxu1  ;;  %13239 = vmatmul.mubr.f32.gmra.mrb[20].mxu0 %v5242_v23  ;;  %vm4986_vm7 = vcmp.ge.f32.partialorder %v4691_v19, 0.0  ;;  %v5115_v28 = vmul.f32 %v16060_v5, %v4691_v19 }
 0x43a   : > { %v4706_v14 = vadd.f32 %v16257_v2, %v13022_v16  ;;  %v4700_v4 = vpop.f32.mrb[25].mxu1  ;;  %v5244_v63 = vsel %vm4987_vm8, %v4696_v9, %v5116_v22 }
 0x43b   : > { %v4701_v61 = vadd.f32 %v16257_v2, %v4700_v4  ;;  %v5243_v12 = vsel %vm4986_vm7, %v4691_v19, %v5115_v28 }
 0x43c   : > { %v5118_v51 = vmul.f32 %v16060_v5, %v4706_v14  ;;  %13241 = vmatprep.mubr.f32.mxu0 %v5243_v12  ;;  %vm4989_vm10 = vcmp.ge.f32.partialorder %v4706_v14, 0.0 }
 0x43d   : > { %v13025_v60 = vpop.f32.mrb[26].mxu1  ;;  %13242 = vmatmul.mubr.f32.gmra.mrb[22].mxu0 %v5244_v63  ;;  %vm4988_vm9 = vcmp.ge.f32.partialorder %v4701_v61, 0.0  ;;  %v5117_v45 = vmul.f32 %v16060_v5, %v4701_v61 }
 0x43e   : > { %v4716_v43 = vadd.f32 %v16257_v2, %v13025_v60  ;;  %v4710_v37 = vpop.f32.mrb[27].mxu1  ;;  %v5246_v49 = vsel %vm4989_vm10, %v4706_v14, %v5118_v51 }
 0x43f   : > { %v4711_v53 = vadd.f32 %v16257_v2, %v4710_v37  ;;  %v5245_v44 = vsel %vm4988_vm9, %v4701_v61, %v5117_v45 }
 0x440   : > { %v5120_v13 = vmul.f32 %v16060_v5, %v4716_v43  ;;  %13244 = vmatprep.mubr.f32.mxu0 %v5245_v44  ;;  %vm4991_vm12 = vcmp.ge.f32.partialorder %v4716_v43, 0.0 }
 0x441   : > { %v13028_v39 = vpop.f32.mrb[28].mxu1  ;;  %13245 = vmatmul.mubr.f32.gmra.mrb[24].mxu0 %v5246_v49  ;;  %vm4990_vm11 = vcmp.ge.f32.partialorder %v4711_v53, 0.0  ;;  %v5119_v8 = vmul.f32 %v16060_v5, %v4711_v53 }
 0x442   : > { %v4726_v46 = vadd.f32 %v16257_v2, %v13028_v39  ;;  %v4720_v42 = vpop.f32.mrb[29].mxu1  ;;  %v5248_v34 = vsel %vm4991_vm12, %v4716_v43, %v5120_v13 }
 0x443   : > { %v4721_v54 = vadd.f32 %v16257_v2, %v4720_v42  ;;  %v5247_v25 = vsel %vm4990_vm11, %v4711_v53, %v5119_v8 }
 0x444   : > { %v5122_v1 = vmul.f32 %v16060_v5, %v4726_v46  ;;  %13247 = vmatprep.mubr.f32.mxu0 %v5247_v25  ;;  %vm4993_vm14 = vcmp.ge.f32.partialorder %v4726_v46, 0.0 }
 0x445   : > { %v13031_v15 = vpop.f32.mrb[30].mxu1  ;;  %13248 = vmatmul.mubr.f32.gmra.mrb[26].mxu0 %v5248_v34  ;;  %vm4992_vm13 = vcmp.ge.f32.partialorder %v4721_v54, 0.0  ;;  %v5121_v32 = vmul.f32 %v16060_v5, %v4721_v54 }
 0x446   : > { %v4736_v18 = vadd.f32 %v16257_v2, %v13031_v15  ;;  %v4730_v50 = vpop.f32.mrb[31].mxu1  ;;  %v5250_v6 = vsel %vm4993_vm14, %v4726_v46, %v5122_v1 }
 0x447   : > { %v4731_v52 = vadd.f32 %v16257_v2, %v4730_v50  ;;  %v5249_v11 = vsel %vm4992_vm13, %v4721_v54, %v5121_v32  ;;  %v16373_v32 = vld [vmem:[%s18011_s5 + $0x3] ss:$0 sm:$0xff] }
 0x448   : > { %v5124_v24 = vmul.f32 %v16060_v5, %v4736_v18  ;;  %13250 = vmatprep.mubr.f32.mxu0 %v5249_v11  ;;  %vm4995_vm0 = vcmp.ge.f32.partialorder %v4736_v18, 0.0 }
 0x449   : > { %v13034_v41 = vpop.f32.mrb[32].mxu1  ;;  %13251 = vmatmul.mubr.f32.gmra.mrb[28].mxu0 %v5250_v6  ;;  %vm4994_vm15 = vcmp.ge.f32.partialorder %v4731_v52, 0.0  ;;  %v5123_v35 = vmul.f32 %v16060_v5, %v4731_v52 }
 0x44a   : > { %v4746_v29 = vadd.f32 %v16257_v2, %v13034_v41  ;;  %v4740_v62 = vpop.f32.mrb[33].mxu1  ;;  %v5252_v38 = vsel %vm4995_vm0, %v4736_v18, %v5124_v24 }
 0x44b   : > { %v4741_v10 = vadd.f32 %v16257_v2, %v4740_v62  ;;  %v5251_v56 = vsel %vm4994_vm15, %v4731_v52, %v5123_v35 }
 0x44c   : > { %v5126_v21 = vmul.f32 %v16060_v5, %v4746_v29  ;;  %13253 = vmatprep.mubr.f32.mxu0 %v5251_v56  ;;  %vm4997_vm3 = vcmp.ge.f32.partialorder %v4746_v29, 0.0 }
 0x44d   : > { %v13037_v57 = vpop.f32.mrb[34].mxu1  ;;  %13254 = vmatmul.mubr.f32.gmra.mrb[30].mxu0 %v5252_v38  ;;  %vm4996_vm2 = vcmp.ge.f32.partialorder %v4741_v10, 0.0  ;;  %v5125_v27 = vmul.f32 %v16060_v5, %v4741_v10 }
 0x44e   : > { %v4756_v7 = vadd.f32 %v16257_v2, %v13037_v57  ;;  %v4750_v58 = vpop.f32.mrb[35].mxu1  ;;  %v5254_v20 = vsel %vm4997_vm3, %v4746_v29, %v5126_v21 }
 0x44f   : > { %v4751_v31 = vadd.f32 %v16257_v2, %v4750_v58  ;;  %v5253_v30 = vsel %vm4996_vm2, %v4741_v10, %v5125_v27 }
 0x450   : > { %v5128_v17 = vmul.f32 %v16060_v5, %v4756_v7  ;;  %13256 = vmatprep.mubr.f32.mxu0 %v5253_v30  ;;  %vm4999_vm5 = vcmp.ge.f32.partialorder %v4756_v7, 0.0 }
 0x451   : > { %v13040_v36 = vpop.f32.mrb[36].mxu1  ;;  %13257 = vmatmul.mubr.f32.gmra.mrb[32].mxu0 %v5254_v20  ;;  %vm4998_vm4 = vcmp.ge.f32.partialorder %v4751_v31, 0.0  ;;  %v5127_v40 = vmul.f32 %v16060_v5, %v4751_v31 }
 0x452   : > { %v4766_v26 = vadd.f32 %v16257_v2, %v13040_v36  ;;  %v4760_v3 = vpop.f32.mrb[37].mxu1  ;;  %v5256_v19 = vsel %vm4999_vm5, %v4756_v7, %v5128_v17 }
 0x453   : > { %v4761_v55 = vadd.f32 %v16257_v2, %v4760_v3  ;;  %v5255_v9 = vsel %vm4998_vm4, %v4751_v31, %v5127_v40 }
 0x454   : > { %v5130_v33 = vmul.f32 %v16060_v5, %v4766_v26  ;;  %13259 = vmatprep.mubr.f32.mxu0 %v5255_v9  ;;  %vm5001_vm7 = vcmp.ge.f32.partialorder %v4766_v26, 0.0 }
 0x455   : > { %v13043_v48 = vpop.f32.mrb[38].mxu1  ;;  %13260 = vmatmul.mubr.f32.gmra.mrb[34].mxu0 %v5256_v19  ;;  %vm5000_vm6 = vcmp.ge.f32.partialorder %v4761_v55, 0.0  ;;  %v5129_v22 = vmul.f32 %v16060_v5, %v4761_v55 }
 0x456   : > { %v4776_v23 = vadd.f32 %v16257_v2, %v13043_v48  ;;  %v4770_v16 = vpop.f32.mrb[39].mxu1  ;;  %v5258_v61 = vsel %vm5001_vm7, %v4766_v26, %v5130_v33 }
 0x457   : > { %v4771_v28 = vadd.f32 %v16257_v2, %v4770_v16  ;;  %v5257_v14 = vsel %vm5000_vm6, %v4761_v55, %v5129_v22 }
 0x458   : > { %v5132_v4 = vmul.f32 %v16060_v5, %v4776_v23  ;;  %13262 = vmatprep.mubr.f32.mxu0 %v5257_v14  ;;  %vm5003_vm9 = vcmp.ge.f32.partialorder %v4776_v23, 0.0 }
 0x459   : > { %v13046_v12 = vpop.f32.mrb[40].mxu1  ;;  %13263 = vmatmul.mubr.f32.gmra.mrb[36].mxu0 %v5258_v61  ;;  %vm5002_vm8 = vcmp.ge.f32.partialorder %v4771_v28, 0.0  ;;  %v5131_v51 = vmul.f32 %v16060_v5, %v4771_v28 }
 0x45a   : > { %v4786_v63 = vadd.f32 %v16257_v2, %v13046_v12  ;;  %v4780_v60 = vpop.f32.mrb[41].mxu1  ;;  %v5260_v53 = vsel %vm5003_vm9, %v4776_v23, %v5132_v4 }
 0x45b   : > { %v4781_v45 = vadd.f32 %v16257_v2, %v4780_v60  ;;  %v5259_v43 = vsel %vm5002_vm8, %v4771_v28, %v5131_v51 }
 0x45c   : > { %v5134_v37 = vmul.f32 %v16060_v5, %v4786_v63  ;;  %13265 = vmatprep.mubr.f32.mxu0 %v5259_v43  ;;  %vm5005_vm11 = vcmp.ge.f32.partialorder %v4786_v63, 0.0 }
 0x45d   : > { %v13049_v44 = vpop.f32.mrb[42].mxu1  ;;  %13266 = vmatmul.mubr.f32.gmra.mrb[38].mxu0 %v5260_v53  ;;  %vm5004_vm10 = vcmp.ge.f32.partialorder %v4781_v45, 0.0  ;;  %v5133_v13 = vmul.f32 %v16060_v5, %v4781_v45 }
 0x45e   : > { %v4796_v49 = vadd.f32 %v16257_v2, %v13049_v44  ;;  %v4790_v39 = vpop.f32.mrb[43].mxu1  ;;  %v5262_v54 = vsel %vm5005_vm11, %v4786_v63, %v5134_v37 }
 0x45f   : > { %v4791_v8 = vadd.f32 %v16257_v2, %v4790_v39  ;;  %v5261_v46 = vsel %vm5004_vm10, %v4781_v45, %v5133_v13 }
 0x460   : > { %v5136_v42 = vmul.f32 %v16060_v5, %v4796_v49  ;;  %13268 = vmatprep.mubr.f32.mxu0 %v5261_v46  ;;  %vm5007_vm13 = vcmp.ge.f32.partialorder %v4796_v49, 0.0 }
 0x461   : > { %v13052_v25 = vpop.f32.mrb[44].mxu1  ;;  %13269 = vmatmul.mubr.f32.gmra.mrb[40].mxu0 %v5262_v54  ;;  %vm5006_vm12 = vcmp.ge.f32.partialorder %v4791_v8, 0.0  ;;  %v5135_v1 = vmul.f32 %v16060_v5, %v4791_v8 }
 0x462   : > { %v4806_v34 = vadd.f32 %v16257_v2, %v13052_v25  ;;  %v4800_v15 = vpop.f32.mrb[45].mxu1  ;;  %v5264_v47 = vsel %vm5007_vm13, %v4796_v49, %v5136_v42 }
 0x463   : > { %v4801_v18 = vadd.f32 %v16257_v2, %v4800_v15  ;;  %v5263_v50 = vsel %vm5006_vm12, %v4791_v8, %v5135_v1 }
 0x464   : > { %v5138_v52 = vmul.f32 %v16060_v5, %v4806_v34  ;;  %v13114_v11 = vpop.f32.mrb[192].mxu0  ;;  %13271 = vmatprep.mubr.f32.mxu0 %v5263_v50  ;;  %vm5009_vm14 = vcmp.ge.f32.partialorder %v4806_v34, 0.0 }
 0x465   : > { %v5382_v24 = vadd.f32 %v13114_v11, %v16373_v32  ;;  %v13055_v6 = vpop.f32.mrb[46].mxu1  ;;  %v5376_v0 = vpop.f32.mrb[193].mxu0  ;;  %13272 = vmatmul.mubr.f32.gmra.mrb[42].mxu0 %v5264_v47  ;;  %vm5008_vm15 = vcmp.ge.f32.partialorder %v4801_v18, 0.0  ;;  %v5137_v41 = vmul.f32 %v16060_v5, %v4801_v18 }
 0x466   : > { %v4816_v35 = vadd.f32 %v16257_v2, %v13055_v6  ;;  %v5377_v29 = vadd.f32 %v16373_v32, %v5376_v0  ;;  %v4810_v62 = vpop.f32.mrb[47].mxu1  ;;  %v5266_v10 = vsel %vm5009_vm14, %v4806_v34, %v5138_v52 }
 0x467   : > { %vm6017_vm0 = vcmp.ge.f32.partialorder %v5382_v24, 0.0  ;;  %v6146_v56 = vmul.f32 %v16377_v59, %v5382_v24  ;;  %v4811_v21 = vadd.f32 %v16257_v2, %v4810_v62  ;;  %v5265_v38 = vsel %vm5008_vm15, %v4801_v18, %v5137_v41 }
 0x468   : > { %v5140_v57 = vmul.f32 %v16060_v5, %v4816_v35  ;;  %v13117_v27 = vpop.f32.mrb[194].mxu0  ;;  %13274 = vmatprep.mubr.f32.mxu0 %v5265_v38  ;;  %vm6016_vm2 = vcmp.ge.f32.partialorder %v5377_v29, 0.0  ;;  %v6145_v7 = vmul.f32 %v16377_v59, %v5377_v29  ;;  %vm5011_vm3 = vcmp.ge.f32.partialorder %v4816_v35, 0.0 }
 0x469   : > { %v6274_v58 = vsel %vm6017_vm0, %v5382_v24, %v6146_v56  ;;  %v5392_v31 = vadd.f32 %v13117_v27, %v16373_v32  ;;  %v13058_v30 = vpop.f32.mrb[48].mxu1  ;;  %v5386_v17 = vpop.f32.mrb[195].mxu0  ;;  %13275 = vmatmul.mubr.f32.gmra.mrb[44].mxu0 %v5266_v10  ;;  %vm5010_vm4 = vcmp.ge.f32.partialorder %v4811_v21, 0.0  ;;  %v5139_v20 = vmul.f32 %v16060_v5, %v4811_v21 }
 0x46a   : > { %v4826_v36 = vadd.f32 %v16257_v2, %v13058_v30  ;;  %v5387_v40 = vadd.f32 %v16373_v32, %v5386_v17  ;;  %v4820_v26 = vpop.f32.mrb[49].mxu1  ;;  %v6273_v3 = vsel %vm6016_vm2, %v5377_v29, %v6145_v7  ;;  %v5268_v55 = vsel %vm5011_vm3, %v4816_v35, %v5140_v57 }
 0x46b   : > { %v6148_v9 = vmul.f32 %v16377_v59, %v5392_v31  ;;  %v4821_v33 = vadd.f32 %v16257_v2, %v4820_v26  ;;  %13336 = vmatprep.mubr.f32.mxu1 %v6273_v3  ;;  %v5267_v19 = vsel %vm5010_vm4, %v4811_v21, %v5139_v20  ;;  %vm6019_vm5 = vcmp.ge.f32.partialorder %v5392_v31, 0.0 }
 0x46c   : > { %v5142_v48 = vmul.f32 %v16060_v5, %v4826_v36  ;;  %v13120_v22 = vpop.f32.mrb[196].mxu0  ;;  %13277 = vmatprep.mubr.f32.mxu0 %v5267_v19  ;;  %13337 = vmatmul.mubr.f32.vlgmr.msra.gmra.mrb[64].mxu1 %v6274_v58  ;;  %vm6018_vm6 = vcmp.ge.f32.partialorder %v5387_v40, 0.0  ;;  %v6147_v23 = vmul.f32 %v16377_v59, %v5387_v40  ;;  %vm5013_vm7 = vcmp.ge.f32.partialorder %v4826_v36, 0.0 }
 0x46d   : > { %v5402_v16 = vadd.f32 %v13120_v22, %v16373_v32  ;;  %v13061_v28 = vpop.f32.mrb[50].mxu1  ;;  %v5396_v14 = vpop.f32.mrb[197].mxu0  ;;  %13278 = vmatmul.mubr.f32.gmra.mrb[46].mxu0 %v5268_v55  ;;  %vm5012_vm8 = vcmp.ge.f32.partialorder %v4821_v33, 0.0  ;;  %v5141_v4 = vmul.f32 %v16060_v5, %v4821_v33  ;;  %v6276_v61 = vsel %vm6019_vm5, %v5392_v31, %v6148_v9 }
 0x46e   : > { %v4836_v12 = vadd.f32 %v16257_v2, %v13061_v28  ;;  %v5397_v51 = vadd.f32 %v16373_v32, %v5396_v14  ;;  %v4830_v63 = vpop.f32.mrb[51].mxu1  ;;  %v6275_v60 = vsel %vm6018_vm6, %v5387_v40, %v6147_v23  ;;  %v5270_v45 = vsel %vm5013_vm7, %v4826_v36, %v5142_v48 }
 0x46f   : > { %v6150_v43 = vmul.f32 %v16377_v59, %v5402_v16  ;;  %v4831_v37 = vadd.f32 %v16257_v2, %v4830_v63  ;;  %13339 = vmatprep.mubr.f32.mxu1 %v6275_v60  ;;  %v5269_v53 = vsel %vm5012_vm8, %v4821_v33, %v5141_v4  ;;  %vm6021_vm9 = vcmp.ge.f32.partialorder %v5402_v16, 0.0 }
 0x470   : > { %v5144_v44 = vmul.f32 %v16060_v5, %v4836_v12  ;;  %v13123_v13 = vpop.f32.mrb[198].mxu0  ;;  %13280 = vmatprep.mubr.f32.mxu0 %v5269_v53  ;;  %13340 = vmatmul.mubr.f32.gmra.mrb[66].mxu1 %v6276_v61  ;;  %vm6020_vm10 = vcmp.ge.f32.partialorder %v5397_v51, 0.0  ;;  %v6149_v49 = vmul.f32 %v16377_v59, %v5397_v51  ;;  %vm5015_vm11 = vcmp.ge.f32.partialorder %v4836_v12, 0.0 }
 0x471   : > { %v5412_v39 = vadd.f32 %v13123_v13, %v16373_v32  ;;  %v13064_v8 = vpop.f32.mrb[52].mxu1  ;;  %v5406_v46 = vpop.f32.mrb[199].mxu0  ;;  %13281 = vmatmul.mubr.f32.gmra.mrb[48].mxu0 %v5270_v45  ;;  %vm5014_vm12 = vcmp.ge.f32.partialorder %v4831_v37, 0.0  ;;  %v5143_v42 = vmul.f32 %v16060_v5, %v4831_v37  ;;  %v6278_v54 = vsel %vm6021_vm9, %v5402_v16, %v6150_v43 }
 0x472   : > { %v4846_v25 = vadd.f32 %v16257_v2, %v13064_v8  ;;  %v5407_v1 = vadd.f32 %v16373_v32, %v5406_v46  ;;  %v4840_v34 = vpop.f32.mrb[53].mxu1  ;;  %v6277_v15 = vsel %vm6020_vm10, %v5397_v51, %v6149_v49  ;;  %v5272_v18 = vsel %vm5015_vm11, %v4836_v12, %v5144_v44 }
 0x473   : > { %v6152_v50 = vmul.f32 %v16377_v59, %v5412_v39  ;;  %v4841_v52 = vadd.f32 %v16257_v2, %v4840_v34  ;;  %13342 = vmatprep.mubr.f32.mxu1 %v6277_v15  ;;  %v5271_v11 = vsel %vm5014_vm12, %v4831_v37, %v5143_v42  ;;  %vm6023_vm13 = vcmp.ge.f32.partialorder %v5412_v39, 0.0 }
 0x474   : > { %v5146_v47 = vmul.f32 %v16060_v5, %v4846_v25  ;;  %v13126_v24 = vpop.f32.mrb[200].mxu0  ;;  %13283 = vmatprep.mubr.f32.mxu0 %v5271_v11  ;;  %13343 = vmatmul.mubr.f32.gmra.mrb[68].mxu1 %v6278_v54  ;;  %vm6022_vm14 = vcmp.ge.f32.partialorder %v5407_v1, 0.0  ;;  %v6151_v6 = vmul.f32 %v16377_v59, %v5407_v1  ;;  %vm5017_vm15 = vcmp.ge.f32.partialorder %v4846_v25, 0.0 }
 0x475   : > { %v5422_v0 = vadd.f32 %v13126_v24, %v16373_v32  ;;  %v13067_v41 = vpop.f32.mrb[54].mxu1  ;;  %v5416_v35 = vpop.f32.mrb[201].mxu0  ;;  %13284 = vmatmul.mubr.f32.gmra.mrb[50].mxu0 %v5272_v18  ;;  %vm5016_vm0 = vcmp.ge.f32.partialorder %v4841_v52, 0.0  ;;  %v5145_v29 = vmul.f32 %v16060_v5, %v4841_v52  ;;  %v6280_v62 = vsel %vm6023_vm13, %v5412_v39, %v6152_v50 }
 0x476   : > { %v4856_v10 = vadd.f32 %v16257_v2, %v13067_v41  ;;  %v5417_v56 = vadd.f32 %v16373_v32, %v5416_v35  ;;  %v4850_v21 = vpop.f32.mrb[55].mxu1  ;;  %v6279_v38 = vsel %vm6022_vm14, %v5407_v1, %v6151_v6  ;;  %v5274_v57 = vsel %vm5017_vm15, %v4846_v25, %v5146_v47 }
 0x477   : > { %v6154_v27 = vmul.f32 %v16377_v59, %v5422_v0  ;;  %v4851_v7 = vadd.f32 %v16257_v2, %v4850_v21  ;;  %13345 = vmatprep.mubr.f32.mxu1 %v6279_v38  ;;  %v5273_v58 = vsel %vm5016_vm0, %v4841_v52, %v5145_v29  ;;  %vm6025_vm2 = vcmp.ge.f32.partialorder %v5422_v0, 0.0 }
 0x478   : > { %v5148_v31 = vmul.f32 %v16060_v5, %v4856_v10  ;;  %v13129_v30 = vpop.f32.mrb[202].mxu0  ;;  %13286 = vmatprep.mubr.f32.mxu0 %v5273_v58  ;;  %13346 = vmatmul.mubr.f32.gmra.mrb[70].mxu1 %v6280_v62  ;;  %vm6024_vm3 = vcmp.ge.f32.partialorder %v5417_v56, 0.0  ;;  %v6153_v17 = vmul.f32 %v16377_v59, %v5417_v56  ;;  %vm5019_vm4 = vcmp.ge.f32.partialorder %v4856_v10, 0.0 }
 0x479   : > { %v5432_v20 = vadd.f32 %v13129_v30, %v16373_v32  ;;  %v13070_v36 = vpop.f32.mrb[56].mxu1  ;;  %v5426_v40 = vpop.f32.mrb[203].mxu0  ;;  %13287 = vmatmul.mubr.f32.gmra.mrb[52].mxu0 %v5274_v57  ;;  %vm5018_vm5 = vcmp.ge.f32.partialorder %v4851_v7, 0.0  ;;  %v5147_v26 = vmul.f32 %v16060_v5, %v4851_v7  ;;  %v6282_v3 = vsel %vm6025_vm2, %v5422_v0, %v6154_v27 }
 0x47a   : > { %v4866_v55 = vadd.f32 %v16257_v2, %v13070_v36  ;;  %v5427_v9 = vadd.f32 %v16373_v32, %v5426_v40  ;;  %v4860_v33 = vpop.f32.mrb[57].mxu1  ;;  %v6281_v19 = vsel %vm6024_vm3, %v5417_v56, %v6153_v17  ;;  %v5276_v48 = vsel %vm5019_vm4, %v4856_v10, %v5148_v31  ;;  %v10902_v36 = vld [vmem:[%s18010_s4 + $0x2d0] sm:$0xff]  ;;  %v10903_v40 = vld [vmem:[%s18010_s4 + $0x2d8] sm:$0xff] }
 0x47b   : > { %v6156_v22 = vmul.f32 %v16377_v59, %v5432_v20  ;;  %v4861_v23 = vadd.f32 %v16257_v2, %v4860_v33  ;;  %13348 = vmatprep.mubr.f32.mxu1 %v6281_v19  ;;  %v5275_v16 = vsel %vm5018_vm5, %v4851_v7, %v5147_v26  ;;  %vm6027_vm6 = vcmp.ge.f32.partialorder %v5432_v20, 0.0 }
 0x47c   : > { %v5150_v28 = vmul.f32 %v16060_v5, %v4866_v55  ;;  %v13132_v14 = vpop.f32.mrb[204].mxu0  ;;  %13289 = vmatprep.mubr.f32.mxu0 %v5275_v16  ;;  %13349 = vmatmul.mubr.f32.gmra.mrb[72].mxu1 %v6282_v3  ;;  %vm6026_vm7 = vcmp.ge.f32.partialorder %v5427_v9, 0.0  ;;  %v6155_v4 = vmul.f32 %v16377_v59, %v5427_v9  ;;  %vm5021_vm8 = vcmp.ge.f32.partialorder %v4866_v55, 0.0 }
 0x47d   : > { %v5442_v61 = vadd.f32 %v13132_v14, %v16373_v32  ;;  %v13073_v12 = vpop.f32.mrb[58].mxu1  ;;  %v5436_v51 = vpop.f32.mrb[205].mxu0  ;;  %13290 = vmatmul.mubr.f32.gmra.mrb[54].mxu0 %v5276_v48  ;;  %vm5020_vm9 = vcmp.ge.f32.partialorder %v4861_v23, 0.0  ;;  %v5149_v63 = vmul.f32 %v16060_v5, %v4861_v23  ;;  %v6284_v60 = vsel %vm6027_vm6, %v5432_v20, %v6156_v22 }
 0x47e   : > { %v4876_v45 = vadd.f32 %v16257_v2, %v13073_v12  ;;  %v5437_v43 = vadd.f32 %v16373_v32, %v5436_v51  ;;  %v4870_v37 = vpop.f32.mrb[59].mxu1  ;;  %v6283_v53 = vsel %vm6026_vm7, %v5427_v9, %v6155_v4  ;;  %v5278_v44 = vsel %vm5021_vm8, %v4866_v55, %v5150_v28  ;;  %v10904_v55 = vld [vmem:[%s18010_s4 + $0x2e0] sm:$0xff]  ;;  %v10905_v9 = vld [vmem:[%s18010_s4 + $0x2e8] sm:$0xff] }
 0x47f   : > { %v6158_v13 = vmul.f32 %v16377_v59, %v5442_v61  ;;  %v4871_v49 = vadd.f32 %v16257_v2, %v4870_v37  ;;  %13351 = vmatprep.mubr.f32.mxu1 %v6283_v53  ;;  %v5277_v39 = vsel %vm5020_vm9, %v4861_v23, %v5149_v63  ;;  %vm6029_vm10 = vcmp.ge.f32.partialorder %v5442_v61, 0.0 }
 0x480   : > { %v5152_v8 = vmul.f32 %v16060_v5, %v4876_v45  ;;  %v13135_v46 = vpop.f32.mrb[206].mxu0  ;;  %13292 = vmatprep.mubr.f32.mxu0 %v5277_v39  ;;  %13352 = vmatmul.mubr.f32.gmra.mrb[74].mxu1 %v6284_v60  ;;  %vm6028_vm11 = vcmp.ge.f32.partialorder %v5437_v43, 0.0  ;;  %v6157_v42 = vmul.f32 %v16377_v59, %v5437_v43  ;;  %vm5023_vm12 = vcmp.ge.f32.partialorder %v4876_v45, 0.0 }
 0x481   : > { %v5452_v54 = vadd.f32 %v13135_v46, %v16373_v32  ;;  %v13076_v25 = vpop.f32.mrb[60].mxu1  ;;  %v5446_v1 = vpop.f32.mrb[207].mxu0  ;;  %13293 = vmatmul.mubr.f32.gmra.mrb[56].mxu0 %v5278_v44  ;;  %vm5022_vm13 = vcmp.ge.f32.partialorder %v4871_v49, 0.0  ;;  %v5151_v34 = vmul.f32 %v16060_v5, %v4871_v49  ;;  %v6286_v15 = vsel %vm6029_vm10, %v5442_v61, %v6158_v13 }
 0x482   : > { %v4886_v18 = vadd.f32 %v16257_v2, %v13076_v25  ;;  %v5447_v50 = vadd.f32 %v16373_v32, %v5446_v1  ;;  %v4880_v52 = vpop.f32.mrb[61].mxu1  ;;  %v6285_v11 = vsel %vm6028_vm11, %v5437_v43, %v6157_v42  ;;  %v5280_v47 = vsel %vm5023_vm12, %v4876_v45, %v5152_v8 }
 0x483   : > { %v6160_v24 = vmul.f32 %v16377_v59, %v5452_v54  ;;  %v4881_v6 = vadd.f32 %v16257_v2, %v4880_v52  ;;  %13354 = vmatprep.mubr.f32.mxu1 %v6285_v11  ;;  %v5279_v0 = vsel %vm5022_vm13, %v4871_v49, %v5151_v34  ;;  %vm6031_vm14 = vcmp.ge.f32.partialorder %v5452_v54, 0.0 }
 0x484   : > { %v5154_v41 = vmul.f32 %v16060_v5, %v4886_v18  ;;  %v13138_v35 = vpop.f32.mrb[208].mxu0  ;;  %13295 = vmatprep.mubr.f32.mxu0 %v5279_v0  ;;  %13355 = vmatmul.mubr.f32.gmra.mrb[76].mxu1 %v6286_v15  ;;  %vm6030_vm15 = vcmp.ge.f32.partialorder %v5447_v50, 0.0  ;;  %v6159_v29 = vmul.f32 %v16377_v59, %v5447_v50  ;;  %vm5025_vm0 = vcmp.ge.f32.partialorder %v4886_v18, 0.0 }
 0x485   : > { %v5462_v62 = vadd.f32 %v13138_v35, %v16373_v32  ;;  %v13079_v10 = vpop.f32.mrb[62].mxu1  ;;  %v5456_v56 = vpop.f32.mrb[209].mxu0  ;;  %13296 = vmatmul.mubr.f32.gmra.mrb[58].mxu0 %v5280_v47  ;;  %vm5024_vm2 = vcmp.ge.f32.partialorder %v4881_v6, 0.0  ;;  %v5153_v21 = vmul.f32 %v16060_v5, %v4881_v6  ;;  %v6288_v58 = vsel %vm6031_vm14, %v5452_v54, %v6160_v24 }
 0x486   : > { %v4896_v38 = vadd.f32 %v16257_v2, %v13079_v10  ;;  %v5457_v57 = vadd.f32 %v16373_v32, %v5456_v56  ;;  %v4890_v27 = vpop.f32.mrb[63].mxu1  ;;  %v6287_v7 = vsel %vm6030_vm15, %v5447_v50, %v6159_v29  ;;  %v5282_v20 = vsel %vm5025_vm0, %v4886_v18, %v5154_v41 }
 0x487   : > { %v6162_v31 = vmul.f32 %v16377_v59, %v5462_v62  ;;  %v4891_v30 = vadd.f32 %v16257_v2, %v4890_v27  ;;  %13357 = vmatprep.mubr.f32.mxu1 %v6287_v7  ;;  %v5281_v17 = vsel %vm5024_vm2, %v4881_v6, %v5153_v21  ;;  %vm6033_vm4 = vcmp.ge.f32.partialorder %v5462_v62, 0.0 }
 0x488   : > { %v5156_v26 = vmul.f32 %v16060_v5, %v4896_v38  ;;  %v13141_v3 = vpop.f32.mrb[210].mxu0  ;;  %13298 = vmatprep.mubr.f32.mxu0 %v5281_v17  ;;  %13358 = vmatmul.mubr.f32.gmra.mrb[78].mxu1 %v6288_v58  ;;  %vm6032_vm3 = vcmp.ge.f32.partialorder %v5457_v57, 0.0  ;;  %v6161_v2 = vmul.f32 %v16377_v59, %v5457_v57  ;;  %vm5027_vm6 = vcmp.ge.f32.partialorder %v4896_v38, 0.0 }
 0x489   : > { %v5472_v33 = vadd.f32 %v13141_v3, %v16373_v32  ;;  %v5466_v19 = vpop.f32.mrb[211].mxu0  ;;  %13299 = vmatmul.mubr.f32.gmra.mrb[60].mxu0 %v5282_v20  ;;  %vm5026_vm5 = vcmp.ge.f32.partialorder %v4891_v30, 0.0  ;;  %v5155_v48 = vmul.f32 %v16060_v5, %v4891_v30  ;;  %v14380_v16 = vpack.c.bf16 %v10903_v40, %v10902_v36 }
 0x48a   : > { %v5467_v22 = vadd.f32 %v16373_v32, %v5466_v19  ;;  %v6289_v23 = vsel %vm6032_vm3, %v5457_v57, %v6161_v2  ;;  %v6290_v4 = vsel %vm6033_vm4, %v5462_v62, %v6162_v31  ;;  %v14384_v61 = vpack.c.bf16 %v10905_v9, %v10904_v55  ;;  %v10911_v2 = vld [vmem:[%s18010_s4 + $0x300] sm:$0xff]  ;;  %v10912_v55 = vld [vmem:[%s18010_s4 + $0x308] sm:$0xff] }
 0x48b   : > { %v6164_v28 = vmul.f32 %v16377_v59, %v5472_v33  ;;  %13360 = vmatprep.mubr.f32.mxu1 %v6289_v23  ;;  %v5283_v14 = vsel %vm5026_vm5, %v4891_v30, %v5155_v48  ;;  %v5284_v51 = vsel %vm5027_vm6, %v4896_v38, %v5156_v26  ;;  %vm6035_vm8 = vcmp.ge.f32.partialorder %v5472_v33, 0.0  ;;  %14381 = vmatprep.subr.bf16.mxu0 %v14380_v16 }
 0x48c   : > { %v13144_v12 = vpop.f32.mrb[212].mxu0  ;;  %13301 = vmatprep.mubr.f32.mxu0 %v5283_v14  ;;  %13361 = vmatmul.mubr.f32.gmra.mrb[80].mxu1 %v6290_v4  ;;  %vm6034_vm7 = vcmp.ge.f32.partialorder %v5467_v22, 0.0  ;;  %v6163_v63 = vmul.f32 %v16377_v59, %v5467_v22  ;;  %v14392_v19 = vpack.c.bf16 %v10912_v55, %v10911_v2  ;;  %v10906_v4 = vld [vmem:[%s18010_s4 + $0x2f0] sm:$0xff] }
 0x48d   : > { %v5482_v5 = vadd.f32 %v13144_v12, %v16373_v32  ;;  %v5476_v60 = vpop.f32.mrb[213].mxu0  ;;  %13302 = vmatmul.mubr.f32.gmra.mrb[62].mxu0 %v5284_v51  ;;  %v6292_v53 = vsel %vm6035_vm8, %v5472_v33, %v6164_v28 }
 0x48e   : > { %v5477_v45 = vadd.f32 %v16373_v32, %v5476_v60  ;;  %v6291_v43 = vsel %vm6034_vm7, %v5467_v22, %v6163_v63  ;;  %14383 = vmatpush3.bf16.xpose.msra.mxu0 %v14380_v16  ;;  %14393 = vmatprep.subr.bf16.mxu1 %v14392_v19 }
 0x48f   : > { %v6166_v37 = vmul.f32 %v16377_v59, %v5482_v5  ;;  %13363 = vmatprep.mubr.f32.mxu1 %v6291_v43  ;;  %14385 = vmatprep.subr.bf16.mxu0 %v14384_v61  ;;  %vm6037_vm10 = vcmp.ge.f32.partialorder %v5482_v5, 0.0 }
 0x490   : > { %v13147_v44 = vpop.f32.mrb[214].mxu0  ;;  %13364 = vmatmul.mubr.f32.gmra.mrb[82].mxu1 %v6292_v53  ;;  %vm6036_vm9 = vcmp.ge.f32.partialorder %v5477_v45, 0.0  ;;  %v6165_v13 = vmul.f32 %v16377_v59, %v5477_v45 }
 0x491   : > { %v5492_v49 = vadd.f32 %v13147_v44, %v16373_v32  ;;  %v5486_v39 = vpop.f32.mrb[215].mxu0  ;;  %v6294_v54 = vsel %vm6037_vm10, %v5482_v5, %v6166_v37  ;;  %14395 = vmatpush3.bf16.xpose.msra.mxu1 %v14392_v19 }
 0x492   : > { %v5487_v8 = vadd.f32 %v16373_v32, %v5486_v39  ;;  %v6293_v46 = vsel %vm6036_vm9, %v5477_v45, %v6165_v13 }
 0x493   : > { %v6168_v42 = vmul.f32 %v16377_v59, %v5492_v49  ;;  %13366 = vmatprep.mubr.f32.mxu1 %v6293_v46  ;;  %vm6039_vm12 = vcmp.ge.f32.partialorder %v5492_v49, 0.0 }
 0x494   : > { %v13150_v25 = vpop.f32.mrb[216].mxu0  ;;  %13367 = vmatmul.mubr.f32.gmra.mrb[84].mxu1 %v6294_v54  ;;  %vm6038_vm11 = vcmp.ge.f32.partialorder %v5487_v8, 0.0  ;;  %v6167_v1 = vmul.f32 %v16377_v59, %v5487_v8 }
 0x495   : > { %v5502_v34 = vadd.f32 %v13150_v25, %v16373_v32  ;;  %v5496_v15 = vpop.f32.mrb[217].mxu0  ;;  %v6296_v11 = vsel %vm6039_vm12, %v5492_v49, %v6168_v42 }
 0x496   : > { %v5497_v18 = vadd.f32 %v16373_v32, %v5496_v15  ;;  %v6295_v50 = vsel %vm6038_vm11, %v5487_v8, %v6167_v1  ;;  %14387 = vmatpush3.bf16.xpose.msra.mxu0 %v14384_v61  ;;  %v10907_v61 = vld [vmem:[%s18010_s4 + $0x2f8] sm:$0xff] }
 0x497   : > { %v6170_v52 = vmul.f32 %v16377_v59, %v5502_v34  ;;  %13369 = vmatprep.mubr.f32.mxu1 %v6295_v50  ;;  %vm6041_vm14 = vcmp.ge.f32.partialorder %v5502_v34, 0.0  ;;  %v14388_v63 = vpack.c.bf16 %v10907_v61, %v10906_v4  ;;  %v10914_v4 = vld [vmem:[%s18010_s4 + $0x318] sm:$0xff] }
 0x498   : > { %v13153_v47 = vpop.f32.mrb[218].mxu0  ;;  %13370 = vmatmul.mubr.f32.gmra.mrb[86].mxu1 %v6296_v11  ;;  %vm6040_vm13 = vcmp.ge.f32.partialorder %v5497_v18, 0.0  ;;  %v6169_v24 = vmul.f32 %v16377_v59, %v5497_v18 }
 0x499   : > { %v5512_v6 = vadd.f32 %v13153_v47, %v16373_v32  ;;  %v5506_v0 = vpop.f32.mrb[219].mxu0  ;;  %v6298_v62 = vsel %vm6041_vm14, %v5502_v34, %v6170_v52  ;;  %14389 = vmatprep.subr.bf16.mxu0 %v14388_v63 }
 0x49a   : > { %v5507_v41 = vadd.f32 %v16373_v32, %v5506_v0  ;;  %v6297_v35 = vsel %vm6040_vm13, %v5497_v18, %v6169_v24 }
 0x49b   : > { %v6172_v29 = vmul.f32 %v16377_v59, %v5512_v6  ;;  %13372 = vmatprep.mubr.f32.mxu1 %v6297_v35  ;;  %vm6043_vm0 = vcmp.ge.f32.partialorder %v5512_v6, 0.0 }
 0x49c   : > { %v13156_v10 = vpop.f32.mrb[220].mxu0  ;;  %13373 = vmatmul.mubr.f32.gmra.mrb[88].mxu1 %v6298_v62  ;;  %vm6042_vm15 = vcmp.ge.f32.partialorder %v5507_v41, 0.0  ;;  %v6171_v56 = vmul.f32 %v16377_v59, %v5507_v41 }
 0x49d   : > { %v5522_v21 = vadd.f32 %v13156_v10, %v16373_v32  ;;  %v5516_v38 = vpop.f32.mrb[221].mxu0  ;;  %v6300_v58 = vsel %vm6043_vm0, %v5512_v6, %v6172_v29 }
 0x49e   : > { %v5517_v57 = vadd.f32 %v16373_v32, %v5516_v38  ;;  %v6299_v27 = vsel %vm6042_vm15, %v5507_v41, %v6171_v56  ;;  %14391 = vmatpush3.bf16.xpose.msra.mxu0 %v14388_v63 }
 0x49f   : > { %v6174_v7 = vmul.f32 %v16377_v59, %v5522_v21  ;;  %13375 = vmatprep.mubr.f32.mxu1 %v6299_v27  ;;  %vm6045_vm3 = vcmp.ge.f32.partialorder %v5522_v21, 0.0 }
 0x4a0   : > { %v13159_v31 = vpop.f32.mrb[222].mxu0  ;;  %13376 = vmatmul.mubr.f32.gmra.mrb[90].mxu1 %v6300_v58  ;;  %vm6044_vm2 = vcmp.ge.f32.partialorder %v5517_v57, 0.0  ;;  %v6173_v30 = vmul.f32 %v16377_v59, %v5517_v57 }
 0x4a1   : > { %v5532_v17 = vadd.f32 %v13159_v31, %v16373_v32  ;;  %v5526_v20 = vpop.f32.mrb[223].mxu0  ;;  %v6302_v3 = vsel %vm6045_vm3, %v5522_v21, %v6174_v7 }
 0x4a2   : > { %v5527_v36 = vadd.f32 %v16373_v32, %v5526_v20  ;;  %v6301_v40 = vsel %vm6044_vm2, %v5517_v57, %v6173_v30 }
 0x4a3   : > { %v6176_v26 = vmul.f32 %v16377_v59, %v5532_v17  ;;  %13378 = vmatprep.mubr.f32.mxu1 %v6301_v40  ;;  %vm6047_vm5 = vcmp.ge.f32.partialorder %v5532_v17, 0.0 }
 0x4a4   : > { %v13162_v9 = vpop.f32.mrb[224].mxu0  ;;  %13379 = vmatmul.mubr.f32.gmra.mrb[92].mxu1 %v6302_v3  ;;  %vm6046_vm4 = vcmp.ge.f32.partialorder %v5527_v36, 0.0  ;;  %v6175_v33 = vmul.f32 %v16377_v59, %v5527_v36 }
 0x4a5   : > { %v5542_v48 = vadd.f32 %v13162_v9, %v16373_v32  ;;  %v5536_v22 = vpop.f32.mrb[225].mxu0  ;;  %v6304_v14 = vsel %vm6047_vm5, %v5532_v17, %v6176_v26 }
 0x4a6   : > { %v5537_v23 = vadd.f32 %v16373_v32, %v5536_v22  ;;  %v6303_v16 = vsel %vm6046_vm4, %v5527_v36, %v6175_v33 }
 0x4a7   : > { %v6178_v28 = vmul.f32 %v16377_v59, %v5542_v48  ;;  %13381 = vmatprep.mubr.f32.mxu1 %v6303_v16  ;;  %vm6049_vm7 = vcmp.ge.f32.partialorder %v5542_v48, 0.0 }
 0x4a8   : > { %v13165_v12 = vpop.f32.mrb[226].mxu0  ;;  %13382 = vmatmul.mubr.f32.gmra.mrb[94].mxu1 %v6304_v14  ;;  %vm6048_vm6 = vcmp.ge.f32.partialorder %v5537_v23, 0.0  ;;  %v6177_v51 = vmul.f32 %v16377_v59, %v5537_v23  ;;  %v10913_v14 = vld [vmem:[%s18010_s4 + $0x310] sm:$0xff] }
 0x4a9   : > { %v5552_v5 = vadd.f32 %v13165_v12, %v16373_v32  ;;  %v5546_v60 = vpop.f32.mrb[227].mxu0  ;;  %v6306_v53 = vsel %vm6049_vm7, %v5542_v48, %v6178_v28 }
 0x4aa   : > { %v5547_v45 = vadd.f32 %v16373_v32, %v5546_v60  ;;  %v6305_v43 = vsel %vm6048_vm6, %v5537_v23, %v6177_v51  ;;  %v14396_v51 = vpack.c.bf16 %v10914_v4, %v10913_v14 }
 0x4ab   : > { %v6180_v37 = vmul.f32 %v16377_v59, %v5552_v5  ;;  %13384 = vmatprep.mubr.f32.mxu1 %v6305_v43  ;;  %vm6051_vm9 = vcmp.ge.f32.partialorder %v5552_v5, 0.0 }
 0x4ac   : > { %v13168_v44 = vpop.f32.mrb[228].mxu0  ;;  %13385 = vmatmul.mubr.f32.gmra.mrb[96].mxu1 %v6306_v53  ;;  %vm6050_vm8 = vcmp.ge.f32.partialorder %v5547_v45, 0.0  ;;  %v6179_v13 = vmul.f32 %v16377_v59, %v5547_v45  ;;  %14397 = vmatprep.subr.bf16.mxu1 %v14396_v51 }
 0x4ad   : > { %v5562_v49 = vadd.f32 %v13168_v44, %v16373_v32  ;;  %v5556_v39 = vpop.f32.mrb[229].mxu0  ;;  %v6308_v54 = vsel %vm6051_vm9, %v5552_v5, %v6180_v37  ;;  %14399 = vmatpush3.bf16.xpose.msra.mxu1 %v14396_v51 }
 0x4ae   : > { %v5557_v8 = vadd.f32 %v16373_v32, %v5556_v39  ;;  %v6307_v46 = vsel %vm6050_vm8, %v5547_v45, %v6179_v13 }
 0x4af   : > { %v6182_v42 = vmul.f32 %v16377_v59, %v5562_v49  ;;  %13387 = vmatprep.mubr.f32.mxu1 %v6307_v46  ;;  %vm6053_vm11 = vcmp.ge.f32.partialorder %v5562_v49, 0.0 }
 0x4b0   : > { %v13171_v25 = vpop.f32.mrb[230].mxu0  ;;  %13388 = vmatmul.mubr.f32.gmra.mrb[98].mxu1 %v6308_v54  ;;  %vm6052_vm10 = vcmp.ge.f32.partialorder %v5557_v8, 0.0  ;;  %v6181_v1 = vmul.f32 %v16377_v59, %v5557_v8 }
 0x4b1   : > { %v5572_v34 = vadd.f32 %v13171_v25, %v16373_v32  ;;  %v5566_v15 = vpop.f32.mrb[231].mxu0  ;;  %v6310_v11 = vsel %vm6053_vm11, %v5562_v49, %v6182_v42 }
 0x4b2   : > { %v5567_v18 = vadd.f32 %v16373_v32, %v5566_v15  ;;  %v6309_v50 = vsel %vm6052_vm10, %v5557_v8, %v6181_v1 }
 0x4b3   : > { %v6184_v52 = vmul.f32 %v16377_v59, %v5572_v34  ;;  %13390 = vmatprep.mubr.f32.mxu1 %v6309_v50  ;;  %vm6055_vm13 = vcmp.ge.f32.partialorder %v5572_v34, 0.0 }
 0x4b4   : > { %v13174_v47 = vpop.f32.mrb[232].mxu0  ;;  %13391 = vmatmul.mubr.f32.gmra.mrb[100].mxu1 %v6310_v11  ;;  %vm6054_vm12 = vcmp.ge.f32.partialorder %v5567_v18, 0.0  ;;  %v6183_v24 = vmul.f32 %v16377_v59, %v5567_v18 }
 0x4b5   : > { %v5582_v6 = vadd.f32 %v13174_v47, %v16373_v32  ;;  %v5576_v0 = vpop.f32.mrb[233].mxu0  ;;  %v6312_v62 = vsel %vm6055_vm13, %v5572_v34, %v6184_v52 }
 0x4b6   : > { %v5577_v41 = vadd.f32 %v16373_v32, %v5576_v0  ;;  %v6311_v35 = vsel %vm6054_vm12, %v5567_v18, %v6183_v24 }
 0x4b7   : > { %v6186_v29 = vmul.f32 %v16377_v59, %v5582_v6  ;;  %13393 = vmatprep.mubr.f32.mxu1 %v6311_v35  ;;  %vm6057_vm15 = vcmp.ge.f32.partialorder %v5582_v6, 0.0 }
 0x4b8   : > { %v13177_v10 = vpop.f32.mrb[234].mxu0  ;;  %13394 = vmatmul.mubr.f32.gmra.mrb[102].mxu1 %v6312_v62  ;;  %vm6056_vm14 = vcmp.ge.f32.partialorder %v5577_v41, 0.0  ;;  %v6185_v56 = vmul.f32 %v16377_v59, %v5577_v41 }
 0x4b9   : > { %v5592_v21 = vadd.f32 %v13177_v10, %v16373_v32  ;;  %v5586_v38 = vpop.f32.mrb[235].mxu0  ;;  %v6314_v58 = vsel %vm6057_vm15, %v5582_v6, %v6186_v29 }
 0x4ba   : > { %v5587_v57 = vadd.f32 %v16373_v32, %v5586_v38  ;;  %v6313_v27 = vsel %vm6056_vm14, %v5577_v41, %v6185_v56 }
 0x4bb   : > { %v6188_v7 = vmul.f32 %v16377_v59, %v5592_v21  ;;  %13396 = vmatprep.mubr.f32.mxu1 %v6313_v27  ;;  %vm6059_vm2 = vcmp.ge.f32.partialorder %v5592_v21, 0.0 }
 0x4bc   : > { %v13180_v31 = vpop.f32.mrb[236].mxu0  ;;  %13397 = vmatmul.mubr.f32.gmra.mrb[104].mxu1 %v6314_v58  ;;  %vm6058_vm0 = vcmp.ge.f32.partialorder %v5587_v57, 0.0  ;;  %v6187_v30 = vmul.f32 %v16377_v59, %v5587_v57 }
 0x4bd   : > { %v5602_v17 = vadd.f32 %v13180_v31, %v16373_v32  ;;  %v5596_v20 = vpop.f32.mrb[237].mxu0  ;;  %v6316_v3 = vsel %vm6059_vm2, %v5592_v21, %v6188_v7 }
 0x4be   : > { %v5597_v36 = vadd.f32 %v16373_v32, %v5596_v20  ;;  %v6315_v40 = vsel %vm6058_vm0, %v5587_v57, %v6187_v30 }
 0x4bf   : > { %v6190_v26 = vmul.f32 %v16377_v59, %v5602_v17  ;;  %13399 = vmatprep.mubr.f32.mxu1 %v6315_v40  ;;  %vm6061_vm4 = vcmp.ge.f32.partialorder %v5602_v17, 0.0 }
 0x4c0   : > { %v13183_v2 = vpop.f32.mrb[238].mxu0  ;;  %13400 = vmatmul.mubr.f32.gmra.mrb[106].mxu1 %v6316_v3  ;;  %vm6060_vm3 = vcmp.ge.f32.partialorder %v5597_v36, 0.0  ;;  %v6189_v55 = vmul.f32 %v16377_v59, %v5597_v36 }
 0x4c1   : > { %v5612_v9 = vadd.f32 %v13183_v2, %v16373_v32  ;;  %v5606_v33 = vpop.f32.mrb[239].mxu0  ;;  %v6318_v23 = vsel %vm6061_vm4, %v5602_v17, %v6190_v26 }
 0x4c2   : > { %v5607_v19 = vadd.f32 %v16373_v32, %v5606_v33  ;;  %v6317_v48 = vsel %vm6060_vm3, %v5597_v36, %v6189_v55 }
 0x4c3   : > { %v6192_v22 = vmul.f32 %v16377_v59, %v5612_v9  ;;  %13402 = vmatprep.mubr.f32.mxu1 %v6317_v48  ;;  %vm6063_vm6 = vcmp.ge.f32.partialorder %v5612_v9, 0.0 }
 0x4c4   : > { %v13186_v16 = vpop.f32.mrb[240].mxu0  ;;  %13403 = vmatmul.mubr.f32.gmra.mrb[108].mxu1 %v6318_v23  ;;  %vm6062_vm5 = vcmp.ge.f32.partialorder %v5607_v19, 0.0  ;;  %v6191_v28 = vmul.f32 %v16377_v59, %v5607_v19  ;;  %v16575_v23 = vld [vmem:[%s18011_s5 + $0x3] ss:$0 sm:$0xff] }
 0x4c5   : > { %v5622_v61 = vadd.f32 %v13186_v16, %v16373_v32  ;;  %v5616_v12 = vpop.f32.mrb[241].mxu0  ;;  %v6320_v45 = vsel %vm6063_vm6, %v5612_v9, %v6192_v22 }
 0x4c6   : > { %v5617_v63 = vadd.f32 %v16373_v32, %v5616_v12  ;;  %v6319_v5 = vsel %vm6062_vm5, %v5607_v19, %v6191_v28 }
 0x4c7   : > { %v6194_v60 = vmul.f32 %v16377_v59, %v5622_v61  ;;  %13405 = vmatprep.mubr.f32.mxu1 %v6319_v5  ;;  %vm6065_vm8 = vcmp.ge.f32.partialorder %v5622_v61, 0.0  ;;  %v10916_v5 = vld [vmem:[%s18010_s4 + $0x328] sm:$0xff] }
 0x4c8   : > { %v13189_v43 = vpop.f32.mrb[242].mxu0  ;;  %13406 = vmatmul.mubr.f32.gmra.mrb[110].mxu1 %v6320_v45  ;;  %vm6064_vm7 = vcmp.ge.f32.partialorder %v5617_v63, 0.0  ;;  %v6193_v37 = vmul.f32 %v16377_v59, %v5617_v63 }
 0x4c9   : > { %v5632_v53 = vadd.f32 %v13189_v43, %v16373_v32  ;;  %v5626_v44 = vpop.f32.mrb[243].mxu0  ;;  %v6322_v8 = vsel %vm6065_vm8, %v5622_v61, %v6194_v60 }
 0x4ca   : > { %v5627_v13 = vadd.f32 %v16373_v32, %v5626_v44  ;;  %v6321_v49 = vsel %vm6064_vm7, %v5617_v63, %v6193_v37  ;;  %v10915_v63 = vld [vmem:[%s18010_s4 + $0x320] sm:$0xff] }
 0x4cb   : > { %v6196_v39 = vmul.f32 %v16377_v59, %v5632_v53  ;;  %13408 = vmatprep.mubr.f32.mxu1 %v6321_v49  ;;  %vm6067_vm10 = vcmp.ge.f32.partialorder %v5632_v53, 0.0  ;;  %v14400_v43 = vpack.c.bf16 %v10916_v5, %v10915_v63 }
 0x4cc   : > { %v13192_v46 = vpop.f32.mrb[244].mxu0  ;;  %13409 = vmatmul.mubr.f32.gmra.mrb[112].mxu1 %v6322_v8  ;;  %vm6066_vm9 = vcmp.ge.f32.partialorder %v5627_v13, 0.0  ;;  %v6195_v42 = vmul.f32 %v16377_v59, %v5627_v13 }
 0x4cd   : > { %v5642_v54 = vadd.f32 %v13192_v46, %v16373_v32  ;;  %v5636_v25 = vpop.f32.mrb[245].mxu0  ;;  %v6324_v18 = vsel %vm6067_vm10, %v5632_v53, %v6196_v39  ;;  %14401 = vmatprep.subr.bf16.mxu1 %v14400_v43 }
 0x4ce   : > { %v5637_v1 = vadd.f32 %v16373_v32, %v5636_v25  ;;  %v6323_v34 = vsel %vm6066_vm9, %v5627_v13, %v6195_v42  ;;  %14403 = vmatpush3.bf16.xpose.msra.mxu1 %v14400_v43 }
 0x4cf   : > { %v6198_v15 = vmul.f32 %v16377_v59, %v5642_v54  ;;  %13411 = vmatprep.mubr.f32.mxu1 %v6323_v34  ;;  %vm6069_vm12 = vcmp.ge.f32.partialorder %v5642_v54, 0.0 }
 0x4d0   : > { %v13195_v50 = vpop.f32.mrb[246].mxu0  ;;  %13412 = vmatmul.mubr.f32.gmra.mrb[114].mxu1 %v6324_v18  ;;  %vm6068_vm11 = vcmp.ge.f32.partialorder %v5637_v1, 0.0  ;;  %v6197_v52 = vmul.f32 %v16377_v59, %v5637_v1 }
 0x4d1   : > { %v5652_v11 = vadd.f32 %v13195_v50, %v16373_v32  ;;  %v5646_v47 = vpop.f32.mrb[247].mxu0  ;;  %v6326_v41 = vsel %vm6069_vm12, %v5642_v54, %v6198_v15 }
 0x4d2   : > { %v5647_v24 = vadd.f32 %v16373_v32, %v5646_v47  ;;  %v6325_v6 = vsel %vm6068_vm11, %v5637_v1, %v6197_v52 }
 0x4d3   : > { %v6200_v0 = vmul.f32 %v16377_v59, %v5652_v11  ;;  %13414 = vmatprep.mubr.f32.mxu1 %v6325_v6  ;;  %vm6071_vm14 = vcmp.ge.f32.partialorder %v5652_v11, 0.0 }
 0x4d4   : > { %v13198_v35 = vpop.f32.mrb[248].mxu0  ;;  %13415 = vmatmul.mubr.f32.gmra.mrb[116].mxu1 %v6326_v41  ;;  %vm6070_vm13 = vcmp.ge.f32.partialorder %v5647_v24, 0.0  ;;  %v6199_v29 = vmul.f32 %v16377_v59, %v5647_v24 }
 0x4d5   : > { %v5662_v62 = vadd.f32 %v13198_v35, %v16373_v32  ;;  %v5656_v10 = vpop.f32.mrb[249].mxu0  ;;  %v6328_v57 = vsel %vm6071_vm14, %v5652_v11, %v6200_v0 }
 0x4d6   : > { %v5657_v56 = vadd.f32 %v16373_v32, %v5656_v10  ;;  %v6327_v21 = vsel %vm6070_vm13, %v5647_v24, %v6199_v29 }
 0x4d7   : > { %v6202_v38 = vmul.f32 %v16377_v59, %v5662_v62  ;;  %13417 = vmatprep.mubr.f32.mxu1 %v6327_v21  ;;  %vm6073_vm0 = vcmp.ge.f32.partialorder %v5662_v62, 0.0 }
 0x4d8   : > { %v13201_v27 = vpop.f32.mrb[250].mxu0  ;;  %13418 = vmatmul.mubr.f32.gmra.mrb[118].mxu1 %v6328_v57  ;;  %vm6072_vm15 = vcmp.ge.f32.partialorder %v5657_v56, 0.0  ;;  %v6201_v7 = vmul.f32 %v16377_v59, %v5657_v56 }
 0x4d9   : > { %v5672_v58 = vadd.f32 %v13201_v27, %v16373_v32  ;;  %v5666_v31 = vpop.f32.mrb[251].mxu0  ;;  %v6330_v36 = vsel %vm6073_vm0, %v5662_v62, %v6202_v38 }
 0x4da   : > { %v5667_v30 = vadd.f32 %v16373_v32, %v5666_v31  ;;  %v6329_v17 = vsel %vm6072_vm15, %v5657_v56, %v6201_v7 }
 0x4db   : > { %v6204_v20 = vmul.f32 %v16377_v59, %v5672_v58  ;;  %13420 = vmatprep.mubr.f32.mxu1 %v6329_v17  ;;  %vm6075_vm3 = vcmp.ge.f32.partialorder %v5672_v58, 0.0 }
 0x4dc   : > { %v13204_v40 = vpop.f32.mrb[252].mxu0  ;;  %13421 = vmatmul.mubr.f32.gmra.mrb[120].mxu1 %v6330_v36  ;;  %vm6074_vm2 = vcmp.ge.f32.partialorder %v5667_v30, 0.0  ;;  %v6203_v26 = vmul.f32 %v16377_v59, %v5667_v30 }
 0x4dd   : > { %v5682_v3 = vadd.f32 %v13204_v40, %v16373_v32  ;;  %v5676_v2 = vpop.f32.mrb[253].mxu0  ;;  %v6332_v19 = vsel %vm6075_vm3, %v5672_v58, %v6204_v20 }
 0x4de   : > { %v5677_v55 = vadd.f32 %v16373_v32, %v5676_v2  ;;  %v6331_v9 = vsel %vm6074_vm2, %v5667_v30, %v6203_v26 }
 0x4df   : > { %v6206_v33 = vmul.f32 %v16377_v59, %v5682_v3  ;;  %13423 = vmatprep.mubr.f32.mxu1 %v6331_v9  ;;  %vm6077_vm5 = vcmp.ge.f32.partialorder %v5682_v3, 0.0 }
 0x4e0   : > { %v13207_v48 = vpop.f32.mrb[254].mxu0  ;;  %13424 = vmatmul.mubr.f32.gmra.mrb[122].mxu1 %v6332_v19  ;;  %vm6076_vm4 = vcmp.ge.f32.partialorder %v5677_v55, 0.0  ;;  %v6205_v22 = vmul.f32 %v16377_v59, %v5677_v55 }
 0x4e1   : > { %v5692_v16 = vadd.f32 %v16575_v23, %v13207_v48  ;;  %v5686_v28 = vpop.f32.mrb[255].mxu0  ;;  %v6334_v61 = vsel %vm6077_vm5, %v5682_v3, %v6206_v33 }
 0x4e2   : > { %v5687_v32 = vadd.f32 %v16575_v23, %v5686_v28  ;;  %v6333_v14 = vsel %vm6076_vm4, %v5677_v55, %v6205_v22 }
 0x4e3   : > { %v6208_v4 = vmul.f32 %v16377_v59, %v5692_v16  ;;  %13426 = vmatprep.mubr.f32.mxu1 %v6333_v14  ;;  %vm6079_vm7 = vcmp.ge.f32.partialorder %v5692_v16, 0.0 }
 0x4e4   : > { %v13210_v12 = vpop.f32.mrb[0].mxu0  ;;  %13427 = vmatmul.mubr.f32.gmra.mrb[124].mxu1 %v6334_v61  ;;  %vm6078_vm6 = vcmp.ge.f32.partialorder %v5687_v32, 0.0  ;;  %v6207_v51 = vmul.f32 %v16377_v59, %v5687_v32 }
 0x4e5   : > { %v5702_v60 = vadd.f32 %v16575_v23, %v13210_v12  ;;  %v5696_v45 = vpop.f32.mrb[1].mxu0  ;;  %v6336_v13 = vsel %vm6079_vm7, %v5692_v16, %v6208_v4 }
 0x4e6   : > { %v5697_v37 = vadd.f32 %v16575_v23, %v5696_v45  ;;  %v6335_v53 = vsel %vm6078_vm6, %v5687_v32, %v6207_v51 }
 0x4e7   : > { %v6210_v44 = vmul.f32 %v16377_v59, %v5702_v60  ;;  %13429 = vmatprep.mubr.f32.mxu1 %v6335_v53  ;;  %vm6081_vm9 = vcmp.ge.f32.partialorder %v5702_v60, 0.0  ;;  %v10918_v53 = vld [vmem:[%s18010_s4 + $0x338] sm:$0xff] }
 0x4e8   : > { %v13213_v49 = vpop.f32.mrb[2].mxu0  ;;  %13430 = vmatmul.mubr.f32.gmra.mrb[126].mxu1 %v6336_v13  ;;  %vm6080_vm8 = vcmp.ge.f32.partialorder %v5697_v37, 0.0  ;;  %v6209_v39 = vmul.f32 %v16377_v59, %v5697_v37 }
 0x4e9   : > { %v5712_v8 = vadd.f32 %v16575_v23, %v13213_v49  ;;  %v5706_v46 = vpop.f32.mrb[3].mxu0  ;;  %v6338_v1 = vsel %vm6081_vm9, %v5702_v60, %v6210_v44 }
 0x4ea   : > { %v5707_v42 = vadd.f32 %v16575_v23, %v5706_v46  ;;  %v6337_v54 = vsel %vm6080_vm8, %v5697_v37, %v6209_v39  ;;  %v10917_v37 = vld [vmem:[%s18010_s4 + $0x330] sm:$0xff] }
 0x4eb   : > { %v6212_v25 = vmul.f32 %v16377_v59, %v5712_v8  ;;  %13432 = vmatprep.mubr.f32.mxu1 %v6337_v54  ;;  %vm6083_vm11 = vcmp.ge.f32.partialorder %v5712_v8, 0.0  ;;  %v14404_v49 = vpack.c.bf16 %v10918_v53, %v10917_v37 }
 0x4ec   : > { %v13216_v34 = vpop.f32.mrb[4].mxu0  ;;  %13433 = vmatmul.mubr.f32.gmra.mrb[128].mxu1 %v6338_v1  ;;  %vm6082_vm10 = vcmp.ge.f32.partialorder %v5707_v42, 0.0  ;;  %v6211_v15 = vmul.f32 %v16377_v59, %v5707_v42 }
 0x4ed   : > { %v5722_v18 = vadd.f32 %v16575_v23, %v13216_v34  ;;  %v5716_v50 = vpop.f32.mrb[5].mxu0  ;;  %v6340_v24 = vsel %vm6083_vm11, %v5712_v8, %v6212_v25  ;;  %14405 = vmatprep.subr.bf16.mxu1 %v14404_v49 }
 0x4ee   : > { %v5717_v52 = vadd.f32 %v16575_v23, %v5716_v50  ;;  %v6339_v11 = vsel %vm6082_vm10, %v5707_v42, %v6211_v15  ;;  %14407 = vmatpush3.bf16.xpose.msra.mxu1 %v14404_v49 }
 0x4ef   : > { %v6214_v47 = vmul.f32 %v16377_v59, %v5722_v18  ;;  %13435 = vmatprep.mubr.f32.mxu1 %v6339_v11  ;;  %vm6085_vm13 = vcmp.ge.f32.partialorder %v5722_v18, 0.0 }
 0x4f0   : > { %v13219_v6 = vpop.f32.mrb[6].mxu0  ;;  %13436 = vmatmul.mubr.f32.gmra.mrb[130].mxu1 %v6340_v24  ;;  %vm6084_vm12 = vcmp.ge.f32.partialorder %v5717_v52, 0.0  ;;  %v6213_v0 = vmul.f32 %v16377_v59, %v5717_v52 }
 0x4f1   : > { %v5732_v41 = vadd.f32 %v16575_v23, %v13219_v6  ;;  %v5726_v35 = vpop.f32.mrb[7].mxu0  ;;  %v6342_v56 = vsel %vm6085_vm13, %v5722_v18, %v6214_v47 }
 0x4f2   : > { %v5727_v29 = vadd.f32 %v16575_v23, %v5726_v35  ;;  %v6341_v62 = vsel %vm6084_vm12, %v5717_v52, %v6213_v0 }
 0x4f3   : > { %v6216_v10 = vmul.f32 %v16377_v59, %v5732_v41  ;;  %13438 = vmatprep.mubr.f32.mxu1 %v6341_v62  ;;  %vm6087_vm15 = vcmp.ge.f32.partialorder %v5732_v41, 0.0 }
 0x4f4   : > { %v13222_v21 = vpop.f32.mrb[8].mxu0  ;;  %13439 = vmatmul.mubr.f32.gmra.mrb[132].mxu1 %v6342_v56  ;;  %vm6086_vm14 = vcmp.ge.f32.partialorder %v5727_v29, 0.0  ;;  %v6215_v38 = vmul.f32 %v16377_v59, %v5727_v29 }
 0x4f5   : > { %v5742_v57 = vadd.f32 %v16575_v23, %v13222_v21  ;;  %v5736_v27 = vpop.f32.mrb[9].mxu0  ;;  %v6344_v30 = vsel %vm6087_vm15, %v5732_v41, %v6216_v10 }
 0x4f6   : > { %v5737_v7 = vadd.f32 %v16575_v23, %v5736_v27  ;;  %v6343_v58 = vsel %vm6086_vm14, %v5727_v29, %v6215_v38 }
 0x4f7   : > { %v6218_v31 = vmul.f32 %v16377_v59, %v5742_v57  ;;  %13441 = vmatprep.mubr.f32.mxu1 %v6343_v58  ;;  %vm6089_vm2 = vcmp.ge.f32.partialorder %v5742_v57, 0.0 }
 0x4f8   : > { %v13225_v17 = vpop.f32.mrb[10].mxu0  ;;  %13442 = vmatmul.mubr.f32.gmra.mrb[134].mxu1 %v6344_v30  ;;  %vm6088_vm0 = vcmp.ge.f32.partialorder %v5737_v7, 0.0  ;;  %v6217_v20 = vmul.f32 %v16377_v59, %v5737_v7 }
 0x4f9   : > { %v5752_v36 = vadd.f32 %v16575_v23, %v13225_v17  ;;  %v5746_v40 = vpop.f32.mrb[11].mxu0  ;;  %v6346_v55 = vsel %vm6089_vm2, %v5742_v57, %v6218_v31 }
 0x4fa   : > { %v5747_v26 = vadd.f32 %v16575_v23, %v5746_v40  ;;  %v6345_v3 = vsel %vm6088_vm0, %v5737_v7, %v6217_v20 }
 0x4fb   : > { %v6220_v2 = vmul.f32 %v16377_v59, %v5752_v36  ;;  %13444 = vmatprep.mubr.f32.mxu1 %v6345_v3  ;;  %vm6091_vm4 = vcmp.ge.f32.partialorder %v5752_v36, 0.0 }
 0x4fc   : > { %v13228_v9 = vpop.f32.mrb[12].mxu0  ;;  %13445 = vmatmul.mubr.f32.gmra.mrb[136].mxu1 %v6346_v55  ;;  %vm6090_vm3 = vcmp.ge.f32.partialorder %v5747_v26, 0.0  ;;  %v6219_v33 = vmul.f32 %v16377_v59, %v5747_v26 }
 0x4fd   : > { %v5762_v19 = vadd.f32 %v16575_v23, %v13228_v9  ;;  %v5756_v48 = vpop.f32.mrb[13].mxu0  ;;  %v6348_v32 = vsel %vm6091_vm4, %v5752_v36, %v6220_v2 }
 0x4fe   : > { %v5757_v22 = vadd.f32 %v16575_v23, %v5756_v48  ;;  %v6347_v16 = vsel %vm6090_vm3, %v5747_v26, %v6219_v33 }
 0x4ff   : > { %v6222_v28 = vmul.f32 %v16377_v59, %v5762_v19  ;;  %13447 = vmatprep.mubr.f32.mxu1 %v6347_v16  ;;  %vm6093_vm6 = vcmp.ge.f32.partialorder %v5762_v19, 0.0 }
 0x500   : > { %v13231_v14 = vpop.f32.mrb[14].mxu0  ;;  %13448 = vmatmul.mubr.f32.gmra.mrb[138].mxu1 %v6348_v32  ;;  %vm6092_vm5 = vcmp.ge.f32.partialorder %v5757_v22, 0.0  ;;  %v6221_v4 = vmul.f32 %v16377_v59, %v5757_v22 }
 0x501   : > { %v5772_v61 = vadd.f32 %v16575_v23, %v13231_v14  ;;  %v5766_v12 = vpop.f32.mrb[15].mxu0  ;;  %v6350_v60 = vsel %vm6093_vm6, %v5762_v19, %v6222_v28 }
 0x502   : > { %v5767_v51 = vadd.f32 %v16575_v23, %v5766_v12  ;;  %v6349_v63 = vsel %vm6092_vm5, %v5757_v22, %v6221_v4 }
 0x503   : > { %v6224_v5 = vmul.f32 %v16377_v59, %v5772_v61  ;;  %13450 = vmatprep.mubr.f32.mxu1 %v6349_v63  ;;  %vm6095_vm8 = vcmp.ge.f32.partialorder %v5772_v61, 0.0 }
 0x504   : > { %v13234_v45 = vpop.f32.mrb[16].mxu0  ;;  %13451 = vmatmul.mubr.f32.gmra.mrb[140].mxu1 %v6350_v60  ;;  %vm6094_vm7 = vcmp.ge.f32.partialorder %v5767_v51, 0.0  ;;  %v6223_v43 = vmul.f32 %v16377_v59, %v5767_v51 }
 0x505   : > { %v5782_v44 = vadd.f32 %v16575_v23, %v13234_v45  ;;  %v5776_v13 = vpop.f32.mrb[17].mxu0  ;;  %v6352_v42 = vsel %vm6095_vm8, %v5772_v61, %v6224_v5 }
 0x506   : > { %v5777_v39 = vadd.f32 %v16575_v23, %v5776_v13  ;;  %v6351_v8 = vsel %vm6094_vm7, %v5767_v51, %v6223_v43 }
 0x507   : > { %v6226_v46 = vmul.f32 %v16377_v59, %v5782_v44  ;;  %13453 = vmatprep.mubr.f32.mxu1 %v6351_v8  ;;  %vm6097_vm10 = vcmp.ge.f32.partialorder %v5782_v44, 0.0  ;;  %v10920_v8 = vld [vmem:[%s18010_s4 + $0x348] sm:$0xff] }
 0x508   : > { %v13237_v54 = vpop.f32.mrb[18].mxu0  ;;  %13454 = vmatmul.mubr.f32.gmra.mrb[142].mxu1 %v6352_v42  ;;  %vm6096_vm9 = vcmp.ge.f32.partialorder %v5777_v39, 0.0  ;;  %v6225_v25 = vmul.f32 %v16377_v59, %v5777_v39 }
 0x509   : > { %v5792_v1 = vadd.f32 %v16575_v23, %v13237_v54  ;;  %v5786_v34 = vpop.f32.mrb[19].mxu0  ;;  %v6354_v52 = vsel %vm6097_vm10, %v5782_v44, %v6226_v46 }
 0x50a   : > { %v5787_v15 = vadd.f32 %v16575_v23, %v5786_v34  ;;  %v6353_v18 = vsel %vm6096_vm9, %v5777_v39, %v6225_v25  ;;  %v10919_v39 = vld [vmem:[%s18010_s4 + $0x340] sm:$0xff] }
 0x50b   : > { %v6228_v50 = vmul.f32 %v16377_v59, %v5792_v1  ;;  %13456 = vmatprep.mubr.f32.mxu1 %v6353_v18  ;;  %vm6099_vm12 = vcmp.ge.f32.partialorder %v5792_v1, 0.0  ;;  %v14408_v54 = vpack.c.bf16 %v10920_v8, %v10919_v39 }
 0x50c   : > { %v13240_v11 = vpop.f32.mrb[20].mxu0  ;;  %13457 = vmatmul.mubr.f32.gmra.mrb[144].mxu1 %v6354_v52  ;;  %vm6098_vm11 = vcmp.ge.f32.partialorder %v5787_v15, 0.0  ;;  %v6227_v47 = vmul.f32 %v16377_v59, %v5787_v15 }
 0x50d   : > { %v5802_v24 = vadd.f32 %v16575_v23, %v13240_v11  ;;  %v5796_v6 = vpop.f32.mrb[21].mxu0  ;;  %v6356_v29 = vsel %vm6099_vm12, %v5792_v1, %v6228_v50  ;;  %14409 = vmatprep.subr.bf16.mxu1 %v14408_v54 }
 0x50e   : > { %v5797_v0 = vadd.f32 %v16575_v23, %v5796_v6  ;;  %v6355_v41 = vsel %vm6098_vm11, %v5787_v15, %v6227_v47  ;;  %14411 = vmatpush3.bf16.xpose.msra.mxu1 %v14408_v54 }
 0x50f   : > { %v6230_v35 = vmul.f32 %v16377_v59, %v5802_v24  ;;  %13459 = vmatprep.mubr.f32.mxu1 %v6355_v41  ;;  %vm6101_vm14 = vcmp.ge.f32.partialorder %v5802_v24, 0.0 }
 0x510   : > { %v13243_v62 = vpop.f32.mrb[22].mxu0  ;;  %13460 = vmatmul.mubr.f32.gmra.mrb[146].mxu1 %v6356_v29  ;;  %vm6100_vm13 = vcmp.ge.f32.partialorder %v5797_v0, 0.0  ;;  %v6229_v10 = vmul.f32 %v16377_v59, %v5797_v0 }
 0x511   : > { %v5812_v56 = vadd.f32 %v16575_v23, %v13243_v62  ;;  %v5806_v21 = vpop.f32.mrb[23].mxu0  ;;  %v6358_v7 = vsel %vm6101_vm14, %v5802_v24, %v6230_v35 }
 0x512   : > { %v5807_v38 = vadd.f32 %v16575_v23, %v5806_v21  ;;  %v6357_v57 = vsel %vm6100_vm13, %v5797_v0, %v6229_v10 }
 0x513   : > { %v6232_v27 = vmul.f32 %v16377_v59, %v5812_v56  ;;  %13462 = vmatprep.mubr.f32.mxu1 %v6357_v57  ;;  %vm6103_vm0 = vcmp.ge.f32.partialorder %v5812_v56, 0.0 }
 0x514   : > { %v13246_v58 = vpop.f32.mrb[24].mxu0  ;;  %13463 = vmatmul.mubr.f32.gmra.mrb[148].mxu1 %v6358_v7  ;;  %vm6102_vm15 = vcmp.ge.f32.partialorder %v5807_v38, 0.0  ;;  %v6231_v31 = vmul.f32 %v16377_v59, %v5807_v38 }
 0x515   : > { %v5822_v30 = vadd.f32 %v16575_v23, %v13246_v58  ;;  %v5816_v17 = vpop.f32.mrb[25].mxu0  ;;  %v6360_v26 = vsel %vm6103_vm0, %v5812_v56, %v6232_v27 }
 0x516   : > { %v5817_v20 = vadd.f32 %v16575_v23, %v5816_v17  ;;  %v6359_v36 = vsel %vm6102_vm15, %v5807_v38, %v6231_v31 }
 0x517   : > { %v6234_v40 = vmul.f32 %v16377_v59, %v5822_v30  ;;  %13465 = vmatprep.mubr.f32.mxu1 %v6359_v36  ;;  %vm6105_vm3 = vcmp.ge.f32.partialorder %v5822_v30, 0.0 }
 0x518   : > { %v13249_v3 = vpop.f32.mrb[26].mxu0  ;;  %13466 = vmatmul.mubr.f32.gmra.mrb[150].mxu1 %v6360_v26  ;;  %vm6104_vm2 = vcmp.ge.f32.partialorder %v5817_v20, 0.0  ;;  %v6233_v2 = vmul.f32 %v16377_v59, %v5817_v20 }
 0x519   : > { %v5832_v55 = vadd.f32 %v16575_v23, %v13249_v3  ;;  %v5826_v9 = vpop.f32.mrb[27].mxu0  ;;  %v6362_v22 = vsel %vm6105_vm3, %v5822_v30, %v6234_v40 }
 0x51a   : > { %v5827_v33 = vadd.f32 %v16575_v23, %v5826_v9  ;;  %v6361_v19 = vsel %vm6104_vm2, %v5817_v20, %v6233_v2 }
 0x51b   : > { %v6236_v48 = vmul.f32 %v16377_v59, %v5832_v55  ;;  %13468 = vmatprep.mubr.f32.mxu1 %v6361_v19  ;;  %vm6107_vm5 = vcmp.ge.f32.partialorder %v5832_v55, 0.0 }
 0x51c   : > { %v13252_v16 = vpop.f32.mrb[28].mxu0  ;;  %13469 = vmatmul.mubr.f32.gmra.mrb[152].mxu1 %v6362_v22  ;;  %vm6106_vm4 = vcmp.ge.f32.partialorder %v5827_v33, 0.0  ;;  %v6235_v28 = vmul.f32 %v16377_v59, %v5827_v33 }
 0x51d   : > { %v5842_v32 = vadd.f32 %v16575_v23, %v13252_v16  ;;  %v5836_v14 = vpop.f32.mrb[29].mxu0  ;;  %v6364_v51 = vsel %vm6107_vm5, %v5832_v55, %v6236_v48 }
 0x51e   : > { %v5837_v4 = vadd.f32 %v16575_v23, %v5836_v14  ;;  %v6363_v61 = vsel %vm6106_vm4, %v5827_v33, %v6235_v28 }
 0x51f   : > { %v6238_v12 = vmul.f32 %v16377_v59, %v5842_v32  ;;  %13471 = vmatprep.mubr.f32.mxu1 %v6363_v61  ;;  %vm6109_vm7 = vcmp.ge.f32.partialorder %v5842_v32, 0.0 }
 0x520   : > { %v13255_v63 = vpop.f32.mrb[30].mxu0  ;;  %13472 = vmatmul.mubr.f32.gmra.mrb[154].mxu1 %v6364_v51  ;;  %vm6108_vm6 = vcmp.ge.f32.partialorder %v5837_v4, 0.0  ;;  %v6237_v5 = vmul.f32 %v16377_v59, %v5837_v4 }
 0x521   : > { %v5852_v60 = vadd.f32 %v16575_v23, %v13255_v63  ;;  %v5846_v45 = vpop.f32.mrb[31].mxu0  ;;  %v6366_v44 = vsel %vm6109_vm7, %v5842_v32, %v6238_v12 }
 0x522   : > { %v5847_v43 = vadd.f32 %v16575_v23, %v5846_v45  ;;  %v6365_v37 = vsel %vm6108_vm6, %v5837_v4, %v6237_v5  ;;  %v16691_v5 = vld [vmem:[%s18011_s5 + $0x4] ss:$0 sm:$0xff] }
 0x523   : > { %v6240_v53 = vmul.f32 %v16377_v59, %v5852_v60  ;;  %13474 = vmatprep.mubr.f32.mxu1 %v6365_v37  ;;  %vm6111_vm9 = vcmp.ge.f32.partialorder %v5852_v60, 0.0 }
 0x524   : > { %v13258_v13 = vpop.f32.mrb[32].mxu0  ;;  %13475 = vmatmul.mubr.f32.gmra.mrb[156].mxu1 %v6366_v44  ;;  %vm6110_vm8 = vcmp.ge.f32.partialorder %v5847_v43, 0.0  ;;  %v6239_v49 = vmul.f32 %v16377_v59, %v5847_v43 }
 0x525   : > { %v5862_v46 = vadd.f32 %v16575_v23, %v13258_v13  ;;  %v5856_v42 = vpop.f32.mrb[33].mxu0  ;;  %v6368_v15 = vsel %vm6111_vm9, %v5852_v60, %v6240_v53  ;;  %v16695_v53 = vstv %s10891_s10 }
 0x526   : > { %v5857_v25 = vadd.f32 %v16575_v23, %v5856_v42  ;;  %v6367_v1 = vsel %vm6110_vm8, %v5847_v43, %v6239_v49 }
 0x527   : > { %v6242_v34 = vmul.f32 %v16377_v59, %v5862_v46  ;;  %13477 = vmatprep.mubr.f32.mxu1 %v6367_v1  ;;  %vm6113_vm11 = vcmp.ge.f32.partialorder %v5862_v46, 0.0 }
 0x528   : > { %v13261_v18 = vpop.f32.mrb[34].mxu0  ;;  %13478 = vmatmul.mubr.f32.gmra.mrb[158].mxu1 %v6368_v15  ;;  %vm6112_vm10 = vcmp.ge.f32.partialorder %v5857_v25, 0.0  ;;  %v6241_v50 = vmul.f32 %v16377_v59, %v5857_v25 }
 0x529   : > { %v5872_v52 = vadd.f32 %v16575_v23, %v13261_v18  ;;  %v5866_v11 = vpop.f32.mrb[35].mxu0  ;;  %v6370_v0 = vsel %vm6113_vm11, %v5862_v46, %v6242_v34 }
 0x52a   : > { %v5867_v47 = vadd.f32 %v16575_v23, %v5866_v11  ;;  %v6369_v24 = vsel %vm6112_vm10, %v5857_v25, %v6241_v50 }
 0x52b   : > { %v6244_v6 = vmul.f32 %v16377_v59, %v5872_v52  ;;  %13480 = vmatprep.mubr.f32.mxu1 %v6369_v24  ;;  %vm6115_vm13 = vcmp.ge.f32.partialorder %v5872_v52, 0.0 }
 0x52c   : > { %v13264_v41 = vpop.f32.mrb[36].mxu0  ;;  %13481 = vmatmul.mubr.f32.gmra.mrb[160].mxu1 %v6370_v0  ;;  %vm6114_vm12 = vcmp.ge.f32.partialorder %v5867_v47, 0.0  ;;  %v6243_v35 = vmul.f32 %v16377_v59, %v5867_v47 }
 0x52d   : > { %v5882_v29 = vadd.f32 %v16575_v23, %v13264_v41  ;;  %v5876_v62 = vpop.f32.mrb[37].mxu0  ;;  %v6372_v38 = vsel %vm6115_vm13, %v5872_v52, %v6244_v6 }
 0x52e   : > { %v5877_v10 = vadd.f32 %v16575_v23, %v5876_v62  ;;  %v6371_v56 = vsel %vm6114_vm12, %v5867_v47, %v6243_v35 }
 0x52f   : > { %v6246_v21 = vmul.f32 %v16377_v59, %v5882_v29  ;;  %13483 = vmatprep.mubr.f32.mxu1 %v6371_v56  ;;  %vm6117_vm15 = vcmp.ge.f32.partialorder %v5882_v29, 0.0 }
 0x530   : > { %v13267_v57 = vpop.f32.mrb[38].mxu0  ;;  %13484 = vmatmul.mubr.f32.gmra.mrb[162].mxu1 %v6372_v38  ;;  %vm6116_vm14 = vcmp.ge.f32.partialorder %v5877_v10, 0.0  ;;  %v6245_v27 = vmul.f32 %v16377_v59, %v5877_v10 }
 0x531   : > { %v5892_v7 = vadd.f32 %v16575_v23, %v13267_v57  ;;  %v5886_v58 = vpop.f32.mrb[39].mxu0  ;;  %v6374_v20 = vsel %vm6117_vm15, %v5882_v29, %v6246_v21 }
 0x532   : > { %v5887_v31 = vadd.f32 %v16575_v23, %v5886_v58  ;;  %v6373_v30 = vsel %vm6116_vm14, %v5877_v10, %v6245_v27 }
 0x533   : > { %v6248_v17 = vmul.f32 %v16377_v59, %v5892_v7  ;;  %13486 = vmatprep.mubr.f32.mxu1 %v6373_v30  ;;  %vm6119_vm2 = vcmp.ge.f32.partialorder %v5892_v7, 0.0 }
 0x534   : > { %v13270_v36 = vpop.f32.mrb[40].mxu0  ;;  %13487 = vmatmul.mubr.f32.gmra.mrb[164].mxu1 %v6374_v20  ;;  %vm6118_vm0 = vcmp.ge.f32.partialorder %v5887_v31, 0.0  ;;  %v6247_v40 = vmul.f32 %v16377_v59, %v5887_v31 }
 0x535   : > { %v5902_v26 = vadd.f32 %v16575_v23, %v13270_v36  ;;  %v5896_v3 = vpop.f32.mrb[41].mxu0  ;;  %v6376_v33 = vsel %vm6119_vm2, %v5892_v7, %v6248_v17 }
 0x536   : > { %v5897_v2 = vadd.f32 %v16575_v23, %v5896_v3  ;;  %v6375_v55 = vsel %vm6118_vm0, %v5887_v31, %v6247_v40 }
 0x537   : > { %v6250_v9 = vmul.f32 %v16377_v59, %v5902_v26  ;;  %13489 = vmatprep.mubr.f32.mxu1 %v6375_v55  ;;  %vm6121_vm4 = vcmp.ge.f32.partialorder %v5902_v26, 0.0 }
 0x538   : > { %v13273_v19 = vpop.f32.mrb[42].mxu0  ;;  %13490 = vmatmul.mubr.f32.gmra.mrb[166].mxu1 %v6376_v33  ;;  %vm6120_vm3 = vcmp.ge.f32.partialorder %v5897_v2, 0.0  ;;  %v6249_v48 = vmul.f32 %v16377_v59, %v5897_v2 }
 0x539   : > { %v5912_v22 = vadd.f32 %v16575_v23, %v13273_v19  ;;  %v5906_v16 = vpop.f32.mrb[43].mxu0  ;;  %v6378_v4 = vsel %vm6121_vm4, %v5902_v26, %v6250_v9 }
 0x53a   : > { %v5907_v28 = vadd.f32 %v16575_v23, %v5906_v16  ;;  %v6377_v32 = vsel %vm6120_vm3, %v5897_v2, %v6249_v48 }
 0x53b   : > { %v6252_v14 = vmul.f32 %v16377_v59, %v5912_v22  ;;  %13492 = vmatprep.mubr.f32.mxu1 %v6377_v32  ;;  %vm6123_vm6 = vcmp.ge.f32.partialorder %v5912_v22, 0.0 }
 0x53c   : > { %v13276_v61 = vpop.f32.mrb[44].mxu0  ;;  %13493 = vmatmul.mubr.f32.gmra.mrb[168].mxu1 %v6378_v4  ;;  %vm6122_vm5 = vcmp.ge.f32.partialorder %v5907_v28, 0.0  ;;  %v6251_v12 = vmul.f32 %v16377_v59, %v5907_v28 }
 0x53d   : > { %v5922_v51 = vadd.f32 %v16575_v23, %v13276_v61  ;;  %v5916_v63 = vpop.f32.mrb[45].mxu0  ;;  %v6380_v44 = vsel %vm6123_vm6, %v5912_v22, %v6252_v14 }
 0x53e   : > { %v5917_v60 = vadd.f32 %v16575_v23, %v5916_v63  ;;  %v6379_v45 = vsel %vm6122_vm5, %v5907_v28, %v6251_v12 }
 0x53f   : > { %v6254_v43 = vmul.f32 %v16377_v59, %v5922_v51  ;;  %v13338_v37 = vpop.f32.mrb[64].mxu1  ;;  %13495 = vmatprep.mubr.f32.mxu1 %v6379_v45  ;;  %vm6125_vm7 = vcmp.ge.f32.partialorder %v5922_v51, 0.0 }
 0x540   : > { %v6498_v13 = vadd.f32 %v13338_v37, %v16691_v5  ;;  %v13279_v49 = vpop.f32.mrb[46].mxu0  ;;  %v6492_v39 = vpop.f32.mrb[65].mxu1  ;;  %13496 = vmatmul.mubr.f32.gmra.mrb[170].mxu1 %v6380_v44  ;;  %vm6124_vm8 = vcmp.ge.f32.partialorder %v5917_v60, 0.0  ;;  %v6253_v8 = vmul.f32 %v16377_v59, %v5917_v60 }
 0x541   : > { %v5932_v46 = vadd.f32 %v16575_v23, %v13279_v49  ;;  %v6493_v42 = vadd.f32 %v16691_v5, %v6492_v39  ;;  %v5926_v54 = vpop.f32.mrb[47].mxu0  ;;  %v6382_v25 = vsel %vm6125_vm7, %v5922_v51, %v6254_v43 }
 0x542   : > { %vm7133_vm9 = vcmp.ge.f32.partialorder %v6498_v13, 0.0  ;;  %v7262_v1 = vmul.f32 %v16695_v53, %v6498_v13  ;;  %v5927_v34 = vadd.f32 %v16575_v23, %v5926_v54  ;;  %v6381_v15 = vsel %vm6124_vm8, %v5917_v60, %v6253_v8 }
 0x543   : > { %v6256_v18 = vmul.f32 %v16377_v59, %v5932_v46  ;;  %v7261_v50 = vmul.f32 %v16695_v53, %v6493_v42  ;;  %v13341_v52 = vpop.f32.mrb[66].mxu1  ;;  %13498 = vmatprep.mubr.f32.mxu1 %v6381_v15  ;;  %vm7132_vm10 = vcmp.ge.f32.partialorder %v6493_v42, 0.0  ;;  %vm6127_vm11 = vcmp.ge.f32.partialorder %v5932_v46, 0.0 }
 0x544   : > { %v7390_v11 = vsel %vm7133_vm9, %v6498_v13, %v7262_v1  ;;  %v6508_v47 = vadd.f32 %v13341_v52, %v16691_v5  ;;  %v13282_v24 = vpop.f32.mrb[48].mxu0  ;;  %v6502_v6 = vpop.f32.mrb[67].mxu1  ;;  %13499 = vmatmul.mubr.f32.gmra.mrb[172].mxu1 %v6382_v25  ;;  %vm6126_vm12 = vcmp.ge.f32.partialorder %v5927_v34, 0.0  ;;  %v6255_v0 = vmul.f32 %v16377_v59, %v5927_v34 }
 0x545   : > { %v5942_v41 = vadd.f32 %v16575_v23, %v13282_v24  ;;  %v6503_v35 = vadd.f32 %v16691_v5, %v6502_v6  ;;  %v5936_v29 = vpop.f32.mrb[49].mxu0  ;;  %v7389_v62 = vsel %vm7132_vm10, %v6493_v42, %v7261_v50  ;;  %v6384_v10 = vsel %vm6127_vm11, %v5932_v46, %v6256_v18 }
 0x546   : > { %vm7135_vm13 = vcmp.ge.f32.partialorder %v6508_v47, 0.0  ;;  %v7264_v56 = vmul.f32 %v16695_v53, %v6508_v47  ;;  %v5937_v21 = vadd.f32 %v16575_v23, %v5936_v29  ;;  %13560 = vmatprep.mubr.f32.mxu0 %v7389_v62  ;;  %v6383_v38 = vsel %vm6126_vm12, %v5927_v34, %v6255_v0 }
 0x547   : > { %v6258_v57 = vmul.f32 %v16377_v59, %v5942_v41  ;;  %v7263_v27 = vmul.f32 %v16695_v53, %v6503_v35  ;;  %v13344_v7 = vpop.f32.mrb[68].mxu1  ;;  %13501 = vmatprep.mubr.f32.mxu1 %v6383_v38  ;;  %13561 = vmatmul.mubr.f32.vlgmr.msra.gmra.mrb[64].mxu0 %v7390_v11  ;;  %vm7134_vm14 = vcmp.ge.f32.partialorder %v6503_v35, 0.0  ;;  %vm6129_vm15 = vcmp.ge.f32.partialorder %v5942_v41, 0.0 }
 0x548   : > { %v7392_v58 = vsel %vm7135_vm13, %v6508_v47, %v7264_v56  ;;  %v6518_v31 = vadd.f32 %v13344_v7, %v16691_v5  ;;  %v13285_v30 = vpop.f32.mrb[50].mxu0  ;;  %v6512_v17 = vpop.f32.mrb[69].mxu1  ;;  %13502 = vmatmul.mubr.f32.gmra.mrb[174].mxu1 %v6384_v10  ;;  %vm6128_vm0 = vcmp.ge.f32.partialorder %v5937_v21, 0.0  ;;  %v6257_v20 = vmul.f32 %v16377_v59, %v5937_v21 }
 0x549   : > { %v5952_v36 = vadd.f32 %v16575_v23, %v13285_v30  ;;  %v6513_v40 = vadd.f32 %v16691_v5, %v6512_v17  ;;  %v5946_v26 = vpop.f32.mrb[51].mxu0  ;;  %v7391_v3 = vsel %vm7134_vm14, %v6503_v35, %v7263_v27  ;;  %v6386_v2 = vsel %vm6129_vm15, %v5942_v41, %v6258_v57 }
 0x54a   : > { %vm7137_vm2 = vcmp.ge.f32.partialorder %v6518_v31, 0.0  ;;  %v7266_v55 = vmul.f32 %v16695_v53, %v6518_v31  ;;  %v5947_v9 = vadd.f32 %v16575_v23, %v5946_v26  ;;  %13563 = vmatprep.mubr.f32.mxu0 %v7391_v3  ;;  %v6385_v33 = vsel %vm6128_vm0, %v5937_v21, %v6257_v20 }
 0x54b   : > { %v6260_v19 = vmul.f32 %v16377_v59, %v5952_v36  ;;  %v7265_v48 = vmul.f32 %v16695_v53, %v6513_v40  ;;  %v13347_v22 = vpop.f32.mrb[70].mxu1  ;;  %13504 = vmatprep.mubr.f32.mxu1 %v6385_v33  ;;  %13564 = vmatmul.mubr.f32.gmra.mrb[66].mxu0 %v7392_v58  ;;  %vm7136_vm3 = vcmp.ge.f32.partialorder %v6513_v40, 0.0  ;;  %vm6131_vm4 = vcmp.ge.f32.partialorder %v5952_v36, 0.0 }
 0x54c   : > { %v7394_v16 = vsel %vm7137_vm2, %v6518_v31, %v7266_v55  ;;  %v6528_v28 = vadd.f32 %v13347_v22, %v16691_v5  ;;  %v13288_v32 = vpop.f32.mrb[52].mxu0  ;;  %v6522_v14 = vpop.f32.mrb[71].mxu1  ;;  %13505 = vmatmul.mubr.f32.gmra.mrb[176].mxu1 %v6386_v2  ;;  %vm6130_vm5 = vcmp.ge.f32.partialorder %v5947_v9, 0.0  ;;  %v6259_v4 = vmul.f32 %v16377_v59, %v5947_v9 }
 0x54d   : > { %v5962_v61 = vadd.f32 %v16575_v23, %v13288_v32  ;;  %v6523_v12 = vadd.f32 %v16691_v5, %v6522_v14  ;;  %v5956_v51 = vpop.f32.mrb[53].mxu0  ;;  %v7393_v63 = vsel %vm7136_vm3, %v6513_v40, %v7265_v48  ;;  %v6388_v60 = vsel %vm6131_vm4, %v5952_v36, %v6260_v19 }
 0x54e   : > { %vm7139_vm6 = vcmp.ge.f32.partialorder %v6528_v28, 0.0  ;;  %v7268_v45 = vmul.f32 %v16695_v53, %v6528_v28  ;;  %v5957_v43 = vadd.f32 %v16575_v23, %v5956_v51  ;;  %13566 = vmatprep.mubr.f32.mxu0 %v7393_v63  ;;  %v6387_v37 = vsel %vm6130_vm5, %v5947_v9, %v6259_v4 }
 0x54f   : > { %v6262_v44 = vmul.f32 %v16377_v59, %v5962_v61  ;;  %v7267_v13 = vmul.f32 %v16695_v53, %v6523_v12  ;;  %v13350_v49 = vpop.f32.mrb[72].mxu1  ;;  %13507 = vmatprep.mubr.f32.mxu1 %v6387_v37  ;;  %13567 = vmatmul.mubr.f32.gmra.mrb[68].mxu0 %v7394_v16  ;;  %vm7138_vm7 = vcmp.ge.f32.partialorder %v6523_v12, 0.0  ;;  %vm6133_vm8 = vcmp.ge.f32.partialorder %v5962_v61, 0.0 }
 0x550   : > { %v7396_v39 = vsel %vm7139_vm6, %v6528_v28, %v7268_v45  ;;  %v6538_v8 = vadd.f32 %v13350_v49, %v16691_v5  ;;  %v13291_v46 = vpop.f32.mrb[54].mxu0  ;;  %v6532_v42 = vpop.f32.mrb[73].mxu1  ;;  %13508 = vmatmul.mubr.f32.gmra.mrb[178].mxu1 %v6388_v60  ;;  %vm6132_vm9 = vcmp.ge.f32.partialorder %v5957_v43, 0.0  ;;  %v6261_v54 = vmul.f32 %v16377_v59, %v5957_v43 }
 0x551   : > { %v5972_v25 = vadd.f32 %v16575_v23, %v13291_v46  ;;  %v6533_v1 = vadd.f32 %v16691_v5, %v6532_v42  ;;  %v5966_v34 = vpop.f32.mrb[55].mxu0  ;;  %v7395_v15 = vsel %vm7138_vm7, %v6523_v12, %v7267_v13  ;;  %v6390_v18 = vsel %vm6133_vm8, %v5962_v61, %v6262_v44 }
 0x552   : > { %vm7141_vm10 = vcmp.ge.f32.partialorder %v6538_v8, 0.0  ;;  %v7270_v50 = vmul.f32 %v16695_v53, %v6538_v8  ;;  %v5967_v52 = vadd.f32 %v16575_v23, %v5966_v34  ;;  %13569 = vmatprep.mubr.f32.mxu0 %v7395_v15  ;;  %v6389_v11 = vsel %vm6132_vm9, %v5957_v43, %v6261_v54 }
 0x553   : > { %v6264_v47 = vmul.f32 %v16377_v59, %v5972_v25  ;;  %v7269_v24 = vmul.f32 %v16695_v53, %v6533_v1  ;;  %v13353_v6 = vpop.f32.mrb[74].mxu1  ;;  %13510 = vmatprep.mubr.f32.mxu1 %v6389_v11  ;;  %13570 = vmatmul.mubr.f32.gmra.mrb[70].mxu0 %v7396_v39  ;;  %vm7140_vm11 = vcmp.ge.f32.partialorder %v6533_v1, 0.0  ;;  %vm6135_vm12 = vcmp.ge.f32.partialorder %v5972_v25, 0.0 }
 0x554   : > { %v7398_v0 = vsel %vm7141_vm10, %v6538_v8, %v7270_v50  ;;  %v6548_v41 = vadd.f32 %v13353_v6, %v16691_v5  ;;  %v13294_v35 = vpop.f32.mrb[56].mxu0  ;;  %v6542_v29 = vpop.f32.mrb[75].mxu1  ;;  %13511 = vmatmul.mubr.f32.gmra.mrb[180].mxu1 %v6390_v18  ;;  %vm6134_vm13 = vcmp.ge.f32.partialorder %v5967_v52, 0.0  ;;  %v6263_v62 = vmul.f32 %v16377_v59, %v5967_v52 }
 0x555   : > { %v5982_v10 = vadd.f32 %v16575_v23, %v13294_v35  ;;  %v6543_v56 = vadd.f32 %v16691_v5, %v6542_v29  ;;  %v5976_v21 = vpop.f32.mrb[57].mxu0  ;;  %v7397_v38 = vsel %vm7140_vm11, %v6533_v1, %v7269_v24  ;;  %v6392_v57 = vsel %vm6135_vm12, %v5972_v25, %v6264_v47  ;;  %v10922_v35 = vld [vmem:[%s18010_s4 + $0x358] sm:$0xff] }
 0x556   : > { %vm7143_vm14 = vcmp.ge.f32.partialorder %v6548_v41, 0.0  ;;  %v7272_v27 = vmul.f32 %v16695_v53, %v6548_v41  ;;  %v5977_v7 = vadd.f32 %v16575_v23, %v5976_v21  ;;  %13572 = vmatprep.mubr.f32.mxu0 %v7397_v38  ;;  %v6391_v58 = vsel %vm6134_vm13, %v5967_v52, %v6263_v62  ;;  %v10923_v38 = vld [vmem:[%s18010_s4 + $0x360] sm:$0xff] }
 0x557   : > { %v6266_v31 = vmul.f32 %v16377_v59, %v5982_v10  ;;  %v7271_v30 = vmul.f32 %v16695_v53, %v6543_v56  ;;  %v13356_v17 = vpop.f32.mrb[76].mxu1  ;;  %13513 = vmatprep.mubr.f32.mxu1 %v6391_v58  ;;  %13573 = vmatmul.mubr.f32.gmra.mrb[72].mxu0 %v7398_v0  ;;  %vm7142_vm15 = vcmp.ge.f32.partialorder %v6543_v56, 0.0  ;;  %vm6137_vm0 = vcmp.ge.f32.partialorder %v5982_v10, 0.0 }
 0x558   : > { %v7400_v20 = vsel %vm7143_vm14, %v6548_v41, %v7272_v27  ;;  %v6558_v36 = vadd.f32 %v13356_v17, %v16691_v5  ;;  %v13297_v40 = vpop.f32.mrb[58].mxu0  ;;  %v6552_v26 = vpop.f32.mrb[77].mxu1  ;;  %13514 = vmatmul.mubr.f32.gmra.mrb[182].mxu1 %v6392_v57  ;;  %vm6136_vm2 = vcmp.ge.f32.partialorder %v5977_v7, 0.0  ;;  %v6265_v3 = vmul.f32 %v16377_v59, %v5977_v7  ;;  %v10921_v41 = vld [vmem:[%s18010_s4 + $0x350] sm:$0xff]  ;;  %v10924_v57 = vld [vmem:[%s18010_s4 + $0x368] sm:$0xff] }
 0x559   : > { %v5992_v2 = vadd.f32 %v16575_v23, %v13297_v40  ;;  %v6553_v55 = vadd.f32 %v16691_v5, %v6552_v26  ;;  %v5986_v9 = vpop.f32.mrb[59].mxu0  ;;  %v7399_v33 = vsel %vm7142_vm15, %v6543_v56, %v7271_v30  ;;  %v6394_v19 = vsel %vm6137_vm0, %v5982_v10, %v6266_v31 }
 0x55a   : > { %vm7145_vm3 = vcmp.ge.f32.partialorder %v6558_v36, 0.0  ;;  %v7274_v48 = vmul.f32 %v16695_v53, %v6558_v36  ;;  %v5987_v22 = vadd.f32 %v16575_v23, %v5986_v9  ;;  %13575 = vmatprep.mubr.f32.mxu0 %v7399_v33  ;;  %v6393_v16 = vsel %vm6136_vm2, %v5977_v7, %v6265_v3 }
 0x55b   : > { %v6268_v28 = vmul.f32 %v16377_v59, %v5992_v2  ;;  %v7273_v32 = vmul.f32 %v16695_v53, %v6553_v55  ;;  %v13359_v14 = vpop.f32.mrb[78].mxu1  ;;  %13516 = vmatprep.mubr.f32.mxu1 %v6393_v16  ;;  %13576 = vmatmul.mubr.f32.gmra.mrb[74].mxu0 %v7400_v20  ;;  %vm7144_vm4 = vcmp.ge.f32.partialorder %v6553_v55, 0.0  ;;  %vm6139_vm5 = vcmp.ge.f32.partialorder %v5992_v2, 0.0 }
 0x55c   : > { %v7402_v4 = vsel %vm7145_vm3, %v6558_v36, %v7274_v48  ;;  %v6568_v61 = vadd.f32 %v13359_v14, %v16691_v5  ;;  %v13300_v12 = vpop.f32.mrb[60].mxu0  ;;  %v6562_v51 = vpop.f32.mrb[79].mxu1  ;;  %13517 = vmatmul.mubr.f32.gmra.mrb[184].mxu1 %v6394_v19  ;;  %vm6138_vm6 = vcmp.ge.f32.partialorder %v5987_v22, 0.0  ;;  %v6267_v63 = vmul.f32 %v16377_v59, %v5987_v22 }
 0x55d   : > { %v6002_v60 = vadd.f32 %v16575_v23, %v13300_v12  ;;  %v6563_v45 = vadd.f32 %v16691_v5, %v6562_v51  ;;  %v5996_v43 = vpop.f32.mrb[61].mxu0  ;;  %v7401_v37 = vsel %vm7144_vm4, %v6553_v55, %v7273_v32  ;;  %v6396_v44 = vsel %vm6139_vm5, %v5992_v2, %v6268_v28 }
 0x55e   : > { %vm7147_vm7 = vcmp.ge.f32.partialorder %v6568_v61, 0.0  ;;  %v7276_v13 = vmul.f32 %v16695_v53, %v6568_v61  ;;  %v5997_v49 = vadd.f32 %v16575_v23, %v5996_v43  ;;  %13578 = vmatprep.mubr.f32.mxu0 %v7401_v37  ;;  %v6395_v39 = vsel %vm6138_vm6, %v5987_v22, %v6267_v63 }
 0x55f   : > { %v6270_v8 = vmul.f32 %v16377_v59, %v6002_v60  ;;  %v7275_v46 = vmul.f32 %v16695_v53, %v6563_v45  ;;  %v13362_v42 = vpop.f32.mrb[80].mxu1  ;;  %13519 = vmatprep.mubr.f32.mxu1 %v6395_v39  ;;  %13579 = vmatmul.mubr.f32.gmra.mrb[76].mxu0 %v7402_v4  ;;  %vm7146_vm8 = vcmp.ge.f32.partialorder %v6563_v45, 0.0  ;;  %vm6141_vm9 = vcmp.ge.f32.partialorder %v6002_v60, 0.0 }
 0x560   : > { %v6578_v54 = vadd.f32 %v13362_v42, %v16691_v5  ;;  %v13303_v25 = vpop.f32.mrb[62].mxu0  ;;  %v6572_v1 = vpop.f32.mrb[81].mxu1  ;;  %13520 = vmatmul.mubr.f32.gmra.mrb[186].mxu1 %v6396_v44  ;;  %vm6140_vm10 = vcmp.ge.f32.partialorder %v5997_v49, 0.0  ;;  %v6269_v34 = vmul.f32 %v16377_v59, %v5997_v49  ;;  %v7404_v15 = vsel %vm7147_vm7, %v6568_v61, %v7276_v13 }
 0x561   : > { %v6012_v18 = vadd.f32 %v16575_v23, %v13303_v25  ;;  %v6573_v50 = vadd.f32 %v16691_v5, %v6572_v1  ;;  %v6006_v52 = vpop.f32.mrb[63].mxu0  ;;  %v7403_v11 = vsel %vm7146_vm8, %v6563_v45, %v7275_v46  ;;  %v6398_v0 = vsel %vm6141_vm9, %v6002_v60, %v6270_v8 }
 0x562   : > { %v7278_v47 = vmul.f32 %v16695_v53, %v6578_v54  ;;  %v6007_v24 = vadd.f32 %v16575_v23, %v6006_v52  ;;  %13581 = vmatprep.mubr.f32.mxu0 %v7403_v11  ;;  %v6397_v6 = vsel %vm6140_vm10, %v5997_v49, %v6269_v34  ;;  %vm7149_vm11 = vcmp.ge.f32.partialorder %v6578_v54, 0.0 }
 0x563   : > { %v6272_v29 = vmul.f32 %v16377_v59, %v6012_v18  ;;  %v7277_v62 = vmul.f32 %v16695_v53, %v6573_v50  ;;  %v13365_v10 = vpop.f32.mrb[82].mxu1  ;;  %13522 = vmatprep.mubr.f32.mxu1 %v6397_v6  ;;  %13582 = vmatmul.mubr.f32.gmra.mrb[78].mxu0 %v7404_v15  ;;  %vm7148_vm12 = vcmp.ge.f32.partialorder %v6573_v50, 0.0  ;;  %vm6143_vm14 = vcmp.ge.f32.partialorder %v6012_v18, 0.0 }
 0x564   : > { %v6588_v23 = vadd.f32 %v13365_v10, %v16691_v5  ;;  %v6582_v56 = vpop.f32.mrb[83].mxu1  ;;  %13523 = vmatmul.mubr.f32.gmra.mrb[188].mxu1 %v6398_v0  ;;  %vm6142_vm13 = vcmp.ge.f32.partialorder %v6007_v24, 0.0  ;;  %v6271_v21 = vmul.f32 %v16377_v59, %v6007_v24  ;;  %v14412_v58 = vpack.c.bf16 %v10922_v35, %v10921_v41 }
 0x565   : > { %v6583_v27 = vadd.f32 %v16691_v5, %v6582_v56  ;;  %v7405_v7 = vsel %vm7148_vm12, %v6573_v50, %v7277_v62  ;;  %v7406_v31 = vsel %vm7149_vm11, %v6578_v54, %v7278_v47  ;;  %v14416_v59 = vpack.c.bf16 %v10924_v57, %v10923_v38  ;;  %v9749_v38 = vld [vmem:[%s18012_s6] sm:$0xff]  ;;  %v9750_v57 = vld [vmem:[%s18012_s6 + $0x8] sm:$0xff] }
 0x566   : > { %v7280_v30 = vmul.f32 %v16695_v53, %v6588_v23  ;;  %13584 = vmatprep.mubr.f32.mxu0 %v7405_v7  ;;  %v6399_v17 = vsel %vm6142_vm13, %v6007_v24, %v6271_v21  ;;  %vm7151_vm15 = vcmp.ge.f32.partialorder %v6588_v23, 0.0  ;;  %v6400_v40 = vsel %vm6143_vm14, %v6012_v18, %v6272_v29  ;;  %14413 = vmatprep.subr.bf16.mxu1 %v14412_v58 }
 0x567   : > { %v7279_v20 = vmul.f32 %v16695_v53, %v6583_v27  ;;  %v13368_v36 = vpop.f32.mrb[84].mxu1  ;;  %13525 = vmatprep.mubr.f32.mxu1 %v6399_v17  ;;  %13585 = vmatmul.mubr.f32.gmra.mrb[80].mxu0 %v7406_v31  ;;  %vm7150_vm0 = vcmp.ge.f32.partialorder %v6583_v27, 0.0 }
 0x568   : > { %v6598_v26 = vadd.f32 %v13368_v36, %v16691_v5  ;;  %v6592_v3 = vpop.f32.mrb[85].mxu1  ;;  %13526 = vmatmul.mubr.f32.gmra.mrb[190].mxu1 %v6400_v40  ;;  %v7408_v9 = vsel %vm7151_vm15, %v6588_v23, %v7280_v30  ;;  %v10925_v40 = vld [vmem:[%s18010_s4 + $0x370] sm:$0xff] }
 0x569   : > { %v6593_v2 = vadd.f32 %v16691_v5, %v6592_v3  ;;  %v7407_v55 = vsel %vm7150_vm0, %v6583_v27, %v7279_v20  ;;  %14415 = vmatpush3.bf16.xpose.msra.mxu1 %v14412_v58  ;;  %v14424_v58 = vpack.c.bf16 %v9750_v57, %v9749_v38 }
 0x56a   : > { %v7282_v33 = vmul.f32 %v16695_v53, %v6598_v26  ;;  %13587 = vmatprep.mubr.f32.mxu0 %v7407_v55  ;;  %14417 = vmatprep.subr.bf16.mxu1 %v14416_v59  ;;  %vm7153_vm2 = vcmp.ge.f32.partialorder %v6598_v26, 0.0 }
 0x56b   : > { %v7281_v19 = vmul.f32 %v16695_v53, %v6593_v2  ;;  %v13371_v48 = vpop.f32.mrb[86].mxu1  ;;  %13588 = vmatmul.mubr.f32.gmra.mrb[82].mxu0 %v7408_v9  ;;  %vm7152_vm3 = vcmp.ge.f32.partialorder %v6593_v2, 0.0  ;;  %14425 = vmatprep.subr.bf16.mxu0 %v14424_v58 }
 0x56c   : > { %v6608_v22 = vadd.f32 %v13371_v48, %v16691_v5  ;;  %v6602_v16 = vpop.f32.mrb[87].mxu1  ;;  %v7410_v14 = vsel %vm7153_vm2, %v6598_v26, %v7282_v33  ;;  %14427 = vmatpush3.bf16.msra.mxu0 %v14424_v58  ;;  %v10926_v26 = vld [vmem:[%s18010_s4 + $0x378] sm:$0xff] }
 0x56d   : > { %v6603_v28 = vadd.f32 %v16691_v5, %v6602_v16  ;;  %v7409_v32 = vsel %vm7152_vm3, %v6593_v2, %v7281_v19  ;;  %v14420_v55 = vpack.c.bf16 %v10926_v26, %v10925_v40 }
 0x56e   : > { %v7284_v4 = vmul.f32 %v16695_v53, %v6608_v22  ;;  %13590 = vmatprep.mubr.f32.mxu0 %v7409_v32  ;;  %vm7155_vm4 = vcmp.ge.f32.partialorder %v6608_v22, 0.0 }
 0x56f   : > { %v7283_v61 = vmul.f32 %v16695_v53, %v6603_v28  ;;  %v13374_v12 = vpop.f32.mrb[88].mxu1  ;;  %13591 = vmatmul.mubr.f32.gmra.mrb[84].mxu0 %v7410_v14  ;;  %vm7154_vm5 = vcmp.ge.f32.partialorder %v6603_v28, 0.0 }
 0x570   : > { %v6618_v51 = vadd.f32 %v13374_v12, %v16691_v5  ;;  %v6612_v63 = vpop.f32.mrb[89].mxu1  ;;  %v7412_v43 = vsel %vm7155_vm4, %v6608_v22, %v7284_v4 }
 0x571   : > { %v6613_v60 = vadd.f32 %v16691_v5, %v6612_v63  ;;  %v7411_v45 = vsel %vm7154_vm5, %v6603_v28, %v7283_v61  ;;  %14419 = vmatpush3.bf16.xpose.msra.mxu1 %v14416_v59 }
 0x572   : > { %v7286_v37 = vmul.f32 %v16695_v53, %v6618_v51  ;;  %13593 = vmatprep.mubr.f32.mxu0 %v7411_v45  ;;  %vm7157_vm6 = vcmp.ge.f32.partialorder %v6618_v51, 0.0  ;;  %14421 = vmatprep.subr.bf16.mxu1 %v14420_v55 }
 0x573   : > { %v7285_v44 = vmul.f32 %v16695_v53, %v6613_v60  ;;  %v13377_v13 = vpop.f32.mrb[90].mxu1  ;;  %13594 = vmatmul.mubr.f32.gmra.mrb[86].mxu0 %v7412_v43  ;;  %vm7156_vm7 = vcmp.ge.f32.partialorder %v6613_v60, 0.0 }
 0x574   : > { %v6628_v49 = vadd.f32 %v13377_v13, %v16691_v5  ;;  %v6622_v39 = vpop.f32.mrb[91].mxu1  ;;  %v7414_v42 = vsel %vm7157_vm6, %v6618_v51, %v7286_v37 }
 0x575   : > { %v6623_v8 = vadd.f32 %v16691_v5, %v6622_v39  ;;  %v7413_v46 = vsel %vm7156_vm7, %v6613_v60, %v7285_v44 }
 0x576   : > { %v7288_v54 = vmul.f32 %v16695_v53, %v6628_v49  ;;  %13596 = vmatprep.mubr.f32.mxu0 %v7413_v46  ;;  %vm7159_vm8 = vcmp.ge.f32.partialorder %v6628_v49, 0.0 }
 0x577   : > { %v7287_v25 = vmul.f32 %v16695_v53, %v6623_v8  ;;  %v13380_v1 = vpop.f32.mrb[92].mxu1  ;;  %13597 = vmatmul.mubr.f32.gmra.mrb[88].mxu0 %v7414_v42  ;;  %vm7158_vm9 = vcmp.ge.f32.partialorder %v6623_v8, 0.0 }
 0x578   : > { %v6638_v34 = vadd.f32 %v13380_v1, %v16691_v5  ;;  %v6632_v15 = vpop.f32.mrb[93].mxu1  ;;  %v7416_v52 = vsel %vm7159_vm8, %v6628_v49, %v7288_v54 }
 0x579   : > { %v6633_v18 = vadd.f32 %v16691_v5, %v6632_v15  ;;  %v7415_v50 = vsel %vm7158_vm9, %v6623_v8, %v7287_v25  ;;  %14423 = vmatpush3.bf16.xpose.msra.mxu1 %v14420_v55 }
 0x57a   : > { %v7290_v11 = vmul.f32 %v16695_v53, %v6638_v34  ;;  %13599 = vmatprep.mubr.f32.mxu0 %v7415_v50  ;;  %vm7161_vm10 = vcmp.ge.f32.partialorder %v6638_v34, 0.0 }
 0x57b   : > { %v7289_v47 = vmul.f32 %v16695_v53, %v6633_v18  ;;  %v13383_v24 = vpop.f32.mrb[94].mxu1  ;;  %13600 = vmatmul.mubr.f32.gmra.mrb[90].mxu0 %v7416_v52  ;;  %vm7160_vm11 = vcmp.ge.f32.partialorder %v6633_v18, 0.0 }
 0x57c   : > { %v6648_v6 = vadd.f32 %v13383_v24, %v16691_v5  ;;  %v6642_v0 = vpop.f32.mrb[95].mxu1  ;;  %v7418_v29 = vsel %vm7161_vm10, %v6638_v34, %v7290_v11 }
 0x57d   : > { %v6643_v41 = vadd.f32 %v16691_v5, %v6642_v0  ;;  %v7417_v35 = vsel %vm7160_vm11, %v6633_v18, %v7289_v47 }
 0x57e   : > { %v7292_v62 = vmul.f32 %v16695_v53, %v6648_v6  ;;  %13602 = vmatprep.mubr.f32.mxu0 %v7417_v35  ;;  %vm7163_vm12 = vcmp.ge.f32.partialorder %v6648_v6, 0.0 }
 0x57f   : > { %v7291_v10 = vmul.f32 %v16695_v53, %v6643_v41  ;;  %v13386_v23 = vpop.f32.mrb[96].mxu1  ;;  %13603 = vmatmul.mubr.f32.gmra.mrb[92].mxu0 %v7418_v29  ;;  %vm7162_vm13 = vcmp.ge.f32.partialorder %v6643_v41, 0.0 }
 0x580   : > { %v6658_v56 = vadd.f32 %v13386_v23, %v16691_v5  ;;  %v6652_v21 = vpop.f32.mrb[97].mxu1  ;;  %v7420_v31 = vsel %vm7163_vm12, %v6648_v6, %v7292_v62 }
 0x581   : > { %v6653_v27 = vadd.f32 %v16691_v5, %v6652_v21  ;;  %v7419_v7 = vsel %vm7162_vm13, %v6643_v41, %v7291_v10 }
 0x582   : > { %v7294_v30 = vmul.f32 %v16695_v53, %v6658_v56  ;;  %13605 = vmatprep.mubr.f32.mxu0 %v7419_v7  ;;  %vm7165_vm14 = vcmp.ge.f32.partialorder %v6658_v56, 0.0 }
 0x583   : > { %v7293_v17 = vmul.f32 %v16695_v53, %v6653_v27  ;;  %v13389_v59 = vpop.f32.mrb[98].mxu1  ;;  %13606 = vmatmul.mubr.f32.gmra.mrb[94].mxu0 %v7420_v31  ;;  %vm7164_vm15 = vcmp.ge.f32.partialorder %v6653_v27, 0.0 }
 0x584   : > { %v6668_v20 = vadd.f32 %v13389_v59, %v16691_v5  ;;  %v6662_v36 = vpop.f32.mrb[99].mxu1  ;;  %v7422_v9 = vsel %vm7165_vm14, %v6658_v56, %v7294_v30  ;;  %v9751_v59 = vld [vmem:[%s18012_s6 + $0x10] sm:$0xff] }
 0x585   : > { %v6663_v3 = vadd.f32 %v16691_v5, %v6662_v36  ;;  %v7421_v2 = vsel %vm7164_vm15, %v6653_v27, %v7293_v17 }
 0x586   : > { %v7296_v33 = vmul.f32 %v16695_v53, %v6668_v20  ;;  %13608 = vmatprep.mubr.f32.mxu0 %v7421_v2  ;;  %vm7167_vm0 = vcmp.ge.f32.partialorder %v6668_v20, 0.0 }
 0x587   : > { %v7295_v19 = vmul.f32 %v16695_v53, %v6663_v3  ;;  %v13392_v48 = vpop.f32.mrb[100].mxu1  ;;  %13609 = vmatmul.mubr.f32.gmra.mrb[96].mxu0 %v7422_v9  ;;  %vm7166_vm2 = vcmp.ge.f32.partialorder %v6663_v3, 0.0 }
 0x588   : > { %v6678_v22 = vadd.f32 %v13392_v48, %v16691_v5  ;;  %v6672_v16 = vpop.f32.mrb[101].mxu1  ;;  %v7424_v14 = vsel %vm7167_vm0, %v6668_v20, %v7296_v33  ;;  %v9752_v20 = vld [vmem:[%s18012_s6 + $0x18] sm:$0xff] }
 0x589   : > { %v6673_v28 = vadd.f32 %v16691_v5, %v6672_v16  ;;  %v7423_v32 = vsel %vm7166_vm2, %v6663_v3, %v7295_v19  ;;  %v14428_v26 = vpack.c.bf16 %v9752_v20, %v9751_v59 }
 0x58a   : > { %v7298_v4 = vmul.f32 %v16695_v53, %v6678_v22  ;;  %13611 = vmatprep.mubr.f32.mxu0 %v7423_v32  ;;  %vm7169_vm3 = vcmp.ge.f32.partialorder %v6678_v22, 0.0 }
 0x58b   : > { %v7297_v61 = vmul.f32 %v16695_v53, %v6673_v28  ;;  %v13395_v12 = vpop.f32.mrb[102].mxu1  ;;  %13612 = vmatmul.mubr.f32.gmra.mrb[98].mxu0 %v7424_v14  ;;  %vm7168_vm4 = vcmp.ge.f32.partialorder %v6673_v28, 0.0  ;;  %14429 = vmatprep.subr.bf16.mxu0 %v14428_v26 }
 0x58c   : > { %v6688_v51 = vadd.f32 %v13395_v12, %v16691_v5  ;;  %v6682_v63 = vpop.f32.mrb[103].mxu1  ;;  %v7426_v43 = vsel %vm7169_vm3, %v6678_v22, %v7298_v4  ;;  %14431 = vmatpush3.bf16.msra.mxu0 %v14428_v26 }
 0x58d   : > { %v6683_v60 = vadd.f32 %v16691_v5, %v6682_v63  ;;  %v7425_v45 = vsel %vm7168_vm4, %v6673_v28, %v7297_v61 }
 0x58e   : > { %v7300_v37 = vmul.f32 %v16695_v53, %v6688_v51  ;;  %13614 = vmatprep.mubr.f32.mxu0 %v7425_v45  ;;  %vm7171_vm5 = vcmp.ge.f32.partialorder %v6688_v51, 0.0 }
 0x58f   : > { %v7299_v44 = vmul.f32 %v16695_v53, %v6683_v60  ;;  %v13398_v13 = vpop.f32.mrb[104].mxu1  ;;  %13615 = vmatmul.mubr.f32.gmra.mrb[100].mxu0 %v7426_v43  ;;  %vm7170_vm6 = vcmp.ge.f32.partialorder %v6683_v60, 0.0 }
 0x590   : > { %v6698_v49 = vadd.f32 %v13398_v13, %v16691_v5  ;;  %v6692_v39 = vpop.f32.mrb[105].mxu1  ;;  %v7428_v42 = vsel %vm7171_vm5, %v6688_v51, %v7300_v37 }
 0x591   : > { %v6693_v8 = vadd.f32 %v16691_v5, %v6692_v39  ;;  %v7427_v46 = vsel %vm7170_vm6, %v6683_v60, %v7299_v44 }
 0x592   : > { %v7302_v54 = vmul.f32 %v16695_v53, %v6698_v49  ;;  %13617 = vmatprep.mubr.f32.mxu0 %v7427_v46  ;;  %vm7173_vm7 = vcmp.ge.f32.partialorder %v6698_v49, 0.0 }
 0x593   : > { %v7301_v25 = vmul.f32 %v16695_v53, %v6693_v8  ;;  %v13401_v1 = vpop.f32.mrb[106].mxu1  ;;  %13618 = vmatmul.mubr.f32.gmra.mrb[102].mxu0 %v7428_v42  ;;  %vm7172_vm8 = vcmp.ge.f32.partialorder %v6693_v8, 0.0 }
 0x594   : > { %v6708_v34 = vadd.f32 %v13401_v1, %v16691_v5  ;;  %v6702_v15 = vpop.f32.mrb[107].mxu1  ;;  %v7430_v52 = vsel %vm7173_vm7, %v6698_v49, %v7302_v54 }
 0x595   : > { %v6703_v18 = vadd.f32 %v16691_v5, %v6702_v15  ;;  %v7429_v50 = vsel %vm7172_vm8, %v6693_v8, %v7301_v25 }
 0x596   : > { %v7304_v11 = vmul.f32 %v16695_v53, %v6708_v34  ;;  %13620 = vmatprep.mubr.f32.mxu0 %v7429_v50  ;;  %vm7175_vm9 = vcmp.ge.f32.partialorder %v6708_v34, 0.0 }
 0x597   : > { %v7303_v47 = vmul.f32 %v16695_v53, %v6703_v18  ;;  %v13404_v24 = vpop.f32.mrb[108].mxu1  ;;  %13621 = vmatmul.mubr.f32.gmra.mrb[104].mxu0 %v7430_v52  ;;  %vm7174_vm10 = vcmp.ge.f32.partialorder %v6703_v18, 0.0 }
 0x598   : > { %v6718_v6 = vadd.f32 %v13404_v24, %v16691_v5  ;;  %v6712_v0 = vpop.f32.mrb[109].mxu1  ;;  %v7432_v29 = vsel %vm7175_vm9, %v6708_v34, %v7304_v11 }
 0x599   : > { %v6713_v41 = vadd.f32 %v16691_v5, %v6712_v0  ;;  %v7431_v35 = vsel %vm7174_vm10, %v6703_v18, %v7303_v47 }
 0x59a   : > { %v7306_v62 = vmul.f32 %v16695_v53, %v6718_v6  ;;  %13623 = vmatprep.mubr.f32.mxu0 %v7431_v35  ;;  %vm7177_vm11 = vcmp.ge.f32.partialorder %v6718_v6, 0.0 }
 0x59b   : > { %v7305_v10 = vmul.f32 %v16695_v53, %v6713_v41  ;;  %v13407_v23 = vpop.f32.mrb[110].mxu1  ;;  %13624 = vmatmul.mubr.f32.gmra.mrb[106].mxu0 %v7432_v29  ;;  %vm7176_vm12 = vcmp.ge.f32.partialorder %v6713_v41, 0.0 }
 0x59c   : > { %v6728_v56 = vadd.f32 %v13407_v23, %v16691_v5  ;;  %v6722_v21 = vpop.f32.mrb[111].mxu1  ;;  %v7434_v27 = vsel %vm7177_vm11, %v6718_v6, %v7306_v62 }
 0x59d   : > { %v6723_v38 = vadd.f32 %v16691_v5, %v6722_v21  ;;  %v7433_v57 = vsel %vm7176_vm12, %v6713_v41, %v7305_v10 }
 0x59e   : > { %v7308_v7 = vmul.f32 %v16695_v53, %v6728_v56  ;;  %13626 = vmatprep.mubr.f32.mxu0 %v7433_v57  ;;  %vm7179_vm13 = vcmp.ge.f32.partialorder %v6728_v56, 0.0 }
 0x59f   : > { %v7307_v58 = vmul.f32 %v16695_v53, %v6723_v38  ;;  %v13410_v31 = vpop.f32.mrb[112].mxu1  ;;  %13627 = vmatmul.mubr.f32.gmra.mrb[108].mxu0 %v7434_v27  ;;  %vm7178_vm14 = vcmp.ge.f32.partialorder %v6723_v38, 0.0 }
 0x5a0   : > { %v6738_v30 = vadd.f32 %v13410_v31, %v16691_v5  ;;  %v6732_v17 = vpop.f32.mrb[113].mxu1  ;;  %v7436_v3 = vsel %vm7179_vm13, %v6728_v56, %v7308_v7  ;;  %v16895_v7 = vld [vmem:[%s18011_s5 + $0x4] ss:$0 sm:$0xff] }
 0x5a1   : > { %v6733_v36 = vadd.f32 %v16691_v5, %v6732_v17  ;;  %v7435_v40 = vsel %vm7178_vm14, %v6723_v38, %v7307_v58 }
 0x5a2   : > { %v7310_v2 = vmul.f32 %v16695_v53, %v6738_v30  ;;  %13629 = vmatprep.mubr.f32.mxu0 %v7435_v40  ;;  %vm7181_vm15 = vcmp.ge.f32.partialorder %v6738_v30, 0.0 }
 0x5a3   : > { %v7309_v55 = vmul.f32 %v16695_v53, %v6733_v36  ;;  %v13413_v9 = vpop.f32.mrb[114].mxu1  ;;  %13630 = vmatmul.mubr.f32.gmra.mrb[110].mxu0 %v7436_v3  ;;  %vm7180_vm0 = vcmp.ge.f32.partialorder %v6733_v36, 0.0  ;;  %v9753_v3 = vld [vmem:[%s18012_s6 + $0x20] sm:$0xff] }
 0x5a4   : > { %v6748_v33 = vadd.f32 %v13413_v9, %v16691_v5  ;;  %v6742_v19 = vpop.f32.mrb[115].mxu1  ;;  %v7438_v16 = vsel %vm7181_vm15, %v6738_v30, %v7310_v2  ;;  %v9754_v2 = vld [vmem:[%s18012_s6 + $0x28] sm:$0xff] }
 0x5a5   : > { %v6743_v48 = vadd.f32 %v16691_v5, %v6742_v19  ;;  %v7437_v22 = vsel %vm7180_vm0, %v6733_v36, %v7309_v55 }
 0x5a6   : > { %v7312_v28 = vmul.f32 %v16695_v53, %v6748_v33  ;;  %13632 = vmatprep.mubr.f32.mxu0 %v7437_v22  ;;  %vm7183_vm2 = vcmp.ge.f32.partialorder %v6748_v33, 0.0 }
 0x5a7   : > { %v7311_v32 = vmul.f32 %v16695_v53, %v6743_v48  ;;  %v13416_v14 = vpop.f32.mrb[116].mxu1  ;;  %13633 = vmatmul.mubr.f32.gmra.mrb[112].mxu0 %v7438_v16  ;;  %vm7182_vm3 = vcmp.ge.f32.partialorder %v6743_v48, 0.0 }
 0x5a8   : > { %v6758_v4 = vadd.f32 %v13416_v14, %v16691_v5  ;;  %v6752_v61 = vpop.f32.mrb[117].mxu1  ;;  %v7440_v63 = vsel %vm7183_vm2, %v6748_v33, %v7312_v28  ;;  %v14432_v33 = vpack.c.bf16 %v9754_v2, %v9753_v3 }
 0x5a9   : > { %v6753_v12 = vadd.f32 %v16691_v5, %v6752_v61  ;;  %v7439_v51 = vsel %vm7182_vm3, %v6743_v48, %v7311_v32 }
 0x5aa   : > { %v7314_v60 = vmul.f32 %v16695_v53, %v6758_v4  ;;  %13635 = vmatprep.mubr.f32.mxu0 %v7439_v51  ;;  %vm7185_vm4 = vcmp.ge.f32.partialorder %v6758_v4, 0.0  ;;  %14433 = vmatprep.subr.bf16.mxu0 %v14432_v33 }
 0x5ab   : > { %v7313_v45 = vmul.f32 %v16695_v53, %v6753_v12  ;;  %v13419_v43 = vpop.f32.mrb[118].mxu1  ;;  %13636 = vmatmul.mubr.f32.gmra.mrb[114].mxu0 %v7440_v63  ;;  %vm7184_vm5 = vcmp.ge.f32.partialorder %v6753_v12, 0.0 }
 0x5ac   : > { %v6768_v37 = vadd.f32 %v13419_v43, %v16691_v5  ;;  %v6762_v44 = vpop.f32.mrb[119].mxu1  ;;  %v7442_v39 = vsel %vm7185_vm4, %v6758_v4, %v7314_v60  ;;  %14435 = vmatpush3.bf16.msra.mxu0 %v14432_v33  ;;  %v9756_v33 = vld [vmem:[%s18012_s6 + $0x38] sm:$0xff] }
 0x5ad   : > { %v6763_v13 = vadd.f32 %v16691_v5, %v6762_v44  ;;  %v7441_v49 = vsel %vm7184_vm5, %v6753_v12, %v7313_v45 }
 0x5ae   : > { %v7316_v8 = vmul.f32 %v16695_v53, %v6768_v37  ;;  %13638 = vmatprep.mubr.f32.mxu0 %v7441_v49  ;;  %vm7187_vm6 = vcmp.ge.f32.partialorder %v6768_v37, 0.0 }
 0x5af   : > { %v7315_v46 = vmul.f32 %v16695_v53, %v6763_v13  ;;  %v13422_v42 = vpop.f32.mrb[120].mxu1  ;;  %13639 = vmatmul.mubr.f32.gmra.mrb[116].mxu0 %v7442_v39  ;;  %vm7186_vm7 = vcmp.ge.f32.partialorder %v6763_v13, 0.0 }
 0x5b0   : > { %v6778_v54 = vadd.f32 %v13422_v42, %v16691_v5  ;;  %v6772_v25 = vpop.f32.mrb[121].mxu1  ;;  %v7444_v15 = vsel %vm7187_vm6, %v6768_v37, %v7316_v8 }
 0x5b1   : > { %v6773_v1 = vadd.f32 %v16691_v5, %v6772_v25  ;;  %v7443_v34 = vsel %vm7186_vm7, %v6763_v13, %v7315_v46 }
 0x5b2   : > { %v7318_v18 = vmul.f32 %v16695_v53, %v6778_v54  ;;  %13641 = vmatprep.mubr.f32.mxu0 %v7443_v34  ;;  %vm7189_vm8 = vcmp.ge.f32.partialorder %v6778_v54, 0.0 }
 0x5b3   : > { %v7317_v50 = vmul.f32 %v16695_v53, %v6773_v1  ;;  %v13425_v52 = vpop.f32.mrb[122].mxu1  ;;  %13642 = vmatmul.mubr.f32.gmra.mrb[118].mxu0 %v7444_v15  ;;  %vm7188_vm9 = vcmp.ge.f32.partialorder %v6773_v1, 0.0 }
 0x5b4   : > { %v6788_v11 = vadd.f32 %v13425_v52, %v16691_v5  ;;  %v6782_v47 = vpop.f32.mrb[123].mxu1  ;;  %v7446_v0 = vsel %vm7189_vm8, %v6778_v54, %v7318_v18 }
 0x5b5   : > { %v6783_v24 = vadd.f32 %v16691_v5, %v6782_v47  ;;  %v7445_v6 = vsel %vm7188_vm9, %v6773_v1, %v7317_v50 }
 0x5b6   : > { %v7320_v41 = vmul.f32 %v16695_v53, %v6788_v11  ;;  %13644 = vmatprep.mubr.f32.mxu0 %v7445_v6  ;;  %vm7191_vm10 = vcmp.ge.f32.partialorder %v6788_v11, 0.0 }
 0x5b7   : > { %v7319_v35 = vmul.f32 %v16695_v53, %v6783_v24  ;;  %v13428_v29 = vpop.f32.mrb[124].mxu1  ;;  %13645 = vmatmul.mubr.f32.gmra.mrb[120].mxu0 %v7446_v0  ;;  %vm7190_vm11 = vcmp.ge.f32.partialorder %v6783_v24, 0.0 }
 0x5b8   : > { %v6798_v62 = vadd.f32 %v13428_v29, %v16691_v5  ;;  %v6792_v10 = vpop.f32.mrb[125].mxu1  ;;  %v7448_v21 = vsel %vm7191_vm10, %v6788_v11, %v7320_v41 }
 0x5b9   : > { %v6793_v23 = vadd.f32 %v16691_v5, %v6792_v10  ;;  %v7447_v56 = vsel %vm7190_vm11, %v6783_v24, %v7319_v35 }
 0x5ba   : > { %v7322_v38 = vmul.f32 %v16695_v53, %v6798_v62  ;;  %13647 = vmatprep.mubr.f32.mxu0 %v7447_v56  ;;  %vm7193_vm12 = vcmp.ge.f32.partialorder %v6798_v62, 0.0 }
 0x5bb   : > { %v7321_v57 = vmul.f32 %v16695_v53, %v6793_v23  ;;  %v13431_v27 = vpop.f32.mrb[126].mxu1  ;;  %13648 = vmatmul.mubr.f32.gmra.mrb[122].mxu0 %v7448_v21  ;;  %vm7192_vm13 = vcmp.ge.f32.partialorder %v6793_v23, 0.0 }
 0x5bc   : > { %v6808_v58 = vadd.f32 %v16895_v7, %v13431_v27  ;;  %v6802_v31 = vpop.f32.mrb[127].mxu1  ;;  %v7450_v17 = vsel %vm7193_vm12, %v6798_v62, %v7322_v38 }
 0x5bd   : > { %v6803_v5 = vadd.f32 %v16895_v7, %v6802_v31  ;;  %v7449_v30 = vsel %vm7192_vm13, %v6793_v23, %v7321_v57 }
 0x5be   : > { %v7324_v59 = vmul.f32 %v16695_v53, %v6808_v58  ;;  %13650 = vmatprep.mubr.f32.mxu0 %v7449_v30  ;;  %vm7195_vm14 = vcmp.ge.f32.partialorder %v6808_v58, 0.0 }
 0x5bf   : > { %v7323_v20 = vmul.f32 %v16695_v53, %v6803_v5  ;;  %v13434_v36 = vpop.f32.mrb[128].mxu1  ;;  %13651 = vmatmul.mubr.f32.gmra.mrb[124].mxu0 %v7450_v17  ;;  %vm7194_vm15 = vcmp.ge.f32.partialorder %v6803_v5, 0.0 }
 0x5c0   : > { %v6818_v40 = vadd.f32 %v16895_v7, %v13434_v36  ;;  %v6812_v26 = vpop.f32.mrb[129].mxu1  ;;  %v7452_v19 = vsel %vm7195_vm14, %v6808_v58, %v7324_v59 }
 0x5c1   : > { %v6813_v55 = vadd.f32 %v16895_v7, %v6812_v26  ;;  %v7451_v9 = vsel %vm7194_vm15, %v6803_v5, %v7323_v20 }
 0x5c2   : > { %v7326_v48 = vmul.f32 %v16695_v53, %v6818_v40  ;;  %13653 = vmatprep.mubr.f32.mxu0 %v7451_v9  ;;  %vm7197_vm0 = vcmp.ge.f32.partialorder %v6818_v40, 0.0  ;;  %v9755_v9 = vld [vmem:[%s18012_s6 + $0x30] sm:$0xff] }
 0x5c3   : > { %v7325_v22 = vmul.f32 %v16695_v53, %v6813_v55  ;;  %v13437_v16 = vpop.f32.mrb[130].mxu1  ;;  %13654 = vmatmul.mubr.f32.gmra.mrb[126].mxu0 %v7452_v19  ;;  %vm7196_vm2 = vcmp.ge.f32.partialorder %v6813_v55, 0.0 }
 0x5c4   : > { %v6828_v28 = vadd.f32 %v16895_v7, %v13437_v16  ;;  %v6822_v32 = vpop.f32.mrb[131].mxu1  ;;  %v7454_v61 = vsel %vm7197_vm0, %v6818_v40, %v7326_v48 }
 0x5c5   : > { %v6823_v14 = vadd.f32 %v16895_v7, %v6822_v32  ;;  %v7453_v4 = vsel %vm7196_vm2, %v6813_v55, %v7325_v22  ;;  %v14436_v22 = vpack.c.bf16 %v9756_v33, %v9755_v9 }
 0x5c6   : > { %v7328_v12 = vmul.f32 %v16695_v53, %v6828_v28  ;;  %13656 = vmatprep.mubr.f32.mxu0 %v7453_v4  ;;  %vm7199_vm3 = vcmp.ge.f32.partialorder %v6828_v28, 0.0 }
 0x5c7   : > { %v7327_v51 = vmul.f32 %v16695_v53, %v6823_v14  ;;  %v13440_v63 = vpop.f32.mrb[132].mxu1  ;;  %13657 = vmatmul.mubr.f32.gmra.mrb[128].mxu0 %v7454_v61  ;;  %vm7198_vm4 = vcmp.ge.f32.partialorder %v6823_v14, 0.0  ;;  %14437 = vmatprep.subr.bf16.mxu0 %v14436_v22 }
 0x5c8   : > { %v6838_v60 = vadd.f32 %v16895_v7, %v13440_v63  ;;  %v6832_v45 = vpop.f32.mrb[133].mxu1  ;;  %v7456_v44 = vsel %vm7199_vm3, %v6828_v28, %v7328_v12  ;;  %14439 = vmatpush3.bf16.msra.mxu0 %v14436_v22 }
 0x5c9   : > { %v6833_v43 = vadd.f32 %v16895_v7, %v6832_v45  ;;  %v7455_v37 = vsel %vm7198_vm4, %v6823_v14, %v7327_v51 }
 0x5ca   : > { %v7330_v13 = vmul.f32 %v16695_v53, %v6838_v60  ;;  %13659 = vmatprep.mubr.f32.mxu0 %v7455_v37  ;;  %vm7201_vm5 = vcmp.ge.f32.partialorder %v6838_v60, 0.0 }
 0x5cb   : > { %v7329_v49 = vmul.f32 %v16695_v53, %v6833_v43  ;;  %v13443_v39 = vpop.f32.mrb[134].mxu1  ;;  %13660 = vmatmul.mubr.f32.gmra.mrb[130].mxu0 %v7456_v44  ;;  %vm7200_vm6 = vcmp.ge.f32.partialorder %v6833_v43, 0.0 }
 0x5cc   : > { %v6848_v8 = vadd.f32 %v16895_v7, %v13443_v39  ;;  %v6842_v46 = vpop.f32.mrb[135].mxu1  ;;  %v7458_v25 = vsel %vm7201_vm5, %v6838_v60, %v7330_v13 }
 0x5cd   : > { %v6843_v42 = vadd.f32 %v16895_v7, %v6842_v46  ;;  %v7457_v54 = vsel %vm7200_vm6, %v6833_v43, %v7329_v49 }
 0x5ce   : > { %v7332_v1 = vmul.f32 %v16695_v53, %v6848_v8  ;;  %13662 = vmatprep.mubr.f32.mxu0 %v7457_v54  ;;  %vm7203_vm7 = vcmp.ge.f32.partialorder %v6848_v8, 0.0 }
 0x5cf   : > { %v7331_v34 = vmul.f32 %v16695_v53, %v6843_v42  ;;  %v13446_v15 = vpop.f32.mrb[136].mxu1  ;;  %13663 = vmatmul.mubr.f32.gmra.mrb[132].mxu0 %v7458_v25  ;;  %vm7202_vm8 = vcmp.ge.f32.partialorder %v6843_v42, 0.0 }
 0x5d0   : > { %v6858_v18 = vadd.f32 %v16895_v7, %v13446_v15  ;;  %v6852_v50 = vpop.f32.mrb[137].mxu1  ;;  %v7460_v47 = vsel %vm7203_vm7, %v6848_v8, %v7332_v1 }
 0x5d1   : > { %v6853_v52 = vadd.f32 %v16895_v7, %v6852_v50  ;;  %v7459_v11 = vsel %vm7202_vm8, %v6843_v42, %v7331_v34 }
 0x5d2   : > { %v7334_v24 = vmul.f32 %v16695_v53, %v6858_v18  ;;  %13665 = vmatprep.mubr.f32.mxu0 %v7459_v11  ;;  %vm7205_vm9 = vcmp.ge.f32.partialorder %v6858_v18, 0.0 }
 0x5d3   : > { %v7333_v6 = vmul.f32 %v16695_v53, %v6853_v52  ;;  %v13449_v0 = vpop.f32.mrb[138].mxu1  ;;  %13666 = vmatmul.mubr.f32.gmra.mrb[134].mxu0 %v7460_v47  ;;  %vm7204_vm10 = vcmp.ge.f32.partialorder %v6853_v52, 0.0 }
 0x5d4   : > { %v6868_v41 = vadd.f32 %v16895_v7, %v13449_v0  ;;  %v6862_v35 = vpop.f32.mrb[139].mxu1  ;;  %v7462_v10 = vsel %vm7205_vm9, %v6858_v18, %v7334_v24 }
 0x5d5   : > { %v6863_v29 = vadd.f32 %v16895_v7, %v6862_v35  ;;  %v7461_v62 = vsel %vm7204_vm10, %v6853_v52, %v7333_v6 }
 0x5d6   : > { %v7336_v23 = vmul.f32 %v16695_v53, %v6868_v41  ;;  %13668 = vmatprep.mubr.f32.mxu0 %v7461_v62  ;;  %vm7207_vm11 = vcmp.ge.f32.partialorder %v6868_v41, 0.0 }
 0x5d7   : > { %v7335_v56 = vmul.f32 %v16695_v53, %v6863_v29  ;;  %v13452_v21 = vpop.f32.mrb[140].mxu1  ;;  %13669 = vmatmul.mubr.f32.gmra.mrb[136].mxu0 %v7462_v10  ;;  %vm7206_vm12 = vcmp.ge.f32.partialorder %v6863_v29, 0.0 }
 0x5d8   : > { %v6878_v38 = vadd.f32 %v16895_v7, %v13452_v21  ;;  %v6872_v57 = vpop.f32.mrb[141].mxu1  ;;  %v7464_v31 = vsel %vm7207_vm11, %v6868_v41, %v7336_v23 }
 0x5d9   : > { %v6873_v27 = vadd.f32 %v16895_v7, %v6872_v57  ;;  %v7463_v58 = vsel %vm7206_vm12, %v6863_v29, %v7335_v56 }
 0x5da   : > { %v7338_v5 = vmul.f32 %v16695_v53, %v6878_v38  ;;  %13671 = vmatprep.mubr.f32.mxu0 %v7463_v58  ;;  %vm7209_vm13 = vcmp.ge.f32.partialorder %v6878_v38, 0.0 }
 0x5db   : > { %v7337_v30 = vmul.f32 %v16695_v53, %v6873_v27  ;;  %v13455_v17 = vpop.f32.mrb[142].mxu1  ;;  %13672 = vmatmul.mubr.f32.gmra.mrb[138].mxu0 %v7464_v31  ;;  %vm7208_vm14 = vcmp.ge.f32.partialorder %v6873_v27, 0.0 }
 0x5dc   : > { %v6888_v59 = vadd.f32 %v16895_v7, %v13455_v17  ;;  %v6882_v20 = vpop.f32.mrb[143].mxu1  ;;  %v7466_v26 = vsel %vm7209_vm13, %v6878_v38, %v7338_v5 }
 0x5dd   : > { %v6883_v36 = vadd.f32 %v16895_v7, %v6882_v20  ;;  %v7465_v40 = vsel %vm7208_vm14, %v6873_v27, %v7337_v30 }
 0x5de   : > { %v7340_v3 = vmul.f32 %v16695_v53, %v6888_v59  ;;  %13674 = vmatprep.mubr.f32.mxu0 %v7465_v40  ;;  %vm7211_vm15 = vcmp.ge.f32.partialorder %v6888_v59, 0.0 }
 0x5df   : > { %v7339_v2 = vmul.f32 %v16695_v53, %v6883_v36  ;;  %v13458_v55 = vpop.f32.mrb[144].mxu1  ;;  %13675 = vmatmul.mubr.f32.gmra.mrb[140].mxu0 %v7466_v26  ;;  %vm7210_vm0 = vcmp.ge.f32.partialorder %v6883_v36, 0.0 }
 0x5e0   : > { %v6898_v19 = vadd.f32 %v16895_v7, %v13458_v55  ;;  %v6892_v48 = vpop.f32.mrb[145].mxu1  ;;  %v7468_v32 = vsel %vm7211_vm15, %v6888_v59, %v7340_v3 }
 0x5e1   : > { %v6893_v16 = vadd.f32 %v16895_v7, %v6892_v48  ;;  %v7467_v28 = vsel %vm7210_vm0, %v6883_v36, %v7339_v2 }
 0x5e2   : > { %v7342_v14 = vmul.f32 %v16695_v53, %v6898_v19  ;;  %13677 = vmatprep.mubr.f32.mxu0 %v7467_v28  ;;  %vm7213_vm2 = vcmp.ge.f32.partialorder %v6898_v19, 0.0  ;;  %v9758_v28 = vld [vmem:[%s18012_s6 + $0x48] sm:$0xff] }
 0x5e3   : > { %v7341_v4 = vmul.f32 %v16695_v53, %v6893_v16  ;;  %v13461_v61 = vpop.f32.mrb[146].mxu1  ;;  %13678 = vmatmul.mubr.f32.gmra.mrb[142].mxu0 %v7468_v32  ;;  %vm7212_vm3 = vcmp.ge.f32.partialorder %v6893_v16, 0.0 }
 0x5e4   : > { %v6908_v12 = vadd.f32 %v16895_v7, %v13461_v61  ;;  %v6902_v51 = vpop.f32.mrb[147].mxu1  ;;  %v7470_v45 = vsel %vm7213_vm2, %v6898_v19, %v7342_v14 }
 0x5e5   : > { %v6903_v63 = vadd.f32 %v16895_v7, %v6902_v51  ;;  %v7469_v60 = vsel %vm7212_vm3, %v6893_v16, %v7341_v4  ;;  %v9757_v16 = vld [vmem:[%s18012_s6 + $0x40] sm:$0xff] }
 0x5e6   : > { %v7344_v43 = vmul.f32 %v16695_v53, %v6908_v12  ;;  %13680 = vmatprep.mubr.f32.mxu0 %v7469_v60  ;;  %vm7215_vm4 = vcmp.ge.f32.partialorder %v6908_v12, 0.0  ;;  %v14440_v4 = vpack.c.bf16 %v9758_v28, %v9757_v16 }
 0x5e7   : > { %v7343_v37 = vmul.f32 %v16695_v53, %v6903_v63  ;;  %v13464_v44 = vpop.f32.mrb[148].mxu1  ;;  %13681 = vmatmul.mubr.f32.gmra.mrb[144].mxu0 %v7470_v45  ;;  %vm7214_vm5 = vcmp.ge.f32.partialorder %v6903_v63, 0.0 }
 0x5e8   : > { %v6918_v13 = vadd.f32 %v16895_v7, %v13464_v44  ;;  %v6912_v49 = vpop.f32.mrb[149].mxu1  ;;  %v7472_v46 = vsel %vm7215_vm4, %v6908_v12, %v7344_v43  ;;  %14441 = vmatprep.subr.bf16.mxu0 %v14440_v4 }
 0x5e9   : > { %v6913_v39 = vadd.f32 %v16895_v7, %v6912_v49  ;;  %v7471_v8 = vsel %vm7214_vm5, %v6903_v63, %v7343_v37  ;;  %14443 = vmatpush3.bf16.msra.mxu0 %v14440_v4 }
 0x5ea   : > { %v7346_v42 = vmul.f32 %v16695_v53, %v6918_v13  ;;  %13683 = vmatprep.mubr.f32.mxu0 %v7471_v8  ;;  %vm7217_vm6 = vcmp.ge.f32.partialorder %v6918_v13, 0.0 }
 0x5eb   : > { %v7345_v54 = vmul.f32 %v16695_v53, %v6913_v39  ;;  %v13467_v25 = vpop.f32.mrb[150].mxu1  ;;  %13684 = vmatmul.mubr.f32.gmra.mrb[146].mxu0 %v7472_v46  ;;  %vm7216_vm7 = vcmp.ge.f32.partialorder %v6913_v39, 0.0 }
 0x5ec   : > { %v6928_v1 = vadd.f32 %v16895_v7, %v13467_v25  ;;  %v6922_v34 = vpop.f32.mrb[151].mxu1  ;;  %v7474_v50 = vsel %vm7217_vm6, %v6918_v13, %v7346_v42 }
 0x5ed   : > { %v6923_v15 = vadd.f32 %v16895_v7, %v6922_v34  ;;  %v7473_v18 = vsel %vm7216_vm7, %v6913_v39, %v7345_v54 }
 0x5ee   : > { %v7348_v52 = vmul.f32 %v16695_v53, %v6928_v1  ;;  %13686 = vmatprep.mubr.f32.mxu0 %v7473_v18  ;;  %vm7219_vm8 = vcmp.ge.f32.partialorder %v6928_v1, 0.0 }
 0x5ef   : > { %v7347_v11 = vmul.f32 %v16695_v53, %v6923_v15  ;;  %v13470_v47 = vpop.f32.mrb[152].mxu1  ;;  %13687 = vmatmul.mubr.f32.gmra.mrb[148].mxu0 %v7474_v50  ;;  %vm7218_vm9 = vcmp.ge.f32.partialorder %v6923_v15, 0.0 }
 0x5f0   : > { %v6938_v24 = vadd.f32 %v16895_v7, %v13470_v47  ;;  %v6932_v6 = vpop.f32.mrb[153].mxu1  ;;  %v7476_v35 = vsel %vm7219_vm8, %v6928_v1, %v7348_v52 }
 0x5f1   : > { %v6933_v0 = vadd.f32 %v16895_v7, %v6932_v6  ;;  %v7475_v41 = vsel %vm7218_vm9, %v6923_v15, %v7347_v11 }
 0x5f2   : > { %v7350_v29 = vmul.f32 %v16695_v53, %v6938_v24  ;;  %13689 = vmatprep.mubr.f32.mxu0 %v7475_v41  ;;  %vm7221_vm10 = vcmp.ge.f32.partialorder %v6938_v24, 0.0 }
 0x5f3   : > { %v7349_v62 = vmul.f32 %v16695_v53, %v6933_v0  ;;  %v13473_v10 = vpop.f32.mrb[154].mxu1  ;;  %13690 = vmatmul.mubr.f32.gmra.mrb[150].mxu0 %v7476_v35  ;;  %vm7220_vm11 = vcmp.ge.f32.partialorder %v6933_v0, 0.0 }
 0x5f4   : > { %v6948_v23 = vadd.f32 %v16895_v7, %v13473_v10  ;;  %v6942_v56 = vpop.f32.mrb[155].mxu1  ;;  %v7478_v57 = vsel %vm7221_vm10, %v6938_v24, %v7350_v29 }
 0x5f5   : > { %v6943_v21 = vadd.f32 %v16895_v7, %v6942_v56  ;;  %v7477_v38 = vsel %vm7220_vm11, %v6933_v0, %v7349_v62 }
 0x5f6   : > { %v7352_v27 = vmul.f32 %v16695_v53, %v6948_v23  ;;  %13692 = vmatprep.mubr.f32.mxu0 %v7477_v38  ;;  %vm7223_vm12 = vcmp.ge.f32.partialorder %v6948_v23, 0.0 }
 0x5f7   : > { %v7351_v58 = vmul.f32 %v16695_v53, %v6943_v21  ;;  %v13476_v31 = vpop.f32.mrb[156].mxu1  ;;  %13693 = vmatmul.mubr.f32.gmra.mrb[152].mxu0 %v7478_v57  ;;  %vm7222_vm13 = vcmp.ge.f32.partialorder %v6943_v21, 0.0 }
 0x5f8   : > { %v6958_v5 = vadd.f32 %v16895_v7, %v13476_v31  ;;  %v6952_v30 = vpop.f32.mrb[157].mxu1  ;;  %v7480_v20 = vsel %vm7223_vm12, %v6948_v23, %v7352_v27 }
 0x5f9   : > { %v6953_v17 = vadd.f32 %v16895_v7, %v6952_v30  ;;  %v7479_v59 = vsel %vm7222_vm13, %v6943_v21, %v7351_v58 }
 0x5fa   : > { %v7354_v36 = vmul.f32 %v16695_v53, %v6958_v5  ;;  %13695 = vmatprep.mubr.f32.mxu0 %v7479_v59  ;;  %vm7225_vm14 = vcmp.ge.f32.partialorder %v6958_v5, 0.0 }
 0x5fb   : > { %v7353_v40 = vmul.f32 %v16695_v53, %v6953_v17  ;;  %v13479_v26 = vpop.f32.mrb[158].mxu1  ;;  %13696 = vmatmul.mubr.f32.gmra.mrb[154].mxu0 %v7480_v20  ;;  %vm7224_vm15 = vcmp.ge.f32.partialorder %v6953_v17, 0.0 }
 0x5fc   : > { %v6968_v3 = vadd.f32 %v16895_v7, %v13479_v26  ;;  %v6962_v2 = vpop.f32.mrb[159].mxu1  ;;  %v7482_v33 = vsel %vm7225_vm14, %v6958_v5, %v7354_v36  ;;  %v17011_v26 = vld [vmem:[%s18011_s5 + $0x5] ss:$0 sm:$0xff] }
 0x5fd   : > { %v6963_v55 = vadd.f32 %v16895_v7, %v6962_v2  ;;  %v7481_v9 = vsel %vm7224_vm15, %v6953_v17, %v7353_v40 }
 0x5fe   : > { %v7356_v19 = vmul.f32 %v16695_v53, %v6968_v3  ;;  %13698 = vmatprep.mubr.f32.mxu0 %v7481_v9  ;;  %vm7227_vm0 = vcmp.ge.f32.partialorder %v6968_v3, 0.0 }
 0x5ff   : > { %v7355_v48 = vmul.f32 %v16695_v53, %v6963_v55  ;;  %v13482_v22 = vpop.f32.mrb[160].mxu1  ;;  %13699 = vmatmul.mubr.f32.gmra.mrb[156].mxu0 %v7482_v33  ;;  %vm7226_vm2 = vcmp.ge.f32.partialorder %v6963_v55, 0.0 }
 0x600   : > { %v6978_v32 = vadd.f32 %v16895_v7, %v13482_v22  ;;  %v6972_v14 = vpop.f32.mrb[161].mxu1  ;;  %v7484_v51 = vsel %vm7227_vm0, %v6968_v3, %v7356_v19  ;;  %v17015_v19 = vstv %s10910_s9 }
 0x601   : > { %v6973_v61 = vadd.f32 %v16895_v7, %v6972_v14  ;;  %v7483_v12 = vsel %vm7226_vm2, %v6963_v55, %v7355_v48 }
 0x602   : > { %v7358_v63 = vmul.f32 %v16695_v53, %v6978_v32  ;;  %13701 = vmatprep.mubr.f32.mxu0 %v7483_v12  ;;  %vm7229_vm3 = vcmp.ge.f32.partialorder %v6978_v32, 0.0 }
 0x603   : > { %v7357_v60 = vmul.f32 %v16695_v53, %v6973_v61  ;;  %v13485_v45 = vpop.f32.mrb[162].mxu1  ;;  %13702 = vmatmul.mubr.f32.gmra.mrb[158].mxu0 %v7484_v51  ;;  %vm7228_vm4 = vcmp.ge.f32.partialorder %v6973_v61, 0.0 }
 0x604   : > { %v6988_v43 = vadd.f32 %v16895_v7, %v13485_v45  ;;  %v6982_v37 = vpop.f32.mrb[163].mxu1  ;;  %v7486_v49 = vsel %vm7229_vm3, %v6978_v32, %v7358_v63 }
 0x605   : > { %v6983_v44 = vadd.f32 %v16895_v7, %v6982_v37  ;;  %v7485_v13 = vsel %vm7228_vm4, %v6973_v61, %v7357_v60 }
 0x606   : > { %v7360_v39 = vmul.f32 %v16695_v53, %v6988_v43  ;;  %13704 = vmatprep.mubr.f32.mxu0 %v7485_v13  ;;  %vm7231_vm5 = vcmp.ge.f32.partialorder %v6988_v43, 0.0 }
 0x607   : > { %v7359_v8 = vmul.f32 %v16695_v53, %v6983_v44  ;;  %v13488_v46 = vpop.f32.mrb[164].mxu1  ;;  %13705 = vmatmul.mubr.f32.gmra.mrb[160].mxu0 %v7486_v49  ;;  %vm7230_vm6 = vcmp.ge.f32.partialorder %v6983_v44, 0.0 }
 0x608   : > { %v6998_v42 = vadd.f32 %v16895_v7, %v13488_v46  ;;  %v6992_v54 = vpop.f32.mrb[165].mxu1  ;;  %v7488_v34 = vsel %vm7231_vm5, %v6988_v43, %v7360_v39 }
 0x609   : > { %v6993_v25 = vadd.f32 %v16895_v7, %v6992_v54  ;;  %v7487_v1 = vsel %vm7230_vm6, %v6983_v44, %v7359_v8 }
 0x60a   : > { %v7362_v15 = vmul.f32 %v16695_v53, %v6998_v42  ;;  %13707 = vmatprep.mubr.f32.mxu0 %v7487_v1  ;;  %vm7233_vm7 = vcmp.ge.f32.partialorder %v6998_v42, 0.0 }
 0x60b   : > { %v7361_v18 = vmul.f32 %v16695_v53, %v6993_v25  ;;  %v13491_v50 = vpop.f32.mrb[166].mxu1  ;;  %13708 = vmatmul.mubr.f32.gmra.mrb[162].mxu0 %v7488_v34  ;;  %vm7232_vm8 = vcmp.ge.f32.partialorder %v6993_v25, 0.0 }
 0x60c   : > { %v7008_v52 = vadd.f32 %v16895_v7, %v13491_v50  ;;  %v7002_v11 = vpop.f32.mrb[167].mxu1  ;;  %v7490_v6 = vsel %vm7233_vm7, %v6998_v42, %v7362_v15 }
 0x60d   : > { %v7003_v47 = vadd.f32 %v16895_v7, %v7002_v11  ;;  %v7489_v24 = vsel %vm7232_vm8, %v6993_v25, %v7361_v18 }
 0x60e   : > { %v7364_v0 = vmul.f32 %v16695_v53, %v7008_v52  ;;  %13710 = vmatprep.mubr.f32.mxu0 %v7489_v24  ;;  %vm7235_vm9 = vcmp.ge.f32.partialorder %v7008_v52, 0.0 }
 0x60f   : > { %v7363_v41 = vmul.f32 %v16695_v53, %v7003_v47  ;;  %v13494_v35 = vpop.f32.mrb[168].mxu1  ;;  %13711 = vmatmul.mubr.f32.gmra.mrb[164].mxu0 %v7490_v6  ;;  %vm7234_vm10 = vcmp.ge.f32.partialorder %v7003_v47, 0.0 }
 0x610   : > { %v7018_v29 = vadd.f32 %v16895_v7, %v13494_v35  ;;  %v7012_v62 = vpop.f32.mrb[169].mxu1  ;;  %v7492_v56 = vsel %vm7235_vm9, %v7008_v52, %v7364_v0 }
 0x611   : > { %v7013_v10 = vadd.f32 %v16895_v7, %v7012_v62  ;;  %v7491_v23 = vsel %vm7234_vm10, %v7003_v47, %v7363_v41 }
 0x612   : > { %v7366_v21 = vmul.f32 %v16695_v53, %v7018_v29  ;;  %13713 = vmatprep.mubr.f32.mxu0 %v7491_v23  ;;  %vm7237_vm11 = vcmp.ge.f32.partialorder %v7018_v29, 0.0 }
 0x613   : > { %v7365_v38 = vmul.f32 %v16695_v53, %v7013_v10  ;;  %v13497_v57 = vpop.f32.mrb[170].mxu1  ;;  %13714 = vmatmul.mubr.f32.gmra.mrb[166].mxu0 %v7492_v56  ;;  %vm7236_vm12 = vcmp.ge.f32.partialorder %v7013_v10, 0.0 }
 0x614   : > { %v7028_v27 = vadd.f32 %v16895_v7, %v13497_v57  ;;  %v7022_v58 = vpop.f32.mrb[171].mxu1  ;;  %v7494_v30 = vsel %vm7237_vm11, %v7018_v29, %v7366_v21 }
 0x615   : > { %v7023_v31 = vadd.f32 %v16895_v7, %v7022_v58  ;;  %v7493_v5 = vsel %vm7236_vm12, %v7013_v10, %v7365_v38 }
 0x616   : > { %v7368_v17 = vmul.f32 %v16695_v53, %v7028_v27  ;;  %13716 = vmatprep.mubr.f32.mxu0 %v7493_v5  ;;  %vm7239_vm13 = vcmp.ge.f32.partialorder %v7028_v27, 0.0 }
 0x617   : > { %v7367_v59 = vmul.f32 %v16695_v53, %v7023_v31  ;;  %v13500_v20 = vpop.f32.mrb[172].mxu1  ;;  %13717 = vmatmul.mubr.f32.gmra.mrb[168].mxu0 %v7494_v30  ;;  %vm7238_vm14 = vcmp.ge.f32.partialorder %v7023_v31, 0.0 }
 0x618   : > { %v7038_v36 = vadd.f32 %v16895_v7, %v13500_v20  ;;  %v7032_v40 = vpop.f32.mrb[173].mxu1  ;;  %v7496_v55 = vsel %vm7239_vm13, %v7028_v27, %v7368_v17 }
 0x619   : > { %v7033_v3 = vadd.f32 %v16895_v7, %v7032_v40  ;;  %v7495_v2 = vsel %vm7238_vm14, %v7023_v31, %v7367_v59 }
 0x61a   : > { %vm7241_vm15 = vcmp.ge.f32.partialorder %v7038_v36, 0.0  ;;  %v7370_v9 = vmul.f32 %v16695_v53, %v7038_v36  ;;  %v13562_v33 = vpop.f32.mrb[64].mxu0  ;;  %13719 = vmatprep.mubr.f32.mxu0 %v7495_v2 }
 0x61b   : > { %v7369_v48 = vmul.f32 %v16695_v53, %v7033_v3  ;;  %v7614_v22 = vadd.f32 %v13562_v33, %v17011_v26  ;;  %v13503_v16 = vpop.f32.mrb[174].mxu1  ;;  %v7608_v28 = vpop.f32.mrb[65].mxu0  ;;  %13720 = vmatmul.mubr.f32.gmra.mrb[170].mxu0 %v7496_v55  ;;  %vm7240_vm0 = vcmp.ge.f32.partialorder %v7033_v3, 0.0 }
 0x61c   : > { %v7498_v32 = vsel %vm7241_vm15, %v7038_v36, %v7370_v9  ;;  %v7048_v14 = vadd.f32 %v16895_v7, %v13503_v16  ;;  %v7609_v4 = vadd.f32 %v17011_v26, %v7608_v28  ;;  %v7042_v61 = vpop.f32.mrb[175].mxu1 }
 0x61d   : > { %vm8249_vm2 = vcmp.ge.f32.partialorder %v7614_v22, 0.0  ;;  %v8378_v12 = vmul.f32 %v17015_v19, %v7614_v22  ;;  %v7043_v51 = vadd.f32 %v16895_v7, %v7042_v61  ;;  %v7497_v63 = vsel %vm7240_vm0, %v7033_v3, %v7369_v48 }
 0x61e   : > { %vm7243_vm3 = vcmp.ge.f32.partialorder %v7048_v14, 0.0  ;;  %v7372_v60 = vmul.f32 %v16695_v53, %v7048_v14  ;;  %v8377_v45 = vmul.f32 %v17015_v19, %v7609_v4  ;;  %v13565_v43 = vpop.f32.mrb[66].mxu0  ;;  %13722 = vmatprep.mubr.f32.mxu0 %v7497_v63  ;;  %vm8248_vm4 = vcmp.ge.f32.partialorder %v7609_v4, 0.0 }
 0x61f   : > { %v8506_v37 = vsel %vm8249_vm2, %v7614_v22, %v8378_v12  ;;  %v7371_v44 = vmul.f32 %v16695_v53, %v7043_v51  ;;  %v7624_v13 = vadd.f32 %v13565_v43, %v17011_v26  ;;  %v13506_v49 = vpop.f32.mrb[176].mxu1  ;;  %v7618_v39 = vpop.f32.mrb[67].mxu0  ;;  %13723 = vmatmul.mubr.f32.gmra.mrb[172].mxu0 %v7498_v32  ;;  %vm7242_vm5 = vcmp.ge.f32.partialorder %v7043_v51, 0.0 }
 0x620   : > { %v7500_v8 = vsel %vm7243_vm3, %v7048_v14, %v7372_v60  ;;  %v7058_v46 = vadd.f32 %v16895_v7, %v13506_v49  ;;  %v7619_v42 = vadd.f32 %v17011_v26, %v7618_v39  ;;  %v7052_v54 = vpop.f32.mrb[177].mxu1  ;;  %v8505_v25 = vsel %vm8248_vm4, %v7609_v4, %v8377_v45 }
 0x621   : > { %vm8251_vm6 = vcmp.ge.f32.partialorder %v7624_v13, 0.0  ;;  %v8380_v1 = vmul.f32 %v17015_v19, %v7624_v13  ;;  %v7053_v34 = vadd.f32 %v16895_v7, %v7052_v54  ;;  %13784 = vmatprep.mubr.f32.mxu1 %v8505_v25  ;;  %v7499_v15 = vsel %vm7242_vm5, %v7043_v51, %v7371_v44 }
 0x622   : > { %vm7245_vm7 = vcmp.ge.f32.partialorder %v7058_v46, 0.0  ;;  %v7374_v18 = vmul.f32 %v16695_v53, %v7058_v46  ;;  %v8379_v50 = vmul.f32 %v17015_v19, %v7619_v42  ;;  %v13568_v52 = vpop.f32.mrb[68].mxu0  ;;  %13725 = vmatprep.mubr.f32.mxu0 %v7499_v15  ;;  %13785 = vmatmul.mubr.f32.vlgmr.msra.gmra.mrb[192].mxu1 %v8506_v37  ;;  %vm8250_vm8 = vcmp.ge.f32.partialorder %v7619_v42, 0.0 }
 0x623   : > { %v8508_v11 = vsel %vm8251_vm6, %v7624_v13, %v8380_v1  ;;  %v7373_v47 = vmul.f32 %v16695_v53, %v7053_v34  ;;  %v7634_v24 = vadd.f32 %v13568_v52, %v17011_v26  ;;  %v13509_v6 = vpop.f32.mrb[178].mxu1  ;;  %v7628_v0 = vpop.f32.mrb[69].mxu0  ;;  %13726 = vmatmul.mubr.f32.gmra.mrb[174].mxu0 %v7500_v8  ;;  %vm7244_vm9 = vcmp.ge.f32.partialorder %v7053_v34, 0.0 }
 0x624   : > { %v7502_v41 = vsel %vm7245_vm7, %v7058_v46, %v7374_v18  ;;  %v7068_v35 = vadd.f32 %v16895_v7, %v13509_v6  ;;  %v7629_v29 = vadd.f32 %v17011_v26, %v7628_v0  ;;  %v7062_v62 = vpop.f32.mrb[179].mxu1  ;;  %v8507_v10 = vsel %vm8250_vm8, %v7619_v42, %v8379_v50 }
 0x625   : > { %vm8253_vm10 = vcmp.ge.f32.partialorder %v7634_v24, 0.0  ;;  %v8382_v23 = vmul.f32 %v17015_v19, %v7634_v24  ;;  %v7063_v56 = vadd.f32 %v16895_v7, %v7062_v62  ;;  %13787 = vmatprep.mubr.f32.mxu1 %v8507_v10  ;;  %v7501_v21 = vsel %vm7244_vm9, %v7053_v34, %v7373_v47 }
 0x626   : > { %vm7247_vm11 = vcmp.ge.f32.partialorder %v7068_v35, 0.0  ;;  %v7376_v38 = vmul.f32 %v16695_v53, %v7068_v35  ;;  %v8381_v57 = vmul.f32 %v17015_v19, %v7629_v29  ;;  %v13571_v27 = vpop.f32.mrb[70].mxu0  ;;  %13728 = vmatprep.mubr.f32.mxu0 %v7501_v21  ;;  %13788 = vmatmul.mubr.f32.gmra.mrb[194].mxu1 %v8508_v11  ;;  %vm8252_vm12 = vcmp.ge.f32.partialorder %v7629_v29, 0.0 }
 0x627   : > { %v8510_v58 = vsel %vm8253_vm10, %v7634_v24, %v8382_v23  ;;  %v7375_v31 = vmul.f32 %v16695_v53, %v7063_v56  ;;  %v7644_v5 = vadd.f32 %v13571_v27, %v17011_v26  ;;  %v13512_v30 = vpop.f32.mrb[180].mxu1  ;;  %v7638_v17 = vpop.f32.mrb[71].mxu0  ;;  %13729 = vmatmul.mubr.f32.gmra.mrb[176].mxu0 %v7502_v41  ;;  %vm7246_vm13 = vcmp.ge.f32.partialorder %v7063_v56, 0.0 }
 0x628   : > { %v7504_v59 = vsel %vm7247_vm11, %v7068_v35, %v7376_v38  ;;  %v7078_v20 = vadd.f32 %v16895_v7, %v13512_v30  ;;  %v7639_v36 = vadd.f32 %v17011_v26, %v7638_v17  ;;  %v7072_v40 = vpop.f32.mrb[181].mxu1  ;;  %v8509_v3 = vsel %vm8252_vm12, %v7629_v29, %v8381_v57 }
 0x629   : > { %vm8255_vm14 = vcmp.ge.f32.partialorder %v7644_v5, 0.0  ;;  %v8384_v2 = vmul.f32 %v17015_v19, %v7644_v5  ;;  %v7073_v55 = vadd.f32 %v16895_v7, %v7072_v40  ;;  %13790 = vmatprep.mubr.f32.mxu1 %v8509_v3  ;;  %v7503_v9 = vsel %vm7246_vm13, %v7063_v56, %v7375_v31 }
 0x62a   : > { %vm7249_vm15 = vcmp.ge.f32.partialorder %v7078_v20, 0.0  ;;  %v7378_v33 = vmul.f32 %v16695_v53, %v7078_v20  ;;  %v8383_v48 = vmul.f32 %v17015_v19, %v7639_v36  ;;  %v13574_v22 = vpop.f32.mrb[72].mxu0  ;;  %13731 = vmatprep.mubr.f32.mxu0 %v7503_v9  ;;  %13791 = vmatmul.mubr.f32.gmra.mrb[196].mxu1 %v8510_v58  ;;  %vm8254_vm0 = vcmp.ge.f32.partialorder %v7639_v36, 0.0 }
 0x62b   : > { %v8512_v16 = vsel %vm8255_vm14, %v7644_v5, %v8384_v2  ;;  %v7377_v28 = vmul.f32 %v16695_v53, %v7073_v55  ;;  %v7654_v32 = vadd.f32 %v13574_v22, %v17011_v26  ;;  %v13515_v14 = vpop.f32.mrb[182].mxu1  ;;  %v7648_v4 = vpop.f32.mrb[73].mxu0  ;;  %13732 = vmatmul.mubr.f32.gmra.mrb[178].mxu0 %v7504_v59  ;;  %vm7248_vm2 = vcmp.ge.f32.partialorder %v7073_v55, 0.0 }
 0x62c   : > { %v7506_v61 = vsel %vm7249_vm15, %v7078_v20, %v7378_v33  ;;  %v7088_v12 = vadd.f32 %v16895_v7, %v13515_v14  ;;  %v7649_v51 = vadd.f32 %v17011_v26, %v7648_v4  ;;  %v7082_v63 = vpop.f32.mrb[183].mxu1  ;;  %v8511_v60 = vsel %vm8254_vm0, %v7639_v36, %v8383_v48 }
 0x62d   : > { %vm8257_vm3 = vcmp.ge.f32.partialorder %v7654_v32, 0.0  ;;  %v8386_v45 = vmul.f32 %v17015_v19, %v7654_v32  ;;  %v7083_v43 = vadd.f32 %v16895_v7, %v7082_v63  ;;  %13793 = vmatprep.mubr.f32.mxu1 %v8511_v60  ;;  %v7505_v37 = vsel %vm7248_vm2, %v7073_v55, %v7377_v28 }
 0x62e   : > { %vm7251_vm4 = vcmp.ge.f32.partialorder %v7088_v12, 0.0  ;;  %v7380_v44 = vmul.f32 %v16695_v53, %v7088_v12  ;;  %v8385_v13 = vmul.f32 %v17015_v19, %v7649_v51  ;;  %v13577_v49 = vpop.f32.mrb[74].mxu0  ;;  %13734 = vmatprep.mubr.f32.mxu0 %v7505_v37  ;;  %13794 = vmatmul.mubr.f32.gmra.mrb[198].mxu1 %v8512_v16  ;;  %vm8256_vm5 = vcmp.ge.f32.partialorder %v7649_v51, 0.0 }
 0x62f   : > { %v8514_v39 = vsel %vm8257_vm3, %v7654_v32, %v8386_v45  ;;  %v7379_v8 = vmul.f32 %v16695_v53, %v7083_v43  ;;  %v7664_v46 = vadd.f32 %v13577_v49, %v17011_v26  ;;  %v13518_v42 = vpop.f32.mrb[184].mxu1  ;;  %v7658_v54 = vpop.f32.mrb[75].mxu0  ;;  %13735 = vmatmul.mubr.f32.gmra.mrb[180].mxu0 %v7506_v61  ;;  %vm7250_vm6 = vcmp.ge.f32.partialorder %v7083_v43, 0.0 }
 0x630   : > { %v7508_v25 = vsel %vm7251_vm4, %v7088_v12, %v7380_v44  ;;  %v7098_v1 = vadd.f32 %v16895_v7, %v13518_v42  ;;  %v7659_v34 = vadd.f32 %v17011_v26, %v7658_v54  ;;  %v7092_v15 = vpop.f32.mrb[185].mxu1  ;;  %v8513_v18 = vsel %vm8256_vm5, %v7649_v51, %v8385_v13 }
 0x631   : > { %vm8259_vm7 = vcmp.ge.f32.partialorder %v7664_v46, 0.0  ;;  %v8388_v50 = vmul.f32 %v17015_v19, %v7664_v46  ;;  %v7093_v52 = vadd.f32 %v16895_v7, %v7092_v15  ;;  %13796 = vmatprep.mubr.f32.mxu1 %v8513_v18  ;;  %v7507_v11 = vsel %vm7250_vm6, %v7083_v43, %v7379_v8  ;;  %v9759_v8 = vld [vmem:[%s18012_s6 + $0x50] sm:$0xff]  ;;  %v9761_v15 = vld [vmem:[%s18012_s6 + $0x60] sm:$0xff]  ;;  %v9762_v18 = vld [vmem:[%s18012_s6 + $0x68] sm:$0xff] }
 0x632   : > { %vm7253_vm8 = vcmp.ge.f32.partialorder %v7098_v1, 0.0  ;;  %v7382_v47 = vmul.f32 %v16695_v53, %v7098_v1  ;;  %v8387_v24 = vmul.f32 %v17015_v19, %v7659_v34  ;;  %v13580_v6 = vpop.f32.mrb[76].mxu0  ;;  %13737 = vmatprep.mubr.f32.mxu0 %v7507_v11  ;;  %13797 = vmatmul.mubr.f32.gmra.mrb[200].mxu1 %v8514_v39  ;;  %vm8258_vm9 = vcmp.ge.f32.partialorder %v7659_v34, 0.0 }
 0x633   : > { %v8516_v0 = vsel %vm8259_vm7, %v7664_v46, %v8388_v50  ;;  %v7381_v41 = vmul.f32 %v16695_v53, %v7093_v52  ;;  %v7674_v35 = vadd.f32 %v13580_v6, %v17011_v26  ;;  %v13521_v29 = vpop.f32.mrb[186].mxu1  ;;  %v7668_v62 = vpop.f32.mrb[77].mxu0  ;;  %13738 = vmatmul.mubr.f32.gmra.mrb[182].mxu0 %v7508_v25  ;;  %vm7252_vm10 = vcmp.ge.f32.partialorder %v7093_v52, 0.0  ;;  %v9760_v46 = vld [vmem:[%s18012_s6 + $0x58] sm:$0xff] }
 0x634   : > { %v7510_v10 = vsel %vm7253_vm8, %v7098_v1, %v7382_v47  ;;  %v7108_v23 = vadd.f32 %v16895_v7, %v13521_v29  ;;  %v7669_v56 = vadd.f32 %v17011_v26, %v7668_v62  ;;  %v7102_v21 = vpop.f32.mrb[187].mxu1  ;;  %v8515_v38 = vsel %vm8258_vm9, %v7659_v34, %v8387_v24 }
 0x635   : > { %vm8261_vm11 = vcmp.ge.f32.partialorder %v7674_v35, 0.0  ;;  %v8390_v57 = vmul.f32 %v17015_v19, %v7674_v35  ;;  %v7103_v27 = vadd.f32 %v16895_v7, %v7102_v21  ;;  %13799 = vmatprep.mubr.f32.mxu1 %v8515_v38  ;;  %v7509_v58 = vsel %vm7252_vm10, %v7093_v52, %v7381_v41 }
 0x636   : > { %vm7255_vm12 = vcmp.ge.f32.partialorder %v7108_v23, 0.0  ;;  %v7384_v31 = vmul.f32 %v16695_v53, %v7108_v23  ;;  %v8389_v5 = vmul.f32 %v17015_v19, %v7669_v56  ;;  %v13583_v30 = vpop.f32.mrb[78].mxu0  ;;  %13740 = vmatprep.mubr.f32.mxu0 %v7509_v58  ;;  %13800 = vmatmul.mubr.f32.gmra.mrb[202].mxu1 %v8516_v0  ;;  %vm8260_vm13 = vcmp.ge.f32.partialorder %v7669_v56, 0.0 }
 0x637   : > { %v8518_v17 = vsel %vm8261_vm11, %v7674_v35, %v8390_v57  ;;  %v7383_v59 = vmul.f32 %v16695_v53, %v7103_v27  ;;  %v7684_v20 = vadd.f32 %v13583_v30, %v17011_v26  ;;  %v13524_v36 = vpop.f32.mrb[188].mxu1  ;;  %v7678_v40 = vpop.f32.mrb[79].mxu0  ;;  %13741 = vmatmul.mubr.f32.gmra.mrb[184].mxu0 %v7510_v10  ;;  %vm7254_vm14 = vcmp.ge.f32.partialorder %v7103_v27, 0.0 }
 0x638   : > { %v7512_v3 = vsel %vm7255_vm12, %v7108_v23, %v7384_v31  ;;  %v7118_v2 = vadd.f32 %v16895_v7, %v13524_v36  ;;  %v7679_v55 = vadd.f32 %v17011_v26, %v7678_v40  ;;  %v7112_v9 = vpop.f32.mrb[189].mxu1  ;;  %v8517_v33 = vsel %vm8260_vm13, %v7669_v56, %v8389_v5 }
 0x639   : > { %vm8263_vm15 = vcmp.ge.f32.partialorder %v7684_v20, 0.0  ;;  %v8392_v48 = vmul.f32 %v17015_v19, %v7684_v20  ;;  %v7113_v22 = vadd.f32 %v16895_v7, %v7112_v9  ;;  %13802 = vmatprep.mubr.f32.mxu1 %v8517_v33  ;;  %v7511_v16 = vsel %vm7254_vm14, %v7103_v27, %v7383_v59 }
 0x63a   : > { %vm7257_vm0 = vcmp.ge.f32.partialorder %v7118_v2, 0.0  ;;  %v7386_v28 = vmul.f32 %v16695_v53, %v7118_v2  ;;  %v8391_v32 = vmul.f32 %v17015_v19, %v7679_v55  ;;  %v13586_v14 = vpop.f32.mrb[80].mxu0  ;;  %13743 = vmatprep.mubr.f32.mxu0 %v7511_v16  ;;  %13803 = vmatmul.mubr.f32.gmra.mrb[204].mxu1 %v8518_v17  ;;  %vm8262_vm2 = vcmp.ge.f32.partialorder %v7679_v55, 0.0 }
 0x63b   : > { %v7385_v4 = vmul.f32 %v16695_v53, %v7113_v22  ;;  %v7694_v61 = vadd.f32 %v13586_v14, %v17011_v26  ;;  %v13527_v12 = vpop.f32.mrb[190].mxu1  ;;  %v7688_v51 = vpop.f32.mrb[81].mxu0  ;;  %13744 = vmatmul.mubr.f32.gmra.mrb[186].mxu0 %v7512_v3  ;;  %vm7256_vm3 = vcmp.ge.f32.partialorder %v7113_v22, 0.0  ;;  %v8520_v63 = vsel %vm8263_vm15, %v7684_v20, %v8392_v48 }
 0x63c   : > { %v7128_v60 = vadd.f32 %v16895_v7, %v13527_v12  ;;  %v7689_v45 = vadd.f32 %v17011_v26, %v7688_v51  ;;  %v7122_v43 = vpop.f32.mrb[191].mxu1  ;;  %v8519_v37 = vsel %vm8262_vm2, %v7679_v55, %v8391_v32  ;;  %v7514_v44 = vsel %vm7257_vm0, %v7118_v2, %v7386_v28 }
 0x63d   : > { %v8394_v13 = vmul.f32 %v17015_v19, %v7694_v61  ;;  %v7123_v49 = vadd.f32 %v16895_v7, %v7122_v43  ;;  %13805 = vmatprep.mubr.f32.mxu1 %v8519_v37  ;;  %v7513_v39 = vsel %vm7256_vm3, %v7113_v22, %v7385_v4  ;;  %vm8265_vm4 = vcmp.ge.f32.partialorder %v7694_v61, 0.0 }
 0x63e   : > { %v7388_v42 = vmul.f32 %v16695_v53, %v7128_v60  ;;  %v8393_v54 = vmul.f32 %v17015_v19, %v7689_v45  ;;  %v13589_v25 = vpop.f32.mrb[82].mxu0  ;;  %13746 = vmatprep.mubr.f32.mxu0 %v7513_v39  ;;  %13806 = vmatmul.mubr.f32.gmra.mrb[206].mxu1 %v8520_v63  ;;  %vm8264_vm5 = vcmp.ge.f32.partialorder %v7689_v45, 0.0  ;;  %vm7259_vm6 = vcmp.ge.f32.partialorder %v7128_v60, 0.0 }
 0x63f   : > { %v7387_v7 = vmul.f32 %v16695_v53, %v7123_v49  ;;  %v7704_v1 = vadd.f32 %v13589_v25, %v17011_v26  ;;  %v7698_v34 = vpop.f32.mrb[83].mxu0  ;;  %13747 = vmatmul.mubr.f32.gmra.mrb[188].mxu0 %v7514_v44  ;;  %vm7258_vm7 = vcmp.ge.f32.partialorder %v7123_v49, 0.0  ;;  %v14444_v11 = vpack.c.bf16 %v9760_v46, %v9759_v8 }
 0x640   : > { %v7699_v50 = vadd.f32 %v17011_v26, %v7698_v34  ;;  %v8521_v52 = vsel %vm8264_vm5, %v7689_v45, %v8393_v54  ;;  %v8522_v47 = vsel %vm8265_vm4, %v7694_v61, %v8394_v13  ;;  %v14448_v6 = vpack.c.bf16 %v9762_v18, %v9761_v15 }
 0x641   : > { %v8396_v53 = vmul.f32 %v17015_v19, %v7704_v1  ;;  %13808 = vmatprep.mubr.f32.mxu1 %v8521_v52  ;;  %v7515_v24 = vsel %vm7258_vm7, %v7123_v49, %v7387_v7  ;;  %v7516_v0 = vsel %vm7259_vm6, %v7128_v60, %v7388_v42  ;;  %vm8267_vm8 = vcmp.ge.f32.partialorder %v7704_v1, 0.0  ;;  %14445 = vmatprep.subr.bf16.mxu0 %v14444_v11 }
 0x642   : > { %v8395_v41 = vmul.f32 %v17015_v19, %v7699_v50  ;;  %v13592_v35 = vpop.f32.mrb[84].mxu0  ;;  %13749 = vmatprep.mubr.f32.mxu0 %v7515_v24  ;;  %13809 = vmatmul.mubr.f32.gmra.mrb[208].mxu1 %v8522_v47  ;;  %vm8266_vm9 = vcmp.ge.f32.partialorder %v7699_v50, 0.0 }
 0x643   : > { %v7714_v29 = vadd.f32 %v13592_v35, %v17011_v26  ;;  %v7708_v62 = vpop.f32.mrb[85].mxu0  ;;  %13750 = vmatmul.mubr.f32.gmra.mrb[190].mxu0 %v7516_v0  ;;  %v8524_v56 = vsel %vm8267_vm8, %v7704_v1, %v8396_v53  ;;  %v9764_v0 = vld [vmem:[%s18012_s6 + $0x78] sm:$0xff] }
 0x644   : > { %v7709_v10 = vadd.f32 %v17011_v26, %v7708_v62  ;;  %v8523_v23 = vsel %vm8266_vm9, %v7699_v50, %v8395_v41  ;;  %14447 = vmatpush3.bf16.msra.mxu0 %v14444_v11 }
 0x645   : > { %v8398_v21 = vmul.f32 %v17015_v19, %v7714_v29  ;;  %13811 = vmatprep.mubr.f32.mxu1 %v8523_v23  ;;  %14449 = vmatprep.subr.bf16.mxu0 %v14448_v6  ;;  %vm8269_vm10 = vcmp.ge.f32.partialorder %v7714_v29, 0.0 }
 0x646   : > { %v8397_v38 = vmul.f32 %v17015_v19, %v7709_v10  ;;  %v13595_v57 = vpop.f32.mrb[86].mxu0  ;;  %13812 = vmatmul.mubr.f32.gmra.mrb[210].mxu1 %v8524_v56  ;;  %vm8268_vm11 = vcmp.ge.f32.partialorder %v7709_v10, 0.0 }
 0x647   : > { %v7724_v27 = vadd.f32 %v13595_v57, %v17011_v26  ;;  %v7718_v58 = vpop.f32.mrb[87].mxu0  ;;  %v8526_v30 = vsel %vm8269_vm10, %v7714_v29, %v8398_v21 }
 0x648   : > { %v7719_v31 = vadd.f32 %v17011_v26, %v7718_v58  ;;  %v8525_v5 = vsel %vm8268_vm11, %v7709_v10, %v8397_v38  ;;  %14451 = vmatpush3.bf16.msra.mxu0 %v14448_v6  ;;  %v9763_v6 = vld [vmem:[%s18012_s6 + $0x70] sm:$0xff] }
 0x649   : > { %v8400_v17 = vmul.f32 %v17015_v19, %v7724_v27  ;;  %13814 = vmatprep.mubr.f32.mxu1 %v8525_v5  ;;  %vm8271_vm12 = vcmp.ge.f32.partialorder %v7724_v27, 0.0  ;;  %v14452_v29 = vpack.c.bf16 %v9764_v0, %v9763_v6 }
 0x64a   : > { %v8399_v59 = vmul.f32 %v17015_v19, %v7719_v31  ;;  %v13598_v20 = vpop.f32.mrb[88].mxu0  ;;  %13815 = vmatmul.mubr.f32.gmra.mrb[212].mxu1 %v8526_v30  ;;  %vm8270_vm13 = vcmp.ge.f32.partialorder %v7719_v31, 0.0 }
 0x64b   : > { %v7734_v36 = vadd.f32 %v13598_v20, %v17011_v26  ;;  %v7728_v40 = vpop.f32.mrb[89].mxu0  ;;  %v8528_v55 = vsel %vm8271_vm12, %v7724_v27, %v8400_v17  ;;  %14453 = vmatprep.subr.bf16.mxu0 %v14452_v29 }
 0x64c   : > { %v7729_v3 = vadd.f32 %v17011_v26, %v7728_v40  ;;  %v8527_v2 = vsel %vm8270_vm13, %v7719_v31, %v8399_v59  ;;  %14455 = vmatpush3.bf16.msra.mxu0 %v14452_v29 }
 0x64d   : > { %v8402_v9 = vmul.f32 %v17015_v19, %v7734_v36  ;;  %13817 = vmatprep.mubr.f32.mxu1 %v8527_v2  ;;  %vm8273_vm14 = vcmp.ge.f32.partialorder %v7734_v36, 0.0 }
 0x64e   : > { %v8401_v33 = vmul.f32 %v17015_v19, %v7729_v3  ;;  %v13601_v48 = vpop.f32.mrb[90].mxu0  ;;  %13818 = vmatmul.mubr.f32.gmra.mrb[214].mxu1 %v8528_v55  ;;  %vm8272_vm15 = vcmp.ge.f32.partialorder %v7729_v3, 0.0 }
 0x64f   : > { %v7744_v22 = vadd.f32 %v13601_v48, %v17011_v26  ;;  %v7738_v16 = vpop.f32.mrb[91].mxu0  ;;  %v8530_v14 = vsel %vm8273_vm14, %v7734_v36, %v8402_v9 }
 0x650   : > { %v7739_v28 = vadd.f32 %v17011_v26, %v7738_v16  ;;  %v8529_v32 = vsel %vm8272_vm15, %v7729_v3, %v8401_v33 }
 0x651   : > { %v8404_v4 = vmul.f32 %v17015_v19, %v7744_v22  ;;  %13820 = vmatprep.mubr.f32.mxu1 %v8529_v32  ;;  %vm8275_vm0 = vcmp.ge.f32.partialorder %v7744_v22, 0.0 }
 0x652   : > { %v8403_v61 = vmul.f32 %v17015_v19, %v7739_v28  ;;  %v13604_v12 = vpop.f32.mrb[92].mxu0  ;;  %13821 = vmatmul.mubr.f32.gmra.mrb[216].mxu1 %v8530_v14  ;;  %vm8274_vm2 = vcmp.ge.f32.partialorder %v7739_v28, 0.0 }
 0x653   : > { %v7754_v51 = vadd.f32 %v13604_v12, %v17011_v26  ;;  %v7748_v63 = vpop.f32.mrb[93].mxu0  ;;  %v8532_v43 = vsel %vm8275_vm0, %v7744_v22, %v8404_v4 }
 0x654   : > { %v7749_v60 = vadd.f32 %v17011_v26, %v7748_v63  ;;  %v8531_v45 = vsel %vm8274_vm2, %v7739_v28, %v8403_v61 }
 0x655   : > { %v8406_v37 = vmul.f32 %v17015_v19, %v7754_v51  ;;  %13823 = vmatprep.mubr.f32.mxu1 %v8531_v45  ;;  %vm8277_vm3 = vcmp.ge.f32.partialorder %v7754_v51, 0.0 }
 0x656   : > { %v8405_v44 = vmul.f32 %v17015_v19, %v7749_v60  ;;  %v13607_v13 = vpop.f32.mrb[94].mxu0  ;;  %13824 = vmatmul.mubr.f32.gmra.mrb[218].mxu1 %v8532_v43  ;;  %vm8276_vm4 = vcmp.ge.f32.partialorder %v7749_v60, 0.0 }
 0x657   : > { %v7764_v49 = vadd.f32 %v13607_v13, %v17011_v26  ;;  %v7758_v39 = vpop.f32.mrb[95].mxu0  ;;  %v8534_v42 = vsel %vm8277_vm3, %v7754_v51, %v8406_v37 }
 0x658   : > { %v7759_v8 = vadd.f32 %v17011_v26, %v7758_v39  ;;  %v8533_v46 = vsel %vm8276_vm4, %v7749_v60, %v8405_v44 }
 0x659   : > { %v8408_v54 = vmul.f32 %v17015_v19, %v7764_v49  ;;  %13826 = vmatprep.mubr.f32.mxu1 %v8533_v46  ;;  %vm8279_vm5 = vcmp.ge.f32.partialorder %v7764_v49, 0.0 }
 0x65a   : > { %v8407_v25 = vmul.f32 %v17015_v19, %v7759_v8  ;;  %v13610_v7 = vpop.f32.mrb[96].mxu0  ;;  %13827 = vmatmul.mubr.f32.gmra.mrb[220].mxu1 %v8534_v42  ;;  %vm8278_vm6 = vcmp.ge.f32.partialorder %v7759_v8, 0.0 }
 0x65b   : > { %v7774_v1 = vadd.f32 %v13610_v7, %v17011_v26  ;;  %v7768_v34 = vpop.f32.mrb[97].mxu0  ;;  %v8536_v50 = vsel %vm8279_vm5, %v7764_v49, %v8408_v54 }
 0x65c   : > { %v7769_v15 = vadd.f32 %v17011_v26, %v7768_v34  ;;  %v8535_v18 = vsel %vm8278_vm6, %v7759_v8, %v8407_v25 }
 0x65d   : > { %v8410_v52 = vmul.f32 %v17015_v19, %v7774_v1  ;;  %13829 = vmatprep.mubr.f32.mxu1 %v8535_v18  ;;  %vm8281_vm7 = vcmp.ge.f32.partialorder %v7774_v1, 0.0 }
 0x65e   : > { %v8409_v11 = vmul.f32 %v17015_v19, %v7769_v15  ;;  %v13613_v47 = vpop.f32.mrb[98].mxu0  ;;  %13830 = vmatmul.mubr.f32.gmra.mrb[222].mxu1 %v8536_v50  ;;  %vm8280_vm8 = vcmp.ge.f32.partialorder %v7769_v15, 0.0 }
 0x65f   : > { %v7784_v53 = vadd.f32 %v13613_v47, %v17011_v26  ;;  %v7778_v24 = vpop.f32.mrb[99].mxu0  ;;  %v8538_v62 = vsel %vm8281_vm7, %v7774_v1, %v8410_v52 }
 0x660   : > { %v7779_v41 = vadd.f32 %v17011_v26, %v7778_v24  ;;  %v8537_v35 = vsel %vm8280_vm8, %v7769_v15, %v8409_v11 }
 0x661   : > { %v8412_v10 = vmul.f32 %v17015_v19, %v7784_v53  ;;  %13832 = vmatprep.mubr.f32.mxu1 %v8537_v35  ;;  %vm8283_vm9 = vcmp.ge.f32.partialorder %v7784_v53, 0.0 }
 0x662   : > { %v8411_v23 = vmul.f32 %v17015_v19, %v7779_v41  ;;  %v13616_v56 = vpop.f32.mrb[100].mxu0  ;;  %13833 = vmatmul.mubr.f32.gmra.mrb[224].mxu1 %v8538_v62  ;;  %vm8282_vm10 = vcmp.ge.f32.partialorder %v7779_v41, 0.0 }
 0x663   : > { %v7794_v21 = vadd.f32 %v13616_v56, %v17011_v26  ;;  %v7788_v38 = vpop.f32.mrb[101].mxu0  ;;  %v8540_v58 = vsel %vm8283_vm9, %v7784_v53, %v8412_v10 }
 0x664   : > { %v7789_v57 = vadd.f32 %v17011_v26, %v7788_v38  ;;  %v8539_v27 = vsel %vm8282_vm10, %v7779_v41, %v8411_v23 }
 0x665   : > { %v8414_v31 = vmul.f32 %v17015_v19, %v7794_v21  ;;  %13835 = vmatprep.mubr.f32.mxu1 %v8539_v27  ;;  %vm8285_vm11 = vcmp.ge.f32.partialorder %v7794_v21, 0.0 }
 0x666   : > { %v8413_v5 = vmul.f32 %v17015_v19, %v7789_v57  ;;  %v13619_v30 = vpop.f32.mrb[102].mxu0  ;;  %13836 = vmatmul.mubr.f32.gmra.mrb[226].mxu1 %v8540_v58  ;;  %vm8284_vm12 = vcmp.ge.f32.partialorder %v7789_v57, 0.0 }
 0x667   : > { %v7804_v17 = vadd.f32 %v13619_v30, %v17011_v26  ;;  %v7798_v59 = vpop.f32.mrb[103].mxu0  ;;  %v8542_v40 = vsel %vm8285_vm11, %v7794_v21, %v8414_v31 }
 0x668   : > { %v7799_v20 = vadd.f32 %v17011_v26, %v7798_v59  ;;  %v8541_v36 = vsel %vm8284_vm12, %v7789_v57, %v8413_v5 }
 0x669   : > { %v8416_v3 = vmul.f32 %v17015_v19, %v7804_v17  ;;  %13838 = vmatprep.mubr.f32.mxu1 %v8541_v36  ;;  %vm8287_vm13 = vcmp.ge.f32.partialorder %v7804_v17, 0.0 }
 0x66a   : > { %v8415_v2 = vmul.f32 %v17015_v19, %v7799_v20  ;;  %v13622_v55 = vpop.f32.mrb[104].mxu0  ;;  %13839 = vmatmul.mubr.f32.gmra.mrb[228].mxu1 %v8542_v40  ;;  %vm8286_vm14 = vcmp.ge.f32.partialorder %v7799_v20, 0.0 }
 0x66b   : > { %v7814_v9 = vadd.f32 %v13622_v55, %v17011_v26  ;;  %v7808_v33 = vpop.f32.mrb[105].mxu0  ;;  %v8544_v16 = vsel %vm8287_vm13, %v7804_v17, %v8416_v3 }
 0x66c   : > { %v7809_v48 = vadd.f32 %v17011_v26, %v7808_v33  ;;  %v8543_v22 = vsel %vm8286_vm14, %v7799_v20, %v8415_v2 }
 0x66d   : > { %v8418_v28 = vmul.f32 %v17015_v19, %v7814_v9  ;;  %13841 = vmatprep.mubr.f32.mxu1 %v8543_v22  ;;  %vm8289_vm15 = vcmp.ge.f32.partialorder %v7814_v9, 0.0 }
 0x66e   : > { %v8417_v32 = vmul.f32 %v17015_v19, %v7809_v48  ;;  %v13625_v14 = vpop.f32.mrb[106].mxu0  ;;  %13842 = vmatmul.mubr.f32.gmra.mrb[230].mxu1 %v8544_v16  ;;  %vm8288_vm0 = vcmp.ge.f32.partialorder %v7809_v48, 0.0 }
 0x66f   : > { %v7824_v4 = vadd.f32 %v13625_v14, %v17011_v26  ;;  %v7818_v61 = vpop.f32.mrb[107].mxu0  ;;  %v8546_v63 = vsel %vm8289_vm15, %v7814_v9, %v8418_v28 }
 0x670   : > { %v7819_v12 = vadd.f32 %v17011_v26, %v7818_v61  ;;  %v8545_v51 = vsel %vm8288_vm0, %v7809_v48, %v8417_v32 }
 0x671   : > { %v8420_v60 = vmul.f32 %v17015_v19, %v7824_v4  ;;  %13844 = vmatprep.mubr.f32.mxu1 %v8545_v51  ;;  %vm8291_vm2 = vcmp.ge.f32.partialorder %v7824_v4, 0.0 }
 0x672   : > { %v8419_v45 = vmul.f32 %v17015_v19, %v7819_v12  ;;  %v13628_v43 = vpop.f32.mrb[108].mxu0  ;;  %13845 = vmatmul.mubr.f32.gmra.mrb[232].mxu1 %v8546_v63  ;;  %vm8290_vm3 = vcmp.ge.f32.partialorder %v7819_v12, 0.0 }
 0x673   : > { %v7834_v37 = vadd.f32 %v13628_v43, %v17011_v26  ;;  %v7828_v44 = vpop.f32.mrb[109].mxu0  ;;  %v8548_v39 = vsel %vm8291_vm2, %v7824_v4, %v8420_v60 }
 0x674   : > { %v7829_v13 = vadd.f32 %v17011_v26, %v7828_v44  ;;  %v8547_v49 = vsel %vm8290_vm3, %v7819_v12, %v8419_v45 }
 0x675   : > { %v8422_v8 = vmul.f32 %v17015_v19, %v7834_v37  ;;  %13847 = vmatprep.mubr.f32.mxu1 %v8547_v49  ;;  %vm8293_vm4 = vcmp.ge.f32.partialorder %v7834_v37, 0.0 }
 0x676   : > { %v8421_v46 = vmul.f32 %v17015_v19, %v7829_v13  ;;  %v13631_v42 = vpop.f32.mrb[110].mxu0  ;;  %13848 = vmatmul.mubr.f32.gmra.mrb[234].mxu1 %v8548_v39  ;;  %vm8292_vm5 = vcmp.ge.f32.partialorder %v7829_v13, 0.0 }
 0x677   : > { %v7844_v54 = vadd.f32 %v13631_v42, %v17011_v26  ;;  %v7838_v25 = vpop.f32.mrb[111].mxu0  ;;  %v8550_v34 = vsel %vm8293_vm4, %v7834_v37, %v8422_v8 }
 0x678   : > { %v7839_v7 = vadd.f32 %v17011_v26, %v7838_v25  ;;  %v8549_v1 = vsel %vm8292_vm5, %v7829_v13, %v8421_v46 }
 0x679   : > { %v8424_v15 = vmul.f32 %v17015_v19, %v7844_v54  ;;  %13850 = vmatprep.mubr.f32.mxu1 %v8549_v1  ;;  %vm8295_vm6 = vcmp.ge.f32.partialorder %v7844_v54, 0.0 }
 0x67a   : > { %v8423_v18 = vmul.f32 %v17015_v19, %v7839_v7  ;;  %v13634_v50 = vpop.f32.mrb[112].mxu0  ;;  %13851 = vmatmul.mubr.f32.gmra.mrb[236].mxu1 %v8550_v34  ;;  %vm8294_vm7 = vcmp.ge.f32.partialorder %v7839_v7, 0.0 }
 0x67b   : > { %v7854_v52 = vadd.f32 %v13634_v50, %v17011_v26  ;;  %v7848_v11 = vpop.f32.mrb[113].mxu0  ;;  %v8552_v24 = vsel %vm8295_vm6, %v7844_v54, %v8424_v15 }
 0x67c   : > { %v7849_v47 = vadd.f32 %v17011_v26, %v7848_v11  ;;  %v8551_v53 = vsel %vm8294_vm7, %v7839_v7, %v8423_v18 }
 0x67d   : > { %v8426_v6 = vmul.f32 %v17015_v19, %v7854_v52  ;;  %13853 = vmatprep.mubr.f32.mxu1 %v8551_v53  ;;  %vm8297_vm8 = vcmp.ge.f32.partialorder %v7854_v52, 0.0 }
 0x67e   : > { %v8425_v0 = vmul.f32 %v17015_v19, %v7849_v47  ;;  %v13637_v41 = vpop.f32.mrb[114].mxu0  ;;  %13854 = vmatmul.mubr.f32.gmra.mrb[238].mxu1 %v8552_v24  ;;  %vm8296_vm9 = vcmp.ge.f32.partialorder %v7849_v47, 0.0 }
 0x67f   : > { %v7864_v35 = vadd.f32 %v13637_v41, %v17011_v26  ;;  %v7858_v29 = vpop.f32.mrb[115].mxu0  ;;  %v8554_v23 = vsel %vm8297_vm8, %v7854_v52, %v8426_v6 }
 0x680   : > { %v7859_v62 = vadd.f32 %v17011_v26, %v7858_v29  ;;  %v8553_v10 = vsel %vm8296_vm9, %v7849_v47, %v8425_v0  ;;  %v17207_v47 = vld [vmem:[%s18011_s5 + $0x5] ss:$0 sm:$0xff] }
 0x681   : > { %v8428_v56 = vmul.f32 %v17015_v19, %v7864_v35  ;;  %13856 = vmatprep.mubr.f32.mxu1 %v8553_v10  ;;  %vm8299_vm10 = vcmp.ge.f32.partialorder %v7864_v35, 0.0 }
 0x682   : > { %v8427_v21 = vmul.f32 %v17015_v19, %v7859_v62  ;;  %v13640_v38 = vpop.f32.mrb[116].mxu0  ;;  %13857 = vmatmul.mubr.f32.gmra.mrb[240].mxu1 %v8554_v23  ;;  %vm8298_vm11 = vcmp.ge.f32.partialorder %v7859_v62, 0.0 }
 0x683   : > { %v7874_v57 = vadd.f32 %v13640_v38, %v17011_v26  ;;  %v7868_v27 = vpop.f32.mrb[117].mxu0  ;;  %v8556_v5 = vsel %vm8299_vm10, %v7864_v35, %v8428_v56 }
 0x684   : > { %v7869_v58 = vadd.f32 %v17011_v26, %v7868_v27  ;;  %v8555_v31 = vsel %vm8298_vm11, %v7859_v62, %v8427_v21 }
 0x685   : > { %v8430_v30 = vmul.f32 %v17015_v19, %v7874_v57  ;;  %13859 = vmatprep.mubr.f32.mxu1 %v8555_v31  ;;  %vm8301_vm12 = vcmp.ge.f32.partialorder %v7874_v57, 0.0 }
 0x686   : > { %v8429_v17 = vmul.f32 %v17015_v19, %v7869_v58  ;;  %v13643_v59 = vpop.f32.mrb[118].mxu0  ;;  %13860 = vmatmul.mubr.f32.gmra.mrb[242].mxu1 %v8556_v5  ;;  %vm8300_vm13 = vcmp.ge.f32.partialorder %v7869_v58, 0.0 }
 0x687   : > { %v7884_v20 = vadd.f32 %v13643_v59, %v17011_v26  ;;  %v7878_v36 = vpop.f32.mrb[119].mxu0  ;;  %v8558_v2 = vsel %vm8301_vm12, %v7874_v57, %v8430_v30 }
 0x688   : > { %v7879_v40 = vadd.f32 %v17011_v26, %v7878_v36  ;;  %v8557_v3 = vsel %vm8300_vm13, %v7869_v58, %v8429_v17 }
 0x689   : > { %v8432_v55 = vmul.f32 %v17015_v19, %v7884_v20  ;;  %13862 = vmatprep.mubr.f32.mxu1 %v8557_v3  ;;  %vm8303_vm14 = vcmp.ge.f32.partialorder %v7884_v20, 0.0 }
 0x68a   : > { %v8431_v9 = vmul.f32 %v17015_v19, %v7879_v40  ;;  %v13646_v33 = vpop.f32.mrb[120].mxu0  ;;  %13863 = vmatmul.mubr.f32.gmra.mrb[244].mxu1 %v8558_v2  ;;  %vm8302_vm15 = vcmp.ge.f32.partialorder %v7879_v40, 0.0 }
 0x68b   : > { %v7894_v48 = vadd.f32 %v13646_v33, %v17011_v26  ;;  %v7888_v22 = vpop.f32.mrb[121].mxu0  ;;  %v8560_v32 = vsel %vm8303_vm14, %v7884_v20, %v8432_v55 }
 0x68c   : > { %v7889_v16 = vadd.f32 %v17011_v26, %v7888_v22  ;;  %v8559_v28 = vsel %vm8302_vm15, %v7879_v40, %v8431_v9 }
 0x68d   : > { %v8434_v14 = vmul.f32 %v17015_v19, %v7894_v48  ;;  %13865 = vmatprep.mubr.f32.mxu1 %v8559_v28  ;;  %vm8305_vm0 = vcmp.ge.f32.partialorder %v7894_v48, 0.0 }
 0x68e   : > { %v8433_v4 = vmul.f32 %v17015_v19, %v7889_v16  ;;  %v13649_v61 = vpop.f32.mrb[122].mxu0  ;;  %13866 = vmatmul.mubr.f32.gmra.mrb[246].mxu1 %v8560_v32  ;;  %vm8304_vm2 = vcmp.ge.f32.partialorder %v7889_v16, 0.0 }
 0x68f   : > { %v7904_v12 = vadd.f32 %v13649_v61, %v17011_v26  ;;  %v7898_v51 = vpop.f32.mrb[123].mxu0  ;;  %v8562_v45 = vsel %vm8305_vm0, %v7894_v48, %v8434_v14 }
 0x690   : > { %v7899_v63 = vadd.f32 %v17011_v26, %v7898_v51  ;;  %v8561_v60 = vsel %vm8304_vm2, %v7889_v16, %v8433_v4 }
 0x691   : > { %v8436_v43 = vmul.f32 %v17015_v19, %v7904_v12  ;;  %13868 = vmatprep.mubr.f32.mxu1 %v8561_v60  ;;  %vm8307_vm3 = vcmp.ge.f32.partialorder %v7904_v12, 0.0 }
 0x692   : > { %v8435_v37 = vmul.f32 %v17015_v19, %v7899_v63  ;;  %v13652_v44 = vpop.f32.mrb[124].mxu0  ;;  %13869 = vmatmul.mubr.f32.gmra.mrb[248].mxu1 %v8562_v45  ;;  %vm8306_vm4 = vcmp.ge.f32.partialorder %v7899_v63, 0.0 }
 0x693   : > { %v7914_v13 = vadd.f32 %v13652_v44, %v17011_v26  ;;  %v7908_v49 = vpop.f32.mrb[125].mxu0  ;;  %v8564_v46 = vsel %vm8307_vm3, %v7904_v12, %v8436_v43 }
 0x694   : > { %v7909_v39 = vadd.f32 %v17011_v26, %v7908_v49  ;;  %v8563_v8 = vsel %vm8306_vm4, %v7899_v63, %v8435_v37 }
 0x695   : > { %v8438_v42 = vmul.f32 %v17015_v19, %v7914_v13  ;;  %13871 = vmatprep.mubr.f32.mxu1 %v8563_v8  ;;  %vm8309_vm5 = vcmp.ge.f32.partialorder %v7914_v13, 0.0 }
 0x696   : > { %v8437_v54 = vmul.f32 %v17015_v19, %v7909_v39  ;;  %v13655_v25 = vpop.f32.mrb[126].mxu0  ;;  %13872 = vmatmul.mubr.f32.gmra.mrb[250].mxu1 %v8564_v46  ;;  %vm8308_vm6 = vcmp.ge.f32.partialorder %v7909_v39, 0.0 }
 0x697   : > { %v7924_v7 = vadd.f32 %v13655_v25, %v17011_v26  ;;  %v7918_v1 = vpop.f32.mrb[127].mxu0  ;;  %v8566_v18 = vsel %vm8309_vm5, %v7914_v13, %v8438_v42 }
 0x698   : > { %v7919_v34 = vadd.f32 %v17011_v26, %v7918_v1  ;;  %v8565_v15 = vsel %vm8308_vm6, %v7909_v39, %v8437_v54 }
 0x699   : > { %v8440_v50 = vmul.f32 %v17015_v19, %v7924_v7  ;;  %13874 = vmatprep.mubr.f32.mxu1 %v8565_v15  ;;  %vm8311_vm7 = vcmp.ge.f32.partialorder %v7924_v7, 0.0 }
 0x69a   : > { %v8439_v52 = vmul.f32 %v17015_v19, %v7919_v34  ;;  %v13658_v11 = vpop.f32.mrb[128].mxu0  ;;  %13875 = vmatmul.mubr.f32.gmra.mrb[252].mxu1 %v8566_v18  ;;  %vm8310_vm8 = vcmp.ge.f32.partialorder %v7919_v34, 0.0 }
 0x69b   : > { %v7934_v53 = vadd.f32 %v17207_v47, %v13658_v11  ;;  %v7928_v24 = vpop.f32.mrb[129].mxu0  ;;  %v8568_v0 = vsel %vm8311_vm7, %v7924_v7, %v8440_v50 }
 0x69c   : > { %v7929_v26 = vadd.f32 %v17207_v47, %v7928_v24  ;;  %v8567_v6 = vsel %vm8310_vm8, %v7919_v34, %v8439_v52 }
 0x69d   : > { %v8442_v41 = vmul.f32 %v17015_v19, %v7934_v53  ;;  %13877 = vmatprep.mubr.f32.mxu1 %v8567_v6  ;;  %vm8313_vm9 = vcmp.ge.f32.partialorder %v7934_v53, 0.0 }
 0x69e   : > { %v8441_v35 = vmul.f32 %v17015_v19, %v7929_v26  ;;  %v13661_v29 = vpop.f32.mrb[130].mxu0  ;;  %13878 = vmatmul.mubr.f32.gmra.mrb[254].mxu1 %v8568_v0  ;;  %vm8312_vm10 = vcmp.ge.f32.partialorder %v7929_v26, 0.0 }
 0x69f   : > { %v7944_v62 = vadd.f32 %v17207_v47, %v13661_v29  ;;  %v7938_v10 = vpop.f32.mrb[131].mxu0  ;;  %v8570_v21 = vsel %vm8313_vm9, %v7934_v53, %v8442_v41 }
 0x6a0   : > { %v7939_v23 = vadd.f32 %v17207_v47, %v7938_v10  ;;  %v8569_v56 = vsel %vm8312_vm10, %v7929_v26, %v8441_v35 }
 0x6a1   : > { %v8444_v38 = vmul.f32 %v17015_v19, %v7944_v62  ;;  %13880 = vmatprep.mubr.f32.mxu1 %v8569_v56  ;;  %vm8315_vm11 = vcmp.ge.f32.partialorder %v7944_v62, 0.0 }
 0x6a2   : > { %v8443_v57 = vmul.f32 %v17015_v19, %v7939_v23  ;;  %v13664_v27 = vpop.f32.mrb[132].mxu0  ;;  %13881 = vmatmul.mubr.f32.gmra.mrb[0].mxu1 %v8570_v21  ;;  %vm8314_vm12 = vcmp.ge.f32.partialorder %v7939_v23, 0.0 }
 0x6a3   : > { %v7954_v58 = vadd.f32 %v17207_v47, %v13664_v27  ;;  %v7948_v31 = vpop.f32.mrb[133].mxu0  ;;  %v8572_v17 = vsel %vm8315_vm11, %v7944_v62, %v8444_v38 }
 0x6a4   : > { %v7949_v5 = vadd.f32 %v17207_v47, %v7948_v31  ;;  %v8571_v30 = vsel %vm8314_vm12, %v7939_v23, %v8443_v57 }
 0x6a5   : > { %v8446_v59 = vmul.f32 %v17015_v19, %v7954_v58  ;;  %13883 = vmatprep.mubr.f32.mxu1 %v8571_v30  ;;  %vm8317_vm13 = vcmp.ge.f32.partialorder %v7954_v58, 0.0 }
 0x6a6   : > { %v8445_v20 = vmul.f32 %v17015_v19, %v7949_v5  ;;  %v13667_v36 = vpop.f32.mrb[134].mxu0  ;;  %13884 = vmatmul.mubr.f32.gmra.mrb[2].mxu1 %v8572_v17  ;;  %vm8316_vm14 = vcmp.ge.f32.partialorder %v7949_v5, 0.0 }
 0x6a7   : > { %v7964_v40 = vadd.f32 %v17207_v47, %v13667_v36  ;;  %v7958_v3 = vpop.f32.mrb[135].mxu0  ;;  %v8574_v9 = vsel %vm8317_vm13, %v7954_v58, %v8446_v59 }
 0x6a8   : > { %v7959_v2 = vadd.f32 %v17207_v47, %v7958_v3  ;;  %v8573_v55 = vsel %vm8316_vm14, %v7949_v5, %v8445_v20 }
 0x6a9   : > { %v8448_v33 = vmul.f32 %v17015_v19, %v7964_v40  ;;  %13886 = vmatprep.mubr.f32.mxu1 %v8573_v55  ;;  %vm8319_vm15 = vcmp.ge.f32.partialorder %v7964_v40, 0.0 }
 0x6aa   : > { %v8447_v48 = vmul.f32 %v17015_v19, %v7959_v2  ;;  %v13670_v22 = vpop.f32.mrb[136].mxu0  ;;  %13887 = vmatmul.mubr.f32.gmra.mrb[4].mxu1 %v8574_v9  ;;  %vm8318_vm0 = vcmp.ge.f32.partialorder %v7959_v2, 0.0 }
 0x6ab   : > { %v7974_v16 = vadd.f32 %v17207_v47, %v13670_v22  ;;  %v7968_v28 = vpop.f32.mrb[137].mxu0  ;;  %v8576_v4 = vsel %vm8319_vm15, %v7964_v40, %v8448_v33 }
 0x6ac   : > { %v7969_v32 = vadd.f32 %v17207_v47, %v7968_v28  ;;  %v8575_v14 = vsel %vm8318_vm0, %v7959_v2, %v8447_v48 }
 0x6ad   : > { %v8450_v61 = vmul.f32 %v17015_v19, %v7974_v16  ;;  %13889 = vmatprep.mubr.f32.mxu1 %v8575_v14  ;;  %vm8321_vm2 = vcmp.ge.f32.partialorder %v7974_v16, 0.0 }
 0x6ae   : > { %v8449_v12 = vmul.f32 %v17015_v19, %v7969_v32  ;;  %v13673_v51 = vpop.f32.mrb[138].mxu0  ;;  %13890 = vmatmul.mubr.f32.gmra.mrb[6].mxu1 %v8576_v4  ;;  %vm8320_vm3 = vcmp.ge.f32.partialorder %v7969_v32, 0.0 }
 0x6af   : > { %v7984_v63 = vadd.f32 %v17207_v47, %v13673_v51  ;;  %v7978_v60 = vpop.f32.mrb[139].mxu0  ;;  %v8578_v37 = vsel %vm8321_vm2, %v7974_v16, %v8450_v61 }
 0x6b0   : > { %v7979_v45 = vadd.f32 %v17207_v47, %v7978_v60  ;;  %v8577_v43 = vsel %vm8320_vm3, %v7969_v32, %v8449_v12 }
 0x6b1   : > { %v8452_v44 = vmul.f32 %v17015_v19, %v7984_v63  ;;  %13892 = vmatprep.mubr.f32.mxu1 %v8577_v43  ;;  %vm8323_vm4 = vcmp.ge.f32.partialorder %v7984_v63, 0.0 }
 0x6b2   : > { %v8451_v13 = vmul.f32 %v17015_v19, %v7979_v45  ;;  %v13676_v49 = vpop.f32.mrb[140].mxu0  ;;  %13893 = vmatmul.mubr.f32.gmra.mrb[8].mxu1 %v8578_v37  ;;  %vm8322_vm5 = vcmp.ge.f32.partialorder %v7979_v45, 0.0 }
 0x6b3   : > { %v7994_v39 = vadd.f32 %v17207_v47, %v13676_v49  ;;  %v7988_v8 = vpop.f32.mrb[141].mxu0  ;;  %v8580_v54 = vsel %vm8323_vm4, %v7984_v63, %v8452_v44 }
 0x6b4   : > { %v7989_v46 = vadd.f32 %v17207_v47, %v7988_v8  ;;  %v8579_v42 = vsel %vm8322_vm5, %v7979_v45, %v8451_v13 }
 0x6b5   : > { %v8454_v25 = vmul.f32 %v17015_v19, %v7994_v39  ;;  %13895 = vmatprep.mubr.f32.mxu1 %v8579_v42  ;;  %vm8325_vm6 = vcmp.ge.f32.partialorder %v7994_v39, 0.0 }
 0x6b6   : > { %v8453_v7 = vmul.f32 %v17015_v19, %v7989_v46  ;;  %v13679_v1 = vpop.f32.mrb[142].mxu0  ;;  %13896 = vmatmul.mubr.f32.gmra.mrb[10].mxu1 %v8580_v54  ;;  %vm8324_vm7 = vcmp.ge.f32.partialorder %v7989_v46, 0.0 }
 0x6b7   : > { %v8004_v34 = vadd.f32 %v17207_v47, %v13679_v1  ;;  %v7998_v15 = vpop.f32.mrb[143].mxu0  ;;  %v8582_v52 = vsel %vm8325_vm6, %v7994_v39, %v8454_v25 }
 0x6b8   : > { %v7999_v18 = vadd.f32 %v17207_v47, %v7998_v15  ;;  %v8581_v50 = vsel %vm8324_vm7, %v7989_v46, %v8453_v7 }
 0x6b9   : > { %v8456_v11 = vmul.f32 %v17015_v19, %v8004_v34  ;;  %13898 = vmatprep.mubr.f32.mxu1 %v8581_v50  ;;  %vm8327_vm8 = vcmp.ge.f32.partialorder %v8004_v34, 0.0 }
 0x6ba   : > { %v8455_v53 = vmul.f32 %v17015_v19, %v7999_v18  ;;  %v13682_v24 = vpop.f32.mrb[144].mxu0  ;;  %13899 = vmatmul.mubr.f32.gmra.mrb[12].mxu1 %v8582_v52  ;;  %vm8326_vm9 = vcmp.ge.f32.partialorder %v7999_v18, 0.0 }
 0x6bb   : > { %v8014_v26 = vadd.f32 %v17207_v47, %v13682_v24  ;;  %v8008_v6 = vpop.f32.mrb[145].mxu0  ;;  %v8584_v35 = vsel %vm8327_vm8, %v8004_v34, %v8456_v11 }
 0x6bc   : > { %v8009_v0 = vadd.f32 %v17207_v47, %v8008_v6  ;;  %v8583_v41 = vsel %vm8326_vm9, %v7999_v18, %v8455_v53 }
 0x6bd   : > { %v8458_v29 = vmul.f32 %v17015_v19, %v8014_v26  ;;  %13901 = vmatprep.mubr.f32.mxu1 %v8583_v41  ;;  %vm8329_vm10 = vcmp.ge.f32.partialorder %v8014_v26, 0.0 }
 0x6be   : > { %v8457_v62 = vmul.f32 %v17015_v19, %v8009_v0  ;;  %v13685_v10 = vpop.f32.mrb[146].mxu0  ;;  %13902 = vmatmul.mubr.f32.gmra.mrb[14].mxu1 %v8584_v35  ;;  %vm8328_vm11 = vcmp.ge.f32.partialorder %v8009_v0, 0.0 }
 0x6bf   : > { %v8024_v23 = vadd.f32 %v17207_v47, %v13685_v10  ;;  %v8018_v56 = vpop.f32.mrb[147].mxu0  ;;  %v8586_v57 = vsel %vm8329_vm10, %v8014_v26, %v8458_v29 }
 0x6c0   : > { %v8019_v21 = vadd.f32 %v17207_v47, %v8018_v56  ;;  %v8585_v38 = vsel %vm8328_vm11, %v8009_v0, %v8457_v62 }
 0x6c1   : > { %v8460_v27 = vmul.f32 %v17015_v19, %v8024_v23  ;;  %13904 = vmatprep.mubr.f32.mxu1 %v8585_v38  ;;  %vm8331_vm12 = vcmp.ge.f32.partialorder %v8024_v23, 0.0 }
 0x6c2   : > { %v8459_v58 = vmul.f32 %v17015_v19, %v8019_v21  ;;  %v13688_v31 = vpop.f32.mrb[148].mxu0  ;;  %13905 = vmatmul.mubr.f32.gmra.mrb[16].mxu1 %v8586_v57  ;;  %vm8330_vm13 = vcmp.ge.f32.partialorder %v8019_v21, 0.0 }
 0x6c3   : > { %v8034_v5 = vadd.f32 %v17207_v47, %v13688_v31  ;;  %v8028_v30 = vpop.f32.mrb[149].mxu0  ;;  %v8588_v20 = vsel %vm8331_vm12, %v8024_v23, %v8460_v27 }
 0x6c4   : > { %v8029_v17 = vadd.f32 %v17207_v47, %v8028_v30  ;;  %v8587_v59 = vsel %vm8330_vm13, %v8019_v21, %v8459_v58 }
 0x6c5   : > { %v8462_v36 = vmul.f32 %v17015_v19, %v8034_v5  ;;  %13907 = vmatprep.mubr.f32.mxu1 %v8587_v59  ;;  %vm8333_vm14 = vcmp.ge.f32.partialorder %v8034_v5, 0.0 }
 0x6c6   : > { %v8461_v40 = vmul.f32 %v17015_v19, %v8029_v17  ;;  %v13691_v3 = vpop.f32.mrb[150].mxu0  ;;  %13908 = vmatmul.mubr.f32.gmra.mrb[18].mxu1 %v8588_v20  ;;  %vm8332_vm15 = vcmp.ge.f32.partialorder %v8029_v17, 0.0 }
 0x6c7   : > { %v8044_v2 = vadd.f32 %v17207_v47, %v13691_v3  ;;  %v8038_v55 = vpop.f32.mrb[151].mxu0  ;;  %v8590_v48 = vsel %vm8333_vm14, %v8034_v5, %v8462_v36 }
 0x6c8   : > { %v8039_v9 = vadd.f32 %v17207_v47, %v8038_v55  ;;  %v8589_v33 = vsel %vm8332_vm15, %v8029_v17, %v8461_v40 }
 0x6c9   : > { %v8464_v22 = vmul.f32 %v17015_v19, %v8044_v2  ;;  %13910 = vmatprep.mubr.f32.mxu1 %v8589_v33  ;;  %vm8335_vm0 = vcmp.ge.f32.partialorder %v8044_v2, 0.0 }
 0x6ca   : > { %v8463_v16 = vmul.f32 %v17015_v19, %v8039_v9  ;;  %v13694_v28 = vpop.f32.mrb[152].mxu0  ;;  %13911 = vmatmul.mubr.f32.gmra.mrb[20].mxu1 %v8590_v48  ;;  %vm8334_vm2 = vcmp.ge.f32.partialorder %v8039_v9, 0.0 }
 0x6cb   : > { %v8054_v32 = vadd.f32 %v17207_v47, %v13694_v28  ;;  %v8048_v14 = vpop.f32.mrb[153].mxu0  ;;  %v8592_v12 = vsel %vm8335_vm0, %v8044_v2, %v8464_v22 }
 0x6cc   : > { %v8049_v4 = vadd.f32 %v17207_v47, %v8048_v14  ;;  %v8591_v61 = vsel %vm8334_vm2, %v8039_v9, %v8463_v16 }
 0x6cd   : > { %v8466_v51 = vmul.f32 %v17015_v19, %v8054_v32  ;;  %13913 = vmatprep.mubr.f32.mxu1 %v8591_v61  ;;  %vm8337_vm3 = vcmp.ge.f32.partialorder %v8054_v32, 0.0 }
 0x6ce   : > { %v8465_v63 = vmul.f32 %v17015_v19, %v8049_v4  ;;  %v13697_v60 = vpop.f32.mrb[154].mxu0  ;;  %13914 = vmatmul.mubr.f32.gmra.mrb[22].mxu1 %v8592_v12  ;;  %vm8336_vm4 = vcmp.ge.f32.partialorder %v8049_v4, 0.0 }
 0x6cf   : > { %v8064_v45 = vadd.f32 %v17207_v47, %v13697_v60  ;;  %v8058_v43 = vpop.f32.mrb[155].mxu0  ;;  %v8594_v13 = vsel %vm8337_vm3, %v8054_v32, %v8466_v51 }
 0x6d0   : > { %v8059_v37 = vadd.f32 %v17207_v47, %v8058_v43  ;;  %v8593_v44 = vsel %vm8336_vm4, %v8049_v4, %v8465_v63 }
 0x6d1   : > { %v8468_v49 = vmul.f32 %v17015_v19, %v8064_v45  ;;  %13916 = vmatprep.mubr.f32.mxu1 %v8593_v44  ;;  %vm8339_vm5 = vcmp.ge.f32.partialorder %v8064_v45, 0.0 }
 0x6d2   : > { %v8467_v39 = vmul.f32 %v17015_v19, %v8059_v37  ;;  %v13700_v8 = vpop.f32.mrb[156].mxu0  ;;  %13917 = vmatmul.mubr.f32.gmra.mrb[24].mxu1 %v8594_v13  ;;  %vm8338_vm6 = vcmp.ge.f32.partialorder %v8059_v37, 0.0 }
 0x6d3   : > { %v8074_v46 = vadd.f32 %v17207_v47, %v13700_v8  ;;  %v8068_v42 = vpop.f32.mrb[157].mxu0  ;;  %v8596_v7 = vsel %vm8339_vm5, %v8064_v45, %v8468_v49 }
 0x6d4   : > { %v8069_v54 = vadd.f32 %v17207_v47, %v8068_v42  ;;  %v8595_v25 = vsel %vm8338_vm6, %v8059_v37, %v8467_v39 }
 0x6d5   : > { %v8470_v1 = vmul.f32 %v17015_v19, %v8074_v46  ;;  %13919 = vmatprep.mubr.f32.mxu1 %v8595_v25  ;;  %vm8341_vm7 = vcmp.ge.f32.partialorder %v8074_v46, 0.0 }
 0x6d6   : > { %v8469_v34 = vmul.f32 %v17015_v19, %v8069_v54  ;;  %v13703_v15 = vpop.f32.mrb[158].mxu0  ;;  %13920 = vmatmul.mubr.f32.gmra.mrb[26].mxu1 %v8596_v7  ;;  %vm8340_vm8 = vcmp.ge.f32.partialorder %v8069_v54, 0.0  ;;  %v17301_v7 = vld [vmem:[%s18011_s5 + $0x6] ss:$0 sm:$0xff] }
 0x6d7   : > { %v8084_v18 = vadd.f32 %v17207_v47, %v13703_v15  ;;  %v8078_v50 = vpop.f32.mrb[159].mxu0  ;;  %v8598_v53 = vsel %vm8341_vm7, %v8074_v46, %v8470_v1 }
 0x6d8   : > { %v8079_v52 = vadd.f32 %v17207_v47, %v8078_v50  ;;  %v8597_v11 = vsel %vm8340_vm8, %v8069_v54, %v8469_v34 }
 0x6d9   : > { %v8472_v24 = vmul.f32 %v17015_v19, %v8084_v18  ;;  %13922 = vmatprep.mubr.f32.mxu1 %v8597_v11  ;;  %vm8343_vm9 = vcmp.ge.f32.partialorder %v8084_v18, 0.0 }
 0x6da   : > { %v8471_v26 = vmul.f32 %v17015_v19, %v8079_v52  ;;  %v13706_v6 = vpop.f32.mrb[160].mxu0  ;;  %13923 = vmatmul.mubr.f32.gmra.mrb[28].mxu1 %v8598_v53  ;;  %vm8342_vm10 = vcmp.ge.f32.partialorder %v8079_v52, 0.0 }
 0x6db   : > { %v8094_v0 = vadd.f32 %v17207_v47, %v13706_v6  ;;  %v8088_v41 = vpop.f32.mrb[161].mxu0  ;;  %v8600_v62 = vsel %vm8343_vm9, %v8084_v18, %v8472_v24 }
 0x6dc   : > { %v8089_v35 = vadd.f32 %v17207_v47, %v8088_v41  ;;  %v8599_v29 = vsel %vm8342_vm10, %v8079_v52, %v8471_v26  ;;  %v17305_v52 = vstv %s10929_s29 }
 0x6dd   : > { %v8474_v10 = vmul.f32 %v17015_v19, %v8094_v0  ;;  %13925 = vmatprep.mubr.f32.mxu1 %v8599_v29  ;;  %vm8345_vm11 = vcmp.ge.f32.partialorder %v8094_v0, 0.0 }
 0x6de   : > { %v8473_v23 = vmul.f32 %v17015_v19, %v8089_v35  ;;  %v13709_v56 = vpop.f32.mrb[162].mxu0  ;;  %13926 = vmatmul.mubr.f32.gmra.mrb[30].mxu1 %v8600_v62  ;;  %vm8344_vm12 = vcmp.ge.f32.partialorder %v8089_v35, 0.0 }
 0x6df   : > { %v8104_v21 = vadd.f32 %v17207_v47, %v13709_v56  ;;  %v8098_v38 = vpop.f32.mrb[163].mxu0  ;;  %v8602_v58 = vsel %vm8345_vm11, %v8094_v0, %v8474_v10 }
 0x6e0   : > { %v8099_v57 = vadd.f32 %v17207_v47, %v8098_v38  ;;  %v8601_v27 = vsel %vm8344_vm12, %v8089_v35, %v8473_v23 }
 0x6e1   : > { %v8476_v31 = vmul.f32 %v17015_v19, %v8104_v21  ;;  %13928 = vmatprep.mubr.f32.mxu1 %v8601_v27  ;;  %vm8347_vm13 = vcmp.ge.f32.partialorder %v8104_v21, 0.0 }
 0x6e2   : > { %v8475_v5 = vmul.f32 %v17015_v19, %v8099_v57  ;;  %v13712_v30 = vpop.f32.mrb[164].mxu0  ;;  %13929 = vmatmul.mubr.f32.gmra.mrb[32].mxu1 %v8602_v58  ;;  %vm8346_vm14 = vcmp.ge.f32.partialorder %v8099_v57, 0.0 }
 0x6e3   : > { %v8114_v17 = vadd.f32 %v17207_v47, %v13712_v30  ;;  %v8108_v59 = vpop.f32.mrb[165].mxu0  ;;  %v8604_v40 = vsel %vm8347_vm13, %v8104_v21, %v8476_v31 }
 0x6e4   : > { %v8109_v20 = vadd.f32 %v17207_v47, %v8108_v59  ;;  %v8603_v36 = vsel %vm8346_vm14, %v8099_v57, %v8475_v5 }
 0x6e5   : > { %v8478_v3 = vmul.f32 %v17015_v19, %v8114_v17  ;;  %13931 = vmatprep.mubr.f32.mxu1 %v8603_v36  ;;  %vm8349_vm15 = vcmp.ge.f32.partialorder %v8114_v17, 0.0 }
 0x6e6   : > { %v8477_v2 = vmul.f32 %v17015_v19, %v8109_v20  ;;  %v13715_v55 = vpop.f32.mrb[166].mxu0  ;;  %13932 = vmatmul.mubr.f32.gmra.mrb[34].mxu1 %v8604_v40  ;;  %vm8348_vm0 = vcmp.ge.f32.partialorder %v8109_v20, 0.0 }
 0x6e7   : > { %v8124_v9 = vadd.f32 %v17207_v47, %v13715_v55  ;;  %v8118_v33 = vpop.f32.mrb[167].mxu0  ;;  %v8606_v16 = vsel %vm8349_vm15, %v8114_v17, %v8478_v3 }
 0x6e8   : > { %v8119_v48 = vadd.f32 %v17207_v47, %v8118_v33  ;;  %v8605_v22 = vsel %vm8348_vm0, %v8109_v20, %v8477_v2 }
 0x6e9   : > { %v8480_v28 = vmul.f32 %v17015_v19, %v8124_v9  ;;  %13934 = vmatprep.mubr.f32.mxu1 %v8605_v22  ;;  %vm8351_vm2 = vcmp.ge.f32.partialorder %v8124_v9, 0.0 }
 0x6ea   : > { %v8479_v32 = vmul.f32 %v17015_v19, %v8119_v48  ;;  %v13718_v14 = vpop.f32.mrb[168].mxu0  ;;  %13935 = vmatmul.mubr.f32.gmra.mrb[36].mxu1 %v8606_v16  ;;  %vm8350_vm3 = vcmp.ge.f32.partialorder %v8119_v48, 0.0 }
 0x6eb   : > { %v8134_v4 = vadd.f32 %v17207_v47, %v13718_v14  ;;  %v8128_v61 = vpop.f32.mrb[169].mxu0  ;;  %v8608_v63 = vsel %vm8351_vm2, %v8124_v9, %v8480_v28 }
 0x6ec   : > { %v8129_v12 = vadd.f32 %v17207_v47, %v8128_v61  ;;  %v8607_v51 = vsel %vm8350_vm3, %v8119_v48, %v8479_v32 }
 0x6ed   : > { %v8482_v60 = vmul.f32 %v17015_v19, %v8134_v4  ;;  %13937 = vmatprep.mubr.f32.mxu1 %v8607_v51  ;;  %vm8353_vm4 = vcmp.ge.f32.partialorder %v8134_v4, 0.0 }
 0x6ee   : > { %v8481_v45 = vmul.f32 %v17015_v19, %v8129_v12  ;;  %v13721_v43 = vpop.f32.mrb[170].mxu0  ;;  %13938 = vmatmul.mubr.f32.gmra.mrb[38].mxu1 %v8608_v63  ;;  %vm8352_vm5 = vcmp.ge.f32.partialorder %v8129_v12, 0.0 }
 0x6ef   : > { %v8144_v37 = vadd.f32 %v17207_v47, %v13721_v43  ;;  %v8138_v44 = vpop.f32.mrb[171].mxu0  ;;  %v8610_v39 = vsel %vm8353_vm4, %v8134_v4, %v8482_v60 }
 0x6f0   : > { %v8139_v13 = vadd.f32 %v17207_v47, %v8138_v44  ;;  %v8609_v49 = vsel %vm8352_vm5, %v8129_v12, %v8481_v45 }
 0x6f1   : > { %v8484_v8 = vmul.f32 %v17015_v19, %v8144_v37  ;;  %13940 = vmatprep.mubr.f32.mxu1 %v8609_v49  ;;  %vm8355_vm6 = vcmp.ge.f32.partialorder %v8144_v37, 0.0 }
 0x6f2   : > { %v8483_v46 = vmul.f32 %v17015_v19, %v8139_v13  ;;  %v13724_v42 = vpop.f32.mrb[172].mxu0  ;;  %13941 = vmatmul.mubr.f32.gmra.mrb[40].mxu1 %v8610_v39  ;;  %vm8354_vm7 = vcmp.ge.f32.partialorder %v8139_v13, 0.0 }
 0x6f3   : > { %v8154_v54 = vadd.f32 %v17207_v47, %v13724_v42  ;;  %v8148_v25 = vpop.f32.mrb[173].mxu0  ;;  %v8612_v15 = vsel %vm8355_vm6, %v8144_v37, %v8484_v8 }
 0x6f4   : > { %v8149_v1 = vadd.f32 %v17207_v47, %v8148_v25  ;;  %v8611_v34 = vsel %vm8354_vm7, %v8139_v13, %v8483_v46 }
 0x6f5   : > { %vm8357_vm8 = vcmp.ge.f32.partialorder %v8154_v54, 0.0  ;;  %v8486_v18 = vmul.f32 %v17015_v19, %v8154_v54  ;;  %v13786_v50 = vpop.f32.mrb[192].mxu1  ;;  %13943 = vmatprep.mubr.f32.mxu1 %v8611_v34 }
 0x6f6   : > { %v8485_v11 = vmul.f32 %v17015_v19, %v8149_v1  ;;  %v8730_v53 = vadd.f32 %v13786_v50, %v17301_v7  ;;  %v13727_v24 = vpop.f32.mrb[174].mxu0  ;;  %v8724_v26 = vpop.f32.mrb[193].mxu1  ;;  %13944 = vmatmul.mubr.f32.gmra.mrb[42].mxu1 %v8612_v15  ;;  %vm8356_vm9 = vcmp.ge.f32.partialorder %v8149_v1, 0.0 }
 0x6f7   : > { %v8614_v6 = vsel %vm8357_vm8, %v8154_v54, %v8486_v18  ;;  %v8164_v0 = vadd.f32 %v17207_v47, %v13727_v24  ;;  %v8725_v41 = vadd.f32 %v17301_v7, %v8724_v26  ;;  %v8158_v35 = vpop.f32.mrb[175].mxu0 }
 0x6f8   : > { %vm9365_vm10 = vcmp.ge.f32.partialorder %v8730_v53, 0.0  ;;  %v9494_v29 = vmul.f32 %v17305_v52, %v8730_v53  ;;  %v8159_v62 = vadd.f32 %v17207_v47, %v8158_v35  ;;  %v8613_v10 = vsel %vm8356_vm9, %v8149_v1, %v8485_v11 }
 0x6f9   : > { %vm8359_vm11 = vcmp.ge.f32.partialorder %v8164_v0, 0.0  ;;  %v8488_v23 = vmul.f32 %v17015_v19, %v8164_v0  ;;  %v9493_v56 = vmul.f32 %v17305_v52, %v8725_v41  ;;  %v13789_v21 = vpop.f32.mrb[194].mxu1  ;;  %13946 = vmatprep.mubr.f32.mxu1 %v8613_v10  ;;  %vm9364_vm12 = vcmp.ge.f32.partialorder %v8725_v41, 0.0 }
 0x6fa   : > { %v9622_v38 = vsel %vm9365_vm10, %v8730_v53, %v9494_v29  ;;  %v8487_v57 = vmul.f32 %v17015_v19, %v8159_v62  ;;  %v8740_v27 = vadd.f32 %v13789_v21, %v17301_v7  ;;  %v13730_v58 = vpop.f32.mrb[176].mxu0  ;;  %v8734_v31 = vpop.f32.mrb[195].mxu1  ;;  %13947 = vmatmul.mubr.f32.gmra.mrb[44].mxu1 %v8614_v6  ;;  %vm8358_vm13 = vcmp.ge.f32.partialorder %v8159_v62, 0.0 }
 0x6fb   : > { %v8616_v5 = vsel %vm8359_vm11, %v8164_v0, %v8488_v23  ;;  %v8174_v30 = vadd.f32 %v17207_v47, %v13730_v58  ;;  %v8735_v17 = vadd.f32 %v17301_v7, %v8734_v31  ;;  %v8168_v59 = vpop.f32.mrb[177].mxu0  ;;  %v9621_v20 = vsel %vm9364_vm12, %v8725_v41, %v9493_v56 }
 0x6fc   : > { %vm9367_vm14 = vcmp.ge.f32.partialorder %v8740_v27, 0.0  ;;  %v9496_v36 = vmul.f32 %v17305_v52, %v8740_v27  ;;  %v8169_v40 = vadd.f32 %v17207_v47, %v8168_v59  ;;  %14008 = vmatprep.mubr.f32.mxu0 %v9621_v20  ;;  %v8615_v3 = vsel %vm8358_vm13, %v8159_v62, %v8487_v57 }
 0x6fd   : > { %vm8361_vm15 = vcmp.ge.f32.partialorder %v8174_v30, 0.0  ;;  %v8490_v2 = vmul.f32 %v17015_v19, %v8174_v30  ;;  %v9495_v55 = vmul.f32 %v17305_v52, %v8735_v17  ;;  %v13792_v9 = vpop.f32.mrb[196].mxu1  ;;  %13949 = vmatprep.mubr.f32.mxu1 %v8615_v3  ;;  %14009 = vmatmul.mubr.f32.vlgmr.msra.gmra.mrb[192].mxu0 %v9622_v38  ;;  %vm9366_vm0 = vcmp.ge.f32.partialorder %v8735_v17, 0.0 }
 0x6fe   : > { %v9624_v33 = vsel %vm9367_vm14, %v8740_v27, %v9496_v36  ;;  %v8489_v48 = vmul.f32 %v17015_v19, %v8169_v40  ;;  %v8750_v22 = vadd.f32 %v13792_v9, %v17301_v7  ;;  %v13733_v16 = vpop.f32.mrb[178].mxu0  ;;  %v8744_v28 = vpop.f32.mrb[197].mxu1  ;;  %13950 = vmatmul.mubr.f32.gmra.mrb[46].mxu1 %v8616_v5  ;;  %vm8360_vm2 = vcmp.ge.f32.partialorder %v8169_v40, 0.0 }
 0x6ff   : > { %v8618_v32 = vsel %vm8361_vm15, %v8174_v30, %v8490_v2  ;;  %v8184_v14 = vadd.f32 %v17207_v47, %v13733_v16  ;;  %v8745_v4 = vadd.f32 %v17301_v7, %v8744_v28  ;;  %v8178_v61 = vpop.f32.mrb[179].mxu0  ;;  %v9623_v12 = vsel %vm9366_vm0, %v8735_v17, %v9495_v55 }
 0x700   : > { %vm9369_vm3 = vcmp.ge.f32.partialorder %v8750_v22, 0.0  ;;  %v9498_v51 = vmul.f32 %v17305_v52, %v8750_v22  ;;  %v8179_v63 = vadd.f32 %v17207_v47, %v8178_v61  ;;  %14011 = vmatprep.mubr.f32.mxu0 %v9623_v12  ;;  %v8617_v60 = vsel %vm8360_vm2, %v8169_v40, %v8489_v48 }
 0x701   : > { %vm8363_vm4 = vcmp.ge.f32.partialorder %v8184_v14, 0.0  ;;  %v8492_v45 = vmul.f32 %v17015_v19, %v8184_v14  ;;  %v9497_v43 = vmul.f32 %v17305_v52, %v8745_v4  ;;  %v13795_v37 = vpop.f32.mrb[198].mxu1  ;;  %13952 = vmatprep.mubr.f32.mxu1 %v8617_v60  ;;  %14012 = vmatmul.mubr.f32.gmra.mrb[194].mxu0 %v9624_v33  ;;  %vm9368_vm5 = vcmp.ge.f32.partialorder %v8745_v4, 0.0 }
 0x702   : > { %v9626_v44 = vsel %vm9369_vm3, %v8750_v22, %v9498_v51  ;;  %v8491_v13 = vmul.f32 %v17015_v19, %v8179_v63  ;;  %v8760_v49 = vadd.f32 %v13795_v37, %v17301_v7  ;;  %v13736_v39 = vpop.f32.mrb[180].mxu0  ;;  %v8754_v8 = vpop.f32.mrb[199].mxu1  ;;  %13953 = vmatmul.mubr.f32.gmra.mrb[48].mxu1 %v8618_v32  ;;  %vm8362_vm6 = vcmp.ge.f32.partialorder %v8179_v63, 0.0 }
 0x703   : > { %v8620_v46 = vsel %vm8363_vm4, %v8184_v14, %v8492_v45  ;;  %v8194_v42 = vadd.f32 %v17207_v47, %v13736_v39  ;;  %v8755_v54 = vadd.f32 %v17301_v7, %v8754_v8  ;;  %v8188_v25 = vpop.f32.mrb[181].mxu0  ;;  %v9625_v1 = vsel %vm9368_vm5, %v8745_v4, %v9497_v43 }
 0x704   : > { %vm9371_vm7 = vcmp.ge.f32.partialorder %v8760_v49, 0.0  ;;  %v9500_v34 = vmul.f32 %v17305_v52, %v8760_v49  ;;  %v8189_v15 = vadd.f32 %v17207_v47, %v8188_v25  ;;  %14014 = vmatprep.mubr.f32.mxu0 %v9625_v1  ;;  %v8619_v18 = vsel %vm8362_vm6, %v8179_v63, %v8491_v13 }
 0x705   : > { %vm8365_vm8 = vcmp.ge.f32.partialorder %v8194_v42, 0.0  ;;  %v8494_v50 = vmul.f32 %v17015_v19, %v8194_v42  ;;  %v9499_v11 = vmul.f32 %v17305_v52, %v8755_v54  ;;  %v13798_v53 = vpop.f32.mrb[200].mxu1  ;;  %13955 = vmatprep.mubr.f32.mxu1 %v8619_v18  ;;  %14015 = vmatmul.mubr.f32.gmra.mrb[196].mxu0 %v9626_v44  ;;  %vm9370_vm9 = vcmp.ge.f32.partialorder %v8755_v54, 0.0 }
 0x706   : > { %v9628_v24 = vsel %vm9371_vm7, %v8760_v49, %v9500_v34  ;;  %v8493_v26 = vmul.f32 %v17015_v19, %v8189_v15  ;;  %v8770_v6 = vadd.f32 %v13798_v53, %v17301_v7  ;;  %v13739_v0 = vpop.f32.mrb[182].mxu0  ;;  %v8764_v41 = vpop.f32.mrb[201].mxu1  ;;  %13956 = vmatmul.mubr.f32.gmra.mrb[50].mxu1 %v8620_v46  ;;  %vm8364_vm10 = vcmp.ge.f32.partialorder %v8189_v15, 0.0 }
 0x707   : > { %v8622_v35 = vsel %vm8365_vm8, %v8194_v42, %v8494_v50  ;;  %v8204_v29 = vadd.f32 %v17207_v47, %v13739_v0  ;;  %v8765_v62 = vadd.f32 %v17301_v7, %v8764_v41  ;;  %v8198_v10 = vpop.f32.mrb[183].mxu0  ;;  %v9627_v23 = vsel %vm9370_vm9, %v8755_v54, %v9499_v11 }
 0x708   : > { %vm9373_vm11 = vcmp.ge.f32.partialorder %v8770_v6, 0.0  ;;  %v9502_v56 = vmul.f32 %v17305_v52, %v8770_v6  ;;  %v8199_v21 = vadd.f32 %v17207_v47, %v8198_v10  ;;  %14017 = vmatprep.mubr.f32.mxu0 %v9627_v23  ;;  %v8621_v38 = vsel %vm8364_vm10, %v8189_v15, %v8493_v26 }
 0x709   : > { %vm8367_vm12 = vcmp.ge.f32.partialorder %v8204_v29, 0.0  ;;  %v8496_v57 = vmul.f32 %v17015_v19, %v8204_v29  ;;  %v9501_v27 = vmul.f32 %v17305_v52, %v8765_v62  ;;  %v13801_v58 = vpop.f32.mrb[202].mxu1  ;;  %13958 = vmatprep.mubr.f32.mxu1 %v8621_v38  ;;  %14018 = vmatmul.mubr.f32.gmra.mrb[198].mxu0 %v9628_v24  ;;  %vm9372_vm13 = vcmp.ge.f32.partialorder %v8765_v62, 0.0 }
 0x70a   : > { %v9630_v31 = vsel %vm9373_vm11, %v8770_v6, %v9502_v56  ;;  %v8495_v5 = vmul.f32 %v17015_v19, %v8199_v21  ;;  %v8780_v30 = vadd.f32 %v13801_v58, %v17301_v7  ;;  %v13742_v17 = vpop.f32.mrb[184].mxu0  ;;  %v8774_v59 = vpop.f32.mrb[203].mxu1  ;;  %13959 = vmatmul.mubr.f32.gmra.mrb[52].mxu1 %v8622_v35  ;;  %vm8366_vm14 = vcmp.ge.f32.partialorder %v8199_v21, 0.0 }
 0x70b   : > { %v8624_v20 = vsel %vm8367_vm12, %v8204_v29, %v8496_v57  ;;  %v8214_v36 = vadd.f32 %v17207_v47, %v13742_v17  ;;  %v8775_v40 = vadd.f32 %v17301_v7, %v8774_v59  ;;  %v8208_v3 = vpop.f32.mrb[185].mxu0  ;;  %v9629_v2 = vsel %vm9372_vm13, %v8765_v62, %v9501_v27 }
 0x70c   : > { %vm9375_vm15 = vcmp.ge.f32.partialorder %v8780_v30, 0.0  ;;  %v9504_v55 = vmul.f32 %v17305_v52, %v8780_v30  ;;  %v8209_v9 = vadd.f32 %v17207_v47, %v8208_v3  ;;  %14020 = vmatprep.mubr.f32.mxu0 %v9629_v2  ;;  %v8623_v33 = vsel %vm8366_vm14, %v8199_v21, %v8495_v5 }
 0x70d   : > { %vm8369_vm0 = vcmp.ge.f32.partialorder %v8214_v36, 0.0  ;;  %v8498_v48 = vmul.f32 %v17015_v19, %v8214_v36  ;;  %v9503_v22 = vmul.f32 %v17305_v52, %v8775_v40  ;;  %v13804_v16 = vpop.f32.mrb[204].mxu1  ;;  %13961 = vmatprep.mubr.f32.mxu1 %v8623_v33  ;;  %14021 = vmatmul.mubr.f32.gmra.mrb[200].mxu0 %v9630_v31  ;;  %vm9374_vm2 = vcmp.ge.f32.partialorder %v8775_v40, 0.0 }
 0x70e   : > { %v9632_v28 = vsel %vm9375_vm15, %v8780_v30, %v9504_v55  ;;  %v8497_v32 = vmul.f32 %v17015_v19, %v8209_v9  ;;  %v8790_v14 = vadd.f32 %v13804_v16, %v17301_v7  ;;  %v13745_v4 = vpop.f32.mrb[186].mxu0  ;;  %v8784_v61 = vpop.f32.mrb[205].mxu1  ;;  %13962 = vmatmul.mubr.f32.gmra.mrb[54].mxu1 %v8624_v20  ;;  %vm8368_vm3 = vcmp.ge.f32.partialorder %v8209_v9, 0.0 }
 0x70f   : > { %v8626_v12 = vsel %vm8369_vm0, %v8214_v36, %v8498_v48  ;;  %v8224_v51 = vadd.f32 %v17207_v47, %v13745_v4  ;;  %v8785_v63 = vadd.f32 %v17301_v7, %v8784_v61  ;;  %v8218_v60 = vpop.f32.mrb[187].mxu0  ;;  %v9631_v45 = vsel %vm9374_vm2, %v8775_v40, %v9503_v22 }
 0x710   : > { %vm9377_vm4 = vcmp.ge.f32.partialorder %v8790_v14, 0.0  ;;  %v9506_v43 = vmul.f32 %v17305_v52, %v8790_v14  ;;  %v8219_v37 = vadd.f32 %v17207_v47, %v8218_v60  ;;  %14023 = vmatprep.mubr.f32.mxu0 %v9631_v45  ;;  %v8625_v44 = vsel %vm8368_vm3, %v8209_v9, %v8497_v32 }
 0x711   : > { %vm8371_vm5 = vcmp.ge.f32.partialorder %v8224_v51, 0.0  ;;  %v8500_v13 = vmul.f32 %v17015_v19, %v8224_v51  ;;  %v9505_v49 = vmul.f32 %v17305_v52, %v8785_v63  ;;  %v13807_v39 = vpop.f32.mrb[206].mxu1  ;;  %13964 = vmatprep.mubr.f32.mxu1 %v8625_v44  ;;  %14024 = vmatmul.mubr.f32.gmra.mrb[202].mxu0 %v9632_v28  ;;  %vm9376_vm6 = vcmp.ge.f32.partialorder %v8785_v63, 0.0 }
 0x712   : > { %v9634_v8 = vsel %vm9377_vm4, %v8790_v14, %v9506_v43  ;;  %v8499_v46 = vmul.f32 %v17015_v19, %v8219_v37  ;;  %v8800_v42 = vadd.f32 %v13807_v39, %v17301_v7  ;;  %v13748_v54 = vpop.f32.mrb[188].mxu0  ;;  %v8794_v25 = vpop.f32.mrb[207].mxu1  ;;  %13965 = vmatmul.mubr.f32.gmra.mrb[56].mxu1 %v8626_v12  ;;  %vm8370_vm7 = vcmp.ge.f32.partialorder %v8219_v37, 0.0 }
 0x713   : > { %v8628_v1 = vsel %vm8371_vm5, %v8224_v51, %v8500_v13  ;;  %v8234_v34 = vadd.f32 %v17207_v47, %v13748_v54  ;;  %v8795_v15 = vadd.f32 %v17301_v7, %v8794_v25  ;;  %v8228_v18 = vpop.f32.mrb[189].mxu0  ;;  %v9633_v50 = vsel %vm9376_vm6, %v8785_v63, %v9505_v49 }
 0x714   : > { %vm9379_vm8 = vcmp.ge.f32.partialorder %v8800_v42, 0.0  ;;  %v9508_v11 = vmul.f32 %v17305_v52, %v8800_v42  ;;  %v8229_v53 = vadd.f32 %v17207_v47, %v8228_v18  ;;  %14026 = vmatprep.mubr.f32.mxu0 %v9633_v50  ;;  %v8627_v24 = vsel %vm8370_vm7, %v8219_v37, %v8499_v46 }
 0x715   : > { %vm8373_vm9 = vcmp.ge.f32.partialorder %v8234_v34, 0.0  ;;  %v8502_v26 = vmul.f32 %v17015_v19, %v8234_v34  ;;  %v9507_v6 = vmul.f32 %v17305_v52, %v8795_v15  ;;  %v13810_v0 = vpop.f32.mrb[208].mxu1  ;;  %13967 = vmatprep.mubr.f32.mxu1 %v8627_v24  ;;  %14027 = vmatmul.mubr.f32.gmra.mrb[204].mxu0 %v9634_v8  ;;  %vm9378_vm10 = vcmp.ge.f32.partialorder %v8795_v15, 0.0 }
 0x716   : > { %v8501_v41 = vmul.f32 %v17015_v19, %v8229_v53  ;;  %v8810_v35 = vadd.f32 %v13810_v0, %v17301_v7  ;;  %v13751_v29 = vpop.f32.mrb[190].mxu0  ;;  %v8804_v62 = vpop.f32.mrb[209].mxu1  ;;  %13968 = vmatmul.mubr.f32.gmra.mrb[58].mxu1 %v8628_v1  ;;  %vm8372_vm11 = vcmp.ge.f32.partialorder %v8229_v53, 0.0  ;;  %v9636_v10 = vsel %vm9379_vm8, %v8800_v42, %v9508_v11 }
 0x717   : > { %v8244_v23 = vadd.f32 %v17207_v47, %v13751_v29  ;;  %v8805_v56 = vadd.f32 %v17301_v7, %v8804_v62  ;;  %v8238_v21 = vpop.f32.mrb[191].mxu0  ;;  %v9635_v38 = vsel %vm9378_vm10, %v8795_v15, %v9507_v6  ;;  %v8630_v57 = vsel %vm8373_vm9, %v8234_v34, %v8502_v26 }
 0x718   : > { %v9510_v27 = vmul.f32 %v17305_v52, %v8810_v35  ;;  %v8239_v58 = vadd.f32 %v17207_v47, %v8238_v21  ;;  %14029 = vmatprep.mubr.f32.mxu0 %v9635_v38  ;;  %v8629_v31 = vsel %vm8372_vm11, %v8229_v53, %v8501_v41  ;;  %vm9381_vm12 = vcmp.ge.f32.partialorder %v8810_v35, 0.0 }
 0x719   : > { %v8504_v5 = vmul.f32 %v17015_v19, %v8244_v23  ;;  %v9509_v30 = vmul.f32 %v17305_v52, %v8805_v56  ;;  %v13813_v17 = vpop.f32.mrb[210].mxu1  ;;  %13970 = vmatprep.mubr.f32.mxu1 %v8629_v31  ;;  %14030 = vmatmul.mubr.f32.gmra.mrb[206].mxu0 %v9636_v10  ;;  %vm9380_vm13 = vcmp.ge.f32.partialorder %v8805_v56, 0.0  ;;  %vm8375_vm14 = vcmp.ge.f32.partialorder %v8244_v23, 0.0 }
 0x71a   : > { %v8503_v59 = vmul.f32 %v17015_v19, %v8239_v58  ;;  %v8820_v20 = vadd.f32 %v13813_v17, %v17301_v7  ;;  %v8814_v36 = vpop.f32.mrb[211].mxu1  ;;  %13971 = vmatmul.mubr.f32.gmra.mrb[60].mxu1 %v8630_v57  ;;  %vm8374_vm15 = vcmp.ge.f32.partialorder %v8239_v58, 0.0  ;;  %v9638_v3 = vsel %vm9381_vm12, %v8810_v35, %v9510_v27 }
 0x71b   : > { %v8815_v47 = vadd.f32 %v17301_v7, %v8814_v36  ;;  %v9637_v40 = vsel %vm9380_vm13, %v8805_v56, %v9509_v30  ;;  %v8632_v9 = vsel %vm8375_vm14, %v8244_v23, %v8504_v5 }
 0x71c   : > { %v9512_v2 = vmul.f32 %v17305_v52, %v8820_v20  ;;  %14032 = vmatprep.mubr.f32.mxu0 %v9637_v40  ;;  %v8631_v55 = vsel %vm8374_vm15, %v8239_v58, %v8503_v59  ;;  %vm9383_vm0 = vcmp.ge.f32.partialorder %v8820_v20, 0.0 }
 0x71d   : > { %v9511_v33 = vmul.f32 %v17305_v52, %v8815_v47  ;;  %v13816_v48 = vpop.f32.mrb[212].mxu1  ;;  %13973 = vmatprep.mubr.f32.mxu1 %v8631_v55  ;;  %14033 = vmatmul.mubr.f32.gmra.mrb[208].mxu0 %v9638_v3  ;;  %vm9382_vm2 = vcmp.ge.f32.partialorder %v8815_v47, 0.0 }
 0x71e   : > { %v8830_v19 = vadd.f32 %v13816_v48, %v17301_v7  ;;  %v8824_v22 = vpop.f32.mrb[213].mxu1  ;;  %13974 = vmatmul.mubr.f32.gmra.mrb[62].mxu1 %v8632_v9  ;;  %v9640_v32 = vsel %vm9383_vm0, %v8820_v20, %v9512_v2 }
 0x71f   : > { %v8825_v16 = vadd.f32 %v17301_v7, %v8824_v22  ;;  %v9639_v28 = vsel %vm9382_vm2, %v8815_v47, %v9511_v33 }
 0x720   : > { %v9514_v14 = vmul.f32 %v17305_v52, %v8830_v19  ;;  %14035 = vmatprep.mubr.f32.mxu0 %v9639_v28  ;;  %vm9385_vm3 = vcmp.ge.f32.partialorder %v8830_v19, 0.0 }
 0x721   : > { %v9513_v4 = vmul.f32 %v17305_v52, %v8825_v16  ;;  %v13819_v61 = vpop.f32.mrb[214].mxu1  ;;  %14036 = vmatmul.mubr.f32.gmra.mrb[210].mxu0 %v9640_v32  ;;  %vm9384_vm4 = vcmp.ge.f32.partialorder %v8825_v16, 0.0 }
 0x722   : > { %v8840_v12 = vadd.f32 %v13819_v61, %v17301_v7  ;;  %v8834_v51 = vpop.f32.mrb[215].mxu1  ;;  %v9642_v45 = vsel %vm9385_vm3, %v8830_v19, %v9514_v14 }
 0x723   : > { %v8835_v63 = vadd.f32 %v17301_v7, %v8834_v51  ;;  %v9641_v60 = vsel %vm9384_vm4, %v8825_v16, %v9513_v4 }
 0x724   : > { %v9516_v43 = vmul.f32 %v17305_v52, %v8840_v12  ;;  %14038 = vmatprep.mubr.f32.mxu0 %v9641_v60  ;;  %vm9387_vm5 = vcmp.ge.f32.partialorder %v8840_v12, 0.0 }
 0x725   : > { %v9515_v37 = vmul.f32 %v17305_v52, %v8835_v63  ;;  %v13822_v44 = vpop.f32.mrb[216].mxu1  ;;  %14039 = vmatmul.mubr.f32.gmra.mrb[212].mxu0 %v9642_v45  ;;  %vm9386_vm6 = vcmp.ge.f32.partialorder %v8835_v63, 0.0 }
 0x726   : > { %v8850_v13 = vadd.f32 %v13822_v44, %v17301_v7  ;;  %v8844_v49 = vpop.f32.mrb[217].mxu1  ;;  %v9644_v46 = vsel %vm9387_vm5, %v8840_v12, %v9516_v43 }
 0x727   : > { %v8845_v39 = vadd.f32 %v17301_v7, %v8844_v49  ;;  %v9643_v8 = vsel %vm9386_vm6, %v8835_v63, %v9515_v37 }
 0x728   : > { %v9518_v42 = vmul.f32 %v17305_v52, %v8850_v13  ;;  %14041 = vmatprep.mubr.f32.mxu0 %v9643_v8  ;;  %vm9389_vm7 = vcmp.ge.f32.partialorder %v8850_v13, 0.0 }
 0x729   : > { %v9517_v54 = vmul.f32 %v17305_v52, %v8845_v39  ;;  %v13825_v25 = vpop.f32.mrb[218].mxu1  ;;  %14042 = vmatmul.mubr.f32.gmra.mrb[214].mxu0 %v9644_v46  ;;  %vm9388_vm8 = vcmp.ge.f32.partialorder %v8845_v39, 0.0 }
 0x72a   : > { %v8860_v1 = vadd.f32 %v13825_v25, %v17301_v7  ;;  %v8854_v34 = vpop.f32.mrb[219].mxu1  ;;  %v9646_v50 = vsel %vm9389_vm7, %v8850_v13, %v9518_v42 }
 0x72b   : > { %v8855_v15 = vadd.f32 %v17301_v7, %v8854_v34  ;;  %v9645_v18 = vsel %vm9388_vm8, %v8845_v39, %v9517_v54 }
 0x72c   : > { %v9520_v11 = vmul.f32 %v17305_v52, %v8860_v1  ;;  %14044 = vmatprep.mubr.f32.mxu0 %v9645_v18  ;;  %vm9391_vm9 = vcmp.ge.f32.partialorder %v8860_v1, 0.0 }
 0x72d   : > { %v9519_v53 = vmul.f32 %v17305_v52, %v8855_v15  ;;  %v13828_v24 = vpop.f32.mrb[220].mxu1  ;;  %14045 = vmatmul.mubr.f32.gmra.mrb[216].mxu0 %v9646_v50  ;;  %vm9390_vm10 = vcmp.ge.f32.partialorder %v8855_v15, 0.0 }
 0x72e   : > { %v8870_v26 = vadd.f32 %v13828_v24, %v17301_v7  ;;  %v8864_v6 = vpop.f32.mrb[221].mxu1  ;;  %v9648_v35 = vsel %vm9391_vm9, %v8860_v1, %v9520_v11 }
 0x72f   : > { %v8865_v0 = vadd.f32 %v17301_v7, %v8864_v6  ;;  %v9647_v41 = vsel %vm9390_vm10, %v8855_v15, %v9519_v53 }
 0x730   : > { %v9522_v29 = vmul.f32 %v17305_v52, %v8870_v26  ;;  %14047 = vmatprep.mubr.f32.mxu0 %v9647_v41  ;;  %vm9393_vm11 = vcmp.ge.f32.partialorder %v8870_v26, 0.0 }
 0x731   : > { %v9521_v62 = vmul.f32 %v17305_v52, %v8865_v0  ;;  %v13831_v10 = vpop.f32.mrb[222].mxu1  ;;  %14048 = vmatmul.mubr.f32.gmra.mrb[218].mxu0 %v9648_v35  ;;  %vm9392_vm12 = vcmp.ge.f32.partialorder %v8865_v0, 0.0 }
 0x732   : > { %v8880_v23 = vadd.f32 %v13831_v10, %v17301_v7  ;;  %v8874_v56 = vpop.f32.mrb[223].mxu1  ;;  %v9650_v57 = vsel %vm9393_vm11, %v8870_v26, %v9522_v29 }
 0x733   : > { %v8875_v21 = vadd.f32 %v17301_v7, %v8874_v56  ;;  %v9649_v38 = vsel %vm9392_vm12, %v8865_v0, %v9521_v62 }
 0x734   : > { %v9524_v27 = vmul.f32 %v17305_v52, %v8880_v23  ;;  %14050 = vmatprep.mubr.f32.mxu0 %v9649_v38  ;;  %vm9395_vm13 = vcmp.ge.f32.partialorder %v8880_v23, 0.0 }
 0x735   : > { %v9523_v58 = vmul.f32 %v17305_v52, %v8875_v21  ;;  %v13834_v31 = vpop.f32.mrb[224].mxu1  ;;  %14051 = vmatmul.mubr.f32.gmra.mrb[220].mxu0 %v9650_v57  ;;  %vm9394_vm14 = vcmp.ge.f32.partialorder %v8875_v21, 0.0 }
 0x736   : > { %v8890_v5 = vadd.f32 %v13834_v31, %v17301_v7  ;;  %v8884_v30 = vpop.f32.mrb[225].mxu1  ;;  %v9652_v20 = vsel %vm9395_vm13, %v8880_v23, %v9524_v27 }
 0x737   : > { %v8885_v17 = vadd.f32 %v17301_v7, %v8884_v30  ;;  %v9651_v59 = vsel %vm9394_vm14, %v8875_v21, %v9523_v58 }
 0x738   : > { %v9526_v36 = vmul.f32 %v17305_v52, %v8890_v5  ;;  %14053 = vmatprep.mubr.f32.mxu0 %v9651_v59  ;;  %vm9397_vm15 = vcmp.ge.f32.partialorder %v8890_v5, 0.0 }
 0x739   : > { %v9525_v47 = vmul.f32 %v17305_v52, %v8885_v17  ;;  %v13837_v40 = vpop.f32.mrb[226].mxu1  ;;  %14054 = vmatmul.mubr.f32.gmra.mrb[222].mxu0 %v9652_v20  ;;  %vm9396_vm0 = vcmp.ge.f32.partialorder %v8885_v17, 0.0 }
 0x73a   : > { %v8900_v3 = vadd.f32 %v13837_v40, %v17301_v7  ;;  %v8894_v2 = vpop.f32.mrb[227].mxu1  ;;  %v9654_v33 = vsel %vm9397_vm15, %v8890_v5, %v9526_v36 }
 0x73b   : > { %v8895_v55 = vadd.f32 %v17301_v7, %v8894_v2  ;;  %v9653_v9 = vsel %vm9396_vm0, %v8885_v17, %v9525_v47 }
 0x73c   : > { %v9528_v48 = vmul.f32 %v17305_v52, %v8900_v3  ;;  %14056 = vmatprep.mubr.f32.mxu0 %v9653_v9  ;;  %vm9399_vm2 = vcmp.ge.f32.partialorder %v8900_v3, 0.0 }
 0x73d   : > { %v9527_v19 = vmul.f32 %v17305_v52, %v8895_v55  ;;  %v13840_v22 = vpop.f32.mrb[228].mxu1  ;;  %14057 = vmatmul.mubr.f32.gmra.mrb[224].mxu0 %v9654_v33  ;;  %vm9398_vm3 = vcmp.ge.f32.partialorder %v8895_v55, 0.0 }
 0x73e   : > { %v8910_v16 = vadd.f32 %v13840_v22, %v17301_v7  ;;  %v8904_v28 = vpop.f32.mrb[229].mxu1  ;;  %v9656_v4 = vsel %vm9399_vm2, %v8900_v3, %v9528_v48 }
 0x73f   : > { %v8905_v32 = vadd.f32 %v17301_v7, %v8904_v28  ;;  %v9655_v14 = vsel %vm9398_vm3, %v8895_v55, %v9527_v19 }
 0x740   : > { %v9530_v61 = vmul.f32 %v17305_v52, %v8910_v16  ;;  %14059 = vmatprep.mubr.f32.mxu0 %v9655_v14  ;;  %vm9401_vm4 = vcmp.ge.f32.partialorder %v8910_v16, 0.0 }
 0x741   : > { %v9529_v12 = vmul.f32 %v17305_v52, %v8905_v32  ;;  %v13843_v51 = vpop.f32.mrb[230].mxu1  ;;  %14060 = vmatmul.mubr.f32.gmra.mrb[226].mxu0 %v9656_v4  ;;  %vm9400_vm5 = vcmp.ge.f32.partialorder %v8905_v32, 0.0 }
 0x742   : > { %v8920_v63 = vadd.f32 %v13843_v51, %v17301_v7  ;;  %v8914_v60 = vpop.f32.mrb[231].mxu1  ;;  %v9658_v37 = vsel %vm9401_vm4, %v8910_v16, %v9530_v61 }
 0x743   : > { %v8915_v45 = vadd.f32 %v17301_v7, %v8914_v60  ;;  %v9657_v43 = vsel %vm9400_vm5, %v8905_v32, %v9529_v12 }
 0x744   : > { %v9532_v44 = vmul.f32 %v17305_v52, %v8920_v63  ;;  %14062 = vmatprep.mubr.f32.mxu0 %v9657_v43  ;;  %vm9403_vm6 = vcmp.ge.f32.partialorder %v8920_v63, 0.0 }
 0x745   : > { %v9531_v13 = vmul.f32 %v17305_v52, %v8915_v45  ;;  %v13846_v49 = vpop.f32.mrb[232].mxu1  ;;  %14063 = vmatmul.mubr.f32.gmra.mrb[228].mxu0 %v9658_v37  ;;  %vm9402_vm7 = vcmp.ge.f32.partialorder %v8915_v45, 0.0 }
 0x746   : > { %v8930_v39 = vadd.f32 %v13846_v49, %v17301_v7  ;;  %v8924_v8 = vpop.f32.mrb[233].mxu1  ;;  %v9660_v54 = vsel %vm9403_vm6, %v8920_v63, %v9532_v44 }
 0x747   : > { %v8925_v46 = vadd.f32 %v17301_v7, %v8924_v8  ;;  %v9659_v42 = vsel %vm9402_vm7, %v8915_v45, %v9531_v13 }
 0x748   : > { %v9534_v25 = vmul.f32 %v17305_v52, %v8930_v39  ;;  %14065 = vmatprep.mubr.f32.mxu0 %v9659_v42  ;;  %vm9405_vm8 = vcmp.ge.f32.partialorder %v8930_v39, 0.0 }
 0x749   : > { %v9533_v1 = vmul.f32 %v17305_v52, %v8925_v46  ;;  %v13849_v34 = vpop.f32.mrb[234].mxu1  ;;  %14066 = vmatmul.mubr.f32.gmra.mrb[230].mxu0 %v9660_v54  ;;  %vm9404_vm9 = vcmp.ge.f32.partialorder %v8925_v46, 0.0 }
 0x74a   : > { %v8940_v15 = vadd.f32 %v13849_v34, %v17301_v7  ;;  %v8934_v18 = vpop.f32.mrb[235].mxu1  ;;  %v9662_v53 = vsel %vm9405_vm8, %v8930_v39, %v9534_v25 }
 0x74b   : > { %v8935_v50 = vadd.f32 %v17301_v7, %v8934_v18  ;;  %v9661_v11 = vsel %vm9404_vm9, %v8925_v46, %v9533_v1 }
 0x74c   : > { %v9536_v24 = vmul.f32 %v17305_v52, %v8940_v15  ;;  %14068 = vmatprep.mubr.f32.mxu0 %v9661_v11  ;;  %vm9407_vm10 = vcmp.ge.f32.partialorder %v8940_v15, 0.0 }
 0x74d   : > { %v9535_v26 = vmul.f32 %v17305_v52, %v8935_v50  ;;  %v13852_v6 = vpop.f32.mrb[236].mxu1  ;;  %14069 = vmatmul.mubr.f32.gmra.mrb[232].mxu0 %v9662_v53  ;;  %vm9406_vm11 = vcmp.ge.f32.partialorder %v8935_v50, 0.0 }
 0x74e   : > { %v8950_v0 = vadd.f32 %v13852_v6, %v17301_v7  ;;  %v8944_v41 = vpop.f32.mrb[237].mxu1  ;;  %v9664_v62 = vsel %vm9407_vm10, %v8940_v15, %v9536_v24 }
 0x74f   : > { %v8945_v35 = vadd.f32 %v17301_v7, %v8944_v41  ;;  %v9663_v29 = vsel %vm9406_vm11, %v8935_v50, %v9535_v26 }
 0x750   : > { %v9538_v10 = vmul.f32 %v17305_v52, %v8950_v0  ;;  %14071 = vmatprep.mubr.f32.mxu0 %v9663_v29  ;;  %vm9409_vm12 = vcmp.ge.f32.partialorder %v8950_v0, 0.0 }
 0x751   : > { %v9537_v23 = vmul.f32 %v17305_v52, %v8945_v35  ;;  %v13855_v56 = vpop.f32.mrb[238].mxu1  ;;  %14072 = vmatmul.mubr.f32.gmra.mrb[234].mxu0 %v9664_v62  ;;  %vm9408_vm13 = vcmp.ge.f32.partialorder %v8945_v35, 0.0 }
 0x752   : > { %v8960_v21 = vadd.f32 %v13855_v56, %v17301_v7  ;;  %v8954_v38 = vpop.f32.mrb[239].mxu1  ;;  %v9666_v58 = vsel %vm9409_vm12, %v8950_v0, %v9538_v10 }
 0x753   : > { %v8955_v57 = vadd.f32 %v17301_v7, %v8954_v38  ;;  %v9665_v27 = vsel %vm9408_vm13, %v8945_v35, %v9537_v23 }
 0x754   : > { %v9540_v31 = vmul.f32 %v17305_v52, %v8960_v21  ;;  %14074 = vmatprep.mubr.f32.mxu0 %v9665_v27  ;;  %vm9411_vm14 = vcmp.ge.f32.partialorder %v8960_v21, 0.0 }
 0x755   : > { %v9539_v5 = vmul.f32 %v17305_v52, %v8955_v57  ;;  %v13858_v30 = vpop.f32.mrb[240].mxu1  ;;  %14075 = vmatmul.mubr.f32.gmra.mrb[236].mxu0 %v9666_v58  ;;  %vm9410_vm15 = vcmp.ge.f32.partialorder %v8955_v57, 0.0 }
 0x756   : > { %v8970_v17 = vadd.f32 %v13858_v30, %v17301_v7  ;;  %v8964_v59 = vpop.f32.mrb[241].mxu1  ;;  %v9668_v47 = vsel %vm9411_vm14, %v8960_v21, %v9540_v31 }
 0x757   : > { %v8965_v20 = vadd.f32 %v17301_v7, %v8964_v59  ;;  %v9667_v36 = vsel %vm9410_vm15, %v8955_v57, %v9539_v5 }
 0x758   : > { %v9542_v40 = vmul.f32 %v17305_v52, %v8970_v17  ;;  %14077 = vmatprep.mubr.f32.mxu0 %v9667_v36  ;;  %vm9413_vm0 = vcmp.ge.f32.partialorder %v8970_v17, 0.0 }
 0x759   : > { %v9541_v3 = vmul.f32 %v17305_v52, %v8965_v20  ;;  %v13861_v2 = vpop.f32.mrb[242].mxu1  ;;  %14078 = vmatmul.mubr.f32.gmra.mrb[238].mxu0 %v9668_v47  ;;  %vm9412_vm2 = vcmp.ge.f32.partialorder %v8965_v20, 0.0 }
 0x75a   : > { %v8980_v55 = vadd.f32 %v13861_v2, %v17301_v7  ;;  %v8974_v9 = vpop.f32.mrb[243].mxu1  ;;  %v9670_v19 = vsel %vm9413_vm0, %v8970_v17, %v9542_v40 }
 0x75b   : > { %v8975_v33 = vadd.f32 %v17301_v7, %v8974_v9  ;;  %v9669_v48 = vsel %vm9412_vm2, %v8965_v20, %v9541_v3 }
 0x75c   : > { %v9544_v22 = vmul.f32 %v17305_v52, %v8980_v55  ;;  %14080 = vmatprep.mubr.f32.mxu0 %v9669_v48  ;;  %vm9415_vm3 = vcmp.ge.f32.partialorder %v8980_v55, 0.0 }
 0x75d   : > { %v9543_v16 = vmul.f32 %v17305_v52, %v8975_v33  ;;  %v13864_v28 = vpop.f32.mrb[244].mxu1  ;;  %14081 = vmatmul.mubr.f32.gmra.mrb[240].mxu0 %v9670_v19  ;;  %vm9414_vm4 = vcmp.ge.f32.partialorder %v8975_v33, 0.0 }
 0x75e   : > { %v8990_v32 = vadd.f32 %v13864_v28, %v17301_v7  ;;  %v8984_v14 = vpop.f32.mrb[245].mxu1  ;;  %v9672_v12 = vsel %vm9415_vm3, %v8980_v55, %v9544_v22 }
 0x75f   : > { %v8985_v4 = vadd.f32 %v17301_v7, %v8984_v14  ;;  %v9671_v61 = vsel %vm9414_vm4, %v8975_v33, %v9543_v16  ;;  %v17481_v33 = vld [vmem:[%s18011_s5 + $0x6] ss:$0 sm:$0xff] }
 0x760   : > { %v9546_v51 = vmul.f32 %v17305_v52, %v8990_v32  ;;  %14083 = vmatprep.mubr.f32.mxu0 %v9671_v61  ;;  %vm9417_vm5 = vcmp.ge.f32.partialorder %v8990_v32, 0.0 }
 0x761   : > { %v9545_v63 = vmul.f32 %v17305_v52, %v8985_v4  ;;  %v13867_v60 = vpop.f32.mrb[246].mxu1  ;;  %14084 = vmatmul.mubr.f32.gmra.mrb[242].mxu0 %v9672_v12  ;;  %vm9416_vm6 = vcmp.ge.f32.partialorder %v8985_v4, 0.0 }
 0x762   : > { %v9000_v45 = vadd.f32 %v13867_v60, %v17301_v7  ;;  %v8994_v43 = vpop.f32.mrb[247].mxu1  ;;  %v9674_v13 = vsel %vm9417_vm5, %v8990_v32, %v9546_v51 }
 0x763   : > { %v8995_v37 = vadd.f32 %v17301_v7, %v8994_v43  ;;  %v9673_v44 = vsel %vm9416_vm6, %v8985_v4, %v9545_v63 }
 0x764   : > { %v9548_v49 = vmul.f32 %v17305_v52, %v9000_v45  ;;  %14086 = vmatprep.mubr.f32.mxu0 %v9673_v44  ;;  %vm9419_vm7 = vcmp.ge.f32.partialorder %v9000_v45, 0.0 }
 0x765   : > { %v9547_v39 = vmul.f32 %v17305_v52, %v8995_v37  ;;  %v13870_v8 = vpop.f32.mrb[248].mxu1  ;;  %14087 = vmatmul.mubr.f32.gmra.mrb[244].mxu0 %v9674_v13  ;;  %vm9418_vm8 = vcmp.ge.f32.partialorder %v8995_v37, 0.0 }
 0x766   : > { %v9010_v46 = vadd.f32 %v13870_v8, %v17301_v7  ;;  %v9004_v42 = vpop.f32.mrb[249].mxu1  ;;  %v9676_v1 = vsel %vm9419_vm7, %v9000_v45, %v9548_v49 }
 0x767   : > { %v9005_v54 = vadd.f32 %v17301_v7, %v9004_v42  ;;  %v9675_v25 = vsel %vm9418_vm8, %v8995_v37, %v9547_v39 }
 0x768   : > { %v9550_v34 = vmul.f32 %v17305_v52, %v9010_v46  ;;  %14089 = vmatprep.mubr.f32.mxu0 %v9675_v25  ;;  %vm9421_vm9 = vcmp.ge.f32.partialorder %v9010_v46, 0.0 }
 0x769   : > { %v9549_v15 = vmul.f32 %v17305_v52, %v9005_v54  ;;  %v13873_v18 = vpop.f32.mrb[250].mxu1  ;;  %14090 = vmatmul.mubr.f32.gmra.mrb[246].mxu0 %v9676_v1  ;;  %vm9420_vm10 = vcmp.ge.f32.partialorder %v9005_v54, 0.0 }
 0x76a   : > { %v9020_v50 = vadd.f32 %v13873_v18, %v17301_v7  ;;  %v9014_v11 = vpop.f32.mrb[251].mxu1  ;;  %v9678_v26 = vsel %vm9421_vm9, %v9010_v46, %v9550_v34 }
 0x76b   : > { %v9015_v53 = vadd.f32 %v17301_v7, %v9014_v11  ;;  %v9677_v24 = vsel %vm9420_vm10, %v9005_v54, %v9549_v15 }
 0x76c   : > { %v9552_v6 = vmul.f32 %v17305_v52, %v9020_v50  ;;  %14092 = vmatprep.mubr.f32.mxu0 %v9677_v24  ;;  %vm9423_vm11 = vcmp.ge.f32.partialorder %v9020_v50, 0.0 }
 0x76d   : > { %v9551_v0 = vmul.f32 %v17305_v52, %v9015_v53  ;;  %v13876_v41 = vpop.f32.mrb[252].mxu1  ;;  %14093 = vmatmul.mubr.f32.gmra.mrb[248].mxu0 %v9678_v26  ;;  %vm9422_vm12 = vcmp.ge.f32.partialorder %v9015_v53, 0.0 }
 0x76e   : > { %v9030_v35 = vadd.f32 %v13876_v41, %v17301_v7  ;;  %v9024_v29 = vpop.f32.mrb[253].mxu1  ;;  %v9680_v23 = vsel %vm9423_vm11, %v9020_v50, %v9552_v6 }
 0x76f   : > { %v9025_v62 = vadd.f32 %v17301_v7, %v9024_v29  ;;  %v9679_v10 = vsel %vm9422_vm12, %v9015_v53, %v9551_v0 }
 0x770   : > { %v9554_v56 = vmul.f32 %v17305_v52, %v9030_v35  ;;  %14095 = vmatprep.mubr.f32.mxu0 %v9679_v10  ;;  %vm9425_vm13 = vcmp.ge.f32.partialorder %v9030_v35, 0.0 }
 0x771   : > { %v9553_v21 = vmul.f32 %v17305_v52, %v9025_v62  ;;  %v13879_v38 = vpop.f32.mrb[254].mxu1  ;;  %14096 = vmatmul.mubr.f32.gmra.mrb[250].mxu0 %v9680_v23  ;;  %vm9424_vm14 = vcmp.ge.f32.partialorder %v9025_v62, 0.0 }
 0x772   : > { %v9040_v57 = vadd.f32 %v13879_v38, %v17301_v7  ;;  %v9034_v27 = vpop.f32.mrb[255].mxu1  ;;  %v9682_v5 = vsel %vm9425_vm13, %v9030_v35, %v9554_v56 }
 0x773   : > { %v9035_v58 = vadd.f32 %v17301_v7, %v9034_v27  ;;  %v9681_v31 = vsel %vm9424_vm14, %v9025_v62, %v9553_v21 }
 0x774   : > { %v9556_v30 = vmul.f32 %v17305_v52, %v9040_v57  ;;  %14098 = vmatprep.mubr.f32.mxu0 %v9681_v31  ;;  %vm9427_vm15 = vcmp.ge.f32.partialorder %v9040_v57, 0.0 }
 0x775   : > { %v9555_v17 = vmul.f32 %v17305_v52, %v9035_v58  ;;  %v13882_v59 = vpop.f32.mrb[0].mxu1  ;;  %14099 = vmatmul.mubr.f32.gmra.mrb[252].mxu0 %v9682_v5  ;;  %vm9426_vm0 = vcmp.ge.f32.partialorder %v9035_v58, 0.0 }
 0x776   : > { %v9050_v20 = vadd.f32 %v13882_v59, %v17301_v7  ;;  %v9044_v36 = vpop.f32.mrb[1].mxu1  ;;  %v9684_v3 = vsel %vm9427_vm15, %v9040_v57, %v9556_v30 }
 0x777   : > { %v9045_v47 = vadd.f32 %v17301_v7, %v9044_v36  ;;  %v9683_v40 = vsel %vm9426_vm0, %v9035_v58, %v9555_v17 }
 0x778   : > { %v9558_v2 = vmul.f32 %v17305_v52, %v9050_v20  ;;  %14101 = vmatprep.mubr.f32.mxu0 %v9683_v40  ;;  %vm9429_vm2 = vcmp.ge.f32.partialorder %v9050_v20, 0.0 }
 0x779   : > { %v9557_v55 = vmul.f32 %v17305_v52, %v9045_v47  ;;  %v13885_v9 = vpop.f32.mrb[2].mxu1  ;;  %14102 = vmatmul.mubr.f32.gmra.mrb[254].mxu0 %v9684_v3  ;;  %vm9428_vm3 = vcmp.ge.f32.partialorder %v9045_v47, 0.0 }
 0x77a   : > { %v9060_v48 = vadd.f32 %v17481_v33, %v13885_v9  ;;  %v9054_v19 = vpop.f32.mrb[3].mxu1  ;;  %v9686_v16 = vsel %vm9429_vm2, %v9050_v20, %v9558_v2 }
 0x77b   : > { %v9055_v7 = vadd.f32 %v17481_v33, %v9054_v19  ;;  %v9685_v22 = vsel %vm9428_vm3, %v9045_v47, %v9557_v55 }
 0x77c   : > { %v9560_v28 = vmul.f32 %v17305_v52, %v9060_v48  ;;  %14104 = vmatprep.mubr.f32.mxu0 %v9685_v22  ;;  %vm9431_vm4 = vcmp.ge.f32.partialorder %v9060_v48, 0.0 }
 0x77d   : > { %v9559_v32 = vmul.f32 %v17305_v52, %v9055_v7  ;;  %v13888_v14 = vpop.f32.mrb[4].mxu1  ;;  %14105 = vmatmul.mubr.f32.gmra.mrb[0].mxu0 %v9686_v16  ;;  %vm9430_vm5 = vcmp.ge.f32.partialorder %v9055_v7, 0.0 }
 0x77e   : > { %v9070_v4 = vadd.f32 %v17481_v33, %v13888_v14  ;;  %v9064_v61 = vpop.f32.mrb[5].mxu1  ;;  %v9688_v63 = vsel %vm9431_vm4, %v9060_v48, %v9560_v28 }
 0x77f   : > { %v9065_v12 = vadd.f32 %v17481_v33, %v9064_v61  ;;  %v9687_v51 = vsel %vm9430_vm5, %v9055_v7, %v9559_v32 }
 0x780   : > { %v9562_v60 = vmul.f32 %v17305_v52, %v9070_v4  ;;  %14107 = vmatprep.mubr.f32.mxu0 %v9687_v51  ;;  %vm9433_vm6 = vcmp.ge.f32.partialorder %v9070_v4, 0.0 }
 0x781   : > { %v9561_v45 = vmul.f32 %v17305_v52, %v9065_v12  ;;  %v13891_v43 = vpop.f32.mrb[6].mxu1  ;;  %14108 = vmatmul.mubr.f32.gmra.mrb[2].mxu0 %v9688_v63  ;;  %vm9432_vm7 = vcmp.ge.f32.partialorder %v9065_v12, 0.0 }
 0x782   : > { %v9080_v37 = vadd.f32 %v17481_v33, %v13891_v43  ;;  %v9074_v44 = vpop.f32.mrb[7].mxu1  ;;  %v9690_v39 = vsel %vm9433_vm6, %v9070_v4, %v9562_v60 }
 0x783   : > { %v9075_v13 = vadd.f32 %v17481_v33, %v9074_v44  ;;  %v9689_v49 = vsel %vm9432_vm7, %v9065_v12, %v9561_v45 }
 0x784   : > { %v9564_v8 = vmul.f32 %v17305_v52, %v9080_v37  ;;  %14110 = vmatprep.mubr.f32.mxu0 %v9689_v49  ;;  %vm9435_vm8 = vcmp.ge.f32.partialorder %v9080_v37, 0.0 }
 0x785   : > { %v9563_v46 = vmul.f32 %v17305_v52, %v9075_v13  ;;  %v13894_v42 = vpop.f32.mrb[8].mxu1  ;;  %14111 = vmatmul.mubr.f32.gmra.mrb[4].mxu0 %v9690_v39  ;;  %vm9434_vm9 = vcmp.ge.f32.partialorder %v9075_v13, 0.0 }
 0x786   : > { %v9090_v54 = vadd.f32 %v17481_v33, %v13894_v42  ;;  %v9084_v25 = vpop.f32.mrb[9].mxu1  ;;  %v9692_v15 = vsel %vm9435_vm8, %v9080_v37, %v9564_v8 }
 0x787   : > { %v9085_v1 = vadd.f32 %v17481_v33, %v9084_v25  ;;  %v9691_v34 = vsel %vm9434_vm9, %v9075_v13, %v9563_v46 }
 0x788   : > { %v9566_v18 = vmul.f32 %v17305_v52, %v9090_v54  ;;  %14113 = vmatprep.mubr.f32.mxu0 %v9691_v34  ;;  %vm9437_vm10 = vcmp.ge.f32.partialorder %v9090_v54, 0.0 }
 0x789   : > { %v9565_v50 = vmul.f32 %v17305_v52, %v9085_v1  ;;  %v13897_v11 = vpop.f32.mrb[10].mxu1  ;;  %14114 = vmatmul.mubr.f32.gmra.mrb[6].mxu0 %v9692_v15  ;;  %vm9436_vm11 = vcmp.ge.f32.partialorder %v9085_v1, 0.0 }
 0x78a   : > { %v9100_v53 = vadd.f32 %v17481_v33, %v13897_v11  ;;  %v9094_v24 = vpop.f32.mrb[11].mxu1  ;;  %v9694_v0 = vsel %vm9437_vm10, %v9090_v54, %v9566_v18 }
 0x78b   : > { %v9095_v26 = vadd.f32 %v17481_v33, %v9094_v24  ;;  %v9693_v6 = vsel %vm9436_vm11, %v9085_v1, %v9565_v50 }
 0x78c   : > { %v9568_v41 = vmul.f32 %v17305_v52, %v9100_v53  ;;  %14116 = vmatprep.mubr.f32.mxu0 %v9693_v6  ;;  %vm9439_vm12 = vcmp.ge.f32.partialorder %v9100_v53, 0.0 }
 0x78d   : > { %v9567_v35 = vmul.f32 %v17305_v52, %v9095_v26  ;;  %v13900_v29 = vpop.f32.mrb[12].mxu1  ;;  %14117 = vmatmul.mubr.f32.gmra.mrb[8].mxu0 %v9694_v0  ;;  %vm9438_vm13 = vcmp.ge.f32.partialorder %v9095_v26, 0.0 }
 0x78e   : > { %v9110_v62 = vadd.f32 %v17481_v33, %v13900_v29  ;;  %v9104_v10 = vpop.f32.mrb[13].mxu1  ;;  %v9696_v21 = vsel %vm9439_vm12, %v9100_v53, %v9568_v41 }
 0x78f   : > { %v9105_v23 = vadd.f32 %v17481_v33, %v9104_v10  ;;  %v9695_v56 = vsel %vm9438_vm13, %v9095_v26, %v9567_v35 }
 0x790   : > { %v9570_v38 = vmul.f32 %v17305_v52, %v9110_v62  ;;  %14119 = vmatprep.mubr.f32.mxu0 %v9695_v56  ;;  %vm9441_vm14 = vcmp.ge.f32.partialorder %v9110_v62, 0.0 }
 0x791   : > { %v9569_v57 = vmul.f32 %v17305_v52, %v9105_v23  ;;  %v13903_v27 = vpop.f32.mrb[14].mxu1  ;;  %14120 = vmatmul.mubr.f32.gmra.mrb[10].mxu0 %v9696_v21  ;;  %vm9440_vm15 = vcmp.ge.f32.partialorder %v9105_v23, 0.0 }
 0x792   : > { %v9120_v58 = vadd.f32 %v17481_v33, %v13903_v27  ;;  %v9114_v31 = vpop.f32.mrb[15].mxu1  ;;  %v9698_v17 = vsel %vm9441_vm14, %v9110_v62, %v9570_v38 }
 0x793   : > { %v9115_v5 = vadd.f32 %v17481_v33, %v9114_v31  ;;  %v9697_v30 = vsel %vm9440_vm15, %v9105_v23, %v9569_v57 }
 0x794   : > { %v9572_v59 = vmul.f32 %v17305_v52, %v9120_v58  ;;  %14122 = vmatprep.mubr.f32.mxu0 %v9697_v30  ;;  %vm9443_vm0 = vcmp.ge.f32.partialorder %v9120_v58, 0.0 }
 0x795   : > { %v9571_v20 = vmul.f32 %v17305_v52, %v9115_v5  ;;  %v13906_v36 = vpop.f32.mrb[16].mxu1  ;;  %14123 = vmatmul.mubr.f32.gmra.mrb[12].mxu0 %v9698_v17  ;;  %vm9442_vm2 = vcmp.ge.f32.partialorder %v9115_v5, 0.0 }
 0x796   : > { %v9130_v47 = vadd.f32 %v17481_v33, %v13906_v36  ;;  %v9124_v40 = vpop.f32.mrb[17].mxu1  ;;  %v9700_v55 = vsel %vm9443_vm0, %v9120_v58, %v9572_v59 }
 0x797   : > { %v9125_v3 = vadd.f32 %v17481_v33, %v9124_v40  ;;  %v9699_v2 = vsel %vm9442_vm2, %v9115_v5, %v9571_v20 }
 0x798   : > { %v9574_v9 = vmul.f32 %v17305_v52, %v9130_v47  ;;  %14125 = vmatprep.mubr.f32.mxu0 %v9699_v2  ;;  %vm9445_vm3 = vcmp.ge.f32.partialorder %v9130_v47, 0.0 }
 0x799   : > { %v9573_v48 = vmul.f32 %v17305_v52, %v9125_v3  ;;  %v13909_v19 = vpop.f32.mrb[18].mxu1  ;;  %14126 = vmatmul.mubr.f32.gmra.mrb[14].mxu0 %v9700_v55  ;;  %vm9444_vm4 = vcmp.ge.f32.partialorder %v9125_v3, 0.0 }
 0x79a   : > { %v9140_v7 = vadd.f32 %v17481_v33, %v13909_v19  ;;  %v9134_v22 = vpop.f32.mrb[19].mxu1  ;;  %v9702_v32 = vsel %vm9445_vm3, %v9130_v47, %v9574_v9 }
 0x79b   : > { %v9135_v16 = vadd.f32 %v17481_v33, %v9134_v22  ;;  %v9701_v28 = vsel %vm9444_vm4, %v9125_v3, %v9573_v48 }
 0x79c   : > { %v9576_v14 = vmul.f32 %v17305_v52, %v9140_v7  ;;  %14128 = vmatprep.mubr.f32.mxu0 %v9701_v28  ;;  %vm9447_vm5 = vcmp.ge.f32.partialorder %v9140_v7, 0.0 }
 0x79d   : > { %v9575_v4 = vmul.f32 %v17305_v52, %v9135_v16  ;;  %v13912_v61 = vpop.f32.mrb[20].mxu1  ;;  %14129 = vmatmul.mubr.f32.gmra.mrb[16].mxu0 %v9702_v32  ;;  %vm9446_vm6 = vcmp.ge.f32.partialorder %v9135_v16, 0.0 }
 0x79e   : > { %v9150_v12 = vadd.f32 %v17481_v33, %v13912_v61  ;;  %v9144_v51 = vpop.f32.mrb[21].mxu1  ;;  %v9704_v45 = vsel %vm9447_vm5, %v9140_v7, %v9576_v14 }
 0x79f   : > { %v9145_v63 = vadd.f32 %v17481_v33, %v9144_v51  ;;  %v9703_v60 = vsel %vm9446_vm6, %v9135_v16, %v9575_v4 }
 0x7a0   : > { %v9578_v43 = vmul.f32 %v17305_v52, %v9150_v12  ;;  %14131 = vmatprep.mubr.f32.mxu0 %v9703_v60  ;;  %vm9449_vm7 = vcmp.ge.f32.partialorder %v9150_v12, 0.0 }
 0x7a1   : > { %v9577_v37 = vmul.f32 %v17305_v52, %v9145_v63  ;;  %v13915_v44 = vpop.f32.mrb[22].mxu1  ;;  %14132 = vmatmul.mubr.f32.gmra.mrb[18].mxu0 %v9704_v45  ;;  %vm9448_vm8 = vcmp.ge.f32.partialorder %v9145_v63, 0.0 }
 0x7a2   : > { %v9160_v13 = vadd.f32 %v17481_v33, %v13915_v44  ;;  %v9154_v49 = vpop.f32.mrb[23].mxu1  ;;  %v9706_v46 = vsel %vm9449_vm7, %v9150_v12, %v9578_v43 }
 0x7a3   : > { %v9155_v39 = vadd.f32 %v17481_v33, %v9154_v49  ;;  %v9705_v8 = vsel %vm9448_vm8, %v9145_v63, %v9577_v37 }
 0x7a4   : > { %v9580_v42 = vmul.f32 %v17305_v52, %v9160_v13  ;;  %14134 = vmatprep.mubr.f32.mxu0 %v9705_v8  ;;  %vm9451_vm9 = vcmp.ge.f32.partialorder %v9160_v13, 0.0 }
 0x7a5   : > { %v9579_v54 = vmul.f32 %v17305_v52, %v9155_v39  ;;  %v13918_v25 = vpop.f32.mrb[24].mxu1  ;;  %14135 = vmatmul.mubr.f32.gmra.mrb[20].mxu0 %v9706_v46  ;;  %vm9450_vm10 = vcmp.ge.f32.partialorder %v9155_v39, 0.0 }
 0x7a6   : > { %v9170_v1 = vadd.f32 %v17481_v33, %v13918_v25  ;;  %v9164_v34 = vpop.f32.mrb[25].mxu1  ;;  %v9708_v50 = vsel %vm9451_vm9, %v9160_v13, %v9580_v42 }
 0x7a7   : > { %v9165_v15 = vadd.f32 %v17481_v33, %v9164_v34  ;;  %v9707_v18 = vsel %vm9450_vm10, %v9155_v39, %v9579_v54 }
 0x7a8   : > { %v9582_v11 = vmul.f32 %v17305_v52, %v9170_v1  ;;  %14137 = vmatprep.mubr.f32.mxu0 %v9707_v18  ;;  %vm9453_vm11 = vcmp.ge.f32.partialorder %v9170_v1, 0.0 }
 0x7a9   : > { %v9581_v53 = vmul.f32 %v17305_v52, %v9165_v15  ;;  %v13921_v24 = vpop.f32.mrb[26].mxu1  ;;  %14138 = vmatmul.mubr.f32.gmra.mrb[22].mxu0 %v9708_v50  ;;  %vm9452_vm12 = vcmp.ge.f32.partialorder %v9165_v15, 0.0 }
 0x7aa   : > { %v9180_v26 = vadd.f32 %v17481_v33, %v13921_v24  ;;  %v9174_v6 = vpop.f32.mrb[27].mxu1  ;;  %v9710_v35 = vsel %vm9453_vm11, %v9170_v1, %v9582_v11 }
 0x7ab   : > { %v9175_v0 = vadd.f32 %v17481_v33, %v9174_v6  ;;  %v9709_v41 = vsel %vm9452_vm12, %v9165_v15, %v9581_v53 }
 0x7ac   : > { %v9584_v29 = vmul.f32 %v17305_v52, %v9180_v26  ;;  %14140 = vmatprep.mubr.f32.mxu0 %v9709_v41  ;;  %vm9455_vm13 = vcmp.ge.f32.partialorder %v9180_v26, 0.0 }
 0x7ad   : > { %v9583_v62 = vmul.f32 %v17305_v52, %v9175_v0  ;;  %v13924_v10 = vpop.f32.mrb[28].mxu1  ;;  %14141 = vmatmul.mubr.f32.gmra.mrb[24].mxu0 %v9710_v35  ;;  %vm9454_vm14 = vcmp.ge.f32.partialorder %v9175_v0, 0.0 }
 0x7ae   : > { %v9190_v23 = vadd.f32 %v17481_v33, %v13924_v10  ;;  %v9184_v56 = vpop.f32.mrb[29].mxu1  ;;  %v9712_v57 = vsel %vm9455_vm13, %v9180_v26, %v9584_v29 }
 0x7af   : > { %v9185_v21 = vadd.f32 %v17481_v33, %v9184_v56  ;;  %v9711_v38 = vsel %vm9454_vm14, %v9175_v0, %v9583_v62 }
 0x7b0   : > { %v9586_v27 = vmul.f32 %v17305_v52, %v9190_v23  ;;  %14143 = vmatprep.mubr.f32.mxu0 %v9711_v38  ;;  %vm9457_vm15 = vcmp.ge.f32.partialorder %v9190_v23, 0.0 }
 0x7b1   : > { %v9585_v58 = vmul.f32 %v17305_v52, %v9185_v21  ;;  %v13927_v31 = vpop.f32.mrb[30].mxu1  ;;  %14144 = vmatmul.mubr.f32.gmra.mrb[26].mxu0 %v9712_v57  ;;  %vm9456_vm0 = vcmp.ge.f32.partialorder %v9185_v21, 0.0  ;;  %v17571_v57 = vld [vmem:[%s18013_s7] ss:$0 sm:$0xff] }
 0x7b2   : > { %v9200_v5 = vadd.f32 %v17481_v33, %v13927_v31  ;;  %v9194_v30 = vpop.f32.mrb[31].mxu1  ;;  %v9714_v20 = vsel %vm9457_vm15, %v9190_v23, %v9586_v27 }
 0x7b3   : > { %v9195_v17 = vadd.f32 %v17481_v33, %v9194_v30  ;;  %v9713_v59 = vsel %vm9456_vm0, %v9185_v21, %v9585_v58 }
 0x7b4   : > { %v9588_v36 = vmul.f32 %v17305_v52, %v9200_v5  ;;  %14146 = vmatprep.mubr.f32.mxu0 %v9713_v59  ;;  %vm9459_vm2 = vcmp.ge.f32.partialorder %v9200_v5, 0.0 }
 0x7b5   : > { %v9587_v47 = vmul.f32 %v17305_v52, %v9195_v17  ;;  %v13930_v40 = vpop.f32.mrb[32].mxu1  ;;  %14147 = vmatmul.mubr.f32.gmra.mrb[28].mxu0 %v9714_v20  ;;  %vm9458_vm3 = vcmp.ge.f32.partialorder %v9195_v17, 0.0 }
 0x7b6   : > { %v9210_v3 = vadd.f32 %v17481_v33, %v13930_v40  ;;  %v9204_v2 = vpop.f32.mrb[33].mxu1  ;;  %v9716_v48 = vsel %vm9459_vm2, %v9200_v5, %v9588_v36 }
 0x7b7   : > { %v9205_v55 = vadd.f32 %v17481_v33, %v9204_v2  ;;  %v9715_v9 = vsel %vm9458_vm3, %v9195_v17, %v9587_v47 }
 0x7b8   : > { %v9590_v19 = vmul.f32 %v17305_v52, %v9210_v3  ;;  %14149 = vmatprep.mubr.f32.mxu0 %v9715_v9  ;;  %vm9461_vm4 = vcmp.ge.f32.partialorder %v9210_v3, 0.0 }
 0x7b9   : > { %v9589_v7 = vmul.f32 %v17305_v52, %v9205_v55  ;;  %v13933_v22 = vpop.f32.mrb[34].mxu1  ;;  %14150 = vmatmul.mubr.f32.gmra.mrb[30].mxu0 %v9716_v48  ;;  %vm9460_vm5 = vcmp.ge.f32.partialorder %v9205_v55, 0.0 }
 0x7ba   : > { %v9220_v16 = vadd.f32 %v17481_v33, %v13933_v22  ;;  %v9214_v28 = vpop.f32.mrb[35].mxu1  ;;  %v9718_v4 = vsel %vm9461_vm4, %v9210_v3, %v9590_v19 }
 0x7bb   : > { %v9215_v32 = vadd.f32 %v17481_v33, %v9214_v28  ;;  %v9717_v14 = vsel %vm9460_vm5, %v9205_v55, %v9589_v7 }
 0x7bc   : > { %v9592_v61 = vmul.f32 %v17305_v52, %v9220_v16  ;;  %14152 = vmatprep.mubr.f32.mxu0 %v9717_v14  ;;  %vm9463_vm6 = vcmp.ge.f32.partialorder %v9220_v16, 0.0 }
 0x7bd   : > { %v9591_v12 = vmul.f32 %v17305_v52, %v9215_v32  ;;  %v13936_v51 = vpop.f32.mrb[36].mxu1  ;;  %14153 = vmatmul.mubr.f32.gmra.mrb[32].mxu0 %v9718_v4  ;;  %vm9462_vm7 = vcmp.ge.f32.partialorder %v9215_v32, 0.0 }
 0x7be   : > { %v9230_v63 = vadd.f32 %v17481_v33, %v13936_v51  ;;  %v9224_v60 = vpop.f32.mrb[37].mxu1  ;;  %v9720_v37 = vsel %vm9463_vm6, %v9220_v16, %v9592_v61 }
 0x7bf   : > { %v9225_v45 = vadd.f32 %v17481_v33, %v9224_v60  ;;  %v9719_v43 = vsel %vm9462_vm7, %v9215_v32, %v9591_v12 }
 0x7c0   : > { %v9594_v44 = vmul.f32 %v17305_v52, %v9230_v63  ;;  %14155 = vmatprep.mubr.f32.mxu0 %v9719_v43  ;;  %vm9465_vm8 = vcmp.ge.f32.partialorder %v9230_v63, 0.0 }
 0x7c1   : > { %v9593_v13 = vmul.f32 %v17305_v52, %v9225_v45  ;;  %v13939_v49 = vpop.f32.mrb[38].mxu1  ;;  %14156 = vmatmul.mubr.f32.gmra.mrb[34].mxu0 %v9720_v37  ;;  %vm9464_vm9 = vcmp.ge.f32.partialorder %v9225_v45, 0.0 }
 0x7c2   : > { %v9240_v39 = vadd.f32 %v17481_v33, %v13939_v49  ;;  %v9234_v8 = vpop.f32.mrb[39].mxu1  ;;  %v9722_v54 = vsel %vm9465_vm8, %v9230_v63, %v9594_v44 }
 0x7c3   : > { %v9235_v46 = vadd.f32 %v17481_v33, %v9234_v8  ;;  %v9721_v42 = vsel %vm9464_vm9, %v9225_v45, %v9593_v13 }
 0x7c4   : > { %v9596_v25 = vmul.f32 %v17305_v52, %v9240_v39  ;;  %14158 = vmatprep.mubr.f32.mxu0 %v9721_v42  ;;  %vm9467_vm10 = vcmp.ge.f32.partialorder %v9240_v39, 0.0 }
 0x7c5   : > { %v9595_v1 = vmul.f32 %v17305_v52, %v9235_v46  ;;  %v13942_v34 = vpop.f32.mrb[40].mxu1  ;;  %14159 = vmatmul.mubr.f32.gmra.mrb[36].mxu0 %v9722_v54  ;;  %vm9466_vm11 = vcmp.ge.f32.partialorder %v9235_v46, 0.0 }
 0x7c6   : > { %v9250_v15 = vadd.f32 %v17481_v33, %v13942_v34  ;;  %v9244_v18 = vpop.f32.mrb[41].mxu1  ;;  %v9724_v53 = vsel %vm9467_vm10, %v9240_v39, %v9596_v25 }
 0x7c7   : > { %v9245_v50 = vadd.f32 %v17481_v33, %v9244_v18  ;;  %v9723_v11 = vsel %vm9466_vm11, %v9235_v46, %v9595_v1 }
 0x7c8   : > { %v9598_v24 = vmul.f32 %v17305_v52, %v9250_v15  ;;  %14161 = vmatprep.mubr.f32.mxu0 %v9723_v11  ;;  %vm9469_vm12 = vcmp.ge.f32.partialorder %v9250_v15, 0.0 }
 0x7c9   : > { %v9597_v26 = vmul.f32 %v17305_v52, %v9245_v50  ;;  %v13945_v6 = vpop.f32.mrb[42].mxu1  ;;  %14162 = vmatmul.mubr.f32.gmra.mrb[38].mxu0 %v9724_v53  ;;  %vm9468_vm13 = vcmp.ge.f32.partialorder %v9245_v50, 0.0 }
 0x7ca   : > { %v9260_v0 = vadd.f32 %v17481_v33, %v13945_v6  ;;  %v9254_v41 = vpop.f32.mrb[43].mxu1  ;;  %v9726_v62 = vsel %vm9469_vm12, %v9250_v15, %v9598_v24 }
 0x7cb   : > { %v9255_v35 = vadd.f32 %v17481_v33, %v9254_v41  ;;  %v9725_v29 = vsel %vm9468_vm13, %v9245_v50, %v9597_v26 }
 0x7cc   : > { %v9600_v10 = vmul.f32 %v17305_v52, %v9260_v0  ;;  %14164 = vmatprep.mubr.f32.mxu0 %v9725_v29  ;;  %vm9471_vm14 = vcmp.ge.f32.partialorder %v9260_v0, 0.0 }
 0x7cd   : > { %v9599_v23 = vmul.f32 %v17305_v52, %v9255_v35  ;;  %v13948_v56 = vpop.f32.mrb[44].mxu1  ;;  %14165 = vmatmul.mubr.f32.gmra.mrb[40].mxu0 %v9726_v62  ;;  %vm9470_vm15 = vcmp.ge.f32.partialorder %v9255_v35, 0.0 }
 0x7ce   : > { %v9270_v21 = vadd.f32 %v17481_v33, %v13948_v56  ;;  %v9264_v38 = vpop.f32.mrb[45].mxu1  ;;  %v9728_v31 = vsel %vm9471_vm14, %v9260_v0, %v9600_v10 }
 0x7cf   : > { %v9265_v27 = vadd.f32 %v17481_v33, %v9264_v38  ;;  %v9727_v58 = vsel %vm9470_vm15, %v9255_v35, %v9599_v23 }
 0x7d0   : > { %v9602_v5 = vmul.f32 %v17305_v52, %v9270_v21  ;;  %v14010_v30 = vpop.f32.mrb[192].mxu0  ;;  %14167 = vmatprep.mubr.f32.mxu0 %v9727_v58  ;;  %vm9473_vm0 = vcmp.ge.f32.partialorder %v9270_v21, 0.0 }
 0x7d1   : > { %v9601_v17 = vmul.f32 %v17305_v52, %v9265_v27  ;;  %v9844_v59 = vadd.f32 %v14010_v30, %v17571_v57  ;;  %v13951_v20 = vpop.f32.mrb[46].mxu1  ;;  %v9838_v36 = vpop.f32.mrb[193].mxu0  ;;  %14168 = vmatmul.mubr.f32.gmra.mrb[42].mxu0 %v9728_v31  ;;  %vm9472_vm2 = vcmp.ge.f32.partialorder %v9265_v27, 0.0 }
 0x7d2   : > { %v9280_v47 = vadd.f32 %v17481_v33, %v13951_v20  ;;  %v9839_v40 = vadd.f32 %v17571_v57, %v9838_v36  ;;  %v9274_v3 = vpop.f32.mrb[47].mxu1  ;;  %v9730_v9 = vsel %vm9473_vm0, %v9270_v21, %v9602_v5 }
 0x7d3   : > { %10478 = vst.msk [vmem:[%s17579_s17 + $0x8] sm:$0xff] %vm459_vm1, %v9844_v59  ;;  %v9275_v2 = vadd.f32 %v17481_v33, %v9274_v3  ;;  %v9729_v55 = vsel %vm9472_vm2, %v9265_v27, %v9601_v17 }
 0x7d4   : > { %v9604_v48 = vmul.f32 %v17305_v52, %v9280_v47  ;;  %10477 = vst.msk [vmem:[%s17579_s17] sm:$0xff] %vm459_vm1, %v9839_v40  ;;  %v14013_v19 = vpop.f32.mrb[194].mxu0  ;;  %14170 = vmatprep.mubr.f32.mxu0 %v9729_v55  ;;  %vm9475_vm3 = vcmp.ge.f32.partialorder %v9280_v47, 0.0 }
 0x7d5   : > { %v9603_v7 = vmul.f32 %v17305_v52, %v9275_v2  ;;  %v9854_v22 = vadd.f32 %v14013_v19, %v17571_v57  ;;  %v13954_v16 = vpop.f32.mrb[48].mxu1  ;;  %v9848_v28 = vpop.f32.mrb[195].mxu0  ;;  %14171 = vmatmul.mubr.f32.gmra.mrb[44].mxu0 %v9730_v9  ;;  %vm9474_vm4 = vcmp.ge.f32.partialorder %v9275_v2, 0.0 }
 0x7d6   : > { %v9290_v32 = vadd.f32 %v17481_v33, %v13954_v16  ;;  %v9849_v14 = vadd.f32 %v17571_v57, %v9848_v28  ;;  %v9284_v4 = vpop.f32.mrb[49].mxu1  ;;  %v9732_v51 = vsel %vm9475_vm3, %v9280_v47, %v9604_v48 }
 0x7d7   : > { %10480 = vst.msk [vmem:[%s17579_s17 + $0x18] sm:$0xff] %vm459_vm1, %v9854_v22  ;;  %v9285_v61 = vadd.f32 %v17481_v33, %v9284_v4  ;;  %v9731_v12 = vsel %vm9474_vm4, %v9275_v2, %v9603_v7 }
 0x7d8   : > { %v9606_v63 = vmul.f32 %v17305_v52, %v9290_v32  ;;  %10479 = vst.msk [vmem:[%s17579_s17 + $0x10] sm:$0xff] %vm459_vm1, %v9849_v14  ;;  %v14016_v60 = vpop.f32.mrb[196].mxu0  ;;  %14173 = vmatprep.mubr.f32.mxu0 %v9731_v12  ;;  %vm9477_vm5 = vcmp.ge.f32.partialorder %v9290_v32, 0.0 }
 0x7d9   : > { %v9605_v45 = vmul.f32 %v17305_v52, %v9285_v61  ;;  %v9864_v43 = vadd.f32 %v14016_v60, %v17571_v57  ;;  %v13957_v37 = vpop.f32.mrb[50].mxu1  ;;  %v9858_v44 = vpop.f32.mrb[197].mxu0  ;;  %14174 = vmatmul.mubr.f32.gmra.mrb[46].mxu0 %v9732_v51  ;;  %vm9476_vm6 = vcmp.ge.f32.partialorder %v9285_v61, 0.0 }
 0x7da   : > { %v9300_v13 = vadd.f32 %v17481_v33, %v13957_v37  ;;  %v9859_v49 = vadd.f32 %v17571_v57, %v9858_v44  ;;  %v9294_v39 = vpop.f32.mrb[51].mxu1  ;;  %v9734_v42 = vsel %vm9477_vm5, %v9290_v32, %v9606_v63 }
 0x7db   : > { %10482 = vst.msk [vmem:[%s17579_s17 + $0x28] sm:$0xff] %vm459_vm1, %v9864_v43  ;;  %v9295_v8 = vadd.f32 %v17481_v33, %v9294_v39  ;;  %v9733_v46 = vsel %vm9476_vm6, %v9285_v61, %v9605_v45 }
 0x7dc   : > { %v9608_v54 = vmul.f32 %v17305_v52, %v9300_v13  ;;  %10481 = vst.msk [vmem:[%s17579_s17 + $0x20] sm:$0xff] %vm459_vm1, %v9859_v49  ;;  %v14019_v25 = vpop.f32.mrb[198].mxu0  ;;  %14176 = vmatprep.mubr.f32.mxu0 %v9733_v46  ;;  %vm9479_vm7 = vcmp.ge.f32.partialorder %v9300_v13, 0.0 }
 0x7dd   : > { %v9607_v1 = vmul.f32 %v17305_v52, %v9295_v8  ;;  %v9874_v34 = vadd.f32 %v14019_v25, %v17571_v57  ;;  %v13960_v15 = vpop.f32.mrb[52].mxu1  ;;  %v9868_v18 = vpop.f32.mrb[199].mxu0  ;;  %14177 = vmatmul.mubr.f32.gmra.mrb[48].mxu0 %v9734_v42  ;;  %vm9478_vm8 = vcmp.ge.f32.partialorder %v9295_v8, 0.0 }
 0x7de   : > { %v9310_v50 = vadd.f32 %v17481_v33, %v13960_v15  ;;  %v9869_v11 = vadd.f32 %v17571_v57, %v9868_v18  ;;  %v9304_v53 = vpop.f32.mrb[53].mxu1  ;;  %v9736_v6 = vsel %vm9479_vm7, %v9300_v13, %v9608_v54 }
 0x7df   : > { %10484 = vst.msk [vmem:[%s17579_s17 + $0x38] sm:$0xff] %vm459_vm1, %v9874_v34  ;;  %v9305_v24 = vadd.f32 %v17481_v33, %v9304_v53  ;;  %v9735_v26 = vsel %vm9478_vm8, %v9295_v8, %v9607_v1 }
 0x7e0   : > { %v9610_v0 = vmul.f32 %v17305_v52, %v9310_v50  ;;  %10483 = vst.msk [vmem:[%s17579_s17 + $0x30] sm:$0xff] %vm459_vm1, %v9869_v11  ;;  %v14022_v41 = vpop.f32.mrb[200].mxu0  ;;  %14179 = vmatprep.mubr.f32.mxu0 %v9735_v26  ;;  %vm9481_vm9 = vcmp.ge.f32.partialorder %v9310_v50, 0.0 }
 0x7e1   : > { %v9609_v35 = vmul.f32 %v17305_v52, %v9305_v24  ;;  %v9884_v29 = vadd.f32 %v14022_v41, %v17571_v57  ;;  %v13963_v62 = vpop.f32.mrb[54].mxu1  ;;  %v9878_v10 = vpop.f32.mrb[201].mxu0  ;;  %14180 = vmatmul.mubr.f32.gmra.mrb[50].mxu0 %v9736_v6  ;;  %vm9480_vm10 = vcmp.ge.f32.partialorder %v9305_v24, 0.0 }
 0x7e2   : > { %v9320_v23 = vadd.f32 %v17481_v33, %v13963_v62  ;;  %v9879_v56 = vadd.f32 %v17571_v57, %v9878_v10  ;;  %v9314_v21 = vpop.f32.mrb[55].mxu1  ;;  %v9738_v58 = vsel %vm9481_vm9, %v9310_v50, %v9610_v0 }
 0x7e3   : > { %10486 = vst.msk [vmem:[%s17579_s17 + $0x48] sm:$0xff] %vm459_vm1, %v9884_v29  ;;  %v9315_v38 = vadd.f32 %v17481_v33, %v9314_v21  ;;  %v9737_v27 = vsel %vm9480_vm10, %v9305_v24, %v9609_v35 }
 0x7e4   : > { %v9612_v31 = vmul.f32 %v17305_v52, %v9320_v23  ;;  %10485 = vst.msk [vmem:[%s17579_s17 + $0x40] sm:$0xff] %vm459_vm1, %v9879_v56  ;;  %v14025_v5 = vpop.f32.mrb[202].mxu0  ;;  %14182 = vmatprep.mubr.f32.mxu0 %v9737_v27  ;;  %vm9483_vm11 = vcmp.ge.f32.partialorder %v9320_v23, 0.0 }
 0x7e5   : > { %v9611_v30 = vmul.f32 %v17305_v52, %v9315_v38  ;;  %v9894_v17 = vadd.f32 %v14025_v5, %v17571_v57  ;;  %v13966_v59 = vpop.f32.mrb[56].mxu1  ;;  %v9888_v20 = vpop.f32.mrb[203].mxu0  ;;  %14183 = vmatmul.mubr.f32.gmra.mrb[52].mxu0 %v9738_v58  ;;  %vm9482_vm12 = vcmp.ge.f32.partialorder %v9315_v38, 0.0 }
 0x7e6   : > { %v9330_v36 = vadd.f32 %v17481_v33, %v13966_v59  ;;  %v9889_v47 = vadd.f32 %v17571_v57, %v9888_v20  ;;  %v9324_v40 = vpop.f32.mrb[57].mxu1  ;;  %v9740_v55 = vsel %vm9483_vm11, %v9320_v23, %v9612_v31 }
 0x7e7   : > { %10488 = vst.msk [vmem:[%s17579_s17 + $0x58] sm:$0xff] %vm459_vm1, %v9894_v17  ;;  %v9325_v3 = vadd.f32 %v17481_v33, %v9324_v40  ;;  %v9739_v2 = vsel %vm9482_vm12, %v9315_v38, %v9611_v30 }
 0x7e8   : > { %v9614_v9 = vmul.f32 %v17305_v52, %v9330_v36  ;;  %10487 = vst.msk [vmem:[%s17579_s17 + $0x50] sm:$0xff] %vm459_vm1, %v9889_v47  ;;  %v14028_v48 = vpop.f32.mrb[204].mxu0  ;;  %14185 = vmatprep.mubr.f32.mxu0 %v9739_v2  ;;  %vm9485_vm13 = vcmp.ge.f32.partialorder %v9330_v36, 0.0 }
 0x7e9   : > { %v9613_v19 = vmul.f32 %v17305_v52, %v9325_v3  ;;  %v9904_v7 = vadd.f32 %v14028_v48, %v17571_v57  ;;  %v13969_v22 = vpop.f32.mrb[58].mxu1  ;;  %v9898_v16 = vpop.f32.mrb[205].mxu0  ;;  %14186 = vmatmul.mubr.f32.gmra.mrb[54].mxu0 %v9740_v55  ;;  %vm9484_vm14 = vcmp.ge.f32.partialorder %v9325_v3, 0.0 }
 0x7ea   : > { %v9340_v28 = vadd.f32 %v17481_v33, %v13969_v22  ;;  %v9899_v32 = vadd.f32 %v17571_v57, %v9898_v16  ;;  %v9334_v14 = vpop.f32.mrb[59].mxu1  ;;  %v9742_v12 = vsel %vm9485_vm13, %v9330_v36, %v9614_v9 }
 0x7eb   : > { %10490 = vst.msk [vmem:[%s17579_s17 + $0x68] sm:$0xff] %vm459_vm1, %v9904_v7  ;;  %v9335_v4 = vadd.f32 %v17481_v33, %v9334_v14  ;;  %v9741_v61 = vsel %vm9484_vm14, %v9325_v3, %v9613_v19 }
 0x7ec   : > { %v9616_v51 = vmul.f32 %v17305_v52, %v9340_v28  ;;  %10489 = vst.msk [vmem:[%s17579_s17 + $0x60] sm:$0xff] %vm459_vm1, %v9899_v32  ;;  %v14031_v63 = vpop.f32.mrb[206].mxu0  ;;  %14188 = vmatprep.mubr.f32.mxu0 %v9741_v61  ;;  %vm9487_vm15 = vcmp.ge.f32.partialorder %v9340_v28, 0.0 }
 0x7ed   : > { %v9615_v60 = vmul.f32 %v17305_v52, %v9335_v4  ;;  %v9914_v45 = vadd.f32 %v14031_v63, %v17571_v57  ;;  %v13972_v43 = vpop.f32.mrb[60].mxu1  ;;  %v9908_v37 = vpop.f32.mrb[207].mxu0  ;;  %14189 = vmatmul.mubr.f32.gmra.mrb[56].mxu0 %v9742_v12  ;;  %vm9486_vm0 = vcmp.ge.f32.partialorder %v9335_v4, 0.0 }
 0x7ee   : > { %v9350_v44 = vadd.f32 %v17481_v33, %v13972_v43  ;;  %v9909_v13 = vadd.f32 %v17571_v57, %v9908_v37  ;;  %v9344_v49 = vpop.f32.mrb[61].mxu1  ;;  %v9744_v46 = vsel %vm9487_vm15, %v9340_v28, %v9616_v51 }
 0x7ef   : > { %10492 = vst.msk [vmem:[%s17579_s17 + $0x78] sm:$0xff] %vm459_vm1, %v9914_v45  ;;  %v9345_v39 = vadd.f32 %v17481_v33, %v9344_v49  ;;  %v9743_v8 = vsel %vm9486_vm0, %v9335_v4, %v9615_v60 }
 0x7f0   : > { %v9618_v42 = vmul.f32 %v17305_v52, %v9350_v44  ;;  %10491 = vst.msk [vmem:[%s17579_s17 + $0x70] sm:$0xff] %vm459_vm1, %v9909_v13  ;;  %v14034_v54 = vpop.f32.mrb[208].mxu0  ;;  %14191 = vmatprep.mubr.f32.mxu0 %v9743_v8  ;;  %vm9489_vm2 = vcmp.ge.f32.partialorder %v9350_v44, 0.0 }
 0x7f1   : > { %v9617_v25 = vmul.f32 %v17305_v52, %v9345_v39  ;;  %v9924_v1 = vadd.f32 %v14034_v54, %v17571_v57  ;;  %v13975_v34 = vpop.f32.mrb[62].mxu1  ;;  %v9918_v15 = vpop.f32.mrb[209].mxu0  ;;  %14192 = vmatmul.mubr.f32.gmra.mrb[58].mxu0 %v9744_v46  ;;  %vm9488_vm3 = vcmp.ge.f32.partialorder %v9345_v39, 0.0 }
 0x7f2   : > { %v9360_v18 = vadd.f32 %v17481_v33, %v13975_v34  ;;  %v9919_v50 = vadd.f32 %v17571_v57, %v9918_v15  ;;  %v9354_v11 = vpop.f32.mrb[63].mxu1  ;;  %v9746_v26 = vsel %vm9489_vm2, %v9350_v44, %v9618_v42 }
 0x7f3   : > { %10494 = vst.msk [vmem:[%s17579_s17 + $0x88] sm:$0xff] %vm459_vm1, %v9924_v1  ;;  %v9355_v53 = vadd.f32 %v17481_v33, %v9354_v11  ;;  %v9745_v24 = vsel %vm9488_vm3, %v9345_v39, %v9617_v25 }
 0x7f4   : > { %v9620_v6 = vmul.f32 %v17305_v52, %v9360_v18  ;;  %10493 = vst.msk [vmem:[%s17579_s17 + $0x80] sm:$0xff] %vm459_vm1, %v9919_v50  ;;  %v14037_v0 = vpop.f32.mrb[210].mxu0  ;;  %14194 = vmatprep.mubr.f32.mxu0 %v9745_v24  ;;  %vm9491_vm4 = vcmp.ge.f32.partialorder %v9360_v18, 0.0 }
 0x7f5   : > { %v9619_v41 = vmul.f32 %v17305_v52, %v9355_v53  ;;  %v9934_v35 = vadd.f32 %v14037_v0, %v17571_v57  ;;  %v9928_v29 = vpop.f32.mrb[211].mxu0  ;;  %14195 = vmatmul.mubr.f32.gmra.mrb[60].mxu0 %v9746_v26  ;;  %vm9490_vm5 = vcmp.ge.f32.partialorder %v9355_v53, 0.0 }
 0x7f6   : > { %v9929_v33 = vadd.f32 %v17571_v57, %v9928_v29  ;;  %v9748_v10 = vsel %vm9491_vm4, %v9360_v18, %v9620_v6 }
 0x7f7   : > { %10496 = vst.msk [vmem:[%s17579_s17 + $0x98] sm:$0xff] %vm459_vm1, %v9934_v35  ;;  %v9747_v62 = vsel %vm9490_vm5, %v9355_v53, %v9619_v41 }
 0x7f8   : > { %10495 = vst.msk [vmem:[%s17579_s17 + $0x90] sm:$0xff] %vm459_vm1, %v9929_v33  ;;  %v14040_v23 = vpop.f32.mrb[212].mxu0  ;;  %14197 = vmatprep.mubr.f32.mxu0 %v9747_v62 }
 0x7f9   : > { %v9944_v52 = vadd.f32 %v14040_v23, %v17571_v57  ;;  %v9938_v56 = vpop.f32.mrb[213].mxu0  ;;  %14198 = vmatmul.mubr.f32.gmra.mrb[62].mxu0 %v9748_v10 }
 0x7fa   : > { %v9939_v21 = vadd.f32 %v17571_v57, %v9938_v56 }
 0x7fb   : > { %10498 = vst.msk [vmem:[%s17579_s17 + $0xa8] sm:$0xff] %vm459_vm1, %v9944_v52 }
 0x7fc   : > { %10497 = vst.msk [vmem:[%s17579_s17 + $0xa0] sm:$0xff] %vm459_vm1, %v9939_v21  ;;  %v14043_v38 = vpop.f32.mrb[214].mxu0 }
 0x7fd   : > { %v9954_v27 = vadd.f32 %v14043_v38, %v17571_v57  ;;  %v9948_v58 = vpop.f32.mrb[215].mxu0 }
 0x7fe   : > { %v9949_v31 = vadd.f32 %v17571_v57, %v9948_v58 }
 0x7ff   : > { %10500 = vst.msk [vmem:[%s17579_s17 + $0xb8] sm:$0xff] %vm459_vm1, %v9954_v27 }
 0x800   : > { %10499 = vst.msk [vmem:[%s17579_s17 + $0xb0] sm:$0xff] %vm459_vm1, %v9949_v31  ;;  %v14046_v5 = vpop.f32.mrb[216].mxu0 }
 0x801   : > { %v9964_v30 = vadd.f32 %v14046_v5, %v17571_v57  ;;  %v9958_v17 = vpop.f32.mrb[217].mxu0 }
 0x802   : > { %v9959_v59 = vadd.f32 %v17571_v57, %v9958_v17 }
 0x803   : > { %10502 = vst.msk [vmem:[%s17579_s17 + $0xc8] sm:$0xff] %vm459_vm1, %v9964_v30 }
 0x804   : > { %10501 = vst.msk [vmem:[%s17579_s17 + $0xc0] sm:$0xff] %vm459_vm1, %v9959_v59  ;;  %v14049_v20 = vpop.f32.mrb[218].mxu0 }
 0x805   : > { %v9974_v36 = vadd.f32 %v14049_v20, %v17571_v57  ;;  %v9968_v47 = vpop.f32.mrb[219].mxu0 }
 0x806   : > { %v9969_v40 = vadd.f32 %v17571_v57, %v9968_v47 }
 0x807   : > { %10504 = vst.msk [vmem:[%s17579_s17 + $0xd8] sm:$0xff] %vm459_vm1, %v9974_v36 }
 0x808   : > { %10503 = vst.msk [vmem:[%s17579_s17 + $0xd0] sm:$0xff] %vm459_vm1, %v9969_v40  ;;  %v14052_v3 = vpop.f32.mrb[220].mxu0 }
 0x809   : > { %v9984_v2 = vadd.f32 %v14052_v3, %v17571_v57  ;;  %v9978_v55 = vpop.f32.mrb[221].mxu0 }
 0x80a   : > { %v9979_v9 = vadd.f32 %v17571_v57, %v9978_v55 }
 0x80b   : > { %10506 = vst.msk [vmem:[%s17579_s17 + $0xe8] sm:$0xff] %vm459_vm1, %v9984_v2 }
 0x80c   : > { %10505 = vst.msk [vmem:[%s17579_s17 + $0xe0] sm:$0xff] %vm459_vm1, %v9979_v9  ;;  %v14055_v48 = vpop.f32.mrb[222].mxu0 }
 0x80d   : > { %v9994_v19 = vadd.f32 %v14055_v48, %v17571_v57  ;;  %v9988_v7 = vpop.f32.mrb[223].mxu0 }
 0x80e   : > { %v9989_v22 = vadd.f32 %v17571_v57, %v9988_v7 }
 0x80f   : > { %10508 = vst.msk [vmem:[%s17579_s17 + $0xf8] sm:$0xff] %vm459_vm1, %v9994_v19 }
 0x810   : > { %10507 = vst.msk [vmem:[%s17579_s17 + $0xf0] sm:$0xff] %vm459_vm1, %v9989_v22  ;;  %v14058_v16 = vpop.f32.mrb[224].mxu0 }
 0x811   : > { %v10004_v28 = vadd.f32 %v14058_v16, %v17571_v57  ;;  %v9998_v32 = vpop.f32.mrb[225].mxu0 }
 0x812   : > { %v9999_v14 = vadd.f32 %v17571_v57, %v9998_v32 }
 0x813   : > { %10510 = vst.msk [vmem:[%s17579_s17 + $0x108] sm:$0xff] %vm459_vm1, %v10004_v28 }
 0x814   : > { %10509 = vst.msk [vmem:[%s17579_s17 + $0x100] sm:$0xff] %vm459_vm1, %v9999_v14  ;;  %v14061_v4 = vpop.f32.mrb[226].mxu0 }
 0x815   : > { %v10014_v61 = vadd.f32 %v14061_v4, %v17571_v57  ;;  %v10008_v12 = vpop.f32.mrb[227].mxu0 }
 0x816   : > { %v10009_v51 = vadd.f32 %v17571_v57, %v10008_v12 }
 0x817   : > { %10512 = vst.msk [vmem:[%s17579_s17 + $0x118] sm:$0xff] %vm459_vm1, %v10014_v61 }
 0x818   : > { %10511 = vst.msk [vmem:[%s17579_s17 + $0x110] sm:$0xff] %vm459_vm1, %v10009_v51  ;;  %v14064_v63 = vpop.f32.mrb[228].mxu0 }
 0x819   : > { %v10024_v60 = vadd.f32 %v14064_v63, %v17571_v57  ;;  %v10018_v45 = vpop.f32.mrb[229].mxu0 }
 0x81a   : > { %v10019_v43 = vadd.f32 %v17571_v57, %v10018_v45 }
 0x81b   : > { %10514 = vst.msk [vmem:[%s17579_s17 + $0x128] sm:$0xff] %vm459_vm1, %v10024_v60 }
 0x81c   : > { %10513 = vst.msk [vmem:[%s17579_s17 + $0x120] sm:$0xff] %vm459_vm1, %v10019_v43  ;;  %v14067_v37 = vpop.f32.mrb[230].mxu0 }
 0x81d   : > { %v10034_v44 = vadd.f32 %v14067_v37, %v17571_v57  ;;  %v10028_v13 = vpop.f32.mrb[231].mxu0 }
 0x81e   : > { %v10029_v49 = vadd.f32 %v17571_v57, %v10028_v13 }
 0x81f   : > { %10516 = vst.msk [vmem:[%s17579_s17 + $0x138] sm:$0xff] %vm459_vm1, %v10034_v44 }
 0x820   : > { %10515 = vst.msk [vmem:[%s17579_s17 + $0x130] sm:$0xff] %vm459_vm1, %v10029_v49  ;;  %v14070_v39 = vpop.f32.mrb[232].mxu0 }
 0x821   : > { %v10044_v8 = vadd.f32 %v14070_v39, %v17571_v57  ;;  %v10038_v46 = vpop.f32.mrb[233].mxu0 }
 0x822   : > { %v10039_v42 = vadd.f32 %v17571_v57, %v10038_v46 }
 0x823   : > { %10518 = vst.msk [vmem:[%s17579_s17 + $0x148] sm:$0xff] %vm459_vm1, %v10044_v8 }
 0x824   : > { %10517 = vst.msk [vmem:[%s17579_s17 + $0x140] sm:$0xff] %vm459_vm1, %v10039_v42  ;;  %v14073_v54 = vpop.f32.mrb[234].mxu0 }
 0x825   : > { %v10054_v25 = vadd.f32 %v14073_v54, %v17571_v57  ;;  %v10048_v1 = vpop.f32.mrb[235].mxu0 }
 0x826   : > { %v10049_v34 = vadd.f32 %v17571_v57, %v10048_v1 }
 0x827   : > { %10520 = vst.msk [vmem:[%s17579_s17 + $0x158] sm:$0xff] %vm459_vm1, %v10054_v25 }
 0x828   : > { %10519 = vst.msk [vmem:[%s17579_s17 + $0x150] sm:$0xff] %vm459_vm1, %v10049_v34  ;;  %v14076_v15 = vpop.f32.mrb[236].mxu0 }
 0x829   : > { %v10064_v18 = vadd.f32 %v14076_v15, %v17571_v57  ;;  %v10058_v50 = vpop.f32.mrb[237].mxu0 }
 0x82a   : > { %v10059_v11 = vadd.f32 %v17571_v57, %v10058_v50 }
 0x82b   : > { %10522 = vst.msk [vmem:[%s17579_s17 + $0x168] sm:$0xff] %vm459_vm1, %v10064_v18 }
 0x82c   : > { %10521 = vst.msk [vmem:[%s17579_s17 + $0x160] sm:$0xff] %vm459_vm1, %v10059_v11  ;;  %v14079_v53 = vpop.f32.mrb[238].mxu0 }
 0x82d   : > { %v10074_v24 = vadd.f32 %v14079_v53, %v17571_v57  ;;  %v10068_v26 = vpop.f32.mrb[239].mxu0 }
 0x82e   : > { %v10069_v6 = vadd.f32 %v17571_v57, %v10068_v26 }
 0x82f   : > { %10524 = vst.msk [vmem:[%s17579_s17 + $0x178] sm:$0xff] %vm459_vm1, %v10074_v24 }
 0x830   : > { %10523 = vst.msk [vmem:[%s17579_s17 + $0x170] sm:$0xff] %vm459_vm1, %v10069_v6  ;;  %v14082_v0 = vpop.f32.mrb[240].mxu0 }
 0x831   : > { %v10084_v41 = vadd.f32 %v14082_v0, %v17571_v57  ;;  %v10078_v35 = vpop.f32.mrb[241].mxu0 }
 0x832   : > { %v10079_v29 = vadd.f32 %v17571_v57, %v10078_v35 }
 0x833   : > { %10526 = vst.msk [vmem:[%s17579_s17 + $0x188] sm:$0xff] %vm459_vm1, %v10084_v41 }
 0x834   : > { %10525 = vst.msk [vmem:[%s17579_s17 + $0x180] sm:$0xff] %vm459_vm1, %v10079_v29  ;;  %v14085_v33 = vpop.f32.mrb[242].mxu0 }
 0x835   : > { %v10094_v62 = vadd.f32 %v14085_v33, %v17571_v57  ;;  %v10088_v10 = vpop.f32.mrb[243].mxu0 }
 0x836   : > { %v10089_v23 = vadd.f32 %v17571_v57, %v10088_v10 }
 0x837   : > { %10528 = vst.msk [vmem:[%s17579_s17 + $0x198] sm:$0xff] %vm459_vm1, %v10094_v62 }
 0x838   : > { %10527 = vst.msk [vmem:[%s17579_s17 + $0x190] sm:$0xff] %vm459_vm1, %v10089_v23  ;;  %v14088_v52 = vpop.f32.mrb[244].mxu0 }
 0x839   : > { %v10104_v56 = vadd.f32 %v14088_v52, %v17571_v57  ;;  %v10098_v21 = vpop.f32.mrb[245].mxu0 }
 0x83a   : > { %v10099_v38 = vadd.f32 %v17571_v57, %v10098_v21 }
 0x83b   : > { %10530 = vst.msk [vmem:[%s17579_s17 + $0x1a8] sm:$0xff] %vm459_vm1, %v10104_v56 }
 0x83c   : > { %10529 = vst.msk [vmem:[%s17579_s17 + $0x1a0] sm:$0xff] %vm459_vm1, %v10099_v38  ;;  %v14091_v27 = vpop.f32.mrb[246].mxu0 }
 0x83d   : > { %v10114_v58 = vadd.f32 %v14091_v27, %v17571_v57  ;;  %v10108_v31 = vpop.f32.mrb[247].mxu0 }
 0x83e   : > { %v10109_v5 = vadd.f32 %v17571_v57, %v10108_v31 }
 0x83f   : > { %10532 = vst.msk [vmem:[%s17579_s17 + $0x1b8] sm:$0xff] %vm459_vm1, %v10114_v58 }
 0x840   : > { %10531 = vst.msk [vmem:[%s17579_s17 + $0x1b0] sm:$0xff] %vm459_vm1, %v10109_v5  ;;  %v14094_v30 = vpop.f32.mrb[248].mxu0 }
 0x841   : > { %v10124_v17 = vadd.f32 %v14094_v30, %v17571_v57  ;;  %v10118_v59 = vpop.f32.mrb[249].mxu0 }
 0x842   : > { %v10119_v20 = vadd.f32 %v17571_v57, %v10118_v59 }
 0x843   : > { %10534 = vst.msk [vmem:[%s17579_s17 + $0x1c8] sm:$0xff] %vm459_vm1, %v10124_v17 }
 0x844   : > { %10533 = vst.msk [vmem:[%s17579_s17 + $0x1c0] sm:$0xff] %vm459_vm1, %v10119_v20  ;;  %v14097_v36 = vpop.f32.mrb[250].mxu0 }
 0x845   : > { %v10134_v47 = vadd.f32 %v14097_v36, %v17571_v57  ;;  %v10128_v40 = vpop.f32.mrb[251].mxu0 }
 0x846   : > { %v10129_v3 = vadd.f32 %v17571_v57, %v10128_v40 }
 0x847   : > { %10536 = vst.msk [vmem:[%s17579_s17 + $0x1d8] sm:$0xff] %vm459_vm1, %v10134_v47 }
 0x848   : > { %10535 = vst.msk [vmem:[%s17579_s17 + $0x1d0] sm:$0xff] %vm459_vm1, %v10129_v3  ;;  %v14100_v2 = vpop.f32.mrb[252].mxu0 }
 0x849   : > { %v10144_v55 = vadd.f32 %v14100_v2, %v17571_v57  ;;  %v10138_v9 = vpop.f32.mrb[253].mxu0 }
 0x84a   : > { %v10139_v48 = vadd.f32 %v17571_v57, %v10138_v9 }
 0x84b   : > { %10538 = vst.msk [vmem:[%s17579_s17 + $0x1e8] sm:$0xff] %vm459_vm1, %v10144_v55 }
 0x84c   : > { %10537 = vst.msk [vmem:[%s17579_s17 + $0x1e0] sm:$0xff] %vm459_vm1, %v10139_v48  ;;  %v14103_v19 = vpop.f32.mrb[254].mxu0 }
 0x84d   : > { %v10154_v7 = vadd.f32 %v14103_v19, %v17571_v57  ;;  %v10148_v22 = vpop.f32.mrb[255].mxu0 }
 0x84e   : > { %v10149_v16 = vadd.f32 %v17571_v57, %v10148_v22 }
 0x84f   : > { %10540 = vst.msk [vmem:[%s17579_s17 + $0x1f8] sm:$0xff] %vm459_vm1, %v10154_v7 }
 0x850   : > { %10539 = vst.msk [vmem:[%s17579_s17 + $0x1f0] sm:$0xff] %vm459_vm1, %v10149_v16  ;;  %v14106_v28 = vpop.f32.mrb[0].mxu0 }
 0x851   : > { %v10164_v32 = vadd.f32 %v14106_v28, %v17571_v57  ;;  %v10158_v14 = vpop.f32.mrb[1].mxu0 }
 0x852   : > { %v10159_v4 = vadd.f32 %v17571_v57, %v10158_v14 }
 0x853   : > { %10542 = vst.msk [vmem:[%s17579_s17 + $0x208] sm:$0xff] %vm459_vm1, %v10164_v32 }
 0x854   : > { %10541 = vst.msk [vmem:[%s17579_s17 + $0x200] sm:$0xff] %vm459_vm1, %v10159_v4  ;;  %v14109_v61 = vpop.f32.mrb[2].mxu0 }
 0x855   : > { %v10174_v12 = vadd.f32 %v14109_v61, %v17571_v57  ;;  %v10168_v51 = vpop.f32.mrb[3].mxu0 }
 0x856   : > { %v10169_v63 = vadd.f32 %v17571_v57, %v10168_v51 }
 0x857   : > { %10544 = vst.msk [vmem:[%s17579_s17 + $0x218] sm:$0xff] %vm459_vm1, %v10174_v12 }
 0x858   : > { %10543 = vst.msk [vmem:[%s17579_s17 + $0x210] sm:$0xff] %vm459_vm1, %v10169_v63  ;;  %v14112_v60 = vpop.f32.mrb[4].mxu0 }
 0x859   : > { %v10184_v45 = vadd.f32 %v14112_v60, %v17571_v57  ;;  %v10178_v43 = vpop.f32.mrb[5].mxu0 }
 0x85a   : > { %v10179_v37 = vadd.f32 %v17571_v57, %v10178_v43 }
 0x85b   : > { %10546 = vst.msk [vmem:[%s17579_s17 + $0x228] sm:$0xff] %vm459_vm1, %v10184_v45 }
 0x85c   : > { %10545 = vst.msk [vmem:[%s17579_s17 + $0x220] sm:$0xff] %vm459_vm1, %v10179_v37  ;;  %v14115_v44 = vpop.f32.mrb[6].mxu0 }
 0x85d   : > { %v10194_v13 = vadd.f32 %v14115_v44, %v17571_v57  ;;  %v10188_v49 = vpop.f32.mrb[7].mxu0 }
 0x85e   : > { %v10189_v39 = vadd.f32 %v17571_v57, %v10188_v49 }
 0x85f   : > { %10548 = vst.msk [vmem:[%s17579_s17 + $0x238] sm:$0xff] %vm459_vm1, %v10194_v13 }
 0x860   : > { %10547 = vst.msk [vmem:[%s17579_s17 + $0x230] sm:$0xff] %vm459_vm1, %v10189_v39  ;;  %v14118_v8 = vpop.f32.mrb[8].mxu0 }
 0x861   : > { %v10204_v46 = vadd.f32 %v14118_v8, %v17571_v57  ;;  %v10198_v42 = vpop.f32.mrb[9].mxu0 }
 0x862   : > { %v10199_v54 = vadd.f32 %v17571_v57, %v10198_v42 }
 0x863   : > { %10550 = vst.msk [vmem:[%s17579_s17 + $0x248] sm:$0xff] %vm459_vm1, %v10204_v46 }
 0x864   : > { %10549 = vst.msk [vmem:[%s17579_s17 + $0x240] sm:$0xff] %vm459_vm1, %v10199_v54  ;;  %v14121_v25 = vpop.f32.mrb[10].mxu0 }
 0x865   : > { %v10214_v1 = vadd.f32 %v14121_v25, %v17571_v57  ;;  %v10208_v34 = vpop.f32.mrb[11].mxu0 }
 0x866   : > { %v10209_v15 = vadd.f32 %v17571_v57, %v10208_v34 }
 0x867   : > { %10552 = vst.msk [vmem:[%s17579_s17 + $0x258] sm:$0xff] %vm459_vm1, %v10214_v1 }
 0x868   : > { %10551 = vst.msk [vmem:[%s17579_s17 + $0x250] sm:$0xff] %vm459_vm1, %v10209_v15  ;;  %v14124_v18 = vpop.f32.mrb[12].mxu0 }
 0x869   : > { %v10224_v50 = vadd.f32 %v14124_v18, %v17571_v57  ;;  %v10218_v11 = vpop.f32.mrb[13].mxu0 }
 0x86a   : > { %v10219_v53 = vadd.f32 %v17571_v57, %v10218_v11 }
 0x86b   : > { %10554 = vst.msk [vmem:[%s17579_s17 + $0x268] sm:$0xff] %vm459_vm1, %v10224_v50 }
 0x86c   : > { %10553 = vst.msk [vmem:[%s17579_s17 + $0x260] sm:$0xff] %vm459_vm1, %v10219_v53  ;;  %v14127_v24 = vpop.f32.mrb[14].mxu0 }
 0x86d   : > { %v10234_v26 = vadd.f32 %v14127_v24, %v17571_v57  ;;  %v10228_v6 = vpop.f32.mrb[15].mxu0 }
 0x86e   : > { %v10229_v0 = vadd.f32 %v17571_v57, %v10228_v6 }
 0x86f   : > { %10556 = vst.msk [vmem:[%s17579_s17 + $0x278] sm:$0xff] %vm459_vm1, %v10234_v26 }
 0x870   : > { %10555 = vst.msk [vmem:[%s17579_s17 + $0x270] sm:$0xff] %vm459_vm1, %v10229_v0  ;;  %v14130_v41 = vpop.f32.mrb[16].mxu0 }
 0x871   : > { %v10244_v35 = vadd.f32 %v14130_v41, %v17571_v57  ;;  %v10238_v29 = vpop.f32.mrb[17].mxu0 }
 0x872   : > { %v10239_v33 = vadd.f32 %v17571_v57, %v10238_v29 }
 0x873   : > { %10558 = vst.msk [vmem:[%s17579_s17 + $0x288] sm:$0xff] %vm459_vm1, %v10244_v35 }
 0x874   : > { %10557 = vst.msk [vmem:[%s17579_s17 + $0x280] sm:$0xff] %vm459_vm1, %v10239_v33  ;;  %v14133_v62 = vpop.f32.mrb[18].mxu0 }
 0x875   : > { %v10254_v10 = vadd.f32 %v14133_v62, %v17571_v57  ;;  %v10248_v23 = vpop.f32.mrb[19].mxu0 }
 0x876   : > { %v10249_v52 = vadd.f32 %v17571_v57, %v10248_v23 }
 0x877   : > { %10560 = vst.msk [vmem:[%s17579_s17 + $0x298] sm:$0xff] %vm459_vm1, %v10254_v10 }
 0x878   : > { %10559 = vst.msk [vmem:[%s17579_s17 + $0x290] sm:$0xff] %vm459_vm1, %v10249_v52  ;;  %v14136_v56 = vpop.f32.mrb[20].mxu0 }
 0x879   : > { %v10264_v21 = vadd.f32 %v14136_v56, %v17571_v57  ;;  %v10258_v38 = vpop.f32.mrb[21].mxu0 }
 0x87a   : > { %v10259_v27 = vadd.f32 %v17571_v57, %v10258_v38 }
 0x87b   : > { %10562 = vst.msk [vmem:[%s17579_s17 + $0x2a8] sm:$0xff] %vm459_vm1, %v10264_v21 }
 0x87c   : > { %10561 = vst.msk [vmem:[%s17579_s17 + $0x2a0] sm:$0xff] %vm459_vm1, %v10259_v27  ;;  %v14139_v58 = vpop.f32.mrb[22].mxu0 }
 0x87d   : > { %v10274_v31 = vadd.f32 %v14139_v58, %v17571_v57  ;;  %v10268_v5 = vpop.f32.mrb[23].mxu0 }
 0x87e   : > { %v10269_v30 = vadd.f32 %v17571_v57, %v10268_v5 }
 0x87f   : > { %10564 = vst.msk [vmem:[%s17579_s17 + $0x2b8] sm:$0xff] %vm459_vm1, %v10274_v31 }
 0x880   : > { %10563 = vst.msk [vmem:[%s17579_s17 + $0x2b0] sm:$0xff] %vm459_vm1, %v10269_v30  ;;  %v14142_v17 = vpop.f32.mrb[24].mxu0 }
 0x881   : > { %v10284_v59 = vadd.f32 %v14142_v17, %v17571_v57  ;;  %v10278_v20 = vpop.f32.mrb[25].mxu0 }
 0x882   : > { %v10279_v36 = vadd.f32 %v17571_v57, %v10278_v20 }
 0x883   : > { %10566 = vst.msk [vmem:[%s17579_s17 + $0x2c8] sm:$0xff] %vm459_vm1, %v10284_v59 }
 0x884   : > { %10565 = vst.msk [vmem:[%s17579_s17 + $0x2c0] sm:$0xff] %vm459_vm1, %v10279_v36  ;;  %v14145_v47 = vpop.f32.mrb[26].mxu0 }
 0x885   : > { %v10294_v40 = vadd.f32 %v14145_v47, %v17571_v57  ;;  %v10288_v3 = vpop.f32.mrb[27].mxu0 }
 0x886   : > { %v10289_v2 = vadd.f32 %v17571_v57, %v10288_v3 }
 0x887   : > { %10568 = vst.msk [vmem:[%s17579_s17 + $0x2d8] sm:$0xff] %vm459_vm1, %v10294_v40 }
 0x888   : > { %10567 = vst.msk [vmem:[%s17579_s17 + $0x2d0] sm:$0xff] %vm459_vm1, %v10289_v2  ;;  %v14148_v55 = vpop.f32.mrb[28].mxu0 }
 0x889   : > { %v10304_v9 = vadd.f32 %v14148_v55, %v17571_v57  ;;  %v10298_v48 = vpop.f32.mrb[29].mxu0 }
 0x88a   : > { %v10299_v19 = vadd.f32 %v17571_v57, %v10298_v48 }
 0x88b   : > { %10570 = vst.msk [vmem:[%s17579_s17 + $0x2e8] sm:$0xff] %vm459_vm1, %v10304_v9 }
 0x88c   : > { %10569 = vst.msk [vmem:[%s17579_s17 + $0x2e0] sm:$0xff] %vm459_vm1, %v10299_v19  ;;  %v14151_v7 = vpop.f32.mrb[30].mxu0 }
 0x88d   : > { %v10314_v22 = vadd.f32 %v14151_v7, %v17571_v57  ;;  %v10308_v16 = vpop.f32.mrb[31].mxu0 }
 0x88e   : > { %v10309_v28 = vadd.f32 %v17571_v57, %v10308_v16 }
 0x88f   : > { %10572 = vst.msk [vmem:[%s17579_s17 + $0x2f8] sm:$0xff] %vm459_vm1, %v10314_v22 }
 0x890   : > { %10571 = vst.msk [vmem:[%s17579_s17 + $0x2f0] sm:$0xff] %vm459_vm1, %v10309_v28  ;;  %v14154_v32 = vpop.f32.mrb[32].mxu0 }
 0x891   : > { %v10324_v14 = vadd.f32 %v14154_v32, %v17571_v57  ;;  %v10318_v4 = vpop.f32.mrb[33].mxu0 }
 0x892   : > { %v10319_v61 = vadd.f32 %v17571_v57, %v10318_v4 }
 0x893   : > { %10574 = vst.msk [vmem:[%s17579_s17 + $0x308] sm:$0xff] %vm459_vm1, %v10324_v14 }
 0x894   : > { %10573 = vst.msk [vmem:[%s17579_s17 + $0x300] sm:$0xff] %vm459_vm1, %v10319_v61  ;;  %v14157_v12 = vpop.f32.mrb[34].mxu0 }
 0x895   : > { %v10334_v51 = vadd.f32 %v14157_v12, %v17571_v57  ;;  %v10328_v63 = vpop.f32.mrb[35].mxu0 }
 0x896   : > { %v10329_v60 = vadd.f32 %v17571_v57, %v10328_v63 }
 0x897   : > { %10576 = vst.msk [vmem:[%s17579_s17 + $0x318] sm:$0xff] %vm459_vm1, %v10334_v51 }
 0x898   : > { %10575 = vst.msk [vmem:[%s17579_s17 + $0x310] sm:$0xff] %vm459_vm1, %v10329_v60  ;;  %v14160_v45 = vpop.f32.mrb[36].mxu0 }
 0x899   : > { %v10344_v43 = vadd.f32 %v14160_v45, %v17571_v57  ;;  %v10338_v37 = vpop.f32.mrb[37].mxu0 }
 0x89a   : > { %v10339_v44 = vadd.f32 %v17571_v57, %v10338_v37 }
 0x89b   : > { %10578 = vst.msk [vmem:[%s17579_s17 + $0x328] sm:$0xff] %vm459_vm1, %v10344_v43 }
 0x89c   : > { %10577 = vst.msk [vmem:[%s17579_s17 + $0x320] sm:$0xff] %vm459_vm1, %v10339_v44  ;;  %v14163_v13 = vpop.f32.mrb[38].mxu0 }
 0x89d   : > { %v10354_v49 = vadd.f32 %v14163_v13, %v17571_v57  ;;  %v10348_v39 = vpop.f32.mrb[39].mxu0 }
 0x89e   : > { %v10349_v8 = vadd.f32 %v17571_v57, %v10348_v39 }
 0x89f   : > { %10580 = vst.msk [vmem:[%s17579_s17 + $0x338] sm:$0xff] %vm459_vm1, %v10354_v49 }
 0x8a0   : > { %10579 = vst.msk [vmem:[%s17579_s17 + $0x330] sm:$0xff] %vm459_vm1, %v10349_v8  ;;  %v14166_v46 = vpop.f32.mrb[40].mxu0 }
 0x8a1   : > { %v10364_v42 = vadd.f32 %v14166_v46, %v17571_v57  ;;  %v10358_v54 = vpop.f32.mrb[41].mxu0 }
 0x8a2   : > { %v10359_v25 = vadd.f32 %v17571_v57, %v10358_v54 }
 0x8a3   : > { %10582 = vst.msk [vmem:[%s17579_s17 + $0x348] sm:$0xff] %vm459_vm1, %v10364_v42 }
 0x8a4   : > { %10581 = vst.msk [vmem:[%s17579_s17 + $0x340] sm:$0xff] %vm459_vm1, %v10359_v25  ;;  %v14169_v1 = vpop.f32.mrb[42].mxu0 }
 0x8a5   : > { %v10374_v34 = vadd.f32 %v14169_v1, %v17571_v57  ;;  %v10368_v15 = vpop.f32.mrb[43].mxu0 }
 0x8a6   : > { %v10369_v18 = vadd.f32 %v17571_v57, %v10368_v15 }
 0x8a7   : > { %10584 = vst.msk [vmem:[%s17579_s17 + $0x358] sm:$0xff] %vm459_vm1, %v10374_v34 }
 0x8a8   : > { %10583 = vst.msk [vmem:[%s17579_s17 + $0x350] sm:$0xff] %vm459_vm1, %v10369_v18  ;;  %v14172_v50 = vpop.f32.mrb[44].mxu0 }
 0x8a9   : > { %v10384_v11 = vadd.f32 %v14172_v50, %v17571_v57  ;;  %v10378_v53 = vpop.f32.mrb[45].mxu0 }
 0x8aa   : > { %v10379_v24 = vadd.f32 %v17571_v57, %v10378_v53 }
 0x8ab   : > { %10586 = vst.msk [vmem:[%s17579_s17 + $0x368] sm:$0xff] %vm459_vm1, %v10384_v11 }
 0x8ac   : > { %10585 = vst.msk [vmem:[%s17579_s17 + $0x360] sm:$0xff] %vm459_vm1, %v10379_v24  ;;  %v14175_v26 = vpop.f32.mrb[46].mxu0 }
 0x8ad   : > { %v10394_v6 = vadd.f32 %v14175_v26, %v17571_v57  ;;  %v10388_v0 = vpop.f32.mrb[47].mxu0 }
 0x8ae   : > { %v10389_v41 = vadd.f32 %v17571_v57, %v10388_v0 }
 0x8af   : > { %10588 = vst.msk [vmem:[%s17579_s17 + $0x378] sm:$0xff] %vm459_vm1, %v10394_v6 }
 0x8b0   : > { %10587 = vst.msk [vmem:[%s17579_s17 + $0x370] sm:$0xff] %vm459_vm1, %v10389_v41  ;;  %v14178_v35 = vpop.f32.mrb[48].mxu0 }
 0x8b1   : > { %v10404_v29 = vadd.f32 %v14178_v35, %v17571_v57  ;;  %v10398_v33 = vpop.f32.mrb[49].mxu0 }
 0x8b2   : > { %v10399_v62 = vadd.f32 %v17571_v57, %v10398_v33 }
 0x8b3   : > { %10590 = vst.msk [vmem:[%s17579_s17 + $0x388] sm:$0xff] %vm459_vm1, %v10404_v29 }
 0x8b4   : > { %10589 = vst.msk [vmem:[%s17579_s17 + $0x380] sm:$0xff] %vm459_vm1, %v10399_v62  ;;  %v14181_v10 = vpop.f32.mrb[50].mxu0 }
 0x8b5   : > { %v10414_v23 = vadd.f32 %v14181_v10, %v17571_v57  ;;  %v10408_v52 = vpop.f32.mrb[51].mxu0 }
 0x8b6   : > { %v10409_v56 = vadd.f32 %v17571_v57, %v10408_v52 }
 0x8b7   : > { %10592 = vst.msk [vmem:[%s17579_s17 + $0x398] sm:$0xff] %vm459_vm1, %v10414_v23 }
 0x8b8   : > { %10591 = vst.msk [vmem:[%s17579_s17 + $0x390] sm:$0xff] %vm459_vm1, %v10409_v56  ;;  %v14184_v21 = vpop.f32.mrb[52].mxu0 }
 0x8b9   : > { %v10424_v38 = vadd.f32 %v14184_v21, %v17571_v57  ;;  %v10418_v27 = vpop.f32.mrb[53].mxu0 }
 0x8ba   : > { %v10419_v58 = vadd.f32 %v17571_v57, %v10418_v27 }
 0x8bb   : > { %10594 = vst.msk [vmem:[%s17579_s17 + $0x3a8] sm:$0xff] %vm459_vm1, %v10424_v38 }
 0x8bc   : > { %10593 = vst.msk [vmem:[%s17579_s17 + $0x3a0] sm:$0xff] %vm459_vm1, %v10419_v58  ;;  %v14187_v31 = vpop.f32.mrb[54].mxu0 }
 0x8bd   : > { %v10434_v5 = vadd.f32 %v14187_v31, %v17571_v57  ;;  %v10428_v30 = vpop.f32.mrb[55].mxu0 }
 0x8be   : > { %v10429_v17 = vadd.f32 %v17571_v57, %v10428_v30 }
 0x8bf   : > { %10596 = vst.msk [vmem:[%s17579_s17 + $0x3b8] sm:$0xff] %vm459_vm1, %v10434_v5 }
 0x8c0   : > { %10595 = vst.msk [vmem:[%s17579_s17 + $0x3b0] sm:$0xff] %vm459_vm1, %v10429_v17  ;;  %v14190_v59 = vpop.f32.mrb[56].mxu0 }
 0x8c1   : > { %v10444_v20 = vadd.f32 %v14190_v59, %v17571_v57  ;;  %v10438_v36 = vpop.f32.mrb[57].mxu0 }
 0x8c2   : > { %v10439_v47 = vadd.f32 %v17571_v57, %v10438_v36 }
 0x8c3   : > { %10598 = vst.msk [vmem:[%s17579_s17 + $0x3c8] sm:$0xff] %vm459_vm1, %v10444_v20 }
 0x8c4   : > { %10597 = vst.msk [vmem:[%s17579_s17 + $0x3c0] sm:$0xff] %vm459_vm1, %v10439_v47  ;;  %v14193_v40 = vpop.f32.mrb[58].mxu0 }
 0x8c5   : > { %v10454_v3 = vadd.f32 %v14193_v40, %v17571_v57  ;;  %v10448_v2 = vpop.f32.mrb[59].mxu0 }
 0x8c6   : > { %v10449_v55 = vadd.f32 %v17571_v57, %v10448_v2 }
 0x8c7   : > { %10600 = vst.msk [vmem:[%s17579_s17 + $0x3d8] sm:$0xff] %vm459_vm1, %v10454_v3 }
 0x8c8   : > { %10599 = vst.msk [vmem:[%s17579_s17 + $0x3d0] sm:$0xff] %vm459_vm1, %v10449_v55  ;;  %v14196_v9 = vpop.f32.mrb[60].mxu0 }
 0x8c9   : > { %v10464_v48 = vadd.f32 %v14196_v9, %v17571_v57  ;;  %v10458_v19 = vpop.f32.mrb[61].mxu0 }
 0x8ca   : > { %v10459_v7 = vadd.f32 %v17571_v57, %v10458_v19 }
 0x8cb   : > { %10602 = vst.msk [vmem:[%s17579_s17 + $0x3e8] sm:$0xff] %vm459_vm1, %v10464_v48 }
 0x8cc   : > { %10601 = vst.msk [vmem:[%s17579_s17 + $0x3e0] sm:$0xff] %vm459_vm1, %v10459_v7  ;;  %v14199_v22 = vpop.f32.mrb[62].mxu0 }
 0x8cd   : > { %v10474_v16 = vadd.f32 %v14199_v22, %v17571_v57  ;;  %v10468_v28 = vpop.f32.mrb[63].mxu0 }
 0x8ce   : > { %v10469_v32 = vadd.f32 %v17571_v57, %v10468_v28 }
 0x8cf   : > { %10604 = vst.msk [vmem:[%s17579_s17 + $0x3f8] sm:$0xff] %vm459_vm1, %v10474_v16 }
 0x8d0   : > { %10603 = vst.msk [vmem:[%s17579_s17 + $0x3f0] sm:$0xff] %vm459_vm1, %v10469_v32 }
 0x8d1 PF: > { %s19_s27 = sadd.s32 1, %s14510_s27  }
 0x8d2   : > { %p16_p1 = scmp.ge.s32.totalorder %s19_s27, 4  }
 0x8d4   :  { %18 = sbr.rel (!%p16_p1) target bundleno = 1 (0x1), region = 99 }
 0x8db   :  { %10627 = vsyncpa [#allocation3], 1 }
 0x8dc   :  { %10629 = vsyncpa [#allocation3 + $0x1], 1 }

</bundles_post_ra>
